<compile_context>
chip_gen: v6e
topology: v6e:2x2x1
jax: 0.10.0
libtpu: 0.0.40
codegen_flags: <defaults>
</compile_context>

<pallas_src>
import jax
import jax.numpy as jnp
from jax.experimental import pallas as pl
from jax.experimental.pallas import tpu as pltpu

H, W = 14, 14          # spatial size (from the module's example input)
HW = H * W             # 196 pixels -> lane axis
CIN, COUT = 512, 64    # conv2d38: 512 -> 64, 1x1, no bias
EPS = 1e-3             # batchnorm2d38 eps


def _pool_dtype():
    """bf16 pooling on chips with a native bf16 VPU (v6e/v7x); f32 elsewhere (v5e, CPU)."""
    try:
        kind = jax.devices()[0].device_kind.lower()
    except Exception:
        return jnp.float32
    if "v6" in kind or "v7" in kind or "7x" in kind:
        return jnp.bfloat16
    return jnp.float32


def make_fused_kernel(pool_dtype):
    def fused_kernel(x_ref, w_ref, gamma_ref, beta_ref, out_ref):
        x = x_ref[...].astype(pool_dtype)                       # (CIN, HW)

        # Border masks from a tiny (1, HW) iota; broadcast against the data in jnp.where.
        col = jax.lax.broadcasted_iota(jnp.int32, (1, HW), 1)   # flat pixel index
        wcol = col % W                                          # column within row
        has_left = wcol > 0
        has_right = wcol < W - 1
        has_up = col >= W
        has_down = col < HW - W

        # ---- MaxPool2d(kernel=3, stride=1, padding=1), separable, via lane rolls ----
        # pltpu.roll requires non-negative shifts; use circular-equivalent positive ones.
        left = pltpu.roll(x, 1, axis=1)                         # value of pixel p-1
        right = pltpu.roll(x, HW - 1, axis=1)                   # value of pixel p+1
        m = jnp.maximum(x, jnp.where(has_left, left, x))
        m = jnp.maximum(m, jnp.where(has_right, right, m))

        up = pltpu.roll(m, W, axis=1)                           # row h-1
        down = pltpu.roll(m, HW - W, axis=1)                    # row h+1
        m = jnp.maximum(m, jnp.where(has_up, up, m))
        m = jnp.maximum(m, jnp.where(has_down, down, m))

        # ---- Conv2d 1x1 (no bias): MXU matmul, bf16 operands, f32 accumulation ----
        y = jnp.dot(w_ref[...].astype(jnp.bfloat16),
                    m.astype(jnp.bfloat16),
                    preferred_element_type=jnp.float32)         # (COUT, HW) f32

        # ---- BatchNorm2d train-mode forward: biased batch stats over N*H*W (N=1) ----
        inv_n = 1.0 / HW
        mean = jnp.sum(y, axis=1, keepdims=True) * inv_n        # (COUT, 1)
        d = y - mean
        var = jnp.sum(d * d, axis=1, keepdims=True) * inv_n     # biased, centered
        scale = jax.lax.rsqrt(var + EPS) * gamma_ref[...]
        out_ref[...] = d * scale + beta_ref[...]

    return fused_kernel


_FUSED_KERNEL = make_fused_kernel(_pool_dtype())


@jax.jit
def model_forward(x_nchw, conv_w, gamma, beta):
    """x_nchw: (1, 512, 14, 14) f32. Returns (1, 64, 14, 14) f32 (NCHW, like PyTorch)."""
    x2 = x_nchw.reshape(CIN, HW)          # free reshape of contiguous NCHW (N=1)
    w2 = conv_w.reshape(COUT, CIN)        # free reshape (1x1 kernel)

    y = pl.pallas_call(
        _FUSED_KERNEL,
        out_shape=jax.ShapeDtypeStruct((COUT, HW), jnp.float32),
        in_specs=[pl.BlockSpec(memory_space=pltpu.MemorySpace.VMEM)] * 4,
        out_specs=pl.BlockSpec(memory_space=pltpu.MemorySpace.VMEM),
    )(x2, w2, gamma.reshape(COUT, 1), beta.reshape(COUT, 1))

    return y.reshape(1, COUT, H, W)       # free reshape, no transpose


def _reference(x_nchw, conv_w, gamma, beta):
    """Pure-JAX f32 reference for correctness checking."""
    x = x_nchw[0]                                                # (Cin, H, W)
    xp = jnp.pad(x, ((0, 0), (1, 1), (1, 1)), constant_values=-jnp.inf)
    m = jnp.full_like(x, -jnp.inf)
    for dh in range(3):
        for dw in range(3):
            m = jnp.maximum(m, xp[:, dh:dh + H, dw:dw + W])
    y = jnp.einsum('chw,oc->ohw', m, conv_w.reshape(COUT, CIN))  # (Cout, H, W)
    mean = jnp.mean(y, axis=(1, 2), keepdims=True)
    var = jnp.mean((y - mean) ** 2, axis=(1, 2), keepdims=True)
    out = (y - mean) * jax.lax.rsqrt(var + EPS) * gamma[:, None, None] + beta[:, None, None]
    return out[None]


if __name__ == "__main__":
    key = jax.random.PRNGKey(0)
    kx, kw = jax.random.split(key)

    # deterministic synthetic parameters (shapes from the module __init__)
    x = jax.random.normal(kx, (1, CIN, H, W), dtype=jnp.float32)
    conv_w = jax.random.normal(kw, (COUT, CIN, 1, 1), dtype=jnp.float32) * 0.05
    gamma = jnp.ones((COUT,), dtype=jnp.float32)   # BatchNorm2d default weight init
    beta = jnp.zeros((COUT,), dtype=jnp.float32)   # BatchNorm2d default bias init

    out = jax.block_until_ready(model_forward(x, conv_w, gamma, beta))
    ref = jax.block_until_ready(_reference(x, conv_w, gamma, beta))

    assert out.shape == (1, COUT, H, W), out.shape
    # tolerance loosened vs the f32 reference because the MXU matmul uses bf16 operands
    # (f32 accumulation); K=512 accumulations => ~1e-2 max deviation after BN.
    assert jnp.allclose(out, ref, atol=3e-2, rtol=3e-2), "mismatch vs reference"
    # TODO(synk): BatchNorm running_mean/running_var (momentum=0.1) are not updated;
    # only the train-mode forward normalization is computed.
    print("KERNEL_OK")
</pallas_src>

<mosaic_0001>
module attributes {stable_mosaic.version = 11 : i64} {
  func.func @fused_kernel(%arg0: memref<512x196xf32, #tpu.memory_space<vmem>>, %arg1: memref<64x512xf32, #tpu.memory_space<vmem>>, %arg2: memref<64x1xf32, #tpu.memory_space<vmem>>, %arg3: memref<64x1xf32, #tpu.memory_space<vmem>>, %arg4: memref<64x196xf32, #tpu.memory_space<vmem>>) attributes {dimension_semantics = [], scalar_prefetch = 0 : i64, scratch_operands = 0 : i64, tpu.core_type = #tpu.core_type<tc>} {
    %c0 = arith.constant 0 : index
    %c0_0 = arith.constant 0 : index
    %0 = vector.load %arg0[%c0, %c0_0] : memref<512x196xf32, #tpu.memory_space<vmem>>, vector<512x196xf32>
    %1 = tpu.iota {dimensions = array<i32: 1>} : vector<1x196xi32>
    %c14_i32 = arith.constant 14 : i32
    %c0_i32 = arith.constant 0 : i32
    %2 = arith.cmpi eq, %c14_i32, %c0_i32 : i32
    %c1_i32 = arith.constant 1 : i32
    %3 = arith.select %2, %c1_i32, %c14_i32 : i32
    %4 = vector.broadcast %3 : i32 to vector<1x196xi32>
    %5 = arith.remsi %1, %4 : vector<1x196xi32>
    %c0_i32_1 = arith.constant 0 : i32
    %6 = vector.broadcast %c0_i32_1 : i32 to vector<1x196xi32>
    %7 = arith.cmpi ne, %5, %6 : vector<1x196xi32>
    %c0_i32_2 = arith.constant 0 : i32
    %8 = vector.broadcast %c0_i32_2 : i32 to vector<1x196xi32>
    %9 = arith.cmpi slt, %5, %8 : vector<1x196xi32>
    %c0_i32_3 = arith.constant 0 : i32
    %10 = arith.cmpi slt, %3, %c0_i32_3 : i32
    %11 = vector.broadcast %10 : i1 to vector<1x196xi1>
    %12 = vector.broadcast %11 : vector<1x196xi1> to vector<1x196xi1>
    %13 = arith.xori %9, %12 : vector<1x196xi1>
    %14 = arith.andi %13, %7 : vector<1x196xi1>
    %15 = vector.broadcast %3 : i32 to vector<1x196xi32>
    %16 = arith.addi %5, %15 : vector<1x196xi32>
    %17 = arith.select %14, %16, %5 : vector<1x196xi1>, vector<1x196xi32>
    %c0_i32_4 = arith.constant 0 : i32
    %18 = vector.broadcast %c0_i32_4 : i32 to vector<1x196xi32>
    %19 = arith.cmpi sgt, %17, %18 : vector<1x196xi32>
    %c13_i32 = arith.constant 13 : i32
    %20 = vector.broadcast %c13_i32 : i32 to vector<1x196xi32>
    %21 = arith.cmpi slt, %17, %20 : vector<1x196xi32>
    %c14_i32_5 = arith.constant 14 : i32
    %22 = vector.broadcast %c14_i32_5 : i32 to vector<1x196xi32>
    %23 = arith.cmpi sge, %1, %22 : vector<1x196xi32>
    %c182_i32 = arith.constant 182 : i32
    %24 = vector.broadcast %c182_i32 : i32 to vector<1x196xi32>
    %25 = arith.cmpi slt, %1, %24 : vector<1x196xi32>
    %c1_i32_6 = arith.constant 1 : i32
    %26 = tpu.dynamic_rotate %0 by %c1_i32_6 dim 1 : vector<512x196xf32>, i32 -> vector<512x196xf32>
    %c195_i32 = arith.constant 195 : i32
    %27 = tpu.dynamic_rotate %0 by %c195_i32 dim 1 : vector<512x196xf32>, i32 -> vector<512x196xf32>
    %28 = vector.shape_cast %19 : vector<1x196xi1> to vector<1x196xi1>
    %29 = vector.broadcast %28 : vector<1x196xi1> to vector<512x196xi1>
    %30 = arith.select %29, %26, %0 : vector<512x196xi1>, vector<512x196xf32>
    %31 = arith.maximumf %0, %30 : vector<512x196xf32>
    %32 = vector.shape_cast %21 : vector<1x196xi1> to vector<1x196xi1>
    %33 = vector.broadcast %32 : vector<1x196xi1> to vector<512x196xi1>
    %34 = arith.select %33, %27, %31 : vector<512x196xi1>, vector<512x196xf32>
    %35 = arith.maximumf %31, %34 : vector<512x196xf32>
    %c14_i32_7 = arith.constant 14 : i32
    %36 = tpu.dynamic_rotate %35 by %c14_i32_7 dim 1 : vector<512x196xf32>, i32 -> vector<512x196xf32>
    %c182_i32_8 = arith.constant 182 : i32
    %37 = tpu.dynamic_rotate %35 by %c182_i32_8 dim 1 : vector<512x196xf32>, i32 -> vector<512x196xf32>
    %38 = vector.shape_cast %23 : vector<1x196xi1> to vector<1x196xi1>
    %39 = vector.broadcast %38 : vector<1x196xi1> to vector<512x196xi1>
    %40 = arith.select %39, %36, %35 : vector<512x196xi1>, vector<512x196xf32>
    %41 = arith.maximumf %35, %40 : vector<512x196xf32>
    %42 = vector.shape_cast %25 : vector<1x196xi1> to vector<1x196xi1>
    %43 = vector.broadcast %42 : vector<1x196xi1> to vector<512x196xi1>
    %44 = arith.select %43, %37, %41 : vector<512x196xi1>, vector<512x196xf32>
    %45 = arith.maximumf %41, %44 : vector<512x196xf32>
    %c0_9 = arith.constant 0 : index
    %c0_10 = arith.constant 0 : index
    %46 = vector.load %arg1[%c0_9, %c0_10] : memref<64x512xf32, #tpu.memory_space<vmem>>, vector<64x512xf32>
    %47 = arith.truncf %46 : vector<64x512xf32> to vector<64x512xbf16>
    %48 = arith.truncf %45 : vector<512x196xf32> to vector<512x196xbf16>
    %cst = arith.constant dense<0.000000e+00> : vector<64x196xf32>
    %49 = tpu.matmul %47, %48, %cst {dimension_numbers = #tpu.dot_dimension_numbers<[1], [0], [0], [1], [0, 0, 1, 1], [], []>} : vector<64x512xbf16>, vector<512x196xbf16>, vector<64x196xf32> -> vector<64x196xf32>
    %cst_11 = arith.constant dense<0.000000e+00> : vector<64xf32>
    %50 = vector.multi_reduction <add>, %49, %cst_11 [1] : vector<64x196xf32> to vector<64xf32>
    %51 = vector.shape_cast %50 : vector<64xf32> to vector<64x1xf32>
    %cst_12 = arith.constant 0.00510204071 : f32
    %52 = vector.broadcast %cst_12 : f32 to vector<64x1xf32>
    %53 = arith.mulf %51, %52 : vector<64x1xf32>
    %54 = vector.broadcast %53 : vector<64x1xf32> to vector<64x196xf32>
    %55 = arith.subf %49, %54 : vector<64x196xf32>
    %56 = arith.mulf %55, %55 : vector<64x196xf32>
    %cst_13 = arith.constant dense<0.000000e+00> : vector<64xf32>
    %57 = vector.multi_reduction <add>, %56, %cst_13 [1] : vector<64x196xf32> to vector<64xf32>
    %58 = vector.shape_cast %57 : vector<64xf32> to vector<64x1xf32>
    %cst_14 = arith.constant 0.00510204071 : f32
    %59 = vector.broadcast %cst_14 : f32 to vector<64x1xf32>
    %60 = arith.mulf %58, %59 : vector<64x1xf32>
    %cst_15 = arith.constant 1.000000e-03 : f32
    %61 = vector.broadcast %cst_15 : f32 to vector<64x1xf32>
    %62 = arith.addf %60, %61 : vector<64x1xf32>
    %63 = math.rsqrt %62 : vector<64x1xf32>
    %c0_16 = arith.constant 0 : index
    %c0_17 = arith.constant 0 : index
    %64 = vector.load %arg2[%c0_16, %c0_17] : memref<64x1xf32, #tpu.memory_space<vmem>>, vector<64x1xf32>
    %65 = arith.mulf %63, %64 : vector<64x1xf32>
    %66 = vector.broadcast %65 : vector<64x1xf32> to vector<64x196xf32>
    %67 = arith.mulf %55, %66 : vector<64x196xf32>
    %c0_18 = arith.constant 0 : index
    %c0_19 = arith.constant 0 : index
    %68 = vector.load %arg3[%c0_18, %c0_19] : memref<64x1xf32, #tpu.memory_space<vmem>>, vector<64x1xf32>
    %69 = vector.broadcast %68 : vector<64x1xf32> to vector<64x196xf32>
    %70 = arith.addf %67, %69 : vector<64x196xf32>
    %c0_20 = arith.constant 0 : index
    %c0_21 = arith.constant 0 : index
    %71 = vector.load %arg4[%c0_20, %c0_21] : memref<64x196xf32, #tpu.memory_space<vmem>>, vector<64x196xf32>
    tpu.vector_store %arg4[%c0_20, %c0_21], %70 {strides = array<i32>} : memref<64x196xf32, #tpu.memory_space<vmem>>, vector<64x196xf32>,
    return
  }
}

</mosaic_0001>

<bundles_post_ra>
// kernel: model_forward.1
= control target key start
LH: loop header
LB: loop body
LE: loop exit
PB: predicated region body
PF: predicated region fallthrough
CT: control target
= control target key end

     0   :  { %s7247_s5 = smov 68   ;;  %vm194_vm0 = vcmask 1048096   ;;  %s7248_s21 = smov 61   ;;  %vm1159_vm9 = vcmask 498688   ;;  %vm1996_vm13 = vcmask 1039360   ;;  %vm3217_vm15 = vcmask 605184   ;;  %s14639_s0 = inlined_call_operand.vmem [shape: f32[512,196], index: 0, kind: input, shape index: {}]   ;;  %s14640_s1 = inlined_call_operand.vmem [shape: f32[64,512], index: 1, kind: input, shape index: {}]   ;;  %s14641_s3 = inlined_call_operand.vmem [shape: f32[64,1], index: 3, kind: input, shape index: {}]   ;;  %s14642_s2 = inlined_call_operand.vmem [shape: f32[64,1], index: 2, kind: input, shape index: {}]   ;;  %s14643_s4 = inlined_call_operand.vmem [shape: f32[64,196], index: 4, kind: output, shape index: {}]  }
   0x1   :  { %v17_v0 = vld [vmem:[%s14639_s0] sm:$0xff]  ;;  %v19_v1 = vld [vmem:[%s14639_s0 + $0x10] sm:$0xff] }
   0x2   :  { %v25_v2 = vld [vmem:[%s14639_s0 + $0x40] sm:$0xff]  ;;  %v4992_v3 = vpack.i.bf16 %v19_v1, %v17_v0  ;;  %v27_v4 = vld [vmem:[%s14639_s0 + $0x50] sm:$0xff] }
   0x3   :  { %v21_v5 = vld [vmem:[%s14639_s0 + $0x20] sm:$0xff]  ;;  %v23_v6 = vld [vmem:[%s14639_s0 + $0x30] sm:$0xff]  ;;  %v5002_v7 = vpack.i.bf16 %v27_v4, %v25_v2 }
   0x4   :  { %v29_v8 = vld [vmem:[%s14639_s0 + $0x60] sm:$0xff]  ;;  %v31_v9 = vld [vmem:[%s14639_s0 + $0x70] sm:$0xff]  ;;  %4993 = vrot.lane.b32.xlu0 %v4992_v3, %s7247_s5  ;;  %v4997_v10 = vpack.i.bf16 %v23_v6, %v21_v5 }
   0x5   :  { %5003 = vrot.lane.b32.xlu1 %v5002_v7, %s7247_s5  ;;  %v5007_v11 = vpack.i.bf16 %v31_v9, %v29_v8  ;;  %v33_v12 = vld [vmem:[%s14639_s0 + $0x80] sm:$0xff]  ;;  %v35_v13 = vld [vmem:[%s14639_s0 + $0x90] sm:$0xff] }
   0x6   :  { %v37_v14 = vld [vmem:[%s14639_s0 + $0xa0] sm:$0xff]  ;;  %v39_v15 = vld [vmem:[%s14639_s0 + $0xb0] sm:$0xff]  ;;  %v5012_v16 = vpack.i.bf16 %v35_v13, %v33_v12 }
   0x7   :  { %v5017_v17 = vpack.i.bf16 %v39_v15, %v37_v14  ;;  %v41_v18 = vld [vmem:[%s14639_s0 + $0xc0] sm:$0xff]  ;;  %v43_v19 = vld [vmem:[%s14639_s0 + $0xd0] sm:$0xff] }
   0x8   :  { %4998 = vrot.lane.b32.xlu0 %v4997_v10, %s7247_s5  ;;  %v45_v20 = vld [vmem:[%s14639_s0 + $0xe0] sm:$0xff]  ;;  %v47_v21 = vld [vmem:[%s14639_s0 + $0xf0] sm:$0xff]  ;;  %v5022_v22 = vpack.i.bf16 %v43_v19, %v41_v18 }
   0x9   :  { %5008 = vrot.lane.b32.xlu1 %v5007_v11, %s7247_s5  ;;  %v5027_v23 = vpack.i.bf16 %v47_v21, %v45_v20  ;;  %v49_v24 = vld [vmem:[%s14639_s0 + $0x100] sm:$0xff]  ;;  %v51_v25 = vld [vmem:[%s14639_s0 + $0x110] sm:$0xff] }
   0xa   :  { %v53_v26 = vld [vmem:[%s14639_s0 + $0x120] sm:$0xff]  ;;  %v55_v27 = vld [vmem:[%s14639_s0 + $0x130] sm:$0xff]  ;;  %v5032_v28 = vpack.i.bf16 %v51_v25, %v49_v24 }
   0xb   :  { %v5037_v29 = vpack.i.bf16 %v55_v27, %v53_v26  ;;  %v57_v30 = vld [vmem:[%s14639_s0 + $0x140] sm:$0xff]  ;;  %v59_v31 = vld [vmem:[%s14639_s0 + $0x150] sm:$0xff] }
   0xc   :  { %5013 = vrot.lane.b32.xlu0 %v5012_v16, %s7247_s5  ;;  %v61_v32 = vld [vmem:[%s14639_s0 + $0x160] sm:$0xff]  ;;  %v63_v33 = vld [vmem:[%s14639_s0 + $0x170] sm:$0xff]  ;;  %v5042_v34 = vpack.i.bf16 %v59_v31, %v57_v30 }
   0xd   :  { %5018 = vrot.lane.b32.xlu1 %v5017_v17, %s7247_s5  ;;  %v5047_v35 = vpack.i.bf16 %v63_v33, %v61_v32  ;;  %v65_v36 = vld [vmem:[%s14639_s0 + $0x180] sm:$0xff]  ;;  %v67_v37 = vld [vmem:[%s14639_s0 + $0x190] sm:$0xff]  ;;  %v18_v33 = vld [vmem:[%s14639_s0 + $0x8] sm:$0xff] }
   0xe   :  { %v69_v38 = vld [vmem:[%s14639_s0 + $0x1a0] sm:$0xff]  ;;  %v71_v39 = vld [vmem:[%s14639_s0 + $0x1b0] sm:$0xff]  ;;  %v5052_v40 = vpack.i.bf16 %v67_v37, %v65_v36 }
   0xf   :  { %v5057_v41 = vpack.i.bf16 %v71_v39, %v69_v38  ;;  %v73_v42 = vld [vmem:[%s14639_s0 + $0x1c0] sm:$0xff]  ;;  %v75_v43 = vld [vmem:[%s14639_s0 + $0x1d0] sm:$0xff]  ;;  %v26_v38 = vld [vmem:[%s14639_s0 + $0x48] sm:$0xff] }
  0x10   :  { %5023 = vrot.lane.b32.xlu0 %v5022_v22, %s7247_s5  ;;  %v77_v44 = vld [vmem:[%s14639_s0 + $0x1e0] sm:$0xff]  ;;  %v79_v45 = vld [vmem:[%s14639_s0 + $0x1f0] sm:$0xff]  ;;  %v5062_v46 = vpack.i.bf16 %v75_v43, %v73_v42  ;;  %v28_v39 = vld [vmem:[%s14639_s0 + $0x58] sm:$0xff] }
  0x11   :  { %5028 = vrot.lane.b32.xlu1 %v5027_v23, %s7247_s5  ;;  %v5067_v47 = vpack.i.bf16 %v79_v45, %v77_v44  ;;  %v81_v48 = vld [vmem:[%s14639_s0 + $0x200] sm:$0xff]  ;;  %v83_v49 = vld [vmem:[%s14639_s0 + $0x210] sm:$0xff] }
  0x12   :  { %v85_v50 = vld [vmem:[%s14639_s0 + $0x220] sm:$0xff]  ;;  %v87_v51 = vld [vmem:[%s14639_s0 + $0x230] sm:$0xff]  ;;  %v5072_v52 = vpack.i.bf16 %v83_v49, %v81_v48 }
  0x13   :  { %v5077_v53 = vpack.i.bf16 %v87_v51, %v85_v50  ;;  %v89_v54 = vld [vmem:[%s14639_s0 + $0x240] sm:$0xff]  ;;  %v91_v55 = vld [vmem:[%s14639_s0 + $0x250] sm:$0xff] }
  0x14   :  { %5033 = vrot.lane.b32.xlu0 %v5032_v28, %s7247_s5  ;;  %v93_v56 = vld [vmem:[%s14639_s0 + $0x260] sm:$0xff]  ;;  %v95_v57 = vld [vmem:[%s14639_s0 + $0x270] sm:$0xff]  ;;  %v5082_v58 = vpack.i.bf16 %v91_v55, %v89_v54  ;;  %v32_v54 = vld [vmem:[%s14639_s0 + $0x78] sm:$0xff] }
  0x15   :  { %5038 = vrot.lane.b32.xlu1 %v5037_v29, %s7247_s5  ;;  %v5087_v59 = vpack.i.bf16 %v95_v57, %v93_v56  ;;  %v97_v60 = vld [vmem:[%s14639_s0 + $0x280] sm:$0xff]  ;;  %v99_v61 = vld [vmem:[%s14639_s0 + $0x290] sm:$0xff] }
  0x16   :  { %v101_v62 = vld [vmem:[%s14639_s0 + $0x2a0] sm:$0xff]  ;;  %v103_v63 = vld [vmem:[%s14639_s0 + $0x2b0] sm:$0xff]  ;;  %v5092_v0 = vpack.i.bf16 %v99_v61, %v97_v60 }
  0x17   :  { %v5097_v1 = vpack.i.bf16 %v103_v63, %v101_v62  ;;  %v105_v2 = vld [vmem:[%s14639_s0 + $0x2c0] sm:$0xff]  ;;  %v107_v3 = vld [vmem:[%s14639_s0 + $0x2d0] sm:$0xff] }
  0x18   :  { %5043 = vrot.lane.b32.xlu0 %v5042_v34, %s7247_s5  ;;  %v109_v4 = vld [vmem:[%s14639_s0 + $0x2e0] sm:$0xff]  ;;  %v111_v5 = vld [vmem:[%s14639_s0 + $0x2f0] sm:$0xff]  ;;  %v5102_v6 = vpack.i.bf16 %v107_v3, %v105_v2  ;;  %v20_v34 = vld [vmem:[%s14639_s0 + $0x18] sm:$0xff] }
  0x19   :  { %5048 = vrot.lane.b32.xlu1 %v5047_v35, %s7247_s5  ;;  %v5107_v7 = vpack.i.bf16 %v111_v5, %v109_v4  ;;  %v113_v8 = vld [vmem:[%s14639_s0 + $0x300] sm:$0xff]  ;;  %v115_v9 = vld [vmem:[%s14639_s0 + $0x310] sm:$0xff]  ;;  %v38_v5 = vld [vmem:[%s14639_s0 + $0xa8] sm:$0xff] }
  0x1a   :  { %v117_v10 = vld [vmem:[%s14639_s0 + $0x320] sm:$0xff]  ;;  %v119_v11 = vld [vmem:[%s14639_s0 + $0x330] sm:$0xff]  ;;  %v5112_v12 = vpack.i.bf16 %v115_v9, %v113_v8 }
  0x1b   :  { %v5117_v13 = vpack.i.bf16 %v119_v11, %v117_v10  ;;  %v121_v14 = vld [vmem:[%s14639_s0 + $0x340] sm:$0xff]  ;;  %v123_v15 = vld [vmem:[%s14639_s0 + $0x350] sm:$0xff] }
  0x1c   :  { %5053 = vrot.lane.b32.xlu0 %v5052_v40, %s7247_s5  ;;  %v125_v16 = vld [vmem:[%s14639_s0 + $0x360] sm:$0xff]  ;;  %v127_v17 = vld [vmem:[%s14639_s0 + $0x370] sm:$0xff]  ;;  %v5122_v18 = vpack.i.bf16 %v123_v15, %v121_v14 }
  0x1d   :  { %5058 = vrot.lane.b32.xlu1 %v5057_v41, %s7247_s5  ;;  %v5127_v19 = vpack.i.bf16 %v127_v17, %v125_v16  ;;  %v129_v20 = vld [vmem:[%s14639_s0 + $0x380] sm:$0xff]  ;;  %v131_v21 = vld [vmem:[%s14639_s0 + $0x390] sm:$0xff]  ;;  %v42_v16 = vld [vmem:[%s14639_s0 + $0xc8] sm:$0xff] }
  0x1e   :  { %v133_v22 = vld [vmem:[%s14639_s0 + $0x3a0] sm:$0xff]  ;;  %v135_v23 = vld [vmem:[%s14639_s0 + $0x3b0] sm:$0xff]  ;;  %v5132_v24 = vpack.i.bf16 %v131_v21, %v129_v20  ;;  %v44_v17 = vld [vmem:[%s14639_s0 + $0xd8] sm:$0xff] }
  0x1f   :  { %v5137_v25 = vpack.i.bf16 %v135_v23, %v133_v22  ;;  %v137_v26 = vld [vmem:[%s14639_s0 + $0x3c0] sm:$0xff]  ;;  %v139_v27 = vld [vmem:[%s14639_s0 + $0x3d0] sm:$0xff]  ;;  %v46_v21 = vld [vmem:[%s14639_s0 + $0xe8] sm:$0xff] }
  0x20   :  { %5063 = vrot.lane.b32.xlu0 %v5062_v46, %s7247_s5  ;;  %v141_v28 = vld [vmem:[%s14639_s0 + $0x3e0] sm:$0xff]  ;;  %v143_v29 = vld [vmem:[%s14639_s0 + $0x3f0] sm:$0xff]  ;;  %v5142_v30 = vpack.i.bf16 %v139_v27, %v137_v26  ;;  %v22_v46 = vld [vmem:[%s14639_s0 + $0x28] sm:$0xff] }
  0x21   :  { %5068 = vrot.lane.b32.xlu1 %v5067_v47, %s7247_s5  ;;  %v5147_v31 = vpack.i.bf16 %v143_v29, %v141_v28  ;;  %v24_v47 = vld [vmem:[%s14639_s0 + $0x38] sm:$0xff] }
  0x22   :  { %v48_v22 = vld [vmem:[%s14639_s0 + $0xf8] sm:$0xff] }
  0x24   :  { %5073 = vrot.lane.b32.xlu0 %v5072_v52, %s7247_s5 }
  0x25   :  { %5078 = vrot.lane.b32.xlu1 %v5077_v53, %s7247_s5  ;;  %v30_v53 = vld [vmem:[%s14639_s0 + $0x68] sm:$0xff] }
  0x28   :  { %5083 = vrot.lane.b32.xlu0 %v5082_v58, %s7247_s5 }
  0x29   :  { %5088 = vrot.lane.b32.xlu1 %v5087_v59, %s7247_s5 }
  0x2c   :  { %5093 = vrot.lane.b32.xlu0 %v5092_v0, %s7247_s5  ;;  %v34_v0 = vld [vmem:[%s14639_s0 + $0x88] sm:$0xff] }
  0x2d   :  { %5098 = vrot.lane.b32.xlu1 %v5097_v1, %s7247_s5  ;;  %v36_v1 = vld [vmem:[%s14639_s0 + $0x98] sm:$0xff] }
  0x30   :  { %5103 = vrot.lane.b32.xlu0 %v5102_v6, %s7247_s5  ;;  %v40_v6 = vld [vmem:[%s14639_s0 + $0xb8] sm:$0xff] }
  0x31   :  { %5108 = vrot.lane.b32.xlu1 %v5107_v7, %s7247_s5 }
  0x34   :  { %5113 = vrot.lane.b32.xlu0 %v5112_v12, %s7247_s5 }
  0x35   :  { %5118 = vrot.lane.b32.xlu1 %v5117_v13, %s7247_s5 }
  0x38   :  { %5123 = vrot.lane.b32.xlu0 %v5122_v18, %s7247_s5 }
  0x39   :  { %5128 = vrot.lane.b32.xlu1 %v5127_v19, %s7247_s5 }
  0x3c   :  { %5133 = vrot.lane.b32.xlu0 %v5132_v24, %s7247_s5 }
  0x3d   :  { %5138 = vrot.lane.b32.xlu1 %v5137_v25, %s7247_s5 }
  0x40   :  { %5143 = vrot.lane.b32.xlu0 %v5142_v30, %s7247_s5 }
  0x41   :  { %5148 = vrot.lane.b32.xlu1 %v5147_v31, %s7247_s5 }
  0x76   :  { %v7502_v32 = vpop.permute.xlu0 %4993 }
  0x77   :  { %v14672_v35 = vunpack.i.h.bf16 %v7502_v32  ;;  %v14674_v36 = vunpack.i.l.bf16 %v7502_v32  ;;  %v7512_v37 = vpop.permute.xlu1 %5003 }
  0x78   :  { %v14664_v40 = vunpack.i.h.bf16 %v7512_v37  ;;  %v14668_v41 = vunpack.i.l.bf16 %v7512_v37 }
  0x79   :  { %v7525_v42 = vsel %vm194_vm0, %v14674_v36, %v18_v33  ;;  %v7530_v43 = vsel %vm194_vm0, %v14672_v35, %v20_v34  ;;  %v50_v33 = vld [vmem:[%s14639_s0 + $0x108] sm:$0xff]  ;;  %v52_v34 = vld [vmem:[%s14639_s0 + $0x118] sm:$0xff] }
  0x7a   :  { %15510 = vst [vmem:[#allocation2_spill] sm:$0xff] %v7525_v42  ;;  %15511 = vst [vmem:[#allocation3_spill] sm:$0xff] %v7530_v43  ;;  %v7532_v44 = vpop.permute.xlu0 %4998  ;;  %v5152_v45 = vpack.i.bf16 %v7530_v43, %v7525_v42  ;;  %v7545_v48 = vsel %vm194_vm0, %v14668_v41, %v26_v38  ;;  %v7550_v49 = vsel %vm194_vm0, %v14664_v40, %v28_v39 }
  0x7b   :  { %15512 = vst [vmem:[#allocation4_spill] sm:$0xff] %v7545_v48  ;;  %15513 = vst [vmem:[#allocation5_spill] sm:$0xff] %v7550_v49  ;;  %v14673_v50 = vunpack.i.h.bf16 %v7532_v44  ;;  %v14675_v51 = vunpack.i.l.bf16 %v7532_v44  ;;  %v7554_v52 = vpop.permute.xlu1 %5008  ;;  %v5162_v57 = vpack.i.bf16 %v7550_v49, %v7545_v48 }
  0x7c   :  { %5153 = vrot.lane.b32.xlu0 %v5152_v45, %s7247_s5  ;;  %v14665_v55 = vunpack.i.h.bf16 %v7554_v52  ;;  %v14669_v56 = vunpack.i.l.bf16 %v7554_v52 }
  0x7d   :  { %v7570_v58 = vsel %vm194_vm0, %v14675_v51, %v22_v46  ;;  %v7575_v59 = vsel %vm194_vm0, %v14673_v50, %v24_v47  ;;  %v54_v46 = vld [vmem:[%s14639_s0 + $0x128] sm:$0xff]  ;;  %v56_v47 = vld [vmem:[%s14639_s0 + $0x138] sm:$0xff] }
  0x7e   :  { %15514 = vst [vmem:[#allocation6_spill] sm:$0xff] %v7570_v58  ;;  %15515 = vst [vmem:[#allocation7_spill] sm:$0xff] %v7575_v59  ;;  %v7577_v60 = vpop.permute.xlu0 %5013  ;;  %v5157_v61 = vpack.i.bf16 %v7575_v59, %v7570_v58  ;;  %v7584_v62 = vsel %vm194_vm0, %v14669_v56, %v30_v53  ;;  %v7589_v63 = vsel %vm194_vm0, %v14665_v55, %v32_v54 }
  0x7f   :  { %15516 = vst [vmem:[#allocation8_spill] sm:$0xff] %v7584_v62  ;;  %15517 = vst [vmem:[#allocation9_spill] sm:$0xff] %v7589_v63  ;;  %v14658_v2 = vunpack.i.h.bf16 %v7577_v60  ;;  %v14662_v3 = vunpack.i.l.bf16 %v7577_v60  ;;  %v7599_v4 = vpop.permute.xlu1 %5018  ;;  %v5167_v9 = vpack.i.bf16 %v7589_v63, %v7584_v62 }
  0x80   :  { %5158 = vrot.lane.b32.xlu1 %v5157_v61, %s7247_s5  ;;  %5163 = vrot.lane.b32.xlu0 %v5162_v57, %s7247_s5  ;;  %v14659_v7 = vunpack.i.h.bf16 %v7599_v4  ;;  %v14663_v8 = vunpack.i.l.bf16 %v7599_v4 }
  0x81   :  { %v7616_v10 = vsel %vm194_vm0, %v14662_v3, %v34_v0  ;;  %v7621_v11 = vsel %vm194_vm0, %v14658_v2, %v36_v1 }
  0x82   :  { %15518 = vst [vmem:[#allocation10_spill] sm:$0xff] %v7616_v10  ;;  %15519 = vst [vmem:[#allocation11_spill] sm:$0xff] %v7621_v11  ;;  %v7623_v12 = vpop.permute.xlu0 %5023  ;;  %v5172_v13 = vpack.i.bf16 %v7621_v11, %v7616_v10  ;;  %v7630_v14 = vsel %vm194_vm0, %v14663_v8, %v38_v5  ;;  %v7635_v15 = vsel %vm194_vm0, %v14659_v7, %v40_v6 }
  0x83   :  { %15520 = vst [vmem:[#allocation12_spill] sm:$0xff] %v7630_v14  ;;  %15521 = vst [vmem:[#allocation13_spill] sm:$0xff] %v7635_v15  ;;  %v14649_v18 = vunpack.i.h.bf16 %v7623_v12  ;;  %v14654_v19 = vunpack.i.l.bf16 %v7623_v12  ;;  %v7645_v20 = vpop.permute.xlu1 %5028  ;;  %v5177_v25 = vpack.i.bf16 %v7635_v15, %v7630_v14 }
  0x84   :  { %5168 = vrot.lane.b32.xlu1 %v5167_v9, %s7247_s5  ;;  %5173 = vrot.lane.b32.xlu0 %v5172_v13, %s7247_s5  ;;  %v14653_v23 = vunpack.i.h.bf16 %v7645_v20  ;;  %v14655_v24 = vunpack.i.l.bf16 %v7645_v20  ;;  %v58_v13 = vld [vmem:[%s14639_s0 + $0x148] sm:$0xff] }
  0x85   :  { %v7662_v26 = vsel %vm194_vm0, %v14654_v19, %v42_v16  ;;  %v7667_v27 = vsel %vm194_vm0, %v14649_v18, %v44_v17  ;;  %v60_v16 = vld [vmem:[%s14639_s0 + $0x158] sm:$0xff] }
  0x86   :  { %15522 = vst [vmem:[#allocation14_spill] sm:$0xff] %v7662_v26  ;;  %15523 = vst [vmem:[#allocation15_spill] sm:$0xff] %v7667_v27  ;;  %v7669_v28 = vpop.permute.xlu0 %5033  ;;  %v5182_v29 = vpack.i.bf16 %v7667_v27, %v7662_v26  ;;  %v7676_v30 = vsel %vm194_vm0, %v14655_v24, %v46_v21  ;;  %v7681_v31 = vsel %vm194_vm0, %v14653_v23, %v48_v22 }
  0x87   :  { %15524 = vst [vmem:[#allocation16_spill] sm:$0xff] %v7676_v30  ;;  %15525 = vst [vmem:[#allocation17_spill] sm:$0xff] %v7681_v31  ;;  %v14644_v38 = vunpack.i.h.bf16 %v7669_v28  ;;  %v14648_v39 = vunpack.i.l.bf16 %v7669_v28  ;;  %v7691_v45 = vpop.permute.xlu1 %5038  ;;  %v5187_v57 = vpack.i.bf16 %v7681_v31, %v7676_v30 }
  0x88   :  { %5178 = vrot.lane.b32.xlu1 %v5177_v25, %s7247_s5  ;;  %5183 = vrot.lane.b32.xlu0 %v5182_v29, %s7247_s5  ;;  %v14645_v53 = vunpack.i.h.bf16 %v7691_v45  ;;  %v14652_v54 = vunpack.i.l.bf16 %v7691_v45  ;;  %v62_v25 = vld [vmem:[%s14639_s0 + $0x168] sm:$0xff]  ;;  %v64_v29 = vld [vmem:[%s14639_s0 + $0x178] sm:$0xff] }
  0x89   :  { %v7708_v61 = vsel %vm194_vm0, %v14648_v39, %v50_v33  ;;  %v7713_v0 = vsel %vm194_vm0, %v14644_v38, %v52_v34 }
  0x8a   :  { %15526 = vst [vmem:[#allocation18_spill] sm:$0xff] %v7708_v61  ;;  %15527 = vst [vmem:[#allocation19_spill] sm:$0xff] %v7713_v0  ;;  %v7715_v1 = vpop.permute.xlu0 %5043  ;;  %v5192_v5 = vpack.i.bf16 %v7713_v0, %v7708_v61  ;;  %v7722_v6 = vsel %vm194_vm0, %v14652_v54, %v54_v46  ;;  %v7727_v9 = vsel %vm194_vm0, %v14645_v53, %v56_v47 }
  0x8b   :  { %15528 = vst [vmem:[#allocation20_spill] sm:$0xff] %v7722_v6  ;;  %15529 = vst [vmem:[#allocation21_spill] sm:$0xff] %v7727_v9  ;;  %v14646_v17 = vunpack.i.h.bf16 %v7715_v1  ;;  %v14647_v21 = vunpack.i.l.bf16 %v7715_v1  ;;  %v7737_v22 = vpop.permute.xlu1 %5048  ;;  %v5197_v46 = vpack.i.bf16 %v7727_v9, %v7722_v6 }
  0x8c   :  { %5188 = vrot.lane.b32.xlu1 %v5187_v57, %s7247_s5  ;;  %5193 = vrot.lane.b32.xlu0 %v5192_v5, %s7247_s5  ;;  %v14650_v33 = vunpack.i.h.bf16 %v7737_v22  ;;  %v14651_v34 = vunpack.i.l.bf16 %v7737_v22 }
  0x8d   :  { %v7754_v47 = vsel %vm194_vm0, %v14647_v21, %v58_v13  ;;  %v7759_v38 = vsel %vm194_vm0, %v14646_v17, %v60_v16  ;;  %v66_v16 = vld [vmem:[%s14639_s0 + $0x188] sm:$0xff]  ;;  %v68_v17 = vld [vmem:[%s14639_s0 + $0x198] sm:$0xff] }
  0x8e   :  { %15530 = vst [vmem:[#allocation22_spill] sm:$0xff] %v7754_v47  ;;  %15531 = vst [vmem:[#allocation23_spill] sm:$0xff] %v7759_v38  ;;  %v7761_v57 = vpop.permute.xlu0 %5053  ;;  %v5202_v5 = vpack.i.bf16 %v7759_v38, %v7754_v47  ;;  %v7768_v53 = vsel %vm194_vm0, %v14651_v34, %v62_v25  ;;  %v7773_v13 = vsel %vm194_vm0, %v14650_v33, %v64_v29  ;;  %v70_v25 = vld [vmem:[%s14639_s0 + $0x1a8] sm:$0xff]  ;;  %v72_v29 = vld [vmem:[%s14639_s0 + $0x1b8] sm:$0xff] }
  0x8f   :  { %15532 = vst [vmem:[#allocation24_spill] sm:$0xff] %v7768_v53  ;;  %15533 = vst [vmem:[#allocation25_spill] sm:$0xff] %v7773_v13  ;;  %v14656_v21 = vunpack.i.h.bf16 %v7761_v57  ;;  %v14657_v39 = vunpack.i.l.bf16 %v7761_v57  ;;  %v7783_v18 = vpop.permute.xlu1 %5058  ;;  %v5207_v54 = vpack.i.bf16 %v7773_v13, %v7768_v53 }
  0x90   :  { %5198 = vrot.lane.b32.xlu1 %v5197_v46, %s7247_s5  ;;  %5203 = vrot.lane.b32.xlu0 %v5202_v5, %s7247_s5  ;;  %v14660_v33 = vunpack.i.h.bf16 %v7783_v18  ;;  %v14661_v34 = vunpack.i.l.bf16 %v7783_v18 }
  0x91   :  { %v7800_v23 = vsel %vm194_vm0, %v14657_v39, %v66_v16  ;;  %v7805_v19 = vsel %vm194_vm0, %v14656_v21, %v68_v17  ;;  %v74_v17 = vld [vmem:[%s14639_s0 + $0x1c8] sm:$0xff]  ;;  %v76_v21 = vld [vmem:[%s14639_s0 + $0x1d8] sm:$0xff] }
  0x92   :  { %15534 = vst [vmem:[#allocation26_spill] sm:$0xff] %v7800_v23  ;;  %15535 = vst [vmem:[#allocation27_spill] sm:$0xff] %v7805_v19  ;;  %v7807_v46 = vpop.permute.xlu0 %5063  ;;  %v5212_v5 = vpack.i.bf16 %v7805_v19, %v7800_v23  ;;  %v7814_v24 = vsel %vm194_vm0, %v14661_v34, %v70_v25  ;;  %v7819_v16 = vsel %vm194_vm0, %v14660_v33, %v72_v29  ;;  %v78_v25 = vld [vmem:[%s14639_s0 + $0x1e8] sm:$0xff]  ;;  %v80_v29 = vld [vmem:[%s14639_s0 + $0x1f8] sm:$0xff] }
  0x93   :  { %15536 = vst [vmem:[#allocation28_spill] sm:$0xff] %v7807_v46  ;;  %15537 = vst [vmem:[#allocation29_spill] sm:$0xff] %v7814_v24  ;;  %v14666_v39 = vunpack.i.h.bf16 %v7807_v46  ;;  %v14667_v2 = vunpack.i.l.bf16 %v7807_v46  ;;  %v7829_v7 = vpop.permute.xlu1 %5068  ;;  %v5217_v3 = vpack.i.bf16 %v7819_v16, %v7814_v24 }
  0x94   :  { %15538 = vst [vmem:[#allocation30_spill] sm:$0xff] %v7819_v16  ;;  %5208 = vrot.lane.b32.xlu1 %v5207_v54, %s7247_s5  ;;  %5213 = vrot.lane.b32.xlu0 %v5212_v5, %s7247_s5  ;;  %v14670_v33 = vunpack.i.h.bf16 %v7829_v7  ;;  %v14671_v34 = vunpack.i.l.bf16 %v7829_v7 }
  0x95   :  { %v7846_v8 = vsel %vm194_vm0, %v14667_v2, %v74_v17  ;;  %v7851_v40 = vsel %vm194_vm0, %v14666_v39, %v76_v21  ;;  %v82_v21 = vld [vmem:[%s14639_s0 + $0x208] sm:$0xff]  ;;  %v84_v39 = vld [vmem:[%s14639_s0 + $0x218] sm:$0xff] }
  0x96   :  { %15539 = vst [vmem:[#allocation31_spill] sm:$0xff] %v7846_v8  ;;  %15540 = vst [vmem:[#allocation32_spill] sm:$0xff] %v7851_v40  ;;  %v7853_v54 = vpop.permute.xlu0 %5073  ;;  %v5222_v5 = vpack.i.bf16 %v7851_v40, %v7846_v8  ;;  %v7860_v55 = vsel %vm194_vm0, %v14671_v34, %v78_v25  ;;  %v7865_v17 = vsel %vm194_vm0, %v14670_v33, %v80_v29  ;;  %v86_v25 = vld [vmem:[%s14639_s0 + $0x228] sm:$0xff]  ;;  %v88_v29 = vld [vmem:[%s14639_s0 + $0x238] sm:$0xff] }
  0x97   :  { %15541 = vst [vmem:[#allocation33_spill] sm:$0xff] %v7853_v54  ;;  %15542 = vst [vmem:[#allocation34_spill] sm:$0xff] %v7860_v55  ;;  %v14676_v2 = vunpack.i.h.bf16 %v7853_v54  ;;  %v14677_v41 = vunpack.i.l.bf16 %v7853_v54  ;;  %v7875_v56 = vpop.permute.xlu1 %5078  ;;  %v5227_v35 = vpack.i.bf16 %v7865_v17, %v7860_v55 }
  0x98   :  { %15543 = vst [vmem:[#allocation35_spill] sm:$0xff] %v7865_v17  ;;  %15544 = vst [vmem:[#allocation36_spill] sm:$0xff] %v7875_v56  ;;  %5218 = vrot.lane.b32.xlu1 %v5217_v3, %s7247_s5  ;;  %5223 = vrot.lane.b32.xlu0 %v5222_v5, %s7247_s5  ;;  %v14682_v33 = vunpack.i.h.bf16 %v7875_v56  ;;  %v14683_v34 = vunpack.i.l.bf16 %v7875_v56 }
  0x99   :  { %v7892_v50 = vsel %vm194_vm0, %v14677_v41, %v82_v21  ;;  %v7897_v36 = vsel %vm194_vm0, %v14676_v2, %v84_v39  ;;  %v90_v39 = vld [vmem:[%s14639_s0 + $0x248] sm:$0xff]  ;;  %v92_v2 = vld [vmem:[%s14639_s0 + $0x258] sm:$0xff] }
  0x9a   :  { %15545 = vst [vmem:[#allocation37_spill] sm:$0xff] %v7892_v50  ;;  %15546 = vst [vmem:[#allocation38_spill] sm:$0xff] %v7897_v36  ;;  %v7899_v3 = vpop.permute.xlu0 %5083  ;;  %v5232_v5 = vpack.i.bf16 %v7897_v36, %v7892_v50  ;;  %v7906_v51 = vsel %vm194_vm0, %v14683_v34, %v86_v25  ;;  %v7911_v21 = vsel %vm194_vm0, %v14682_v33, %v88_v29  ;;  %v94_v25 = vld [vmem:[%s14639_s0 + $0x268] sm:$0xff]  ;;  %v96_v29 = vld [vmem:[%s14639_s0 + $0x278] sm:$0xff] }
  0x9b   :  { %15547 = vst [vmem:[#allocation39_spill] sm:$0xff] %v7899_v3  ;;  %15548 = vst [vmem:[#allocation40_spill] sm:$0xff] %v7906_v51  ;;  %v14692_v50 = vunpack.i.l.bf16 %v7899_v3  ;;  %v7921_v54 = vpop.permute.xlu1 %5088  ;;  %v5237_v41 = vpack.i.bf16 %v7911_v21, %v7906_v51  ;;  %v15552_v8 = vunpack.i.h.bf16 %v7899_v3 }
  0x9c   :  { %15549 = vst [vmem:[#allocation41_spill] sm:$0xff] %v7911_v21  ;;  %15550 = vst [vmem:[#allocation42_spill] sm:$0xff] %v7921_v54  ;;  %5228 = vrot.lane.b32.xlu1 %v5227_v35, %s7247_s5  ;;  %5233 = vrot.lane.b32.xlu0 %v5232_v5, %s7247_s5  ;;  %v14697_v34 = vunpack.i.l.bf16 %v7921_v54  ;;  %v15556_v51 = vunpack.i.h.bf16 %v7921_v54 }
  0x9d   :  { %v7938_v56 = vsel %vm194_vm0, %v14692_v50, %v90_v39  ;;  %v7943_v46 = vsel %vm194_vm0, %v15552_v8, %v92_v2  ;;  %v98_v2 = vld [vmem:[%s14639_s0 + $0x288] sm:$0xff]  ;;  %v100_v8 = vld [vmem:[%s14639_s0 + $0x298] sm:$0xff] }
  0x9e   :  { %15551 = vst [vmem:[#allocation43_spill] sm:$0xff] %v7938_v56  ;;  %15553 = vst [vmem:[#allocation44_spill] sm:$0xff] %v7943_v46  ;;  %v7945_v35 = vpop.permute.xlu0 %5093  ;;  %v5242_v5 = vpack.i.bf16 %v7943_v46, %v7938_v56  ;;  %v7952_v33 = vsel %vm194_vm0, %v14697_v34, %v94_v25  ;;  %v7957_v39 = vsel %vm194_vm0, %v15556_v51, %v96_v29  ;;  %v102_v25 = vld [vmem:[%s14639_s0 + $0x2a8] sm:$0xff]  ;;  %v104_v51 = vld [vmem:[%s14639_s0 + $0x2b8] sm:$0xff] }
  0x9f   :  { %15554 = vst [vmem:[#allocation45_spill] sm:$0xff] %v7945_v35  ;;  %15555 = vst [vmem:[#allocation46_spill] sm:$0xff] %v7952_v33  ;;  %v14706_v56 = vunpack.i.l.bf16 %v7945_v35  ;;  %v7967_v3 = vpop.permute.xlu1 %5098  ;;  %v5247_v50 = vpack.i.bf16 %v7957_v39, %v7952_v33  ;;  %v15560_v46 = vunpack.i.h.bf16 %v7945_v35 }
  0xa0   :  { %15557 = vst [vmem:[#allocation47_spill] sm:$0xff] %v7957_v39  ;;  %15558 = vst [vmem:[#allocation48_spill] sm:$0xff] %v7967_v3  ;;  %5238 = vrot.lane.b32.xlu1 %v5237_v41, %s7247_s5  ;;  %5243 = vrot.lane.b32.xlu0 %v5242_v5, %s7247_s5  ;;  %v14711_v34 = vunpack.i.l.bf16 %v7967_v3  ;;  %v15564_v39 = vunpack.i.h.bf16 %v7967_v3 }
  0xa1   :  { %v7984_v54 = vsel %vm194_vm0, %v14706_v56, %v98_v2  ;;  %v7989_v55 = vsel %vm194_vm0, %v15560_v46, %v100_v8  ;;  %v106_v46 = vld [vmem:[%s14639_s0 + $0x2c8] sm:$0xff]  ;;  %v108_v8 = vld [vmem:[%s14639_s0 + $0x2d8] sm:$0xff] }
  0xa2   :  { %15559 = vst [vmem:[#allocation49_spill] sm:$0xff] %v7984_v54  ;;  %15561 = vst [vmem:[#allocation50_spill] sm:$0xff] %v7989_v55  ;;  %v7991_v41 = vpop.permute.xlu0 %5103  ;;  %v5252_v5 = vpack.i.bf16 %v7989_v55, %v7984_v54  ;;  %v7998_v29 = vsel %vm194_vm0, %v14711_v34, %v102_v25  ;;  %v8003_v2 = vsel %vm194_vm0, %v15564_v39, %v104_v51  ;;  %v110_v25 = vld [vmem:[%s14639_s0 + $0x2e8] sm:$0xff]  ;;  %v112_v39 = vld [vmem:[%s14639_s0 + $0x2f8] sm:$0xff] }
  0xa3   :  { %15562 = vst [vmem:[#allocation51_spill] sm:$0xff] %v7991_v41  ;;  %15563 = vst [vmem:[#allocation52_spill] sm:$0xff] %v7998_v29  ;;  %v14720_v54 = vunpack.i.l.bf16 %v7991_v41  ;;  %v8013_v35 = vpop.permute.xlu1 %5108  ;;  %v5257_v56 = vpack.i.bf16 %v8003_v2, %v7998_v29  ;;  %v15568_v55 = vunpack.i.h.bf16 %v7991_v41 }
  0xa4   :  { %15565 = vst [vmem:[#allocation53_spill] sm:$0xff] %v8003_v2  ;;  %15566 = vst [vmem:[#allocation54_spill] sm:$0xff] %v8013_v35  ;;  %5248 = vrot.lane.b32.xlu1 %v5247_v50, %s7247_s5  ;;  %5253 = vrot.lane.b32.xlu0 %v5252_v5, %s7247_s5  ;;  %v14725_v34 = vunpack.i.l.bf16 %v8013_v35  ;;  %v15572_v2 = vunpack.i.h.bf16 %v8013_v35 }
  0xa5   :  { %v8030_v3 = vsel %vm194_vm0, %v14720_v54, %v106_v46  ;;  %v8035_v33 = vsel %vm194_vm0, %v15568_v55, %v108_v8  ;;  %v114_v55 = vld [vmem:[%s14639_s0 + $0x308] sm:$0xff]  ;;  %v116_v8 = vld [vmem:[%s14639_s0 + $0x318] sm:$0xff] }
  0xa6   :  { %15567 = vst [vmem:[#allocation55_spill] sm:$0xff] %v8030_v3  ;;  %15569 = vst [vmem:[#allocation56_spill] sm:$0xff] %v8035_v33  ;;  %v8037_v50 = vpop.permute.xlu0 %5113  ;;  %v5262_v5 = vpack.i.bf16 %v8035_v33, %v8030_v3  ;;  %v8044_v51 = vsel %vm194_vm0, %v14725_v34, %v110_v25  ;;  %v8049_v46 = vsel %vm194_vm0, %v15572_v2, %v112_v39  ;;  %v118_v25 = vld [vmem:[%s14639_s0 + $0x328] sm:$0xff]  ;;  %v120_v2 = vld [vmem:[%s14639_s0 + $0x338] sm:$0xff] }
  0xa7   :  { %15570 = vst [vmem:[#allocation57_spill] sm:$0xff] %v8037_v50  ;;  %15571 = vst [vmem:[#allocation58_spill] sm:$0xff] %v8044_v51  ;;  %v14734_v3 = vunpack.i.l.bf16 %v8037_v50  ;;  %v8059_v41 = vpop.permute.xlu1 %5118  ;;  %v5267_v54 = vpack.i.bf16 %v8049_v46, %v8044_v51  ;;  %v15576_v33 = vunpack.i.h.bf16 %v8037_v50 }
  0xa8   :  { %15573 = vst [vmem:[#allocation59_spill] sm:$0xff] %v8049_v46  ;;  %15574 = vst [vmem:[#allocation60_spill] sm:$0xff] %v8059_v41  ;;  %5258 = vrot.lane.b32.xlu1 %v5257_v56, %s7247_s5  ;;  %5263 = vrot.lane.b32.xlu0 %v5262_v5, %s7247_s5  ;;  %v14739_v34 = vunpack.i.l.bf16 %v8059_v41  ;;  %v15580_v46 = vunpack.i.h.bf16 %v8059_v41 }
  0xa9   :  { %v8076_v35 = vsel %vm194_vm0, %v14734_v3, %v114_v55  ;;  %v8081_v29 = vsel %vm194_vm0, %v15576_v33, %v116_v8  ;;  %v122_v33 = vld [vmem:[%s14639_s0 + $0x348] sm:$0xff]  ;;  %v124_v8 = vld [vmem:[%s14639_s0 + $0x358] sm:$0xff] }
  0xaa   :  { %15575 = vst [vmem:[#allocation61_spill] sm:$0xff] %v8076_v35  ;;  %15577 = vst [vmem:[#allocation62_spill] sm:$0xff] %v8081_v29  ;;  %v8083_v56 = vpop.permute.xlu0 %5123  ;;  %v5272_v5 = vpack.i.bf16 %v8081_v29, %v8076_v35  ;;  %v8090_v39 = vsel %vm194_vm0, %v14739_v34, %v118_v25  ;;  %v8095_v55 = vsel %vm194_vm0, %v15580_v46, %v120_v2  ;;  %v126_v25 = vld [vmem:[%s14639_s0 + $0x368] sm:$0xff]  ;;  %v128_v46 = vld [vmem:[%s14639_s0 + $0x378] sm:$0xff] }
  0xab   :  { %15578 = vst [vmem:[#allocation63_spill] sm:$0xff] %v8083_v56  ;;  %15579 = vst [vmem:[#allocation64_spill] sm:$0xff] %v8090_v39  ;;  %v14748_v35 = vunpack.i.l.bf16 %v8083_v56  ;;  %v8105_v50 = vpop.permute.xlu1 %5128  ;;  %v5277_v3 = vpack.i.bf16 %v8095_v55, %v8090_v39  ;;  %v15584_v29 = vunpack.i.h.bf16 %v8083_v56 }
  0xac   :  { %15581 = vst [vmem:[#allocation65_spill] sm:$0xff] %v8095_v55  ;;  %15582 = vst [vmem:[#allocation66_spill] sm:$0xff] %v8105_v50  ;;  %5268 = vrot.lane.b32.xlu1 %v5267_v54, %s7247_s5  ;;  %5273 = vrot.lane.b32.xlu0 %v5272_v5, %s7247_s5  ;;  %v14753_v34 = vunpack.i.l.bf16 %v8105_v50  ;;  %v15588_v55 = vunpack.i.h.bf16 %v8105_v50 }
  0xad   :  { %v8122_v41 = vsel %vm194_vm0, %v14748_v35, %v122_v33  ;;  %v8127_v51 = vsel %vm194_vm0, %v15584_v29, %v124_v8  ;;  %v130_v29 = vld [vmem:[%s14639_s0 + $0x388] sm:$0xff]  ;;  %v132_v8 = vld [vmem:[%s14639_s0 + $0x398] sm:$0xff] }
  0xae   :  { %15583 = vst [vmem:[#allocation67_spill] sm:$0xff] %v8122_v41  ;;  %15585 = vst [vmem:[#allocation68_spill] sm:$0xff] %v8127_v51  ;;  %v8129_v54 = vpop.permute.xlu0 %5133  ;;  %v5282_v5 = vpack.i.bf16 %v8127_v51, %v8122_v41  ;;  %v8136_v2 = vsel %vm194_vm0, %v14753_v34, %v126_v25  ;;  %v8141_v33 = vsel %vm194_vm0, %v15588_v55, %v128_v46  ;;  %v134_v25 = vld [vmem:[%s14639_s0 + $0x3a8] sm:$0xff]  ;;  %v136_v55 = vld [vmem:[%s14639_s0 + $0x3b8] sm:$0xff] }
  0xaf   :  { %15586 = vst [vmem:[#allocation69_spill] sm:$0xff] %v8129_v54  ;;  %15587 = vst [vmem:[#allocation70_spill] sm:$0xff] %v8136_v2  ;;  %v14762_v41 = vunpack.i.l.bf16 %v8129_v54  ;;  %v8151_v56 = vpop.permute.xlu1 %5138  ;;  %v5287_v35 = vpack.i.bf16 %v8141_v33, %v8136_v2  ;;  %v15592_v51 = vunpack.i.h.bf16 %v8129_v54 }
  0xb0   :  { %15589 = vst [vmem:[#allocation71_spill] sm:$0xff] %v8141_v33  ;;  %15590 = vst [vmem:[#allocation72_spill] sm:$0xff] %v8151_v56  ;;  %5278 = vrot.lane.b32.xlu1 %v5277_v3, %s7247_s5  ;;  %5283 = vrot.lane.b32.xlu0 %v5282_v5, %s7247_s5  ;;  %v14767_v34 = vunpack.i.l.bf16 %v8151_v56  ;;  %v15596_v33 = vunpack.i.h.bf16 %v8151_v56 }
  0xb1   :  { %v8168_v50 = vsel %vm194_vm0, %v14762_v41, %v130_v29  ;;  %v8173_v39 = vsel %vm194_vm0, %v15592_v51, %v132_v8  ;;  %v138_v51 = vld [vmem:[%s14639_s0 + $0x3c8] sm:$0xff]  ;;  %v140_v8 = vld [vmem:[%s14639_s0 + $0x3d8] sm:$0xff] }
  0xb2   :  { %15591 = vst [vmem:[#allocation73_spill] sm:$0xff] %v8168_v50  ;;  %15593 = vst [vmem:[#allocation74_spill] sm:$0xff] %v8173_v39  ;;  %v8175_v3 = vpop.permute.xlu0 %5143  ;;  %v5292_v5 = vpack.i.bf16 %v8173_v39, %v8168_v50  ;;  %v8182_v46 = vsel %vm194_vm0, %v14767_v34, %v134_v25  ;;  %v8187_v29 = vsel %vm194_vm0, %v15596_v33, %v136_v55  ;;  %v142_v25 = vld [vmem:[%s14639_s0 + $0x3e8] sm:$0xff]  ;;  %v144_v33 = vld [vmem:[%s14639_s0 + $0x3f8] sm:$0xff] }
  0xb3   :  { %15594 = vst [vmem:[#allocation75_spill] sm:$0xff] %v8175_v3  ;;  %15595 = vst [vmem:[#allocation76_spill] sm:$0xff] %v8182_v46  ;;  %v14778_v54 = vunpack.i.l.bf16 %v8175_v3  ;;  %v8197_v50 = vpop.permute.xlu1 %5148  ;;  %v5297_v41 = vpack.i.bf16 %v8187_v29, %v8182_v46  ;;  %v15600_v39 = vunpack.i.h.bf16 %v8175_v3 }
  0xb4   :  { %15597 = vst [vmem:[#allocation77_spill] sm:$0xff] %v8187_v29  ;;  %15598 = vst [vmem:[#allocation78_spill] sm:$0xff] %v8197_v50  ;;  %5288 = vrot.lane.b32.xlu1 %v5287_v35, %s7247_s5  ;;  %5293 = vrot.lane.b32.xlu0 %v5292_v5, %s7247_s5  ;;  %v14777_v55 = vunpack.i.h.bf16 %v8197_v50  ;;  %v14776_v34 = vunpack.i.l.bf16 %v8197_v50 }
  0xb5   :  { %v8214_v56 = vsel %vm194_vm0, %v14778_v54, %v138_v51  ;;  %v8219_v2 = vsel %vm194_vm0, %v15600_v39, %v140_v8 }
  0xb6   :  { %15599 = vst [vmem:[#allocation79_spill] sm:$0xff] %v8214_v56  ;;  %15601 = vst [vmem:[#allocation80_spill] sm:$0xff] %v8219_v2  ;;  %v5302_v35 = vpack.i.bf16 %v8219_v2, %v8214_v56  ;;  %v8226_v5 = vsel %vm194_vm0, %v14776_v34, %v142_v25  ;;  %v8231_v46 = vsel %vm194_vm0, %v14777_v55, %v144_v33 }
  0xb7   :  { %15602 = vst [vmem:[#allocation81_spill] sm:$0xff] %v8226_v5  ;;  %15603 = vst [vmem:[#allocation82_spill] sm:$0xff] %v8231_v46  ;;  %v5307_v39 = vpack.i.bf16 %v8231_v46, %v8226_v5 }
  0xb8   :  { %5298 = vrot.lane.b32.xlu1 %v5297_v41, %s7247_s5  ;;  %5303 = vrot.lane.b32.xlu0 %v5302_v35, %s7247_s5 }
  0xbc   :  { %5308 = vrot.lane.b32.xlu1 %v5307_v39, %s7247_s5 }
  0xee   :  { %v8238_v51 = vpop.permute.xlu0 %5153 }
  0xef   :  { %v14779_v8 = vunpack.i.l.bf16 %v8238_v51 }
  0xf1   :  { %v5312_v25 = vpack.i.bf16 %v7530_v43, %v14779_v8 }
  0xf2   :  { %v8244_v34 = vpop.permute.xlu1 %5158  ;;  %v8246_v33 = vpop.permute.xlu0 %5163 }
  0xf3   :  { %v14785_v41 = vunpack.i.l.bf16 %v8244_v34  ;;  %v14784_v35 = vunpack.i.l.bf16 %v8246_v33  ;;  %5313 = vrot.lane.b32.xlu1 %v5312_v25, %s7248_s21 }
  0xf5   :  { %v5317_v39 = vpack.i.bf16 %v7575_v59, %v14785_v41  ;;  %v5322_v55 = vpack.i.bf16 %v7550_v49, %v14784_v35  ;;  %v15716_v49 = vld [vmem:[#allocation57_spill] sm:$0xff] }
  0xf6   :  { %v8257_v54 = vpop.permute.xlu1 %5168  ;;  %v8259_v8 = vpop.permute.xlu0 %5173 }
  0xf7   :  { %v14793_v5 = vunpack.i.l.bf16 %v8257_v54  ;;  %v14792_v46 = vunpack.i.l.bf16 %v8259_v8  ;;  %5318 = vrot.lane.b32.xlu0 %v5317_v39, %s7248_s21  ;;  %5323 = vrot.lane.b32.xlu1 %v5322_v55, %s7248_s21 }
  0xf9   :  { %v5327_v25 = vpack.i.bf16 %v7589_v63, %v14793_v5  ;;  %v5332_v35 = vpack.i.bf16 %v7621_v11, %v14792_v46 }
  0xfa   :  { %v8271_v41 = vpop.permute.xlu1 %5178  ;;  %v8273_v50 = vpop.permute.xlu0 %5183 }
  0xfb   :  { %v14799_v3 = vunpack.i.l.bf16 %v8271_v41  ;;  %v14798_v56 = vunpack.i.l.bf16 %v8273_v50  ;;  %5328 = vrot.lane.b32.xlu0 %v5327_v25, %s7248_s21  ;;  %5333 = vrot.lane.b32.xlu1 %v5332_v35, %s7248_s21 }
  0xfd   :  { %v5337_v55 = vpack.i.bf16 %v7635_v15, %v14799_v3  ;;  %v5342_v39 = vpack.i.bf16 %v7667_v27, %v14798_v56 }
  0xfe   :  { %v8285_v46 = vpop.permute.xlu1 %5188  ;;  %v8287_v5 = vpop.permute.xlu0 %5193 }
  0xff   :  { %v14804_v2 = vunpack.i.l.bf16 %v8285_v46  ;;  %v14805_v29 = vunpack.i.l.bf16 %v8287_v5  ;;  %5338 = vrot.lane.b32.xlu0 %v5337_v55, %s7248_s21  ;;  %5343 = vrot.lane.b32.xlu1 %v5342_v39, %s7248_s21  ;;  %v14813_v55 = vmov 0  }
 0x100   :  { %7072 = vset.pattern.permute.xlu1 %v14813_v55  ;;  %7073 = vset.pattern.permute.xlu0 %v14813_v55 }
 0x101   :  { %v5347_v35 = vpack.i.bf16 %v7681_v31, %v14804_v2  ;;  %v5352_v25 = vpack.i.bf16 %v7713_v0, %v14805_v29 }
 0x102   :  { %v8299_v56 = vpop.permute.xlu1 %5198  ;;  %v8301_v3 = vpop.permute.xlu0 %5203 }
 0x103   :  { %v14812_v27 = vunpack.i.l.bf16 %v8299_v56  ;;  %v14815_v15 = vunpack.i.l.bf16 %v8301_v3  ;;  %5348 = vrot.lane.b32.xlu0 %v5347_v35, %s7248_s21  ;;  %5353 = vrot.lane.b32.xlu1 %v5352_v25, %s7248_s21 }
 0x105   :  { %v5357_v29 = vpack.i.bf16 %v7727_v9, %v14812_v27  ;;  %v5362_v0 = vpack.i.bf16 %v7759_v38, %v14815_v15  ;;  %v15607_v9 = vunpack.i.l.bf16 %v8238_v51 }
 0x106   :  { %v8308_v39 = vpop.permute.xlu1 %5208  ;;  %v8310_v2 = vpop.permute.xlu0 %5213 }
 0x107   :  { %v14818_v35 = vunpack.i.l.bf16 %v8308_v39  ;;  %v14819_v25 = vunpack.i.l.bf16 %v8310_v2  ;;  %5358 = vrot.lane.b32.xlu0 %v5357_v29, %s7248_s21  ;;  %5363 = vrot.lane.b32.xlu1 %v5362_v0, %s7248_s21 }
 0x109   :  { %v5367_v27 = vpack.i.bf16 %v7773_v13, %v14818_v35  ;;  %v5372_v55 = vpack.i.bf16 %v7805_v19, %v14819_v25 }
 0x10a   :  { %v8323_v31 = vpop.permute.xlu1 %5218  ;;  %v8325_v11 = vpop.permute.xlu0 %5223 }
 0x10b   :  { %v14824_v15 = vunpack.i.l.bf16 %v8323_v31  ;;  %v14825_v38 = vunpack.i.l.bf16 %v8325_v11  ;;  %5368 = vrot.lane.b32.xlu0 %v5367_v27, %s7248_s21  ;;  %5373 = vrot.lane.b32.xlu1 %v5372_v55, %s7248_s21 }
 0x10d   :  { %v5377_v35 = vpack.i.bf16 %v7819_v16, %v14824_v15  ;;  %v5382_v25 = vpack.i.bf16 %v7851_v40, %v14825_v38  ;;  %v5161_v38 = vunpack.i.h.bf16 %v8244_v34  ;;  %v15604_v16 = vunpack.i.l.bf16 %v7532_v44 }
 0x10e   :  { %v8337_v0 = vpop.permute.xlu1 %5228  ;;  %v8339_v29 = vpop.permute.xlu0 %5233 }
 0x10f   :  { %v14830_v19 = vunpack.i.l.bf16 %v8337_v0  ;;  %v14831_v13 = vunpack.i.l.bf16 %v8339_v29  ;;  %5378 = vrot.lane.b32.xlu0 %v5377_v35, %s7248_s21  ;;  %5383 = vrot.lane.b32.xlu1 %v5382_v25, %s7248_s21  ;;  %v15605_v35 = vunpack.i.l.bf16 %v8244_v34 }
 0x111   :  { %v5387_v55 = vpack.i.bf16 %v7865_v17, %v14830_v19  ;;  %v5392_v15 = vpack.i.bf16 %v7897_v36, %v14831_v13  ;;  %v517_v25 = vsel %vm194_vm0, %v15605_v35, %v15604_v16  ;;  %v5156_v36 = vunpack.i.h.bf16 %v8238_v51 }
 0x112   :  { %v8351_v27 = vpop.permute.xlu1 %5238  ;;  %v5412_v13 = vpack.i.bf16 %v517_v25, %v7570_v58  ;;  %v15606_v17 = vunpack.i.l.bf16 %v7502_v32  ;;  %v15608_v16 = vunpack.i.h.bf16 %v7532_v44  ;;  %v5171_v25 = vunpack.i.h.bf16 %v8257_v54  ;;  %v15713_v58 = vld [vmem:[#allocation59_spill] sm:$0xff] }
 0x113   :  { %v14838_v40 = vunpack.i.l.bf16 %v8351_v27  ;;  %5388 = vrot.lane.b32.xlu0 %v5387_v55, %s7248_s21  ;;  %5393 = vrot.lane.b32.xlu1 %v5392_v15, %s7248_s21  ;;  %v15610_v51 = vunpack.i.l.bf16 %v7554_v52 }
 0x114   :  { %v515_v34 = vsel %vm194_vm0, %v15607_v9, %v15606_v17  ;;  %v518_v55 = vsel %vm194_vm0, %v5161_v38, %v15608_v16  ;;  %v15611_v9 = vunpack.i.l.bf16 %v8257_v54  ;;  %v15612_v17 = vunpack.i.l.bf16 %v7512_v37 }
 0x115   :  { %v5397_v19 = vpack.i.bf16 %v7911_v21, %v14838_v40  ;;  %v5402_v15 = vpack.i.bf16 %v515_v34, %v7525_v42  ;;  %v5417_v35 = vpack.i.bf16 %v5161_v38, %v518_v55  ;;  %v15609_v40 = vunpack.i.h.bf16 %v7502_v32 }
 0x116   :  { %v521_v44 = vsel %vm194_vm0, %v15611_v9, %v15610_v51  ;;  %v5166_v38 = vunpack.i.h.bf16 %v8246_v33  ;;  %v15613_v32 = vunpack.i.l.bf16 %v8246_v33  ;;  %v15614_v34 = vunpack.i.h.bf16 %v7554_v52 }
 0x117   :  { %5398 = vrot.lane.b32.xlu0 %v5397_v19, %s7248_s21  ;;  %5413 = vrot.lane.b32.xlu1 %v5412_v13, %s7248_s21  ;;  %v516_v21 = vsel %vm194_vm0, %v5156_v36, %v15609_v40  ;;  %v5432_v13 = vpack.i.bf16 %v521_v44, %v7584_v62  ;;  %v5181_v16 = vunpack.i.h.bf16 %v8271_v41  ;;  %v15615_v55 = vunpack.i.h.bf16 %v7512_v37 }
 0x118   :  { %v5407_v19 = vpack.i.bf16 %v5156_v36, %v516_v21  ;;  %v519_v40 = vsel %vm194_vm0, %v15613_v32, %v15612_v17  ;;  %v522_v54 = vsel %vm194_vm0, %v5171_v25, %v15614_v34  ;;  %v15616_v33 = vunpack.i.l.bf16 %v7599_v4 }
 0x119   :  { %v5422_v36 = vpack.i.bf16 %v519_v40, %v7545_v48  ;;  %v5437_v21 = vpack.i.bf16 %v5171_v25, %v522_v54  ;;  %v5176_v25 = vunpack.i.h.bf16 %v8259_v8  ;;  %v15618_v44 = vunpack.i.l.bf16 %v7577_v60 }
 0x11a   :  { %v15619_v37 = vunpack.i.l.bf16 %v8259_v8  ;;  %v5191_v32 = vunpack.i.h.bf16 %v8285_v46  ;;  %v15621_v40 = vunpack.i.h.bf16 %v7577_v60  ;;  %v15622_v8 = vunpack.i.l.bf16 %v7645_v20 }
 0x11b   :  { %5403 = vrot.lane.b32.xlu0 %v5402_v15, %s7248_s21  ;;  %5418 = vrot.lane.b32.xlu1 %v5417_v35, %s7248_s21  ;;  %v520_v15 = vsel %vm194_vm0, %v5166_v38, %v15615_v55  ;;  %v15617_v35 = vunpack.i.l.bf16 %v8271_v41  ;;  %v15623_v54 = vunpack.i.l.bf16 %v8285_v46  ;;  %v15624_v55 = vunpack.i.l.bf16 %v7623_v12 }
 0x11c   :  { %v5427_v51 = vpack.i.bf16 %v5166_v38, %v520_v15  ;;  %v524_v34 = vsel %vm194_vm0, %v5176_v25, %v15621_v40  ;;  %v15625_v60 = vunpack.i.l.bf16 %v8273_v50 }
 0x11d   :  { %v525_v52 = vsel %vm194_vm0, %v15617_v35, %v15616_v33  ;;  %v15626_v33 = vunpack.i.h.bf16 %v7645_v20 }
 0x11e   :  { %v5452_v9 = vpack.i.bf16 %v525_v52, %v7630_v14  ;;  %v527_v15 = vsel %vm194_vm0, %v15625_v60, %v15624_v55  ;;  %v15636_v55 = vunpack.i.l.bf16 %v7715_v1  ;;  %v15637_v60 = vunpack.i.l.bf16 %v8301_v3 }
 0x11f   :  { %5408 = vrot.lane.b32.xlu0 %v5407_v19, %s7248_s21  ;;  %5433 = vrot.lane.b32.xlu1 %v5432_v13, %s7248_s21  ;;  %v523_v19 = vsel %vm194_vm0, %v15619_v37, %v15618_v44  ;;  %v15620_v13 = vunpack.i.h.bf16 %v7599_v4  ;;  %v529_v4 = vsel %vm194_vm0, %v15623_v54, %v15622_v8  ;;  %v530_v46 = vsel %vm194_vm0, %v5191_v32, %v15626_v33 }
 0x120   :  { %v5442_v38 = vpack.i.bf16 %v523_v19, %v7616_v10  ;;  %v5462_v35 = vpack.i.bf16 %v527_v15, %v7662_v26  ;;  %v5477_v52 = vpack.i.bf16 %v5191_v32, %v530_v46  ;;  %v15629_v44 = vunpack.i.h.bf16 %v7623_v12  ;;  %v8505_v46 = vpop.permute.xlu0 %5243  ;;  %v15718_v10 = vld [vmem:[#allocation60_spill] sm:$0xff]  ;;  %v8881_v26 = vld [vmem:[%s14639_s0 + $0x100] sm:$0xff] }
 0x121   :  { %v526_v41 = vsel %vm194_vm0, %v5181_v16, %v15620_v13  ;;  %v5196_v13 = vunpack.i.h.bf16 %v8287_v5  ;;  %v5211_v54 = vunpack.i.h.bf16 %v8308_v39  ;;  %v535_v15 = vsel %vm194_vm0, %v15637_v60, %v15636_v55 }
 0x122   :  { %v5457_v17 = vpack.i.bf16 %v5181_v16, %v526_v41  ;;  %v5186_v16 = vunpack.i.h.bf16 %v8273_v50  ;;  %v15630_v41 = vunpack.i.l.bf16 %v7669_v28  ;;  %v15651_v55 = vunpack.i.l.bf16 %v8325_v11 }
 0x123   :  { %5423 = vrot.lane.b32.xlu0 %v5422_v36, %s7248_s21  ;;  %5438 = vrot.lane.b32.xlu1 %v5437_v21, %s7248_s21  ;;  %v5447_v36 = vpack.i.bf16 %v5176_v25, %v524_v34  ;;  %v5472_v21 = vpack.i.bf16 %v529_v4, %v7676_v30  ;;  %v15628_v25 = vunpack.i.l.bf16 %v8299_v56  ;;  %v15633_v34 = vunpack.i.h.bf16 %v7669_v28 }
 0x124   :  { %v528_v20 = vsel %vm194_vm0, %v5186_v16, %v15629_v44  ;;  %v15635_v4 = vunpack.i.l.bf16 %v8308_v39  ;;  %v5206_v28 = vunpack.i.h.bf16 %v8301_v3  ;;  %v15638_v39 = vunpack.i.h.bf16 %v7737_v22 }
 0x125   :  { %v5467_v37 = vpack.i.bf16 %v5186_v16, %v528_v20  ;;  %v532_v8 = vsel %vm194_vm0, %v5196_v13, %v15633_v34  ;;  %v5221_v3 = vunpack.i.h.bf16 %v8323_v31  ;;  %v5231_v34 = vunpack.i.h.bf16 %v8337_v0 }
 0x126   :  { %v538_v33 = vsel %vm194_vm0, %v5211_v54, %v15638_v39 }
 0x127   :  { %5428 = vrot.lane.b32.xlu0 %v5427_v51, %s7248_s21  ;;  %5453 = vrot.lane.b32.xlu1 %v5452_v9, %s7248_s21  ;;  %v5201_v51 = vunpack.i.h.bf16 %v8299_v56  ;;  %v15627_v9 = vunpack.i.l.bf16 %v7691_v45 }
 0x129   :  { %v533_v50 = vsel %vm194_vm0, %v15628_v25, %v15627_v9  ;;  %v15640_v25 = vunpack.i.l.bf16 %v7783_v18 }
 0x12a   :  { %v5492_v19 = vpack.i.bf16 %v533_v50, %v7722_v6  ;;  %v8921_v6 = vld [vmem:[%s14639_s0 + $0x170] sm:$0xff] }
 0x12b   :  { %5443 = vrot.lane.b32.xlu0 %v5442_v38, %s7248_s21  ;;  %5458 = vrot.lane.b32.xlu1 %v5457_v17, %s7248_s21  ;;  %v15631_v38 = vunpack.i.l.bf16 %v8287_v5  ;;  %v15632_v17 = vunpack.i.h.bf16 %v7691_v45  ;;  %v15634_v5 = vunpack.i.l.bf16 %v7737_v22  ;;  %v15641_v22 = vunpack.i.l.bf16 %v8323_v31  ;;  %15741 = vst [vmem:[#allocation100_spill] sm:$0xff] %v8921_v6 }
 0x12c   :  { %v15644_v31 = vunpack.i.h.bf16 %v7783_v18  ;;  %v15646_v18 = vunpack.i.l.bf16 %v7829_v7 }
 0x12d   :  { %v531_v56 = vsel %vm194_vm0, %v15631_v38, %v15630_v41  ;;  %v534_v12 = vsel %vm194_vm0, %v5201_v51, %v15632_v17  ;;  %v537_v45 = vsel %vm194_vm0, %v15635_v4, %v15634_v5  ;;  %v541_v50 = vsel %vm194_vm0, %v15641_v22, %v15640_v25 }
 0x12e   :  { %v5497_v32 = vpack.i.bf16 %v5201_v51, %v534_v12  ;;  %v5482_v40 = vpack.i.bf16 %v531_v56, %v7708_v61  ;;  %v5512_v16 = vpack.i.bf16 %v537_v45, %v7768_v53  ;;  %v15639_v51 = vunpack.i.h.bf16 %v7715_v1  ;;  %v8531_v56 = vpop.permute.xlu0 %5253  ;;  %v15648_v45 = vld [vmem:[#allocation34_spill] sm:$0xff] }
 0x12f   :  { %5448 = vrot.lane.b32.xlu0 %v5447_v36, %s7248_s21  ;;  %5473 = vrot.lane.b32.xlu1 %v5472_v21, %s7248_s21  ;;  %v8491_v36 = vpop.permute.xlu1 %5248  ;;  %v5487_v21 = vpack.i.bf16 %v5196_v13, %v532_v8  ;;  %v5216_v1 = vunpack.i.h.bf16 %v8310_v2  ;;  %v15643_v13 = vunpack.i.l.bf16 %v8310_v2  ;;  %v542_v38 = vsel %vm194_vm0, %v5221_v3, %v15644_v31  ;;  %v8962_v61 = vld [vmem:[%s14639_s0 + $0x1a0] sm:$0xff] }
 0x130   :  { %v536_v9 = vsel %vm194_vm0, %v5206_v28, %v15639_v51  ;;  %v5537_v12 = vpack.i.bf16 %v5221_v3, %v542_v38  ;;  %v15647_v8 = vunpack.i.l.bf16 %v8337_v0  ;;  %v15652_v0 = vunpack.i.h.bf16 %v7829_v7  ;;  %v15655_v3 = vld [vmem:[#allocation36_spill] sm:$0xff]  ;;  %15748 = vst [vmem:[#allocation104_spill] sm:$0xff] %v8962_v61 }
 0x131   :  { %v5507_v20 = vpack.i.bf16 %v5206_v28, %v536_v9  ;;  %v15656_v25 = vunpack.i.l.bf16 %v15655_v3  ;;  %v15657_v7 = vunpack.i.l.bf16 %v8351_v27  ;;  %v15661_v38 = vunpack.i.l.bf16 %v8339_v29 }
 0x132   :  { %v8549_v5 = vpop.permute.xlu0 %5263 }
 0x133   :  { %5463 = vrot.lane.b32.xlu0 %v5462_v35, %s7248_s21  ;;  %5478 = vrot.lane.b32.xlu1 %v5477_v52, %s7248_s21  ;;  %v5517_v35 = vpack.i.bf16 %v5211_v54, %v538_v33  ;;  %v5502_v52 = vpack.i.bf16 %v535_v15, %v7754_v47  ;;  %v8517_v44 = vpop.permute.xlu1 %5258  ;;  %v545_v54 = vsel %vm194_vm0, %v15647_v8, %v15646_v18  ;;  %v15663_v18 = vld [vmem:[#allocation37_spill] sm:$0xff] }
 0x134   :  { %v546_v15 = vsel %vm194_vm0, %v5231_v34, %v15652_v0  ;;  %v549_v22 = vsel %vm194_vm0, %v15657_v7, %v15656_v25  ;;  %v15670_v25 = vld [vmem:[#allocation43_spill] sm:$0xff]  ;;  %v15671_v7 = vld [vmem:[#allocation46_spill] sm:$0xff] }
 0x135   :  { %v5557_v33 = vpack.i.bf16 %v5231_v34, %v546_v15  ;;  %v5245_v34 = vunpack.i.l.bf16 %v8505_v46 }
 0x137   :  { %5468 = vrot.lane.b32.xlu0 %v5467_v37, %s7248_s21  ;;  %5493 = vrot.lane.b32.xlu1 %v5492_v19, %s7248_s21  ;;  %v5532_v37 = vpack.i.bf16 %v541_v50, %v7814_v24  ;;  %v15642_v19 = vunpack.i.l.bf16 %v7761_v57  ;;  %v8535_v17 = vpop.permute.xlu1 %5268  ;;  %v8575_v50 = vpop.permute.xlu0 %5273 }
 0x139   :  { %v539_v41 = vsel %vm194_vm0, %v15643_v13, %v15642_v19  ;;  %v5236_v13 = vunpack.i.h.bf16 %v8339_v29 }
 0x13b   :  { %5483 = vrot.lane.b32.xlu0 %v5482_v40, %s7248_s21  ;;  %5498 = vrot.lane.b32.xlu1 %v5497_v32, %s7248_s21  ;;  %v5522_v32 = vpack.i.bf16 %v539_v41, %v7800_v23  ;;  %v15645_v40 = vunpack.i.h.bf16 %v7761_v57  ;;  %v5226_v57 = vunpack.i.h.bf16 %v8325_v11  ;;  %v8561_v39 = vpop.permute.xlu1 %5278  ;;  %v5241_v11 = vunpack.i.h.bf16 %v8351_v27  ;;  %v15659_v41 = vld [vmem:[#allocation33_spill] sm:$0xff]  ;;  %v8979_v23 = vld [vmem:[%s14639_s0 + $0x1c0] sm:$0xff] }
 0x13c   :  { %v15660_v31 = vunpack.i.l.bf16 %v15659_v41  ;;  %v5281_v63 = vunpack.i.h.bf16 %v8561_v39  ;;  %15751 = vst [vmem:[#allocation106_spill] sm:$0xff] %v8979_v23  ;;  %v15757_v24 = vunpack.i.l.bf16 %v8561_v39 }
 0x13d   :  { %v540_v2 = vsel %vm194_vm0, %v5216_v1, %v15645_v40  ;;  %v8593_v40 = vpop.permute.xlu0 %5283 }
 0x13e   :  { %v5527_v4 = vpack.i.bf16 %v5216_v1, %v540_v2  ;;  %v15658_v1 = vld [vmem:[#allocation40_spill] sm:$0xff]  ;;  %v547_v27 = vsel %vm194_vm0, %v15661_v38, %v15660_v31 }
 0x13f   :  { %5488 = vrot.lane.b32.xlu0 %v5487_v21, %s7248_s21  ;;  %5513 = vrot.lane.b32.xlu1 %v5512_v16, %s7248_s21  ;;  %v5552_v21 = vpack.i.bf16 %v545_v54, %v15648_v45  ;;  %v15649_v16 = vld [vmem:[#allocation28_spill] sm:$0xff]  ;;  %v5572_v19 = vpack.i.bf16 %v549_v22, %v15658_v1  ;;  %v5562_v8 = vpack.i.bf16 %v547_v27, %v15663_v18  ;;  %v15664_v54 = vunpack.i.h.bf16 %v15659_v41 }
 0x140   :  { %v15650_v28 = vunpack.i.l.bf16 %v15649_v16  ;;  %v15654_v51 = vunpack.i.h.bf16 %v15649_v16  ;;  %v15665_v16 = vld [vmem:[#allocation44_spill] sm:$0xff] }
 0x141   :  { %v548_v29 = vsel %vm194_vm0, %v5236_v13, %v15664_v54 }
 0x142   :  { %v543_v60 = vsel %vm194_vm0, %v15651_v55, %v15650_v28  ;;  %v544_v9 = vsel %vm194_vm0, %v5226_v57, %v15654_v51  ;;  %v5587_v28 = vpack.i.bf16 %v15665_v16, %v5245_v34  ;;  %v5246_v55 = vunpack.i.h.bf16 %v8505_v46 }
 0x143   :  { %5503 = vrot.lane.b32.xlu0 %v5502_v52, %s7248_s21  ;;  %5518 = vrot.lane.b32.xlu1 %v5517_v35, %s7248_s21  ;;  %v15653_v35 = vld [vmem:[#allocation31_spill] sm:$0xff] }
 0x144   :  { %v5542_v52 = vpack.i.bf16 %v543_v60, %v15653_v35  ;;  %v15666_v60 = vld [vmem:[#allocation39_spill] sm:$0xff]  ;;  %v9089_v35 = vld [vmem:[%s14639_s0 + $0x280] sm:$0xff] }
 0x145   :  { %v15667_v0 = vunpack.i.l.bf16 %v15666_v60  ;;  %15776 = vst [vmem:[#allocation116_spill] sm:$0xff] %v9089_v35  ;;  %v9132_v35 = vld [vmem:[%s14639_s0 + $0x2f0] sm:$0xff] }
 0x146   :  { %15783 = vst [vmem:[#allocation121_spill] sm:$0xff] %v9132_v35  ;;  %v9175_v35 = vld [vmem:[%s14639_s0 + $0x320] sm:$0xff] }
 0x147   :  { %5508 = vrot.lane.b32.xlu0 %v5507_v20, %s7248_s21  ;;  %5533 = vrot.lane.b32.xlu1 %v5532_v37, %s7248_s21  ;;  %v8579_v20 = vpop.permute.xlu1 %5288  ;;  %v5547_v37 = vpack.i.bf16 %v5226_v57, %v544_v9  ;;  %v5567_v57 = vpack.i.bf16 %v5236_v13, %v548_v29  ;;  %v551_v15 = vsel %vm194_vm0, %v5245_v34, %v15667_v0  ;;  %v15675_v29 = vld [vmem:[#allocation50_spill] sm:$0xff] }
 0x148   :  { %v5582_v46 = vpack.i.bf16 %v551_v15, %v15670_v25  ;;  %v5261_v15 = vunpack.i.h.bf16 %v8517_v44  ;;  %v15767_v45 = vunpack.i.l.bf16 %v8579_v20  ;;  %15788 = vst [vmem:[#allocation126_spill] sm:$0xff] %v9175_v35  ;;  %v9216_v35 = vld [vmem:[%s14639_s0 + $0x390] sm:$0xff] }
 0x149   :  { %15794 = vst [vmem:[#allocation131_spill] sm:$0xff] %v9216_v35  ;;  %v9239_v35 = vld [vmem:[%s14639_s0 + $0x3a0] sm:$0xff] }
 0x14a   :  { %15800 = vst [vmem:[#allocation134_spill] sm:$0xff] %v9239_v35 }
 0x14b   :  { %5523 = vrot.lane.b32.xlu0 %v5522_v32, %s7248_s21  ;;  %5538 = vrot.lane.b32.xlu1 %v5537_v12, %s7248_s21  ;;  %v15662_v12 = vunpack.i.h.bf16 %v15655_v3 }
 0x14d   :  { %v550_v32 = vsel %vm194_vm0, %v5241_v11, %v15662_v12  ;;  %v5255_v12 = vunpack.i.l.bf16 %v8531_v56 }
 0x14e   :  { %v5577_v2 = vpack.i.bf16 %v5241_v11, %v550_v32  ;;  %v8614_v11 = vpop.permute.xlu0 %5293  ;;  %v5260_v32 = vunpack.i.l.bf16 %v8517_v44 }
 0x14f   :  { %5528 = vrot.lane.b32.xlu0 %v5527_v4, %s7248_s21  ;;  %5553 = vrot.lane.b32.xlu1 %v5552_v21, %s7248_s21  ;;  %v5250_v4 = vunpack.i.l.bf16 %v8491_v36  ;;  %v8601_v21 = vpop.permute.xlu1 %5298 }
 0x152   :  { %v8630_v41 = vpop.permute.xlu0 %5303 }
 0x153   :  { %5543 = vrot.lane.b32.xlu0 %v5542_v52, %s7248_s21  ;;  %5558 = vrot.lane.b32.xlu1 %v5557_v33, %s7248_s21  ;;  %v5251_v33 = vunpack.i.h.bf16 %v8491_v36  ;;  %v15668_v52 = vld [vmem:[#allocation42_spill] sm:$0xff]  ;;  %v8618_v3 = vpop.permute.xlu1 %5308 }
 0x154   :  { %v15669_v51 = vunpack.i.l.bf16 %v15668_v52 }
 0x156   :  { %v553_v9 = vsel %vm194_vm0, %v5250_v4, %v15669_v51 }
 0x157   :  { %5548 = vrot.lane.b32.xlu0 %v5547_v37, %s7248_s21  ;;  %5573 = vrot.lane.b32.xlu1 %v5572_v19, %s7248_s21  ;;  %v5597_v22 = vpack.i.bf16 %v553_v9, %v15671_v7  ;;  %v15672_v37 = vunpack.i.h.bf16 %v15666_v60  ;;  %v15673_v19 = vunpack.i.h.bf16 %v15668_v52 }
 0x159   :  { %v552_v36 = vsel %vm194_vm0, %v5246_v55, %v15672_v37  ;;  %v554_v13 = vsel %vm194_vm0, %v5251_v33, %v15673_v19 }
 0x15a   :  { %v5592_v38 = vpack.i.bf16 %v5246_v55, %v552_v36  ;;  %v5607_v27 = vpack.i.bf16 %v5251_v33, %v554_v13  ;;  %v15676_v55 = vld [vmem:[#allocation45_spill] sm:$0xff]  ;;  %v15678_v33 = vld [vmem:[#allocation48_spill] sm:$0xff] }
 0x15b   :  { %5563 = vrot.lane.b32.xlu0 %v5562_v8, %s7248_s21  ;;  %5578 = vrot.lane.b32.xlu1 %v5577_v2, %s7248_s21  ;;  %v15674_v8 = vld [vmem:[#allocation47_spill] sm:$0xff]  ;;  %v15677_v60 = vunpack.i.l.bf16 %v15676_v55  ;;  %v15679_v52 = vunpack.i.l.bf16 %v15678_v33  ;;  %v15683_v36 = vunpack.i.h.bf16 %v15676_v55  ;;  %v15684_v19 = vunpack.i.h.bf16 %v15678_v33  ;;  %v15689_v33 = vld [vmem:[#allocation53_spill] sm:$0xff] }
 0x15c   :  { %v5602_v54 = vpack.i.bf16 %v15674_v8, %v5250_v4  ;;  %v5270_v55 = vunpack.i.l.bf16 %v8535_v17  ;;  %v15775_v8 = vld [vmem:[#allocation70_spill] sm:$0xff] }
 0x15d   :  { %v555_v0 = vsel %vm194_vm0, %v5255_v12, %v15677_v60  ;;  %v557_v51 = vsel %vm194_vm0, %v5260_v32, %v15679_v52  ;;  %v558_v13 = vsel %vm194_vm0, %v5261_v15, %v15684_v19  ;;  %v5632_v52 = vpack.i.bf16 %v15689_v33, %v5260_v32 }
 0x15e   :  { %v5271_v19 = vunpack.i.h.bf16 %v8535_v17  ;;  %v5662_v59 = vpack.i.bf16 %v15713_v58, %v5270_v55 }
 0x15f   :  { %5568 = vrot.lane.b32.xlu0 %v5567_v57, %s7248_s21  ;;  %5588 = vrot.lane.b32.xlu1 %v5587_v28, %s7248_s21  ;;  %v5617_v57 = vpack.i.bf16 %v15675_v29, %v5255_v12  ;;  %v5256_v28 = vunpack.i.h.bf16 %v8531_v56 }
 0x161   :  { %v556_v44 = vsel %vm194_vm0, %v5256_v28, %v15683_v36 }
 0x162   :  { %v5622_v12 = vpack.i.bf16 %v5256_v28, %v556_v44  ;;  %v5266_v28 = vunpack.i.h.bf16 %v8549_v5 }
 0x163   :  { %5583 = vrot.lane.b32.xlu0 %v5582_v46, %s7248_s21  ;;  %5598 = vrot.lane.b32.xlu1 %v5597_v22, %s7248_s21  ;;  %v15681_v46 = vld [vmem:[#allocation49_spill] sm:$0xff]  ;;  %v15682_v22 = vld [vmem:[#allocation52_spill] sm:$0xff] }
 0x164   :  { %v5612_v56 = vpack.i.bf16 %v555_v0, %v15681_v46  ;;  %v5627_v37 = vpack.i.bf16 %v557_v51, %v15682_v22  ;;  %v15690_v51 = vld [vmem:[#allocation56_spill] sm:$0xff] }
 0x165   :  { %v8632_v31 = vpop.permute.xlu1 %5313 }
 0x167   :  { %5593 = vrot.lane.b32.xlu0 %v5592_v38, %s7248_s21  ;;  %5608 = vrot.lane.b32.xlu1 %v5607_v27, %s7248_s21 }
 0x169   :  { %v8638_v2 = vpop.permute.xlu0 %5318  ;;  %v8640_v34 = vpop.permute.xlu1 %5323 }
 0x16a   :  { %v5320_v33 = vunpack.i.l.bf16 %v8638_v2 }
 0x16b   :  { %5603 = vrot.lane.b32.xlu0 %v5602_v54, %s7248_s21  ;;  %5618 = vrot.lane.b32.xlu1 %v5617_v57, %s7248_s21  ;;  %v5637_v54 = vpack.i.bf16 %v5261_v15, %v558_v13  ;;  %v5265_v57 = vunpack.i.l.bf16 %v8549_v5  ;;  %v15691_v15 = vld [vmem:[#allocation51_spill] sm:$0xff]  ;;  %v15693_v13 = vld [vmem:[#allocation54_spill] sm:$0xff] }
 0x16c   :  { %v15692_v36 = vunpack.i.l.bf16 %v15691_v15  ;;  %v15699_v17 = vunpack.i.h.bf16 %v15691_v15  ;;  %v8782_v15 = vld [vmem:[%s14639_s0 + $0x90] sm:$0xff] }
 0x16d   :  { %v8654_v9 = vpop.permute.xlu0 %5328  ;;  %v8656_v4 = vpop.permute.xlu1 %5333  ;;  %15710 = vst [vmem:[#allocation90_spill] sm:$0xff] %v8782_v15  ;;  %v15717_v15 = vunpack.i.l.bf16 %v15716_v49 }
 0x16e   :  { %15680 = vst [vmem:[#allocation28_spill] sm:$0xff] %v8656_v4  ;;  %v559_v44 = vsel %vm194_vm0, %v5265_v57, %v15692_v36  ;;  %v15700_v36 = vunpack.i.h.bf16 %v15693_v13 }
 0x16f   :  { %5613 = vrot.lane.b32.xlu0 %v5612_v56, %s7248_s21  ;;  %5628 = vrot.lane.b32.xlu1 %v5627_v37, %s7248_s21  ;;  %v5647_v56 = vpack.i.bf16 %v15690_v51, %v5265_v57  ;;  %v145_v37 = vlaneseq  ;;  %v560_v57 = vsel %vm194_vm0, %v5266_v28, %v15699_v17 }
 0x171   :  { %v8668_v38 = vpop.permute.xlu0 %5338  ;;  %v8670_v27 = vpop.permute.xlu1 %5343  ;;  %v8698_v4 = vand.u32 127, %v145_v37  ;;  %v8715_v37 = vld [vmem:[%s14639_s0 + $0x10] sm:$0xff] }
 0x172   :  { %15685 = vst [vmem:[#allocation36_spill] sm:$0xff] %v8668_v38  ;;  %15686 = vst [vmem:[#allocation33_spill] sm:$0xff] %v8670_v27  ;;  %v15697_v27 = vld [vmem:[#allocation58_spill] sm:$0xff] }
 0x173   :  { %5623 = vrot.lane.b32.xlu0 %v5622_v12, %s7248_s21  ;;  %5638 = vrot.lane.b32.xlu1 %v5637_v54, %s7248_s21  ;;  %v15694_v12 = vunpack.i.l.bf16 %v15693_v13  ;;  %15698 = vst [vmem:[#allocation48_spill] sm:$0xff] %v8698_v4  ;;  %15701 = vst [vmem:[#allocation51_spill] sm:$0xff] %v8715_v37 }
 0x175   :  { %v8676_v60 = vpop.permute.xlu0 %5348  ;;  %v8678_v0 = vpop.permute.xlu1 %5353  ;;  %v561_v54 = vsel %vm194_vm0, %v5270_v55, %v15694_v12  ;;  %v15719_v55 = vunpack.i.l.bf16 %v15718_v10 }
 0x176   :  { %15687 = vst [vmem:[#allocation39_spill] sm:$0xff] %v8676_v60  ;;  %15688 = vst [vmem:[#allocation42_spill] sm:$0xff] %v8678_v0  ;;  %v15696_v60 = vld [vmem:[#allocation55_spill] sm:$0xff]  ;;  %v5657_v38 = vpack.i.bf16 %v561_v54, %v15697_v27  ;;  %v5275_v54 = vunpack.i.l.bf16 %v8575_v50 }
 0x177   :  { %5633 = vrot.lane.b32.xlu0 %v5632_v52, %s7248_s21  ;;  %5648 = vrot.lane.b32.xlu1 %v5647_v56, %s7248_s21  ;;  %v5642_v5 = vpack.i.bf16 %v559_v44, %v15696_v60  ;;  %v562_v52 = vsel %vm194_vm0, %v5271_v19, %v15700_v36  ;;  %v8709_v56 = vmul.u32.u64.low 2454267026, %v8698_v4  ;;  %v8710_v12 = vmul.u32.u64.high 2454267026, %v8698_v4, %v8709_v56  ;;  %v8761_v36 = vld [vmem:[%s14639_s0 + $0x20] sm:$0xff]  ;;  %v15813_v60 = vld [vmem:[#allocation75_spill] sm:$0xff] }
 0x178   :  { %v5652_v44 = vpack.i.bf16 %v5266_v28, %v560_v57  ;;  %v5667_v13 = vpack.i.bf16 %v5271_v19, %v562_v52  ;;  %v8738_v19 = vld [vmem:[%s14639_s0 + $0x50] sm:$0xff]  ;;  %v8745_v52 = vld [vmem:[%s14639_s0 + $0x40] sm:$0xff]  ;;  %15707 = vst [vmem:[#allocation87_spill] sm:$0xff] %v8761_v36  ;;  %v15735_v36 = vmov 0  }
 0x179   :  { %v8692_v32 = vpop.permute.xlu0 %5358  ;;  %v8694_v0 = vpop.permute.xlu1 %5363  ;;  %15704 = vst [vmem:[#allocation84_spill] sm:$0xff] %v8738_v19  ;;  %15705 = vst [vmem:[#allocation85_spill] sm:$0xff] %v8745_v52  ;;  %v8754_v28 = vld [vmem:[%s14639_s0 + $0x30] sm:$0xff]  ;;  %vm154_vm1 = vc.u32 %v8709_v56, 2454267026  ;;  %v8775_v57 = vld [vmem:[%s14639_s0 + $0x60] sm:$0xff]  ;;  %v5276_v19 = vunpack.i.h.bf16 %v8575_v50 }
 0x17a   :  { %15695 = vst [vmem:[#allocation45_spill] sm:$0xff] %v8694_v0  ;;  %v8731_v0 = vld [vmem:[%s14639_s0] sm:$0xff]  ;;  %15706 = vst [vmem:[#allocation86_spill] sm:$0xff] %v8754_v28  ;;  %v8818_v50 = vld [vmem:[%s14639_s0 + $0xb0] sm:$0xff] }
 0x17b   :  { %5643 = vrot.lane.b32.xlu0 %v5642_v5, %s7248_s21  ;;  %5658 = vrot.lane.b32.xlu1 %v5657_v38, %s7248_s21  ;;  %v8725_v38 = vadd.s32 128, %v8698_v4  ;;  %15703 = vst [vmem:[#allocation83_spill] sm:$0xff] %v8731_v0  ;;  %15709 = vst [vmem:[#allocation89_spill] sm:$0xff] %v8775_v57  ;;  %v563_v57 = vsel %vm194_vm0, %v5275_v54, %v15717_v15  ;;  %v8839_v15 = vld [vmem:[%s14639_s0 + $0xc0] sm:$0xff]  ;;  %v8860_v28 = vld [vmem:[%s14639_s0 + $0x110] sm:$0xff] }
 0x17c   :  { %15721 = vst [vmem:[#allocation57_spill] sm:$0xff] %v8818_v50  ;;  %15726 = vst [vmem:[#allocation94_spill] sm:$0xff] %v8839_v15  ;;  %v15733_v50 = vld [vmem:[#allocation61_spill] sm:$0xff]  ;;  %v8888_v56 = vld [vmem:[%s14639_s0 + $0x130] sm:$0xff] }
 0x17d   :  { %v8720_v17 = vpop.permute.xlu0 %5368  ;;  %v8722_v5 = vpop.permute.xlu1 %5373  ;;  %15702 = vst [vmem:[#allocation54_spill] sm:$0xff] %v8725_v38  ;;  %v8800_v42 = vmul.u32.u64.low 2454267026, %v8725_v38  ;;  %v8801_v43 = vmul.u32.u64.high 2454267026, %v8725_v38, %v8800_v42  ;;  %v5672_v14 = vpack.i.bf16 %v563_v57, %v15733_v50 }
 0x17f   :  { %5653 = vrot.lane.b32.xlu0 %v5652_v44, %s7248_s21  ;;  %5668 = vrot.lane.b32.xlu1 %v5667_v13, %s7248_s21  ;;  %v8768_v44 = vld [vmem:[%s14639_s0 + $0x70] sm:$0xff]  ;;  %v8789_v13 = vld [vmem:[%s14639_s0 + $0x80] sm:$0xff]  ;;  %vm168_vm2 = vc.u32 %v8800_v42, 2454267026  ;;  %v5285_v42 = vunpack.i.l.bf16 %v8593_v40 }
 0x180   :  { %15708 = vst [vmem:[#allocation88_spill] sm:$0xff] %v8768_v44  ;;  %15712 = vst [vmem:[#allocation91_spill] sm:$0xff] %v8789_v13  ;;  %v15714_v44 = vld [vmem:[#allocation62_spill] sm:$0xff]  ;;  %v15720_v13 = vunpack.i.l.bf16 %v8561_v39  ;;  %v9022_v39 = vld [vmem:[%s14639_s0 + $0x230] sm:$0xff] }
 0x181   :  { %v5677_v48 = vpack.i.bf16 %v15714_v44, %v5275_v54  ;;  %v8795_v62 = vpop.permute.xlu0 %5378  ;;  %v8797_v52 = vpop.permute.xlu1 %5383  ;;  %v8825_v54 = vld [vmem:[%s14639_s0 + $0xa0] sm:$0xff]  ;;  %15761 = vst [vmem:[#allocation111_spill] sm:$0xff] %v9022_v39 }
 0x182   :  { %15715 = vst [vmem:[#allocation92_spill] sm:$0xff] %v8797_v52  ;;  %v565_v37 = vsel %vm194_vm0, %v15720_v13, %v15719_v55  ;;  %15723 = vst [vmem:[#allocation60_spill] sm:$0xff] %v8825_v54  ;;  %v8846_v13 = vld [vmem:[%s14639_s0 + $0xf0] sm:$0xff]  ;;  %v8853_v55 = vld [vmem:[%s14639_s0 + $0xe0] sm:$0xff]  ;;  %v155_v52 = vsel %vm154_vm1, 1, %v15735_v36 }
 0x183   :  { %5663 = vrot.lane.b32.xlu0 %v5662_v59, %s7248_s21  ;;  %5678 = vrot.lane.b32.xlu1 %v5677_v48, %s7248_s21  ;;  %v8832_v48 = vld [vmem:[%s14639_s0 + $0xd0] sm:$0xff]  ;;  %15727 = vst [vmem:[#allocation95_spill] sm:$0xff] %v8846_v13  ;;  %15729 = vst [vmem:[#allocation96_spill] sm:$0xff] %v8853_v55  ;;  %v15736_v59 = vunpack.i.h.bf16 %v15716_v49  ;;  %v15737_v55 = vunpack.i.h.bf16 %v15718_v10  ;;  %v8897_v10 = vld [vmem:[%s14639_s0 + $0x120] sm:$0xff]  ;;  %v156_v49 = vadd.s32 %v8710_v12, %v155_v52 }
 0x184   :  { %15724 = vst [vmem:[#allocation93_spill] sm:$0xff] %v8832_v48  ;;  %v15734_v13 = vld [vmem:[#allocation64_spill] sm:$0xff] }
 0x185   :  { %v8864_v15 = vpop.permute.xlu0 %5388  ;;  %v8866_v54 = vpop.permute.xlu1 %5393  ;;  %v5687_v0 = vpack.i.bf16 %v565_v37, %v15734_v13  ;;  %v564_v30 = vsel %vm194_vm0, %v5276_v19, %v15736_v59  ;;  %v566_v48 = vsel %vm194_vm0, %v5281_v63, %v15737_v55  ;;  %v8904_v55 = vld [vmem:[%s14639_s0 + $0x150] sm:$0xff]  ;;  %v169_v59 = vsel %vm168_vm2, 1, %v15735_v36 }
 0x186   :  { %15731 = vst [vmem:[#allocation97_spill] sm:$0xff] %v8864_v15  ;;  %15732 = vst [vmem:[#allocation98_spill] sm:$0xff] %v8866_v54  ;;  %v5682_v12 = vpack.i.bf16 %v5276_v19, %v564_v30  ;;  %v5697_v52 = vpack.i.bf16 %v5281_v63, %v566_v48  ;;  %v8940_v37 = vld [vmem:[%s14639_s0 + $0x190] sm:$0xff]  ;;  %v8948_v63 = vld [vmem:[%s14639_s0 + $0x180] sm:$0xff]  ;;  %v170_v57 = vadd.s32 %v8801_v43, %v169_v59  ;;  %v157_v59 = vshrl.u32 %v156_v49, 3 }
 0x187   :  { %5673 = vrot.lane.b32.xlu0 %v5672_v14, %s7248_s21  ;;  %5688 = vrot.lane.b32.xlu1 %v5687_v0, %s7248_s21  ;;  %15739 = vst [vmem:[#allocation99_spill] sm:$0xff] %v8904_v55  ;;  %v8911_v14 = vld [vmem:[%s14639_s0 + $0x140] sm:$0xff]  ;;  %15743 = vst [vmem:[#allocation101_spill] sm:$0xff] %v8940_v37  ;;  %v8955_v19 = vld [vmem:[%s14639_s0 + $0x1b0] sm:$0xff]  ;;  %v5301_v13 = vunpack.i.h.bf16 %v8601_v21 }
 0x188   :  { %v8928_v55 = vld [vmem:[%s14639_s0 + $0x160] sm:$0xff]  ;;  %15745 = vst [vmem:[#allocation102_spill] sm:$0xff] %v8948_v63  ;;  %15746 = vst [vmem:[#allocation103_spill] sm:$0xff] %v8955_v19  ;;  %v8972_v30 = vld [vmem:[%s14639_s0 + $0x1d0] sm:$0xff]  ;;  %v5291_v19 = vunpack.i.h.bf16 %v8579_v20 }
 0x189   :  { %v8933_v36 = vpop.permute.xlu0 %5398  ;;  %v8935_v47 = vpop.permute.xlu1 %5413  ;;  %15749 = vst [vmem:[#allocation105_spill] sm:$0xff] %v8972_v30  ;;  %v8993_v48 = vld [vmem:[%s14639_s0 + $0x1e0] sm:$0xff]  ;;  %v9000_v49 = vld [vmem:[%s14639_s0 + $0x210] sm:$0xff]  ;;  %v15758_v30 = vld [vmem:[#allocation65_spill] sm:$0xff] }
 0x18a   :  { %15754 = vst [vmem:[#allocation108_spill] sm:$0xff] %v8993_v48  ;;  %15755 = vst [vmem:[#allocation109_spill] sm:$0xff] %v9000_v49  ;;  %v5692_v6 = vpack.i.bf16 %v15758_v30, %v15757_v24  ;;  %v9015_v0 = vld [vmem:[%s14639_s0 + $0x200] sm:$0xff]  ;;  %v5286_v49 = vunpack.i.h.bf16 %v8593_v40  ;;  %v15763_v43 = vld [vmem:[#allocation63_spill] sm:$0xff] }
 0x18b   :  { %5683 = vrot.lane.b32.xlu0 %v5682_v12, %s7248_s21  ;;  %5698 = vrot.lane.b32.xlu1 %v5697_v52, %s7248_s21  ;;  %v8986_v12 = vld [vmem:[%s14639_s0 + $0x1f0] sm:$0xff]  ;;  %15760 = vst [vmem:[#allocation110_spill] sm:$0xff] %v9015_v0  ;;  %v15764_v48 = vunpack.i.l.bf16 %v15763_v43  ;;  %v15765_v63 = vld [vmem:[#allocation66_spill] sm:$0xff]  ;;  %v171_v0 = vshrl.u32 %v170_v57, 3  ;;  %v158_v57 = vmul.u32 14, %v157_v59 }
 0x18c   :  { %15752 = vst [vmem:[#allocation107_spill] sm:$0xff] %v8986_v12  ;;  %v15759_v52 = vld [vmem:[#allocation68_spill] sm:$0xff]  ;;  %v15766_v61 = vunpack.i.l.bf16 %v15765_v63  ;;  %v9041_v40 = vld [vmem:[%s14639_s0 + $0x220] sm:$0xff]  ;;  %v15779_v29 = vunpack.i.h.bf16 %v15765_v63 }
 0x18d   :  { %v5707_v12 = vpack.i.bf16 %v15759_v52, %v5285_v42  ;;  %v9008_v23 = vpop.permute.xlu0 %5403  ;;  %v9010_v53 = vpop.permute.xlu1 %5418  ;;  %v567_v37 = vsel %vm194_vm0, %v5285_v42, %v15764_v48  ;;  %15768 = vst [vmem:[#allocation63_spill] sm:$0xff] %v9041_v40  ;;  %v9048_v48 = vld [vmem:[%s14639_s0 + $0x250] sm:$0xff]  ;;  %v15774_v42 = vld [vmem:[#allocation67_spill] sm:$0xff]  ;;  %v5300_v52 = vunpack.i.l.bf16 %v8601_v21 }
 0x18e   :  { %v569_v18 = vsel %vm194_vm0, %v15767_v45, %v15766_v61  ;;  %15769 = vst [vmem:[#allocation66_spill] sm:$0xff] %v9048_v48  ;;  %v9069_v61 = vld [vmem:[%s14639_s0 + $0x260] sm:$0xff]  ;;  %v9076_v59 = vld [vmem:[%s14639_s0 + $0x290] sm:$0xff]  ;;  %v570_v7 = vsel %vm194_vm0, %v5291_v19, %v15779_v29 }
 0x18f   :  { %5693 = vrot.lane.b32.xlu0 %v5692_v6, %s7248_s21  ;;  %5708 = vrot.lane.b32.xlu1 %v5707_v12, %s7248_s21  ;;  %v9055_v6 = vld [vmem:[%s14639_s0 + $0x240] sm:$0xff]  ;;  %v9062_v12 = vld [vmem:[%s14639_s0 + $0x270] sm:$0xff]  ;;  %15772 = vst [vmem:[#allocation114_spill] sm:$0xff] %v9069_v61  ;;  %15773 = vst [vmem:[#allocation115_spill] sm:$0xff] %v9076_v59  ;;  %v5717_v48 = vpack.i.bf16 %v569_v18, %v15775_v8 }
 0x190   :  { %15770 = vst [vmem:[#allocation112_spill] sm:$0xff] %v9055_v6  ;;  %15771 = vst [vmem:[#allocation113_spill] sm:$0xff] %v9062_v12  ;;  %v5702_v12 = vpack.i.bf16 %v567_v37, %v15774_v42  ;;  %v9096_v45 = vld [vmem:[%s14639_s0 + $0x2b0] sm:$0xff]  ;;  %v15778_v37 = vunpack.i.h.bf16 %v15763_v43  ;;  %v9109_v61 = vld [vmem:[%s14639_s0 + $0x2a0] sm:$0xff]  ;;  %v9144_v43 = vsub.s32 %v8698_v4, %v158_v57 }
 0x191   :  { %v9080_v6 = vpop.permute.xlu0 %5408  ;;  %v9082_v25 = vpop.permute.xlu1 %5433  ;;  %15777 = vst [vmem:[#allocation117_spill] sm:$0xff] %v9096_v45  ;;  %15780 = vst [vmem:[#allocation118_spill] sm:$0xff] %v9109_v61  ;;  %v9116_v59 = vld [vmem:[%s14639_s0 + $0x2d0] sm:$0xff]  ;;  %v9125_v29 = vld [vmem:[%s14639_s0 + $0x2c0] sm:$0xff] }
 0x192   :  { %v568_v18 = vsel %vm194_vm0, %v5286_v49, %v15778_v37  ;;  %15781 = vst [vmem:[#allocation119_spill] sm:$0xff] %v9116_v59  ;;  %v172_v37 = vmul.u32 14, %v171_v0  ;;  %15782 = vst [vmem:[#allocation120_spill] sm:$0xff] %v9125_v29  ;;  %v9149_v63 = vld [vmem:[%s14639_s0 + $0x310] sm:$0xff]  ;;  %v9156_v0 = vld [vmem:[%s14639_s0 + $0x300] sm:$0xff]  ;;  %v5295_v29 = vunpack.i.l.bf16 %v8614_v11  ;;  %vm176_vm3 = vcmp.ne.s32.totalorder %v9144_v43, 0 }
 0x193   :  { %5703 = vrot.lane.b32.xlu0 %v5702_v12, %s7248_s21  ;;  %5718 = vrot.lane.b32.xlu1 %v5717_v48, %s7248_s21  ;;  %v9139_v48 = vld [vmem:[%s14639_s0 + $0x2e0] sm:$0xff]  ;;  %15785 = vst [vmem:[#allocation123_spill] sm:$0xff] %v9149_v63  ;;  %15786 = vst [vmem:[#allocation124_spill] sm:$0xff] %v9156_v0  ;;  %v9163_v57 = vld [vmem:[%s14639_s0 + $0x330] sm:$0xff]  ;;  %v5712_v4 = vpack.i.bf16 %v5286_v49, %v568_v18  ;;  %vm178_vm4 = vcmp.lt.s32.totalorder %v9144_v43, 0  ;;  %v15814_v59 = vunpack.i.h.bf16 %v15813_v60 }
 0x194   :  { %15784 = vst [vmem:[#allocation122_spill] sm:$0xff] %v9139_v48  ;;  %15787 = vst [vmem:[#allocation125_spill] sm:$0xff] %v9163_v57  ;;  %v5727_v48 = vpack.i.bf16 %v5291_v19, %v570_v7  ;;  %v9182_v12 = vld [vmem:[%s14639_s0 + $0x350] sm:$0xff]  ;;  %v9189_v19 = vld [vmem:[%s14639_s0 + $0x340] sm:$0xff]  ;;  %v9209_v49 = vsub.s32 %v8725_v38, %v172_v37  ;;  %v5306_v57 = vunpack.i.h.bf16 %v8630_v41  ;;  %v5305_v38 = vunpack.i.l.bf16 %v8630_v41 }
 0x195   :  { %v9168_v63 = vpop.permute.xlu0 %5423  ;;  %v9170_v44 = vpop.permute.xlu1 %5438  ;;  %15789 = vst [vmem:[#allocation127_spill] sm:$0xff] %v9182_v12  ;;  %15790 = vst [vmem:[#allocation128_spill] sm:$0xff] %v9189_v19  ;;  %v9196_v18 = vld [vmem:[%s14639_s0 + $0x370] sm:$0xff]  ;;  %v15792_v0 = vld [vmem:[#allocation71_spill] sm:$0xff] }
 0x196   :  { %15791 = vst [vmem:[#allocation129_spill] sm:$0xff] %v9196_v18  ;;  %v9203_v7 = vld [vmem:[%s14639_s0 + $0x360] sm:$0xff]  ;;  %v15797_v37 = vld [vmem:[#allocation73_spill] sm:$0xff]  ;;  %v15801_v8 = vld [vmem:[#allocation76_spill] sm:$0xff]  ;;  %vm177_vm5 = vcmp.ne.s32.totalorder %v9209_v49, 0  ;;  %vm179_vm6 = vcmp.lt.s32.totalorder %v9209_v49, 0  ;;  %v576_v51 = vsel %vm194_vm0, %v5306_v57, %v15814_v59  ;;  %v5425_v54 = vunpack.i.l.bf16 %v9168_v63 }
 0x197   :  { %15793 = vst [vmem:[#allocation130_spill] sm:$0xff] %v9203_v7  ;;  %5713 = vrot.lane.b32.xlu0 %v5712_v4, %s7248_s21  ;;  %5728 = vrot.lane.b32.xlu1 %v5727_v48, %s7248_s21  ;;  %v15795_v18 = vld [vmem:[#allocation74_spill] sm:$0xff]  ;;  %v5296_v4 = vunpack.i.h.bf16 %v8614_v11  ;;  %v9232_v48 = vld [vmem:[%s14639_s0 + $0x3b0] sm:$0xff]  ;;  %v15799_v7 = vld [vmem:[#allocation77_spill] sm:$0xff]  ;;  %v15802_v11 = vunpack.i.l.bf16 %v8579_v20  ;;  %v5311_v20 = vunpack.i.h.bf16 %v8618_v3  ;;  %v5440_v40 = vunpack.i.l.bf16 %v9170_v44 }
 0x198   :  { %v9223_v12 = vld [vmem:[%s14639_s0 + $0x380] sm:$0xff]  ;;  %15798 = vst [vmem:[#allocation133_spill] sm:$0xff] %v9232_v48  ;;  %v5737_v42 = vpack.i.bf16 %v15795_v18, %v5295_v29  ;;  %v15803_v48 = vld [vmem:[#allocation69_spill] sm:$0xff]  ;;  %v5310_v18 = vunpack.i.l.bf16 %v8618_v3  ;;  %v15809_v3 = vld [vmem:[#allocation80_spill] sm:$0xff] }
 0x199   :  { %15796 = vst [vmem:[#allocation132_spill] sm:$0xff] %v9223_v12  ;;  %v5722_v12 = vpack.i.bf16 %v15792_v0, %v15802_v11  ;;  %v9249_v30 = vpop.permute.xlu0 %5428  ;;  %v9251_v19 = vpop.permute.xlu1 %5453  ;;  %v15804_v50 = vunpack.i.l.bf16 %v15803_v48  ;;  %v15805_v11 = vld [vmem:[#allocation72_spill] sm:$0xff]  ;;  %v15807_v41 = vunpack.i.h.bf16 %v15803_v48  ;;  %vm9295_vm7 = vmand %vm178_vm4, %vm176_vm3  ;;  %vm4697_vm3 = vcmask 556032  }
 0x19a   :  { %v15806_v35 = vunpack.i.l.bf16 %v15805_v11  ;;  %vm9317_vm8 = vmand %vm179_vm6, %vm177_vm5 }
 0x19b   :  { %v571_v27 = vsel %vm194_vm0, %v5295_v29, %v15804_v50  ;;  %5723 = vrot.lane.b32.xlu0 %v5722_v12, %s7248_s21  ;;  %5738 = vrot.lane.b32.xlu1 %v5737_v42, %s7248_s21  ;;  %v572_v50 = vsel %vm194_vm0, %v5296_v4, %v15807_v41  ;;  %v182_v29 = vadd.s32 14, %v9144_v43  ;;  %v9281_v12 = vld [vmem:[%s14639_s0 + $0x3c0] sm:$0xff]  ;;  %v15811_v42 = vld [vmem:[#allocation79_spill] sm:$0xff]  ;;  %v15812_v41 = vunpack.i.h.bf16 %v15805_v11 }
 0x19c   :  { %v573_v21 = vsel %vm194_vm0, %v5300_v52, %v15806_v35  ;;  %v9274_v35 = vld [vmem:[%s14639_s0 + $0x3d0] sm:$0xff]  ;;  %15810 = vst [vmem:[#allocation72_spill] sm:$0xff] %v9281_v12  ;;  %v5732_v11 = vpack.i.bf16 %v571_v27, %v15797_v37  ;;  %v15818_v12 = vld [vmem:[#allocation78_spill] sm:$0xff]  ;;  %v5742_v37 = vpack.i.bf16 %v5296_v4, %v572_v50 }
 0x19d   :  { %15808 = vst [vmem:[#allocation69_spill] sm:$0xff] %v9274_v35  ;;  %v574_v58 = vsel %vm194_vm0, %v5301_v13, %v15812_v41  ;;  %v183_v35 = vadd.s32 14, %v9209_v49  ;;  %v9300_v61 = vpop.permute.xlu0 %5443  ;;  %v9302_v48 = vpop.permute.xlu1 %5458  ;;  %v15817_v41 = vunpack.i.l.bf16 %v15813_v60  ;;  %v15819_v22 = vunpack.i.h.bf16 %v15818_v12  ;;  %v9325_v27 = vld [vmem:[%s14639_s0 + $0x3f0] sm:$0xff]  ;;  %v15823_v60 = vld [vmem:[#allocation82_spill] sm:$0xff] }
 0x19e   :  { %v5747_v46 = vpack.i.bf16 %v573_v21, %v15801_v8  ;;  %15822 = vst [vmem:[#allocation75_spill] sm:$0xff] %v9325_v27  ;;  %v15824_v16 = vunpack.i.l.bf16 %v15818_v12  ;;  %v9339_v21 = vld [vmem:[%s14639_s0 + $0x3e0] sm:$0xff]  ;;  %v15826_v8 = vld [vmem:[#allocation81_spill] sm:$0xff]  ;;  %v5757_v39 = vpack.i.bf16 %v5301_v13, %v574_v58  ;;  %v9355_v50 = vpack.i.bf16 %v15823_v60, %v5310_v18 }
 0x19f   :  { %v9308_v59 = vsel %vm194_vm0, %v5305_v38, %v15817_v41  ;;  %v578_v45 = vsel %vm194_vm0, %v5311_v20, %v15819_v22  ;;  %v5752_v22 = vpack.i.bf16 %v15799_v7, %v5300_v52  ;;  %5733 = vrot.lane.b32.xlu0 %v5732_v11, %s7248_s21  ;;  %15825 = vst [vmem:[#allocation78_spill] sm:$0xff] %v9339_v21  ;;  %v15828_v11 = vld [vmem:[#allocation36_spill] sm:$0xff]  ;;  %v15831_v12 = vld [vmem:[#allocation42_spill] sm:$0xff]  ;;  %v15832_v21 = vld [vmem:[#allocation45_spill] sm:$0xff] }
 0x1a0   :  { %v9333_v1 = vsel %vm194_vm0, %v5310_v18, %v15824_v16  ;;  %v9343_v41 = vpack.i.bf16 %v5306_v57, %v576_v51  ;;  %v5767_v52 = vpack.i.bf16 %v15809_v3, %v5305_v38  ;;  %v9349_v16 = vsel %vm9295_vm7, %v182_v29, %v9144_v43  ;;  %5748 = vrot.lane.b32.xlu1 %v5747_v46, %s7248_s21  ;;  %v15827_v29 = vld [vmem:[#allocation28_spill] sm:$0xff]  ;;  %v15830_v57 = vld [vmem:[#allocation39_spill] sm:$0xff] }
 0x1a1   :  { %v9352_v4 = vpack.i.bf16 %v5311_v20, %v578_v45  ;;  %v9360_v58 = vsel %vm9317_vm8, %v183_v35, %v9209_v49  ;;  %v9362_v51 = vpop.permute.xlu0 %5448  ;;  %v9364_v38 = vpop.permute.xlu1 %5473  ;;  %v5762_v13 = vpack.i.bf16 %v9308_v59, %v15811_v42  ;;  %v5315_v46 = vunpack.i.l.bf16 %v8632_v31 }
 0x1a2   :  { %v5321_v45 = vunpack.i.h.bf16 %v8638_v2  ;;  %v5777_v0 = vpack.i.bf16 %v9333_v1, %v15826_v8  ;;  %vm186_vm10 = vcmp.gt.s32.totalorder %v9349_v16, 0  ;;  %vm187_vm11 = vcmp.gt.s32.totalorder %v9360_v58, 0  ;;  %v15829_v2 = vld [vmem:[#allocation33_spill] sm:$0xff] }
 0x1a3   :  { %5743 = vrot.lane.b32.xlu0 %v5742_v37, %s7248_s21  ;;  %v5416_v37 = vunpack.i.h.bf16 %v8935_v47  ;;  %v5415_v49 = vunpack.i.l.bf16 %v8935_v47  ;;  %v5406_v20 = vunpack.i.h.bf16 %v9008_v23  ;;  %v5405_v43 = vunpack.i.l.bf16 %v9008_v23 }
 0x1a4   :  { %5758 = vrot.lane.b32.xlu1 %v5757_v39, %s7248_s21  ;;  %v5421_v1 = vunpack.i.h.bf16 %v9010_v53  ;;  %v5420_v47 = vunpack.i.l.bf16 %v9010_v53  ;;  %v5411_v59 = vunpack.i.h.bf16 %v9080_v6  ;;  %v5410_v23 = vunpack.i.l.bf16 %v9080_v6 }
 0x1a5   :  { %v9389_v18 = vpop.permute.xlu0 %5463  ;;  %v9391_v35 = vpop.permute.xlu1 %5478  ;;  %v1165_v42 = vsel %vm1159_vm9, %v5416_v37, %v5320_v33  ;;  %v1164_v53 = vsel %vm1159_vm9, %v5415_v49, %v5416_v37  ;;  %v1160_v3 = vsel %vm1159_vm9, %v5405_v43, %v5406_v20  ;;  %v1161_v8 = vsel %vm1159_vm9, %v5406_v20, %v5315_v46  ;;  %v7155_v46 = vld [vmem:[%s14639_s0 + $0x8] sm:$0xff] }
 0x1a6   :  { %v1167_v39 = vsel %vm1159_vm9, %v5420_v47, %v5421_v1  ;;  %v5436_v33 = vunpack.i.h.bf16 %v9082_v25  ;;  %v5435_v49 = vunpack.i.l.bf16 %v9082_v25  ;;  %v15834_v25 = vld [vmem:[#allocation87_spill] sm:$0xff]  ;;  %v1417_v6 = vsel %vm187_vm11, %v1161_v8, %v7155_v46 }
 0x1a7   :  { %5753 = vrot.lane.b32.xlu0 %v5752_v22, %s7248_s21  ;;  %v1420_v1 = vsel %vm186_vm10, %v1164_v53, %v15834_v25  ;;  %v7156_v53 = vld [vmem:[%s14639_s0 + $0x38] sm:$0xff]  ;;  %v15837_v43 = vunpack.i.h.bf16 %v8632_v31  ;;  %v1163_v8 = vsel %vm1159_vm9, %v5410_v23, %v5411_v59  ;;  %v5441_v59 = vunpack.i.h.bf16 %v9170_v44  ;;  %v15844_v31 = vld [vmem:[#allocation51_spill] sm:$0xff] }
 0x1a8   :  { %5768 = vrot.lane.b32.xlu1 %v5767_v52, %s7248_s21  ;;  %v1166_v52 = vsel %vm1159_vm9, %v5321_v45, %v5420_v47  ;;  %v7154_v45 = vld [vmem:[%s14639_s0 + $0x28] sm:$0xff]  ;;  %v7157_v44 = vld [vmem:[%s14639_s0 + $0x18] sm:$0xff]  ;;  %vm189_vm12 = vcmp.lt.s32.totalorder %v9360_v58, 13  ;;  %vm188_vm14 = vcmp.lt.s32.totalorder %v9349_v16, 13 }
 0x1a9   :  { %v9411_v27 = vpop.permute.xlu0 %5468  ;;  %v9413_v22 = vpop.permute.xlu1 %5493  ;;  %v1421_v20 = vsel %vm187_vm11, %v1165_v42, %v7154_v45  ;;  %v15835_v47 = vld [vmem:[#allocation83_spill] sm:$0xff]  ;;  %v1162_v7 = vsel %vm1159_vm9, %v15837_v43, %v5410_v23  ;;  %v9483_v43 = vmax.f32 %v15834_v25, %v1420_v1 }
 0x1aa   :  { %v1416_v24 = vsel %vm186_vm10, %v1160_v3, %v15835_v47  ;;  %v1423_v3 = vsel %vm187_vm11, %v1167_v39, %v7156_v53  ;;  %v1418_v1 = vsel %vm186_vm10, %v1162_v7, %v15844_v31 }
 0x1ab   :  { %5763 = vrot.lane.b32.xlu0 %v5762_v13, %s7248_s21  ;;  %15838 = vst [vmem:[#allocation28_spill] sm:$0xff] %v9483_v43  ;;  %v9489_v23 = vmax.f32 %v15835_v47, %v1416_v24  ;;  %v9498_v15 = vmax.f32 %v7156_v53, %v1423_v3  ;;  %v1419_v24 = vsel %vm187_vm11, %v1163_v8, %v7157_v44  ;;  %v15849_v53 = vunpack.i.h.bf16 %v8654_v9 }
 0x1ac   :  { %5778 = vrot.lane.b32.xlu1 %v5777_v0, %s7248_s21  ;;  %v15836_v0 = vld [vmem:[#allocation86_spill] sm:$0xff]  ;;  %v5431_v8 = vunpack.i.h.bf16 %v9249_v30 }
 0x1ad   :  { %v9433_v37 = vpop.permute.xlu0 %5483  ;;  %v9435_v13 = vpop.permute.xlu1 %5498  ;;  %v1422_v42 = vsel %vm186_vm10, %v1166_v52, %v15836_v0  ;;  %v5426_v52 = vunpack.i.h.bf16 %v9168_v63  ;;  %15840 = vst [vmem:[#allocation33_spill] sm:$0xff] %v9489_v23  ;;  %15843 = vst [vmem:[#allocation45_spill] sm:$0xff] %v9498_v15  ;;  %v1174_v3 = vsel %vm1159_vm9, %v15849_v53, %v5440_v40  ;;  %v15857_v23 = vld [vmem:[#allocation7_spill] sm:$0xff] }
 0x1ae   :  { %v9492_v63 = vmax.f32 %v15836_v0, %v1422_v42 }
 0x1af   :  { %5773 = vrot.lane.b32.xlu0 %v9343_v41, %s7248_s21  ;;  %v1172_v41 = vsel %vm1159_vm9, %v5435_v49, %v5436_v33  ;;  %v9496_v49 = vmax.f32 %v7155_v46, %v1417_v6  ;;  %v15847_v6 = vld [vmem:[#allocation3_spill] sm:$0xff]  ;;  %v1168_v42 = vsel %vm1159_vm9, %v5425_v54, %v5426_v52  ;;  %v5456_v54 = vunpack.i.h.bf16 %v9251_v19 }
 0x1b0   :  { %5788 = vrot.lane.b32.xlu1 %v9352_v4, %s7248_s21  ;;  %v9486_v4 = vmax.f32 %v7154_v45, %v1421_v20  ;;  %15841 = vst [vmem:[#allocation39_spill] sm:$0xff] %v9492_v63  ;;  %v15845_v45 = vunpack.i.l.bf16 %v8654_v9  ;;  %v15848_v7 = vpack.i.bf16 %v15847_v6, %v15844_v31  ;;  %v1175_v6 = vsel %vm1159_vm9, %v5440_v40, %v5441_v59  ;;  %v15852_v40 = vld [vmem:[#allocation2_spill] sm:$0xff] }
 0x1b1   :  { %v9477_v60 = vpop.permute.xlu0 %5488  ;;  %v9479_v39 = vpop.permute.xlu1 %5513  ;;  %15842 = vst [vmem:[#allocation42_spill] sm:$0xff] %v9496_v49  ;;  %v5455_v9 = vunpack.i.l.bf16 %v9251_v19  ;;  %v5446_v63 = vunpack.i.h.bf16 %v9300_v61  ;;  %v15853_v59 = vpack.i.bf16 %v15852_v40, %v15835_v47  ;;  %v7159_v47 = vld [vmem:[%s14639_s0 + $0x48] sm:$0xff]  ;;  %v15859_v40 = vunpack.i.h.bf16 %v8640_v34 }
 0x1b2   :  { %15839 = vst [vmem:[#allocation36_spill] sm:$0xff] %v9486_v4  ;;  %v1173_v20 = vsel %vm1159_vm9, %v5436_v33, %v15845_v45  ;;  %v5430_v33 = vunpack.i.l.bf16 %v9249_v30  ;;  %v7158_v30 = vld [vmem:[%s14639_s0 + $0x68] sm:$0xff] }
 0x1b3   :  { %5783 = vrot.lane.b32.xlu0 %v9355_v50, %s7248_s21  ;;  %v15846_v50 = vld [vmem:[#allocation89_spill] sm:$0xff]  ;;  %s7250_s21 = smov 127   ;;  %v1429_v53 = vsel %vm187_vm11, %v1173_v20, %v7158_v30 }
 0x1b4   :  { %v1428_v46 = vsel %vm186_vm10, %v1172_v41, %v15846_v50  ;;  %5798 = vrot.lane.b32.xlu1 %v15848_v7, %s7250_s21  ;;  %v15850_v41 = vunpack.i.l.bf16 %v8640_v34  ;;  %v9535_v7 = vmax.f32 %v15844_v31, %v1418_v1  ;;  %v15855_v31 = vld [vmem:[#allocation85_spill] sm:$0xff]  ;;  %v9586_v15 = vmax.f32 %v7158_v30, %v1429_v53 }
 0x1b5   :  { %v9524_v45 = vpop.permute.xlu0 %5503  ;;  %v9526_v43 = vpop.permute.xlu1 %5518  ;;  %v9549_v19 = vmax.f32 %v15846_v50, %v1428_v46  ;;  %v1424_v1 = vsel %vm186_vm10, %v1168_v42, %v15855_v31  ;;  %v7160_v42 = vld [vmem:[%s14639_s0 + $0x78] sm:$0xff] }
 0x1b6   :  { %v1169_v4 = vsel %vm1159_vm9, %v5426_v52, %v15850_v41  ;;  %15851 = vst [vmem:[#allocation87_spill] sm:$0xff] %v9535_v7  ;;  %v5445_v52 = vunpack.i.l.bf16 %v9300_v61  ;;  %v15856_v41 = vld [vmem:[#allocation88_spill] sm:$0xff]  ;;  %v15858_v61 = vpack.i.bf16 %v15857_v23, %v15836_v0  ;;  %v9561_v7 = vmax.f32 %v7157_v44, %v1419_v24  ;;  %15861 = vst [vmem:[#allocation86_spill] sm:$0xff] %v9586_v15  ;;  %v7161_v30 = vld [vmem:[%s14639_s0 + $0x58] sm:$0xff] }
 0x1b7   :  { %5793 = vrot.lane.b32.xlu0 %v15853_v59, %s7250_s21  ;;  %15854 = vst [vmem:[#allocation83_spill] sm:$0xff] %v9549_v19  ;;  %v1430_v20 = vsel %vm186_vm10, %v1174_v3, %v15856_v41  ;;  %v1425_v46 = vsel %vm187_vm11, %v1169_v4, %v7159_v47  ;;  %v1431_v3 = vsel %vm187_vm11, %v1175_v6, %v7160_v42  ;;  %v15860_v59 = vunpack.i.l.bf16 %v15828_v11 }
 0x1b8   :  { %5808 = vrot.lane.b32.xlu1 %v15858_v61, %s7250_s21  ;;  %v1170_v0 = vsel %vm1159_vm9, %v15859_v40, %v5430_v33  ;;  %v1171_v23 = vsel %vm1159_vm9, %v5430_v33, %v5431_v8  ;;  %v1180_v61 = vsel %vm1159_vm9, %v5455_v9, %v5456_v54  ;;  %v5460_v19 = vunpack.i.l.bf16 %v9302_v48  ;;  %v15864_v40 = vld [vmem:[#allocation6_spill] sm:$0xff] }
 0x1b9   :  { %v9577_v44 = vpop.permute.xlu0 %5508  ;;  %v9579_v24 = vpop.permute.xlu1 %5533  ;;  %v1181_v4 = vsel %vm1159_vm9, %v5456_v54, %v15860_v59  ;;  %v9589_v34 = vmax.f32 %v15855_v31, %v1424_v1  ;;  %v9592_v6 = vmax.f32 %v15856_v41, %v1430_v20  ;;  %v1176_v8 = vsel %vm1159_vm9, %v5445_v52, %v5446_v63  ;;  %v15866_v54 = vld [vmem:[#allocation84_spill] sm:$0xff]  ;;  %v15867_v52 = vld [vmem:[#allocation5_spill] sm:$0xff] }
 0x1ba   :  { %v5450_v33 = vunpack.i.l.bf16 %v9362_v51  ;;  %v15865_v59 = vpack.i.bf16 %v15864_v40, %v15834_v25  ;;  %v1426_v9 = vsel %vm186_vm10, %v1170_v0, %v15866_v54  ;;  %v1427_v53 = vsel %vm187_vm11, %v1171_v23, %v7161_v30  ;;  %v7162_v0 = vld [vmem:[%s14639_s0 + $0xa8] sm:$0xff] }
 0x1bb   :  { %15862 = vst [vmem:[#allocation51_spill] sm:$0xff] %v9589_v34  ;;  %15863 = vst [vmem:[#allocation89_spill] sm:$0xff] %v9592_v6  ;;  %v15868_v1 = vpack.i.bf16 %v15867_v52, %v15866_v54  ;;  %v9612_v20 = vmax.f32 %v7159_v47, %v1425_v46  ;;  %v9614_v25 = vmax.f32 %v7160_v42, %v1431_v3  ;;  %v5461_v15 = vunpack.i.h.bf16 %v9302_v48  ;;  %v15873_v3 = vld [vmem:[#allocation91_spill] sm:$0xff] }
 0x1bc   :  { %5803 = vrot.lane.b32.xlu0 %v15865_v59, %s7250_s21  ;;  %v1437_v40 = vsel %vm187_vm11, %v1181_v4, %v7162_v0  ;;  %v15871_v59 = vld [vmem:[#allocation60_spill] sm:$0xff]  ;;  %v5451_v52 = vunpack.i.h.bf16 %v9362_v51  ;;  %v15872_v46 = vunpack.i.l.bf16 %v15827_v29  ;;  %v1432_v4 = vsel %vm186_vm10, %v1176_v8, %v15873_v3 }
 0x1bd   :  { %5818 = vrot.lane.b32.xlu1 %v15868_v1, %s7250_s21  ;;  %15869 = vst [vmem:[#allocation3_spill] sm:$0xff] %v9612_v20  ;;  %15870 = vst [vmem:[#allocation2_spill] sm:$0xff] %v9614_v25  ;;  %v1436_v23 = vsel %vm186_vm10, %v1180_v61, %v15871_v59  ;;  %v9626_v1 = vpop.permute.xlu0 %5523  ;;  %v9628_v47 = vpop.permute.xlu1 %5538  ;;  %v15874_v6 = vunpack.i.h.bf16 %v15828_v11  ;;  %v5476_v48 = vunpack.i.h.bf16 %v9364_v38  ;;  %v15875_v51 = vunpack.i.h.bf16 %v15827_v29 }
 0x1be   :  { %v1177_v42 = vsel %vm1159_vm9, %v5446_v63, %v15872_v46  ;;  %v5475_v25 = vunpack.i.l.bf16 %v9364_v38  ;;  %v5466_v20 = vunpack.i.h.bf16 %v9389_v18  ;;  %v5465_v63 = vunpack.i.l.bf16 %v9389_v18  ;;  %v15876_v46 = vld [vmem:[#allocation4_spill] sm:$0xff]  ;;  %v7163_v18 = vld [vmem:[%s14639_s0 + $0x88] sm:$0xff] }
 0x1bf   :  { %v1182_v61 = vsel %vm1159_vm9, %v15874_v6, %v5460_v19  ;;  %v1178_v34 = vsel %vm1159_vm9, %v15875_v51, %v5450_v33  ;;  %v15877_v8 = vpack.i.bf16 %v15876_v46, %v15855_v31  ;;  %v9651_v11 = vmax.f32 %v15866_v54, %v1426_v9  ;;  %v15880_v51 = vld [vmem:[#allocation9_spill] sm:$0xff] }
 0x1c0   :  { %v9654_v6 = vmax.f32 %v15871_v59, %v1436_v23  ;;  %v5480_v29 = vunpack.i.l.bf16 %v9391_v35  ;;  %v15881_v38 = vpack.i.bf16 %v15880_v51, %v15856_v41  ;;  %v9661_v49 = vmax.f32 %v7161_v30, %v1427_v53  ;;  %v15885_v30 = vld [vmem:[#allocation57_spill] sm:$0xff]  ;;  %v15886_v51 = vld [vmem:[#allocation90_spill] sm:$0xff] }
 0x1c1   :  { %5813 = vrot.lane.b32.xlu0 %v15877_v8, %s7250_s21  ;;  %15878 = vst [vmem:[#allocation85_spill] sm:$0xff] %v9651_v11  ;;  %v1433_v31 = vsel %vm187_vm11, %v1177_v42, %v7163_v18  ;;  %v1183_v54 = vsel %vm1159_vm9, %v5460_v19, %v5461_v15  ;;  %v1179_v9 = vsel %vm1159_vm9, %v5450_v33, %v5451_v52  ;;  %v9670_v23 = vpop.permute.xlu0 %5528  ;;  %v9672_v46 = vpop.permute.xlu1 %5553  ;;  %v15887_v15 = vunpack.i.l.bf16 %v15830_v57 }
 0x1c2   :  { %15879 = vst [vmem:[#allocation88_spill] sm:$0xff] %v9654_v6  ;;  %5828 = vrot.lane.b32.xlu1 %v15881_v38, %s7250_s21  ;;  %15882 = vst [vmem:[#allocation7_spill] sm:$0xff] %v9661_v49  ;;  %v9674_v8 = vmax.f32 %v7162_v0, %v1437_v40  ;;  %v9677_v41 = vmax.f32 %v15873_v3, %v1432_v4  ;;  %v1438_v53 = vsel %vm186_vm10, %v1182_v61, %v15885_v30  ;;  %v15888_v4 = vld [vmem:[#allocation8_spill] sm:$0xff] }
 0x1c3   :  { %v1434_v42 = vsel %vm186_vm10, %v1178_v34, %v15886_v51  ;;  %v1189_v19 = vsel %vm1159_vm9, %v5476_v48, %v15887_v15  ;;  %v1188_v33 = vsel %vm1159_vm9, %v5475_v25, %v5476_v48  ;;  %v1184_v0 = vsel %vm1159_vm9, %v5465_v63, %v5466_v20  ;;  %v7164_v34 = vld [vmem:[%s14639_s0 + $0xb8] sm:$0xff]  ;;  %v15891_v15 = vld [vmem:[#allocation11_spill] sm:$0xff] }
 0x1c4   :  { %15883 = vst [vmem:[#allocation6_spill] sm:$0xff] %v9674_v8  ;;  %15884 = vst [vmem:[#allocation84_spill] sm:$0xff] %v9677_v41  ;;  %v5481_v40 = vunpack.i.h.bf16 %v9391_v35  ;;  %v5470_v52 = vunpack.i.l.bf16 %v9411_v27  ;;  %v15889_v61 = vpack.i.bf16 %v15888_v4, %v15846_v50  ;;  %v1439_v38 = vsel %vm187_vm11, %v1183_v54, %v7164_v34  ;;  %v7165_v25 = vld [vmem:[%s14639_s0 + $0x98] sm:$0xff]  ;;  %v15898_v41 = vld [vmem:[#allocation95_spill] sm:$0xff] }
 0x1c5   :  { %v1435_v35 = vsel %vm187_vm11, %v1179_v9, %v7165_v25  ;;  %v15890_v48 = vunpack.i.h.bf16 %v15830_v57  ;;  %v5471_v50 = vunpack.i.h.bf16 %v9411_v27  ;;  %v15892_v4 = vpack.i.bf16 %v15891_v15, %v15886_v51  ;;  %v9722_v57 = vpop.permute.xlu0 %5543  ;;  %v9729_v27 = vld [vmem:[%s14639_s0 + $0xe8] sm:$0xff] }
 0x1c6   :  { %5823 = vrot.lane.b32.xlu0 %v15889_v61, %s7250_s21  ;;  %v9715_v54 = vmax.f32 %v15885_v30, %v1438_v53  ;;  %v9718_v61 = vmax.f32 %v15886_v51, %v1434_v42  ;;  %v5496_v6 = vunpack.i.h.bf16 %v9413_v22  ;;  %v5495_v9 = vunpack.i.l.bf16 %v9413_v22  ;;  %v15895_v51 = vld [vmem:[#allocation96_spill] sm:$0xff] }
 0x1c7   :  { %v1190_v63 = vsel %vm1159_vm9, %v15890_v48, %v5480_v29  ;;  %5838 = vrot.lane.b32.xlu1 %v15892_v4, %s7250_s21  ;;  %v9724_v48 = vpop.permute.xlu1 %5558  ;;  %v9734_v53 = vsel %vm187_vm11, %v1189_v19, %v9729_v27  ;;  %v1444_v42 = vsel %vm186_vm10, %v1188_v33, %v15895_v51  ;;  %v15896_v22 = vunpack.i.l.bf16 %v15829_v2  ;;  %v15897_v4 = vld [vmem:[#allocation94_spill] sm:$0xff] }
 0x1c8   :  { %15893 = vst [vmem:[#allocation5_spill] sm:$0xff] %v9715_v54  ;;  %15894 = vst [vmem:[#allocation60_spill] sm:$0xff] %v9718_v61  ;;  %v1440_v8 = vsel %vm186_vm10, %v1184_v0, %v15897_v4  ;;  %v1191_v54 = vsel %vm1159_vm9, %v5480_v29, %v5481_v40  ;;  %v1446_v61 = vsel %vm186_vm10, %v1190_v63, %v15898_v41  ;;  %v15899_v19 = vunpack.i.h.bf16 %v15829_v2  ;;  %v15900_v33 = vld [vmem:[#allocation10_spill] sm:$0xff]  ;;  %v15902_v63 = vld [vmem:[#allocation13_spill] sm:$0xff] }
 0x1c9   :  { %v1185_v15 = vsel %vm1159_vm9, %v5466_v20, %v15896_v22  ;;  %v15901_v49 = vpack.i.bf16 %v15900_v33, %v15873_v3  ;;  %v9756_v20 = vmax.f32 %v7165_v25, %v1435_v35  ;;  %v1187_v22 = vsel %vm1159_vm9, %v5470_v52, %v5471_v50  ;;  %v9778_v25 = vpop.permute.xlu0 %5548 }
 0x1ca   :  { %v1186_v11 = vsel %vm1159_vm9, %v15899_v19, %v5470_v52  ;;  %v5486_v0 = vunpack.i.h.bf16 %v9433_v37  ;;  %v5485_v29 = vunpack.i.l.bf16 %v9433_v37  ;;  %v5500_v40 = vunpack.i.l.bf16 %v9435_v13 }
 0x1cb   :  { %5833 = vrot.lane.b32.xlu0 %v15901_v49, %s7250_s21  ;;  %v15903_v2 = vpack.i.bf16 %v15902_v63, %v15885_v30  ;;  %v9767_v19 = vmax.f32 %v15895_v51, %v1444_v42  ;;  %v7167_v49 = vld [vmem:[%s14639_s0 + $0xc8] sm:$0xff]  ;;  %v9775_v52 = vmax.f32 %v15897_v4, %v1440_v8  ;;  %v1196_v37 = vsel %vm1159_vm9, %v5495_v9, %v5496_v6  ;;  %v9780_v35 = vpop.permute.xlu1 %5573  ;;  %v9785_v30 = vld [vmem:[%s14639_s0 + $0xf8] sm:$0xff] }
 0x1cc   :  { %v1441_v3 = vsel %vm187_vm11, %v1185_v15, %v7167_v49  ;;  %v9790_v50 = vsel %vm187_vm11, %v1191_v54, %v9785_v30  ;;  %v9793_v42 = vmax.f32 %v15898_v41, %v1446_v61  ;;  %v9795_v8 = vmax.f32 %v7163_v18, %v1433_v31  ;;  %v15908_v15 = vld [vmem:[#allocation93_spill] sm:$0xff]  ;;  %v15910_v31 = vld [vmem:[#allocation12_spill] sm:$0xff] }
 0x1cd   :  { %5848 = vrot.lane.b32.xlu1 %v15903_v2, %s7250_s21  ;;  %15904 = vst [vmem:[#allocation91_spill] sm:$0xff] %v9767_v19  ;;  %15905 = vst [vmem:[#allocation4_spill] sm:$0xff] %v9775_v52  ;;  %v9797_v9 = vmax.f32 %v7164_v34, %v1439_v38  ;;  %v1442_v33 = vsel %vm186_vm10, %v1186_v11, %v15908_v15  ;;  %v7169_v63 = vld [vmem:[%s14639_s0 + $0xd8] sm:$0xff]  ;;  %v15909_v54 = vunpack.i.l.bf16 %v8692_v32  ;;  %v5501_v18 = vunpack.i.h.bf16 %v9435_v13 }
 0x1ce   :  { %15906 = vst [vmem:[#allocation9_spill] sm:$0xff] %v9793_v42  ;;  %v1443_v2 = vsel %vm187_vm11, %v1187_v22, %v7169_v63  ;;  %v15911_v34 = vpack.i.bf16 %v15910_v31, %v15871_v59  ;;  %v1452_v11 = vsel %vm186_vm10, %v1196_v37, %v8897_v10  ;;  %v1192_v38 = vsel %vm1159_vm9, %v5485_v29, %v5486_v0  ;;  %v9831_v29 = vpop.permute.xlu0 %5563 }
 0x1cf   :  { %15907 = vst [vmem:[#allocation57_spill] sm:$0xff] %v9797_v9  ;;  %v1197_v61 = vsel %vm1159_vm9, %v5496_v6, %v15909_v54  ;;  %v15912_v19 = vunpack.i.h.bf16 %v8692_v32  ;;  %v5490_v42 = vunpack.i.l.bf16 %v9477_v60  ;;  %v15913_v6 = vld [vmem:[#allocation15_spill] sm:$0xff]  ;;  %v5516_v59 = vunpack.i.h.bf16 %v9479_v39  ;;  %v9833_v32 = vpop.permute.xlu1 %5578 }
 0x1d0   :  { %5843 = vrot.lane.b32.xlu0 %v15911_v34, %s7250_s21  ;;  %v15914_v13 = vpack.i.bf16 %v15913_v6, %v15908_v15  ;;  %v5515_v54 = vunpack.i.l.bf16 %v9479_v39  ;;  %v5506_v31 = vunpack.i.h.bf16 %v9524_v45  ;;  %v5505_v37 = vunpack.i.l.bf16 %v9524_v45  ;;  %v9841_v34 = vld [vmem:[%s14639_s0 + $0x128] sm:$0xff] }
 0x1d1   :  { %v1198_v22 = vsel %vm1159_vm9, %v15912_v19, %v5500_v40  ;;  %v9836_v19 = vmax.f32 %v15908_v15, %v1442_v33  ;;  %v9846_v39 = vsel %vm187_vm11, %v1197_v61, %v9841_v34  ;;  %v15916_v6 = vunpack.i.l.bf16 %v15831_v12  ;;  %v15917_v61 = vld [vmem:[#allocation14_spill] sm:$0xff] }
 0x1d2   :  { %5858 = vrot.lane.b32.xlu1 %v15914_v13, %s7250_s21  ;;  %v5520_v13 = vunpack.i.l.bf16 %v9526_v43  ;;  %v1448_v15 = vsel %vm186_vm10, %v1192_v38, %v8881_v26  ;;  %v1199_v33 = vsel %vm1159_vm9, %v5500_v40, %v5501_v18  ;;  %v1454_v52 = vsel %vm186_vm10, %v1198_v22, %v8888_v56  ;;  %v15921_v18 = vld [vmem:[#allocation17_spill] sm:$0xff] }
 0x1d3   :  { %15915 = vst [vmem:[#allocation90_spill] sm:$0xff] %v9836_v19  ;;  %v1193_v45 = vsel %vm1159_vm9, %v5486_v0, %v15916_v6  ;;  %v5491_v19 = vunpack.i.h.bf16 %v9477_v60  ;;  %v15918_v9 = vpack.i.bf16 %v15917_v61, %v15897_v4  ;;  %v9865_v0 = vmax.f32 %v8897_v10, %v1452_v11  ;;  %v7171_v4 = vld [vmem:[%s14639_s0 + $0x108] sm:$0xff]  ;;  %v9884_v61 = vpop.permute.xlu0 %5568 }
 0x1d4   :  { %v15920_v6 = vunpack.i.h.bf16 %v15831_v12  ;;  %v5521_v40 = vunpack.i.h.bf16 %v9526_v43  ;;  %v15922_v22 = vpack.i.bf16 %v15921_v18, %v15898_v41  ;;  %v9875_v60 = vmax.f32 %v7169_v63, %v1443_v2  ;;  %v9886_v43 = vpop.permute.xlu1 %5588  ;;  %v7172_v63 = vld [vmem:[%s14639_s0 + $0x138] sm:$0xff] }
 0x1d5   :  { %5853 = vrot.lane.b32.xlu0 %v15918_v9, %s7250_s21  ;;  %15919 = vst [vmem:[#allocation8_spill] sm:$0xff] %v9865_v0  ;;  %v1449_v9 = vsel %vm187_vm11, %v1193_v45, %v7171_v4  ;;  %v1204_v12 = vsel %vm1159_vm9, %v5515_v54, %v5516_v59  ;;  %v1200_v11 = vsel %vm1159_vm9, %v5505_v37, %v5506_v31  ;;  %v15925_v37 = vunpack.i.h.bf16 %v8720_v17 }
 0x1d6   :  { %v1194_v38 = vsel %vm1159_vm9, %v15920_v6, %v5490_v42  ;;  %5868 = vrot.lane.b32.xlu1 %v15922_v22, %s7250_s21  ;;  %v9888_v6 = vmax.f32 %v7167_v49, %v1441_v3  ;;  %v9891_v41 = vmax.f32 %v8881_v26, %v1448_v15  ;;  %v1455_v2 = vsel %vm187_vm11, %v1199_v33, %v7172_v63 }
 0x1d7   :  { %v9899_v54 = vmax.f32 %v8888_v56, %v1454_v52  ;;  %v1206_v45 = vsel %vm1159_vm9, %v15925_v37, %v5520_v13  ;;  %v1195_v49 = vsel %vm1159_vm9, %v5490_v42, %v5491_v19  ;;  %v1450_v3 = vsel %vm186_vm10, %v1194_v38, %v8860_v28  ;;  %v15928_v52 = vld [vmem:[#allocation16_spill] sm:$0xff]  ;;  %v15930_v38 = vld [vmem:[#allocation19_spill] sm:$0xff] }
 0x1d8   :  { %15923 = vst [vmem:[#allocation11_spill] sm:$0xff] %v9891_v41  ;;  %v15926_v15 = vunpack.i.l.bf16 %v8720_v17  ;;  %v15927_v22 = vunpack.i.l.bf16 %v15832_v21  ;;  %v15929_v0 = vpack.i.bf16 %v15928_v52, %v15895_v51  ;;  %v1460_v42 = vsel %vm186_vm10, %v1204_v12, %v8928_v55  ;;  %v15932_v37 = vld [vmem:[#allocation100_spill] sm:$0xff] }
 0x1d9   :  { %15924 = vst [vmem:[#allocation96_spill] sm:$0xff] %v9899_v54  ;;  %v1456_v19 = vsel %vm186_vm10, %v1200_v11, %v8911_v14  ;;  %v1207_v17 = vsel %vm1159_vm9, %v5520_v13, %v5521_v40  ;;  %v1462_v51 = vsel %vm186_vm10, %v1206_v45, %v15932_v37  ;;  %v5536_v12 = vunpack.i.h.bf16 %v9579_v24  ;;  %v9936_v11 = vpop.permute.xlu0 %5583  ;;  %v9938_v13 = vpop.permute.xlu1 %5598  ;;  %v7173_v40 = vld [vmem:[%s14639_s0 + $0x118] sm:$0xff] }
 0x1da   :  { %v1205_v18 = vsel %vm1159_vm9, %v5516_v59, %v15926_v15  ;;  %v1201_v33 = vsel %vm1159_vm9, %v5506_v31, %v15927_v22  ;;  %5863 = vrot.lane.b32.xlu0 %v15929_v0, %s7250_s21  ;;  %v5510_v59 = vunpack.i.l.bf16 %v9577_v44  ;;  %v15931_v31 = vpack.i.bf16 %v15930_v38, %v8860_v28 }
 0x1db   :  { %v5511_v0 = vunpack.i.h.bf16 %v9577_v44  ;;  %v5535_v15 = vunpack.i.l.bf16 %v9579_v24  ;;  %v1451_v22 = vsel %vm187_vm11, %v1195_v49, %v7173_v40  ;;  %v9946_v52 = vmax.f32 %v8860_v28, %v1450_v3  ;;  %v9953_v24 = vld [vmem:[%s14639_s0 + $0x168] sm:$0xff]  ;;  %v15935_v49 = vld [vmem:[#allocation18_spill] sm:$0xff] }
 0x1dc   :  { %5878 = vrot.lane.b32.xlu1 %v15931_v31, %s7250_s21  ;;  %v5526_v44 = vunpack.i.h.bf16 %v9626_v1  ;;  %v5525_v45 = vunpack.i.l.bf16 %v9626_v1  ;;  %v9958_v38 = vsel %vm187_vm11, %v1205_v18, %v9953_v24  ;;  %v9961_v31 = vmax.f32 %v8928_v55, %v1460_v42  ;;  %v7175_v28 = vld [vmem:[%s14639_s0 + $0x148] sm:$0xff]  ;;  %v9982_v42 = vld [vmem:[%s14639_s0 + $0x178] sm:$0xff] }
 0x1dd   :  { %15933 = vst [vmem:[#allocation94_spill] sm:$0xff] %v9946_v52  ;;  %v1457_v1 = vsel %vm187_vm11, %v1201_v33, %v7175_v28  ;;  %v15936_v3 = vpack.i.bf16 %v15935_v49, %v8881_v26  ;;  %v9974_v54 = vmax.f32 %v9785_v30, %v9790_v50  ;;  %v9977_v18 = vmax.f32 %v8911_v14, %v1456_v19  ;;  %v15940_v50 = vld [vmem:[#allocation21_spill] sm:$0xff]  ;;  %v10003_v41 = vpop.permute.xlu0 %5593 }
 0x1de   :  { %15934 = vst [vmem:[#allocation95_spill] sm:$0xff] %v9961_v31  ;;  %v9987_v33 = vsel %vm187_vm11, %v1207_v17, %v9982_v42  ;;  %v9990_v26 = vmax.f32 %v15932_v37, %v1462_v51  ;;  %v15939_v49 = vunpack.i.h.bf16 %v15832_v21  ;;  %v15941_v19 = vpack.i.bf16 %v15940_v50, %v8888_v56  ;;  %v10005_v51 = vpop.permute.xlu1 %5608 }
 0x1df   :  { %5873 = vrot.lane.b32.xlu0 %v15936_v3, %s7250_s21  ;;  %15937 = vst [vmem:[#allocation10_spill] sm:$0xff] %v9977_v18  ;;  %v1203_v3 = vsel %vm1159_vm9, %v5510_v59, %v5511_v0  ;;  %v1212_v31 = vsel %vm1159_vm9, %v5535_v15, %v5536_v12  ;;  %v5540_v18 = vunpack.i.l.bf16 %v9628_v47  ;;  %v5530_v17 = vunpack.i.l.bf16 %v9670_v23 }
 0x1e0   :  { %15938 = vst [vmem:[#allocation13_spill] sm:$0xff] %v9990_v26  ;;  %v1202_v30 = vsel %vm1159_vm9, %v15939_v49, %v5510_v59  ;;  %5888 = vrot.lane.b32.xlu1 %v15941_v19, %s7250_s21  ;;  %v1208_v21 = vsel %vm1159_vm9, %v5525_v45, %v5526_v44  ;;  %v10010_v49 = vmax.f32 %v9729_v27, %v9734_v53  ;;  %v15944_v59 = vld [vmem:[#allocation99_spill] sm:$0xff]  ;;  %v15945_v15 = vunpack.i.l.bf16 %v8795_v62  ;;  %v15946_v26 = vld [vmem:[#allocation20_spill] sm:$0xff]  ;;  %v7177_v53 = vld [vmem:[%s14639_s0 + $0x158] sm:$0xff] }
 0x1e1   :  { %v10012_v56 = vmax.f32 %v7173_v40, %v1451_v22  ;;  %v10014_v50 = vmax.f32 %v7171_v4, %v1449_v9  ;;  %v1458_v0 = vsel %vm186_vm10, %v1202_v30, %v15944_v59  ;;  %v15947_v45 = vpack.i.bf16 %v15946_v26, %v8897_v10  ;;  %v15950_v9 = vld [vmem:[#allocation104_spill] sm:$0xff]  ;;  %v15954_v40 = vld [vmem:[#allocation102_spill] sm:$0xff] }
 0x1e2   :  { %v1213_v19 = vsel %vm1159_vm9, %v5536_v12, %v15945_v15  ;;  %v10026_v52 = vmax.f32 %v7172_v63, %v1455_v2  ;;  %v10030_v27 = vmax.f32 %v9841_v34, %v9846_v39  ;;  %v1459_v4 = vsel %vm187_vm11, %v1203_v3, %v7177_v53  ;;  %v15952_v34 = vld [vmem:[#allocation23_spill] sm:$0xff]  ;;  %v10060_v15 = vpop.permute.xlu1 %5618 }
 0x1e3   :  { %15942 = vst [vmem:[#allocation93_spill] sm:$0xff] %v10012_v56  ;;  %15943 = vst [vmem:[#allocation12_spill] sm:$0xff] %v10014_v50  ;;  %5883 = vrot.lane.b32.xlu0 %v15947_v45, %s7250_s21  ;;  %v1468_v12 = vsel %vm186_vm10, %v1212_v31, %v15950_v9  ;;  %v15951_v10 = vunpack.i.l.bf16 %v8722_v5  ;;  %v5541_v2 = vunpack.i.h.bf16 %v9628_v47  ;;  %v15953_v39 = vpack.i.bf16 %v15952_v34, %v15944_v59  ;;  %v10058_v47 = vpop.permute.xlu0 %5603 }
 0x1e4   :  { %15948 = vst [vmem:[#allocation15_spill] sm:$0xff] %v10026_v52  ;;  %15949 = vst [vmem:[#allocation14_spill] sm:$0xff] %v10030_v27  ;;  %v1464_v22 = vsel %vm186_vm10, %v1208_v21, %v15954_v40  ;;  %v15955_v26 = vunpack.i.h.bf16 %v8795_v62  ;;  %v5531_v31 = vunpack.i.h.bf16 %v9670_v23  ;;  %v15956_v3 = vunpack.i.h.bf16 %v8722_v5  ;;  %v10072_v5 = vld [vmem:[%s14639_s0 + $0x1a8] sm:$0xff]  ;;  %v15967_v27 = vld [vmem:[#allocation101_spill] sm:$0xff] }
 0x1e5   :  { %v1209_v63 = vsel %vm1159_vm9, %v5526_v44, %v15951_v10  ;;  %5898 = vrot.lane.b32.xlu1 %v15953_v39, %s7250_s21  ;;  %v5556_v45 = vunpack.i.h.bf16 %v9672_v46  ;;  %v5555_v10 = vunpack.i.l.bf16 %v9672_v46  ;;  %v5546_v21 = vunpack.i.h.bf16 %v9722_v57 }
 0x1e6   :  { %v1214_v30 = vsel %vm1159_vm9, %v15955_v26, %v5540_v18  ;;  %v1210_v44 = vsel %vm1159_vm9, %v15956_v3, %v5530_v17  ;;  %v5545_v62 = vunpack.i.l.bf16 %v9722_v57  ;;  %v10067_v34 = vmax.f32 %v15944_v59, %v1458_v0  ;;  %v15959_v57 = vld [vmem:[#allocation22_spill] sm:$0xff]  ;;  %v10090_v0 = vld [vmem:[%s14639_s0 + $0x188] sm:$0xff]  ;;  %v15961_v26 = vld [vmem:[#allocation25_spill] sm:$0xff] }
 0x1e7   :  { %v10077_v23 = vsel %vm187_vm11, %v1213_v19, %v10072_v5  ;;  %v10080_v39 = vmax.f32 %v15950_v9, %v1468_v12  ;;  %v5560_v46 = vunpack.i.l.bf16 %v9724_v48  ;;  %v15960_v59 = vpack.i.bf16 %v15959_v57, %v8911_v14 }
 0x1e8   :  { %15957 = vst [vmem:[#allocation17_spill] sm:$0xff] %v10067_v34  ;;  %v10095_v19 = vsel %vm187_vm11, %v1209_v63, %v10090_v0  ;;  %v1215_v12 = vsel %vm1159_vm9, %v5540_v18, %v5541_v2  ;;  %v15962_v3 = vpack.i.bf16 %v15961_v26, %v15932_v37  ;;  %v10104_v14 = vmax.f32 %v7175_v28, %v1457_v1  ;;  %v10116_v2 = vpop.permute.xlu0 %5613  ;;  %v10118_v37 = vpop.permute.xlu1 %5628 }
 0x1e9   :  { %15958 = vst [vmem:[#allocation16_spill] sm:$0xff] %v10080_v39  ;;  %5893 = vrot.lane.b32.xlu0 %v15960_v59, %s7250_s21  ;;  %v10102_v39 = vmax.f32 %v7177_v53, %v1459_v4  ;;  %v10107_v57 = vmax.f32 %v15954_v40, %v1464_v22  ;;  %v15966_v59 = vld [vmem:[#allocation103_spill] sm:$0xff]  ;;  %v1211_v63 = vsel %vm1159_vm9, %v5530_v17, %v5531_v31  ;;  %v5561_v53 = vunpack.i.h.bf16 %v9724_v48  ;;  %v15968_v22 = vld [vmem:[#allocation97_spill] sm:$0xff] }
 0x1ea   :  { %5908 = vrot.lane.b32.xlu1 %v15962_v3, %s7250_s21  ;;  %15964 = vst [vmem:[#allocation100_spill] sm:$0xff] %v10104_v14  ;;  %v1470_v34 = vsel %vm186_vm10, %v1214_v30, %v15966_v59  ;;  %v1466_v18 = vsel %vm186_vm10, %v1210_v44, %v15967_v27  ;;  %v1220_v28 = vsel %vm1159_vm9, %v5555_v10, %v5556_v45  ;;  %v5550_v4 = vunpack.i.l.bf16 %v9778_v25  ;;  %v15971_v10 = vld [vmem:[#allocation24_spill] sm:$0xff]  ;;  %v7180_v48 = vld [vmem:[%s14639_s0 + $0x1b8] sm:$0xff]  ;;  %v15980_v14 = vld [vmem:[#allocation106_spill] sm:$0xff] }
 0x1eb   :  { %15963 = vst [vmem:[#allocation19_spill] sm:$0xff] %v10102_v39  ;;  %15965 = vst [vmem:[#allocation18_spill] sm:$0xff] %v10107_v57  ;;  %v1216_v1 = vsel %vm1159_vm9, %v5545_v62, %v5546_v21  ;;  %v15969_v30 = vunpack.i.l.bf16 %v15968_v22  ;;  %v15970_v31 = vunpack.i.h.bf16 %v15968_v22  ;;  %v5576_v26 = vunpack.i.h.bf16 %v9780_v35 }
 0x1ec   :  { %v5575_v3 = vunpack.i.l.bf16 %v9780_v35  ;;  %v15972_v62 = vpack.i.bf16 %v15971_v10, %v8928_v55  ;;  %v10142_v22 = vmax.f32 %v15966_v59, %v1470_v34  ;;  %v10150_v55 = vmax.f32 %v15967_v27, %v1466_v18  ;;  %v10168_v39 = vpop.permute.xlu1 %5638 }
 0x1ed   :  { %v1221_v17 = vsel %vm1159_vm9, %v5556_v45, %v15969_v30  ;;  %v1222_v44 = vsel %vm1159_vm9, %v15970_v31, %v5560_v46  ;;  %v1471_v45 = vsel %vm187_vm11, %v1215_v12, %v7180_v48  ;;  %v7181_v30 = vld [vmem:[%s14639_s0 + $0x198] sm:$0xff]  ;;  %v15975_v31 = vld [vmem:[#allocation27_spill] sm:$0xff]  ;;  %v15978_v12 = vld [vmem:[#allocation92_spill] sm:$0xff]  ;;  %v5551_v18 = vunpack.i.h.bf16 %v9778_v25 }
 0x1ee   :  { %5903 = vrot.lane.b32.xlu0 %v15972_v62, %s7250_s21  ;;  %15973 = vst [vmem:[#allocation21_spill] sm:$0xff] %v10142_v22  ;;  %v1467_v35 = vsel %vm187_vm11, %v1211_v63, %v7181_v30  ;;  %15974 = vst [vmem:[#allocation99_spill] sm:$0xff] %v10150_v55  ;;  %v15976_v10 = vpack.i.bf16 %v15975_v31, %v15967_v27  ;;  %v15977_v62 = vld [vmem:[#allocation108_spill] sm:$0xff]  ;;  %v15979_v22 = vunpack.i.l.bf16 %v15978_v12  ;;  %v10166_v55 = vpop.permute.xlu0 %5623  ;;  %v10173_v27 = vld [vmem:[%s14639_s0 + $0x1e8] sm:$0xff]  ;;  %v5566_v52 = vunpack.i.h.bf16 %v9831_v29 }
 0x1ef   :  { %v1476_v34 = vsel %vm186_vm10, %v1220_v28, %v15977_v62  ;;  %v1472_v63 = vsel %vm186_vm10, %v1216_v1, %v15980_v14  ;;  %v10178_v28 = vsel %vm187_vm11, %v1221_v17, %v10173_v27  ;;  %v15982_v1 = vunpack.i.h.bf16 %v15978_v12  ;;  %v15983_v17 = vld [vmem:[#allocation26_spill] sm:$0xff] }
 0x1f0   :  { %5918 = vrot.lane.b32.xlu1 %v15976_v10, %s7250_s21  ;;  %v1217_v57 = vsel %vm1159_vm9, %v5546_v21, %v15979_v22  ;;  %v1223_v21 = vsel %vm1159_vm9, %v5560_v46, %v5561_v53  ;;  %v15981_v22 = vld [vmem:[#allocation107_spill] sm:$0xff]  ;;  %v1228_v10 = vsel %vm1159_vm9, %v5575_v3, %v5576_v26  ;;  %v5565_v50 = vunpack.i.l.bf16 %v9831_v29  ;;  %v15987_v29 = vld [vmem:[#allocation30_spill] sm:$0xff] }
 0x1f1   :  { %v1478_v25 = vsel %vm186_vm10, %v1222_v44, %v15981_v22  ;;  %v1218_v31 = vsel %vm1159_vm9, %v15982_v1, %v5550_v4  ;;  %v5580_v56 = vunpack.i.l.bf16 %v9833_v32  ;;  %v15984_v46 = vpack.i.bf16 %v15983_v17, %v15954_v40  ;;  %v7183_v44 = vld [vmem:[%s14639_s0 + $0x1c8] sm:$0xff] }
 0x1f2   :  { %v10196_v53 = vmax.f32 %v15977_v62, %v1476_v34  ;;  %v1473_v3 = vsel %vm187_vm11, %v1217_v57, %v7183_v44  ;;  %v10204_v12 = vmax.f32 %v15980_v14, %v1472_v63  ;;  %v15988_v1 = vpack.i.bf16 %v15987_v29, %v15966_v59  ;;  %v10217_v34 = vld [vmem:[%s14639_s0 + $0x1f8] sm:$0xff]  ;;  %v10228_v17 = vpop.permute.xlu0 %5633 }
 0x1f3   :  { %5913 = vrot.lane.b32.xlu0 %v15984_v46, %s7250_s21  ;;  %v10212_v40 = vmax.f32 %v9982_v42, %v9987_v33  ;;  %v10222_v57 = vsel %vm187_vm11, %v1223_v21, %v10217_v34  ;;  %v10225_v63 = vmax.f32 %v15981_v22, %v1478_v25  ;;  %v1219_v59 = vsel %vm1159_vm9, %v5550_v4, %v5551_v18  ;;  %v10230_v46 = vpop.permute.xlu1 %5648  ;;  %v15990_v33 = vld [vmem:[#allocation105_spill] sm:$0xff]  ;;  %v15992_v25 = vld [vmem:[#allocation63_spill] sm:$0xff] }
 0x1f4   :  { %15985 = vst [vmem:[#allocation20_spill] sm:$0xff] %v10196_v53  ;;  %15986 = vst [vmem:[#allocation104_spill] sm:$0xff] %v10204_v12  ;;  %5928 = vrot.lane.b32.xlu1 %v15988_v1, %s7250_s21  ;;  %v10234_v42 = vmax.f32 %v9953_v24, %v9958_v38  ;;  %v1474_v29 = vsel %vm186_vm10, %v1218_v31, %v15990_v33  ;;  %v15991_v21 = vunpack.i.l.bf16 %v8933_v36  ;;  %v5581_v18 = vunpack.i.h.bf16 %v9833_v32  ;;  %v15994_v12 = vld [vmem:[#allocation29_spill] sm:$0xff] }
 0x1f5   :  { %15989 = vst [vmem:[#allocation23_spill] sm:$0xff] %v10225_v63  ;;  %v1484_v4 = vsel %vm186_vm10, %v1228_v10, %v15992_v25  ;;  %v1224_v53 = vsel %vm1159_vm9, %v5565_v50, %v5566_v52  ;;  %v15993_v63 = vunpack.i.h.bf16 %v8933_v36  ;;  %v5571_v38 = vunpack.i.h.bf16 %v9884_v61 }
 0x1f6   :  { %v1229_v1 = vsel %vm1159_vm9, %v5576_v26, %v15991_v21  ;;  %v5570_v31 = vunpack.i.l.bf16 %v9884_v61  ;;  %v15995_v26 = vpack.i.bf16 %v15994_v12, %v15950_v9  ;;  %v15996_v21 = vld [vmem:[#allocation32_spill] sm:$0xff]  ;;  %v10260_v32 = vmax.f32 %v7181_v30, %v1467_v35  ;;  %v7185_v9 = vld [vmem:[%s14639_s0 + $0x1d8] sm:$0xff] }
 0x1f7   :  { %v1230_v24 = vsel %vm1159_vm9, %v15993_v63, %v5580_v56  ;;  %v15997_v10 = vpack.i.bf16 %v15996_v21, %v15990_v33  ;;  %v10264_v36 = vmax.f32 %v10090_v0, %v10095_v19  ;;  %v10266_v50 = vmax.f32 %v7180_v48, %v1471_v45  ;;  %v10283_v0 = vld [vmem:[%s14639_s0 + $0x228] sm:$0xff]  ;;  %v10293_v19 = vpop.permute.xlu0 %5643  ;;  %v10295_v48 = vpop.permute.xlu1 %5658  ;;  %v16001_v45 = vld [vmem:[#allocation98_spill] sm:$0xff] }
 0x1f8   :  { %5923 = vrot.lane.b32.xlu0 %v15995_v26, %s7250_s21  ;;  %v10270_v61 = vmax.f32 %v10072_v5, %v10077_v23  ;;  %v1475_v12 = vsel %vm187_vm11, %v1219_v59, %v7185_v9  ;;  %v10278_v30 = vmax.f32 %v15990_v33, %v1474_v29  ;;  %v10288_v5 = vsel %vm187_vm11, %v1229_v1, %v10283_v0  ;;  %v16003_v59 = vld [vmem:[#allocation110_spill] sm:$0xff]  ;;  %v16004_v26 = vld [vmem:[#allocation111_spill] sm:$0xff] }
 0x1f9   :  { %5938 = vrot.lane.b32.xlu1 %v15997_v10, %s7250_s21  ;;  %v10291_v23 = vmax.f32 %v15992_v25, %v1484_v4  ;;  %v16002_v35 = vunpack.i.l.bf16 %v16001_v45  ;;  %v1480_v33 = vsel %vm186_vm10, %v1224_v53, %v16003_v59  ;;  %v1231_v29 = vsel %vm1159_vm9, %v5580_v56, %v5581_v18 }
 0x1fa   :  { %15998 = vst [vmem:[#allocation102_spill] sm:$0xff] %v10270_v61  ;;  %15999 = vst [vmem:[#allocation22_spill] sm:$0xff] %v10278_v30  ;;  %v1486_v1 = vsel %vm186_vm10, %v1230_v24, %v16004_v26  ;;  %v16005_v4 = vunpack.i.h.bf16 %v16001_v45  ;;  %v1227_v10 = vsel %vm1159_vm9, %v5570_v31, %v5571_v38  ;;  %v5601_v56 = vunpack.i.h.bf16 %v9938_v13  ;;  %v16008_v24 = vld [vmem:[#allocation35_spill] sm:$0xff] }
 0x1fb   :  { %16000 = vst [vmem:[#allocation25_spill] sm:$0xff] %v10291_v23  ;;  %v1225_v63 = vsel %vm1159_vm9, %v5566_v52, %v16002_v35  ;;  %v5586_v23 = vunpack.i.h.bf16 %v9936_v11  ;;  %v5585_v52 = vunpack.i.l.bf16 %v9936_v11  ;;  %v16006_v35 = vld [vmem:[#allocation31_spill] sm:$0xff]  ;;  %v5600_v18 = vunpack.i.l.bf16 %v9938_v13  ;;  %v7188_v13 = vld [vmem:[%s14639_s0 + $0x238] sm:$0xff] }
 0x1fc   :  { %v1226_v21 = vsel %vm1159_vm9, %v16005_v4, %v5570_v31  ;;  %v16007_v53 = vpack.i.bf16 %v16006_v35, %v15980_v14  ;;  %v16009_v45 = vpack.i.bf16 %v16008_v24, %v15981_v22  ;;  %v10323_v4 = vmax.f32 %v7185_v9, %v1475_v12  ;;  %v7187_v11 = vld [vmem:[%s14639_s0 + $0x208] sm:$0xff]  ;;  %v10343_v9 = vpop.permute.xlu1 %5668 }
 0x1fd   :  { %v10325_v38 = vmax.f32 %v7183_v44, %v1473_v3  ;;  %v1481_v14 = vsel %vm187_vm11, %v1225_v63, %v7187_v11  ;;  %v10333_v31 = vmax.f32 %v16003_v59, %v1480_v33  ;;  %v1487_v22 = vsel %vm187_vm11, %v1231_v29, %v7188_v13  ;;  %v10341_v3 = vpop.permute.xlu0 %5653  ;;  %v7189_v63 = vld [vmem:[%s14639_s0 + $0x210] sm:$0xff]  ;;  %v7190_v29 = vld [vmem:[%s14639_s0 + $0x218] sm:$0xff] }
 0x1fe   :  { %5933 = vrot.lane.b32.xlu0 %v16007_v53, %s7250_s21  ;;  %5948 = vrot.lane.b32.xlu1 %v16009_v45, %s7250_s21  ;;  %16010 = vst [vmem:[#allocation103_spill] sm:$0xff] %v10323_v4  ;;  %v5590_v44 = vunpack.i.l.bf16 %v9886_v43  ;;  %v10346_v12 = vmax.f32 %v16004_v26, %v1486_v1  ;;  %v1482_v33 = vsel %vm186_vm10, %v1226_v21, %v7189_v63  ;;  %v5591_v53 = vunpack.i.h.bf16 %v9886_v43 }
 0x1ff   :  { %16011 = vst [vmem:[#allocation101_spill] sm:$0xff] %v10325_v38  ;;  %16012 = vst [vmem:[#allocation97_spill] sm:$0xff] %v10333_v31  ;;  %v1483_v35 = vsel %vm187_vm11, %v1227_v10, %v7190_v29  ;;  %v1232_v24 = vsel %vm1159_vm9, %v5585_v52, %v5586_v23  ;;  %v5596_v45 = vunpack.i.h.bf16 %v10003_v41  ;;  %v16014_v31 = vld [vmem:[#allocation34_spill] sm:$0xff]  ;;  %v1236_v38 = vsel %vm1159_vm9, %v5600_v18, %v5601_v56 }
 0x200   :  { %16013 = vst [vmem:[#allocation24_spill] sm:$0xff] %v10346_v12  ;;  %v1233_v1 = vsel %vm1159_vm9, %v5586_v23, %v5590_v44  ;;  %v5595_v12 = vunpack.i.l.bf16 %v10003_v41  ;;  %v16015_v21 = vpack.i.bf16 %v16014_v31, %v15977_v62  ;;  %v5611_v30 = vunpack.i.h.bf16 %v10005_v51  ;;  %v16016_v52 = vld [vmem:[#allocation38_spill] sm:$0xff]  ;;  %v16017_v23 = vld [vmem:[#allocation109_spill] sm:$0xff]  ;;  %v10380_v62 = vpop.permute.xlu1 %5678 }
 0x201   :  { %v5610_v10 = vunpack.i.l.bf16 %v10005_v51  ;;  %v5605_v43 = vunpack.i.l.bf16 %v10058_v47  ;;  %v16018_v44 = vpack.i.bf16 %v16016_v52, %v16017_v23  ;;  %v10375_v4 = vmax.f32 %v7189_v63, %v1482_v33  ;;  %v10378_v61 = vpop.permute.xlu0 %5663  ;;  %v7191_v31 = vld [vmem:[%s14639_s0 + $0x240] sm:$0xff]  ;;  %v16019_v52 = vld [vmem:[#allocation37_spill] sm:$0xff] }
 0x202   :  { %5943 = vrot.lane.b32.xlu0 %v16015_v21, %s7250_s21  ;;  %v5606_v41 = vunpack.i.h.bf16 %v10058_v47  ;;  %v10384_v18 = vmax.f32 %v10217_v34, %v10222_v57  ;;  %v10388_v51 = vmax.f32 %v10173_v27, %v10178_v28  ;;  %v1488_v63 = vsel %vm186_vm10, %v1232_v24, %v7191_v31  ;;  %v7192_v47 = vld [vmem:[%s14639_s0 + $0x248] sm:$0xff]  ;;  %v7193_v27 = vld [vmem:[%s14639_s0 + $0x260] sm:$0xff] }
 0x203   :  { %5958 = vrot.lane.b32.xlu1 %v16018_v44, %s7250_s21  ;;  %v1489_v33 = vsel %vm187_vm11, %v1233_v1, %v7192_v47  ;;  %v10400_v34 = vmax.f32 %v7190_v29, %v1483_v35  ;;  %v10402_v57 = vmax.f32 %v7187_v11, %v1481_v14  ;;  %v1492_v28 = vsel %vm186_vm10, %v1236_v38, %v7193_v27  ;;  %v16021_v38 = vld [vmem:[#allocation41_spill] sm:$0xff] }
 0x204   :  { %v1234_v24 = vsel %vm1159_vm9, %v5591_v53, %v5595_v12  ;;  %v1235_v21 = vsel %vm1159_vm9, %v5595_v12, %v5596_v45  ;;  %v16020_v23 = vpack.i.bf16 %v16019_v52, %v16003_v59  ;;  %v10415_v29 = vmax.f32 %v7188_v13, %v1487_v22  ;;  %v7195_v44 = vld [vmem:[%s14639_s0 + $0x258] sm:$0xff] }
 0x205   :  { %v1239_v11 = vsel %vm1159_vm9, %v5610_v10, %v5611_v30  ;;  %v1237_v14 = vsel %vm1159_vm9, %v5601_v56, %v5605_v43  ;;  %v5616_v35 = vunpack.i.h.bf16 %v10116_v2  ;;  %v5615_v1 = vunpack.i.l.bf16 %v10116_v2  ;;  %v10430_v30 = vpop.permute.xlu0 %5673  ;;  %v10432_v56 = vpop.permute.xlu1 %5688  ;;  %v7194_v2 = vld [vmem:[%s14639_s0 + $0x250] sm:$0xff] }
 0x206   :  { %5953 = vrot.lane.b32.xlu0 %v16020_v23, %s7250_s21  ;;  %v16022_v53 = vpack.i.bf16 %v16021_v38, %v16004_v26  ;;  %v10425_v12 = vmax.f32 %v7191_v31, %v1488_v63  ;;  %v1238_v59 = vsel %vm1159_vm9, %v5606_v41, %v5610_v10  ;;  %v15048_v13 = vunpack.i.h.bf16 %v10118_v37  ;;  %v7196_v31 = vld [vmem:[%s14639_s0 + $0x278] sm:$0xff] }
 0x207   :  { %v5630_v22 = vunpack.i.l.bf16 %v10118_v37  ;;  %v10434_v45 = vmax.f32 %v7193_v27, %v1492_v28  ;;  %v1490_v26 = vsel %vm186_vm10, %v1234_v24, %v7194_v2  ;;  %v10443_v10 = vmax.f32 %v10283_v0, %v10288_v5  ;;  %v7197_v0 = vld [vmem:[%s14639_s0 + $0x268] sm:$0xff]  ;;  %v7198_v28 = vld [vmem:[%s14639_s0 + $0x270] sm:$0xff] }
 0x208   :  { %5968 = vrot.lane.b32.xlu1 %v16022_v53, %s7250_s21  ;;  %16023 = vst [vmem:[#allocation27_spill] sm:$0xff] %v10425_v12  ;;  %v10445_v43 = vmax.f32 %v7192_v47, %v1489_v33  ;;  %v1491_v41 = vsel %vm187_vm11, %v1235_v21, %v7195_v44  ;;  %v1495_v63 = vsel %vm187_vm11, %v1239_v11, %v7196_v31  ;;  %v5620_v47 = vunpack.i.l.bf16 %v10060_v15  ;;  %v16026_v33 = vld [vmem:[#allocation40_spill] sm:$0xff] }
 0x209   :  { %16024 = vst [vmem:[#allocation108_spill] sm:$0xff] %v10434_v45  ;;  %v1493_v5 = vsel %vm187_vm11, %v1237_v14, %v7197_v0  ;;  %v16027_v27 = vpack.i.bf16 %v16026_v33, %v15992_v25  ;;  %v1494_v24 = vsel %vm186_vm10, %v1238_v59, %v7198_v28  ;;  %v1240_v21 = vsel %vm1159_vm9, %v5615_v1, %v5616_v35  ;;  %v16028_v11 = vld [vmem:[#allocation44_spill] sm:$0xff]  ;;  %v16029_v14 = vld [vmem:[#allocation66_spill] sm:$0xff]  ;;  %v10485_v1 = vpop.permute.xlu0 %5683 }
 0x20a   :  { %16025 = vst [vmem:[#allocation92_spill] sm:$0xff] %v10445_v43  ;;  %v5626_v52 = vunpack.i.h.bf16 %v10166_v55  ;;  %v5625_v23 = vunpack.i.l.bf16 %v10166_v55  ;;  %v16030_v38 = vpack.i.bf16 %v16028_v11, %v16029_v14  ;;  %v1241_v25 = vsel %vm1159_vm9, %v5616_v35, %v5620_v47  ;;  %v16032_v47 = vld [vmem:[#allocation43_spill] sm:$0xff] }
 0x20b   :  { %5963 = vrot.lane.b32.xlu0 %v16027_v27, %s7250_s21  ;;  %v1244_v53 = vsel %vm1159_vm9, %v5630_v22, %v15048_v13  ;;  %v5641_v33 = vunpack.i.h.bf16 %v10168_v39  ;;  %v5640_v59 = vunpack.i.l.bf16 %v10168_v39  ;;  %v10487_v27 = vpop.permute.xlu1 %5698  ;;  %v10489_v55 = vmax.f32 %v7194_v2, %v1490_v26  ;;  %v7199_v22 = vld [vmem:[%s14639_s0 + $0x280] sm:$0xff] }
 0x20c   :  { %5978 = vrot.lane.b32.xlu1 %v16030_v38, %s7250_s21  ;;  %v5621_v45 = vunpack.i.h.bf16 %v10060_v15  ;;  %v5636_v11 = vunpack.i.h.bf16 %v10228_v17  ;;  %v10493_v14 = vmax.f32 %v7195_v44, %v1491_v41  ;;  %v10495_v35 = vmax.f32 %v7198_v28, %v1494_v24  ;;  %v16033_v38 = vld [vmem:[#allocation112_spill] sm:$0xff]  ;;  %v7200_v44 = vld [vmem:[%s14639_s0 + $0x288] sm:$0xff]  ;;  %v7201_v28 = vld [vmem:[%s14639_s0 + $0x2a0] sm:$0xff] }
 0x20d   :  { %v1496_v39 = vsel %vm186_vm10, %v1240_v21, %v7199_v22  ;;  %v16034_v2 = vpack.i.bf16 %v16032_v47, %v16033_v38  ;;  %v10506_v26 = vmax.f32 %v7196_v31, %v1495_v63  ;;  %v10508_v15 = vmax.f32 %v7197_v0, %v1493_v5  ;;  %v16037_v63 = vld [vmem:[#allocation47_spill] sm:$0xff]  ;;  %v16038_v0 = vld [vmem:[#allocation113_spill] sm:$0xff]  ;;  %v10530_v13 = vpop.permute.xlu0 %5693 }
 0x20e   :  { %16031 = vst [vmem:[#allocation106_spill] sm:$0xff] %v10495_v35  ;;  %v1497_v41 = vsel %vm187_vm11, %v1241_v25, %v7200_v44  ;;  %v1500_v24 = vsel %vm186_vm10, %v1244_v53, %v7201_v28  ;;  %v1242_v21 = vsel %vm1159_vm9, %v5621_v45, %v5625_v23  ;;  %v1243_v31 = vsel %vm1159_vm9, %v5625_v23, %v5626_v52 }
 0x20f   :  { %5973 = vrot.lane.b32.xlu0 %v16034_v2, %s7250_s21  ;;  %16035 = vst [vmem:[#allocation107_spill] sm:$0xff] %v10506_v26  ;;  %16036 = vst [vmem:[#allocation26_spill] sm:$0xff] %v10508_v15  ;;  %v16039_v5 = vpack.i.bf16 %v16037_v63, %v16038_v0  ;;  %v1247_v47 = vsel %vm1159_vm9, %v5640_v59, %v5641_v33  ;;  %v5635_v25 = vunpack.i.l.bf16 %v10228_v17  ;;  %v5646_v38 = vunpack.i.h.bf16 %v10293_v19  ;;  %v10532_v53 = vpop.permute.xlu1 %5708  ;;  %v16043_v15 = vld [vmem:[#allocation114_spill] sm:$0xff] }
 0x210   :  { %v5645_v2 = vunpack.i.l.bf16 %v10293_v19  ;;  %v10534_v45 = vmax.f32 %v7199_v22, %v1496_v39  ;;  %v1246_v52 = vsel %vm1159_vm9, %v5636_v11, %v5640_v59  ;;  %v5661_v23 = vunpack.i.h.bf16 %v10295_v48  ;;  %v7202_v59 = vld [vmem:[%s14639_s0 + $0x290] sm:$0xff]  ;;  %v7203_v11 = vld [vmem:[%s14639_s0 + $0x298] sm:$0xff] }
 0x211   :  { %5988 = vrot.lane.b32.xlu1 %v16039_v5, %s7250_s21  ;;  %v5660_v63 = vunpack.i.l.bf16 %v10295_v48  ;;  %v10539_v0 = vmax.f32 %v7201_v28, %v1500_v24  ;;  %v5650_v17 = vunpack.i.l.bf16 %v10230_v46  ;;  %v5656_v33 = vunpack.i.h.bf16 %v10341_v3  ;;  %v16042_v5 = vld [vmem:[#allocation46_spill] sm:$0xff]  ;;  %v16046_v28 = vld [vmem:[#allocation115_spill] sm:$0xff] }
 0x212   :  { %16040 = vst [vmem:[#allocation30_spill] sm:$0xff] %v10534_v45  ;;  %v5655_v19 = vunpack.i.l.bf16 %v10341_v3  ;;  %v16044_v35 = vpack.i.bf16 %v16042_v5, %v16043_v15  ;;  %v1498_v48 = vsel %vm186_vm10, %v1242_v21, %v7202_v59  ;;  %v1499_v22 = vsel %vm187_vm11, %v1243_v31, %v7203_v11  ;;  %v7204_v3 = vld [vmem:[%s14639_s0 + $0x2b8] sm:$0xff]  ;;  %v16045_v15 = vld [vmem:[#allocation50_spill] sm:$0xff]  ;;  %v7205_v31 = vld [vmem:[%s14639_s0 + $0x2b0] sm:$0xff]  ;;  %v10578_v45 = vpop.permute.xlu0 %5703 }
 0x213   :  { %16041 = vst [vmem:[#allocation105_spill] sm:$0xff] %v10539_v0  ;;  %v5651_v39 = vunpack.i.h.bf16 %v10230_v46  ;;  %v16047_v24 = vpack.i.bf16 %v16045_v15, %v16046_v28  ;;  %v16048_v21 = vunpack.i.h.bf16 %v10118_v37  ;;  %v1502_v0 = vsel %vm186_vm10, %v1246_v52, %v7205_v31  ;;  %v10580_v12 = vpop.permute.xlu1 %5718 }
 0x214   :  { %5983 = vrot.lane.b32.xlu0 %v16044_v35, %s7250_s21  ;;  %v1503_v35 = vsel %vm187_vm11, %v1247_v47, %v7204_v3  ;;  %v1248_v47 = vsel %vm1159_vm9, %v5645_v2, %v5646_v38  ;;  %v1249_v46 = vsel %vm1159_vm9, %v5646_v38, %v5650_v17  ;;  %v1252_v15 = vsel %vm1159_vm9, %v5660_v63, %v5661_v23  ;;  %v16050_v38 = vld [vmem:[#allocation49_spill] sm:$0xff]  ;;  %v16051_v17 = vld [vmem:[#allocation116_spill] sm:$0xff]  ;;  %v7206_v63 = vld [vmem:[%s14639_s0 + $0x2a8] sm:$0xff] }
 0x215   :  { %5998 = vrot.lane.b32.xlu1 %v16047_v24, %s7250_s21  ;;  %v1245_v5 = vsel %vm1159_vm9, %v16048_v21, %v5635_v25  ;;  %v5671_v37 = vunpack.i.h.bf16 %v10343_v9  ;;  %v5670_v25 = vunpack.i.l.bf16 %v10343_v9  ;;  %v5665_v28 = vunpack.i.l.bf16 %v10378_v61 }
 0x216   :  { %v10586_v24 = vmax.f32 %v7202_v59, %v1498_v48  ;;  %v1250_v52 = vsel %vm1159_vm9, %v5651_v39, %v5655_v19  ;;  %v1251_v2 = vsel %vm1159_vm9, %v5655_v19, %v5656_v33  ;;  %v16052_v21 = vpack.i.bf16 %v16050_v38, %v16051_v17  ;;  %v16054_v48 = vld [vmem:[#allocation53_spill] sm:$0xff] }
 0x217   :  { %v10594_v26 = vmax.f32 %v7200_v44, %v1497_v41  ;;  %v1501_v9 = vsel %vm187_vm11, %v1245_v5, %v7206_v63  ;;  %v5666_v59 = vunpack.i.h.bf16 %v10378_v61  ;;  %v16055_v39 = vld [vmem:[#allocation117_spill] sm:$0xff]  ;;  %v10606_v19 = vmax.f32 %v7203_v11, %v1499_v22  ;;  %v7207_v41 = vld [vmem:[%s14639_s0 + $0x2c0] sm:$0xff]  ;;  %v7208_v61 = vld [vmem:[%s14639_s0 + $0x2c8] sm:$0xff]  ;;  %v10627_v22 = vpop.permute.xlu0 %5713 }
 0x218   :  { %16049 = vst [vmem:[#allocation63_spill] sm:$0xff] %v10586_v24  ;;  %5993 = vrot.lane.b32.xlu0 %v16052_v21, %s7250_s21  ;;  %v16056_v33 = vpack.i.bf16 %v16054_v48, %v16055_v39  ;;  %v10608_v38 = vmax.f32 %v7204_v3, %v1503_v35  ;;  %v10610_v44 = vmax.f32 %v7205_v31, %v1502_v0  ;;  %v7209_v11 = vld [vmem:[%s14639_s0 + $0x2e0] sm:$0xff]  ;;  %v10629_v3 = vpop.permute.xlu1 %5728  ;;  %v7210_v35 = vld [vmem:[%s14639_s0 + $0x2d0] sm:$0xff]  ;;  %v5676_v48 = vunpack.i.h.bf16 %v10430_v30 }
 0x219   :  { %16053 = vst [vmem:[#allocation29_spill] sm:$0xff] %v10594_v26  ;;  %16057 = vst [vmem:[#allocation32_spill] sm:$0xff] %v10606_v19  ;;  %v1504_v5 = vsel %vm186_vm10, %v1248_v47, %v7207_v41  ;;  %v1505_v17 = vsel %vm187_vm11, %v1249_v46, %v7208_v61  ;;  %v1508_v0 = vsel %vm186_vm10, %v1252_v15, %v7209_v11  ;;  %v7211_v47 = vld [vmem:[%s14639_s0 + $0x2d8] sm:$0xff]  ;;  %v5675_v39 = vunpack.i.l.bf16 %v10430_v30 }
 0x21a   :  { %6008 = vrot.lane.b32.xlu1 %v16056_v33, %s7250_s21  ;;  %16058 = vst [vmem:[#allocation98_spill] sm:$0xff] %v10608_v38  ;;  %16059 = vst [vmem:[#allocation110_spill] sm:$0xff] %v10610_v44  ;;  %v1506_v31 = vsel %vm186_vm10, %v1250_v52, %v7210_v35  ;;  %v1507_v46 = vsel %vm187_vm11, %v1251_v2, %v7211_v47  ;;  %v1255_v15 = vsel %vm1159_vm9, %v5670_v25, %v5671_v37  ;;  %v16060_v52 = vld [vmem:[#allocation52_spill] sm:$0xff]  ;;  %v16061_v38 = vld [vmem:[#allocation118_spill] sm:$0xff] }
 0x21b   :  { %v1253_v21 = vsel %vm1159_vm9, %v5661_v23, %v5665_v28  ;;  %v5691_v33 = vunpack.i.h.bf16 %v10432_v56  ;;  %v5690_v44 = vunpack.i.l.bf16 %v10432_v56  ;;  %v16062_v26 = vpack.i.bf16 %v16060_v52, %v16061_v38  ;;  %v16065_v23 = vld [vmem:[#allocation56_spill] sm:$0xff]  ;;  %v16066_v28 = vld [vmem:[#allocation119_spill] sm:$0xff]  ;;  %v7212_v56 = vld [vmem:[%s14639_s0 + $0x2f8] sm:$0xff] }
 0x21c   :  { %v10651_v24 = vmax.f32 %v7207_v41, %v1504_v5  ;;  %v10653_v2 = vmax.f32 %v7209_v11, %v1508_v0  ;;  %v1254_v37 = vsel %vm1159_vm9, %v5666_v59, %v5670_v25  ;;  %v16067_v19 = vpack.i.bf16 %v16065_v23, %v16066_v28  ;;  %v10670_v41 = vpop.permute.xlu0 %5723  ;;  %v10672_v25 = vpop.permute.xlu1 %5738  ;;  %v7214_v0 = vld [vmem:[%s14639_s0 + $0x2f0] sm:$0xff] }
 0x21d   :  { %6003 = vrot.lane.b32.xlu0 %v16062_v26, %s7250_s21  ;;  %v10660_v30 = vmax.f32 %v7206_v63, %v1501_v9  ;;  %v10662_v43 = vmax.f32 %v7210_v35, %v1506_v31  ;;  %v1511_v26 = vsel %vm187_vm11, %v1255_v15, %v7212_v56  ;;  %v5685_v38 = vunpack.i.l.bf16 %v10485_v1  ;;  %v7213_v63 = vld [vmem:[%s14639_s0 + $0x2e8] sm:$0xff] }
 0x21e   :  { %16063 = vst [vmem:[#allocation111_spill] sm:$0xff] %v10651_v24  ;;  %16064 = vst [vmem:[#allocation31_spill] sm:$0xff] %v10653_v2  ;;  %6018 = vrot.lane.b32.xlu1 %v16067_v19, %s7250_s21  ;;  %v10674_v59 = vmax.f32 %v7208_v61, %v1505_v17  ;;  %v1509_v9 = vsel %vm187_vm11, %v1253_v21, %v7213_v63  ;;  %v5681_v19 = vunpack.i.h.bf16 %v10380_v62  ;;  %v5680_v5 = vunpack.i.l.bf16 %v10380_v62  ;;  %v16070_v15 = vld [vmem:[#allocation55_spill] sm:$0xff]  ;;  %v16071_v21 = vld [vmem:[#allocation120_spill] sm:$0xff] }
 0x21f   :  { %16068 = vst [vmem:[#allocation35_spill] sm:$0xff] %v10662_v43  ;;  %v10683_v11 = vmax.f32 %v7211_v47, %v1507_v46  ;;  %v1510_v61 = vsel %vm186_vm10, %v1254_v37, %v7214_v0  ;;  %v1256_v17 = vsel %vm1159_vm9, %v5675_v39, %v5676_v48  ;;  %v1260_v35 = vsel %vm1159_vm9, %v5690_v44, %v5691_v33  ;;  %v16073_v37 = vld [vmem:[#allocation59_spill] sm:$0xff]  ;;  %v16074_v39 = vld [vmem:[#allocation121_spill] sm:$0xff]  ;;  %v16077_v24 = vld [vmem:[#allocation58_spill] sm:$0xff] }
 0x220   :  { %16069 = vst [vmem:[#allocation34_spill] sm:$0xff] %v10674_v59  ;;  %v5686_v31 = vunpack.i.h.bf16 %v10485_v1  ;;  %v16072_v52 = vpack.i.bf16 %v16070_v15, %v16071_v21  ;;  %v1257_v62 = vsel %vm1159_vm9, %v5676_v48, %v5680_v5  ;;  %v5701_v47 = vunpack.i.h.bf16 %v10487_v27  ;;  %v10709_v48 = vpop.permute.xlu0 %5733 }
 0x221   :  { %v5700_v46 = vunpack.i.l.bf16 %v10487_v27  ;;  %v5695_v23 = vunpack.i.l.bf16 %v10530_v13  ;;  %v16075_v28 = vpack.i.bf16 %v16073_v37, %v16074_v39  ;;  %v1258_v1 = vsel %vm1159_vm9, %v5681_v19, %v5685_v38  ;;  %v7215_v27 = vld [vmem:[%s14639_s0 + $0x300] sm:$0xff]  ;;  %v10723_v37 = vpop.permute.xlu1 %5748 }
 0x222   :  { %6013 = vrot.lane.b32.xlu0 %v16072_v52, %s7250_s21  ;;  %v5696_v44 = vunpack.i.h.bf16 %v10530_v13  ;;  %v5706_v15 = vunpack.i.h.bf16 %v10578_v45  ;;  %v5705_v21 = vunpack.i.l.bf16 %v10578_v45  ;;  %v1512_v5 = vsel %vm186_vm10, %v1256_v17, %v7215_v27  ;;  %v7216_v52 = vld [vmem:[%s14639_s0 + $0x320] sm:$0xff] }
 0x223   :  { %6028 = vrot.lane.b32.xlu1 %v16075_v28, %s7250_s21  ;;  %v1516_v13 = vsel %vm186_vm10, %v1260_v35, %v7216_v52  ;;  %v5720_v45 = vunpack.i.l.bf16 %v10580_v12  ;;  %v10725_v39 = vmax.f32 %v7214_v0, %v1510_v61  ;;  %v7217_v28 = vld [vmem:[%s14639_s0 + $0x308] sm:$0xff]  ;;  %v1259_v2 = vsel %vm1159_vm9, %v5685_v38, %v5686_v31  ;;  %v16078_v35 = vld [vmem:[#allocation122_spill] sm:$0xff]  ;;  %v7218_v0 = vld [vmem:[%s14639_s0 + $0x310] sm:$0xff] }
 0x224   :  { %v1513_v17 = vsel %vm187_vm11, %v1257_v62, %v7217_v28  ;;  %v16079_v59 = vpack.i.bf16 %v16077_v24, %v16078_v35  ;;  %v10737_v19 = vmax.f32 %v7212_v56, %v1511_v26  ;;  %v1514_v61 = vsel %vm186_vm10, %v1258_v1, %v7218_v0  ;;  %v16080_v38 = vld [vmem:[#allocation62_spill] sm:$0xff]  ;;  %v16081_v31 = vld [vmem:[#allocation123_spill] sm:$0xff]  ;;  %v10758_v1 = vpop.permute.xlu0 %5743 }
 0x225   :  { %16076 = vst [vmem:[#allocation38_spill] sm:$0xff] %v10725_v39  ;;  %v1263_v39 = vsel %vm1159_vm9, %v5700_v46, %v5701_v47  ;;  %v1261_v62 = vsel %vm1159_vm9, %v5691_v33, %v5695_v23  ;;  %v16082_v43 = vpack.i.bf16 %v16080_v38, %v16081_v31  ;;  %v10750_v24 = vmax.f32 %v7213_v63, %v1509_v9  ;;  %v7219_v33 = vld [vmem:[%s14639_s0 + $0x318] sm:$0xff]  ;;  %v10769_v23 = vpop.permute.xlu1 %5758 }
 0x226   :  { %6023 = vrot.lane.b32.xlu0 %v16079_v59, %s7250_s21  ;;  %v10752_v56 = vmax.f32 %v7215_v27, %v1512_v5  ;;  %v10754_v26 = vmax.f32 %v7216_v52, %v1516_v13  ;;  %v1262_v59 = vsel %vm1159_vm9, %v5696_v44, %v5700_v46  ;;  %v1264_v35 = vsel %vm1159_vm9, %v5705_v21, %v5706_v15  ;;  %v7220_v21 = vld [vmem:[%s14639_s0 + $0x338] sm:$0xff] }
 0x227   :  { %6038 = vrot.lane.b32.xlu1 %v16082_v43, %s7250_s21  ;;  %v1515_v47 = vsel %vm187_vm11, %v1259_v2, %v7219_v33  ;;  %v5710_v43 = vunpack.i.l.bf16 %v10532_v53  ;;  %v16085_v63 = vunpack.i.h.bf16 %v10580_v12  ;;  %v10771_v46 = vmax.f32 %v7217_v28, %v1513_v17  ;;  %v7221_v2 = vld [vmem:[%s14639_s0 + $0x328] sm:$0xff]  ;;  %v16088_v13 = vld [vmem:[#allocation61_spill] sm:$0xff]  ;;  %v7222_v17 = vld [vmem:[%s14639_s0 + $0x330] sm:$0xff] }
 0x228   :  { %16083 = vst [vmem:[#allocation109_spill] sm:$0xff] %v10752_v56  ;;  %16084 = vst [vmem:[#allocation37_spill] sm:$0xff] %v10754_v26  ;;  %v10773_v44 = vmax.f32 %v7218_v0, %v1514_v61  ;;  %v1519_v27 = vsel %vm187_vm11, %v1263_v39, %v7220_v21  ;;  %v1517_v5 = vsel %vm187_vm11, %v1261_v62, %v7221_v2  ;;  %v5711_v52 = vunpack.i.h.bf16 %v10532_v53  ;;  %v7223_v61 = vld [vmem:[%s14639_s0 + $0x340] sm:$0xff]  ;;  %v16091_v38 = vld [vmem:[#allocation65_spill] sm:$0xff] }
 0x229   :  { %v1268_v9 = vsel %vm1159_vm9, %v5720_v45, %v16085_v63  ;;  %16086 = vst [vmem:[#allocation41_spill] sm:$0xff] %v10771_v46  ;;  %v16089_v45 = vld [vmem:[#allocation124_spill] sm:$0xff]  ;;  %v1518_v39 = vsel %vm186_vm10, %v1262_v59, %v7222_v17  ;;  %v1265_v0 = vsel %vm1159_vm9, %v5706_v15, %v5710_v43  ;;  %v1520_v53 = vsel %vm186_vm10, %v1264_v35, %v7223_v61  ;;  %v16092_v31 = vld [vmem:[#allocation125_spill] sm:$0xff]  ;;  %v7224_v59 = vld [vmem:[%s14639_s0 + $0x360] sm:$0xff] }
 0x22a   :  { %16087 = vst [vmem:[#allocation40_spill] sm:$0xff] %v10773_v44  ;;  %v16090_v28 = vpack.i.bf16 %v16088_v13, %v16089_v45  ;;  %v5715_v62 = vunpack.i.l.bf16 %v10627_v22  ;;  %v16093_v63 = vpack.i.bf16 %v16091_v38, %v16092_v31  ;;  %v1524_v15 = vsel %vm186_vm10, %v1268_v9, %v7224_v59  ;;  %v10814_v45 = vpop.permute.xlu0 %5753  ;;  %v10818_v31 = vpop.permute.xlu1 %5768  ;;  %v16097_v46 = vld [vmem:[#allocation64_spill] sm:$0xff] }
 0x22b   :  { %v5716_v43 = vunpack.i.h.bf16 %v10627_v22  ;;  %v5731_v13 = vunpack.i.h.bf16 %v10629_v3  ;;  %v5730_v35 = vunpack.i.l.bf16 %v10629_v3  ;;  %v5725_v38 = vunpack.i.l.bf16 %v10670_v41  ;;  %v7225_v22 = vld [vmem:[%s14639_s0 + $0x348] sm:$0xff] }
 0x22c   :  { %6033 = vrot.lane.b32.xlu0 %v16090_v28, %s7250_s21  ;;  %6048 = vrot.lane.b32.xlu1 %v16093_v63, %s7250_s21  ;;  %v5726_v28 = vunpack.i.h.bf16 %v10670_v41  ;;  %v10820_v63 = vmax.f32 %v7219_v33, %v1515_v47  ;;  %v10822_v26 = vmax.f32 %v7220_v21, %v1519_v27  ;;  %v10824_v56 = vmax.f32 %v7222_v17, %v1518_v39  ;;  %v16098_v41 = vld [vmem:[#allocation126_spill] sm:$0xff]  ;;  %v16102_v39 = vld [vmem:[#allocation68_spill] sm:$0xff] }
 0x22d   :  { %v1521_v3 = vsel %vm187_vm11, %v1265_v0, %v7225_v22  ;;  %v10831_v9 = vmax.f32 %v7223_v61, %v1520_v53  ;;  %v16099_v44 = vpack.i.bf16 %v16097_v46, %v16098_v41  ;;  %v10837_v33 = vmax.f32 %v7221_v2, %v1517_v5  ;;  %v16103_v0 = vld [vmem:[#allocation127_spill] sm:$0xff] }
 0x22e   :  { %16094 = vst [vmem:[#allocation44_spill] sm:$0xff] %v10822_v26  ;;  %16095 = vst [vmem:[#allocation66_spill] sm:$0xff] %v10824_v56  ;;  %v10839_v47 = vmax.f32 %v7224_v59, %v1524_v15  ;;  %v1266_v21 = vsel %vm1159_vm9, %v5711_v52, %v5715_v62  ;;  %v5736_v27 = vunpack.i.h.bf16 %v10709_v48  ;;  %v5735_v17 = vunpack.i.l.bf16 %v10709_v48  ;;  %v10852_v5 = vpop.permute.xlu0 %5763 }
 0x22f   :  { %16096 = vst [vmem:[#allocation43_spill] sm:$0xff] %v10831_v9  ;;  %16100 = vst [vmem:[#allocation112_spill] sm:$0xff] %v10837_v33  ;;  %v16104_v61 = vpack.i.bf16 %v16102_v39, %v16103_v0  ;;  %v1267_v53 = vsel %vm1159_vm9, %v5715_v62, %v5716_v43  ;;  %v1271_v46 = vsel %vm1159_vm9, %v5730_v35, %v5731_v13  ;;  %v5750_v2 = vunpack.i.l.bf16 %v10723_v37  ;;  %v10860_v39 = vpop.permute.xlu1 %5778 }
 0x230   :  { %6043 = vrot.lane.b32.xlu0 %v16099_v44, %s7250_s21  ;;  %16101 = vst [vmem:[#allocation47_spill] sm:$0xff] %v10839_v47  ;;  %v5751_v44 = vunpack.i.h.bf16 %v10723_v37  ;;  %v16105_v52 = vunpack.i.h.bf16 %v10580_v12  ;;  %v1270_v48 = vsel %vm1159_vm9, %v5726_v28, %v5730_v35  ;;  %v5746_v15 = vunpack.i.h.bf16 %v10758_v1  ;;  %v7226_v37 = vld [vmem:[%s14639_s0 + $0x350] sm:$0xff]  ;;  %v16106_v35 = vld [vmem:[#allocation67_spill] sm:$0xff] }
 0x231   :  { %6058 = vrot.lane.b32.xlu1 %v16104_v61, %s7250_s21  ;;  %v5745_v41 = vunpack.i.l.bf16 %v10758_v1  ;;  %v1522_v62 = vsel %vm186_vm10, %v1266_v21, %v7226_v37  ;;  %v5740_v12 = vunpack.i.l.bf16 %v10672_v25  ;;  %v5761_v43 = vunpack.i.h.bf16 %v10769_v23  ;;  %v16107_v1 = vld [vmem:[#allocation128_spill] sm:$0xff]  ;;  %v7228_v21 = vld [vmem:[%s14639_s0 + $0x378] sm:$0xff] }
 0x232   :  { %v1269_v59 = vsel %vm1159_vm9, %v16105_v52, %v5725_v38  ;;  %v5760_v13 = vunpack.i.l.bf16 %v10769_v23  ;;  %v16108_v28 = vpack.i.bf16 %v16106_v35, %v16107_v1  ;;  %v7227_v38 = vld [vmem:[%s14639_s0 + $0x358] sm:$0xff]  ;;  %v1527_v61 = vsel %vm187_vm11, %v1271_v46, %v7228_v21  ;;  %v16109_v35 = vld [vmem:[#allocation71_spill] sm:$0xff]  ;;  %v7230_v46 = vld [vmem:[%s14639_s0 + $0x370] sm:$0xff] }
 0x233   :  { %v1523_v0 = vsel %vm187_vm11, %v1267_v53, %v7227_v38  ;;  %v5741_v23 = vunpack.i.h.bf16 %v10672_v25  ;;  %v1272_v52 = vsel %vm1159_vm9, %v5735_v17, %v5736_v27  ;;  %v16110_v1 = vld [vmem:[#allocation129_spill] sm:$0xff]  ;;  %v7229_v53 = vld [vmem:[%s14639_s0 + $0x368] sm:$0xff]  ;;  %v1526_v25 = vsel %vm186_vm10, %v1270_v48, %v7230_v46  ;;  %v10909_v56 = vpop.permute.xlu1 %5788 }
 0x234   :  { %6053 = vrot.lane.b32.xlu0 %v16108_v28, %s7250_s21  ;;  %v16111_v28 = vpack.i.bf16 %v16109_v35, %v16110_v1  ;;  %v1525_v47 = vsel %vm187_vm11, %v1269_v59, %v7229_v53  ;;  %v1273_v17 = vsel %vm1159_vm9, %v5736_v27, %v5740_v12  ;;  %v1276_v35 = vsel %vm1159_vm9, %v5750_v2, %v5751_v44  ;;  %v10903_v1 = vpop.permute.xlu0 %5773  ;;  %v7231_v27 = vld [vmem:[%s14639_s0 + $0x380] sm:$0xff] }
 0x235   :  { %v1275_v9 = vsel %vm1159_vm9, %v5745_v41, %v5746_v15  ;;  %v5756_v33 = vunpack.i.h.bf16 %v10814_v45  ;;  %v5755_v59 = vunpack.i.l.bf16 %v10814_v45  ;;  %v10911_v26 = vmax.f32 %v7226_v37, %v1522_v62  ;;  %v16112_v12 = vld [vmem:[#allocation70_spill] sm:$0xff]  ;;  %v7232_v37 = vld [vmem:[%s14639_s0 + $0x388] sm:$0xff] }
 0x236   :  { %6068 = vrot.lane.b32.xlu1 %v16111_v28, %s7250_s21  ;;  %v1274_v28 = vsel %vm1159_vm9, %v5741_v23, %v5745_v41  ;;  %v1528_v2 = vsel %vm186_vm10, %v1272_v52, %v7231_v27  ;;  %v1279_v48 = vsel %vm1159_vm9, %v5760_v13, %v5761_v43  ;;  %v16113_v15 = vld [vmem:[#allocation130_spill] sm:$0xff]  ;;  %v10924_v45 = vmax.f32 %v7225_v22, %v1521_v3 }
 0x237   :  { %v16114_v41 = vpack.i.bf16 %v16112_v12, %v16113_v15  ;;  %v1529_v62 = vsel %vm187_vm11, %v1273_v17, %v7232_v37  ;;  %v7233_v43 = vld [vmem:[%s14639_s0 + $0x3a0] sm:$0xff]  ;;  %v16117_v12 = vld [vmem:[#allocation131_spill] sm:$0xff]  ;;  %v10940_v22 = vmax.f32 %v7227_v38, %v1523_v0  ;;  %v10942_v3 = vmax.f32 %v7228_v21, %v1527_v61  ;;  %v7234_v17 = vld [vmem:[%s14639_s0 + $0x390] sm:$0xff] }
 0x238   :  { %16115 = vst [vmem:[#allocation113_spill] sm:$0xff] %v10924_v45  ;;  %v1532_v23 = vsel %vm186_vm10, %v1276_v35, %v7233_v43  ;;  %v16116_v52 = vld [vmem:[#allocation74_spill] sm:$0xff]  ;;  %v1530_v45 = vsel %vm186_vm10, %v1274_v28, %v7234_v17  ;;  %v7235_v35 = vld [vmem:[%s14639_s0 + $0x398] sm:$0xff]  ;;  %v10956_v38 = vpop.permute.xlu0 %5783  ;;  %v10958_v0 = vmax.f32 %v7229_v53, %v1525_v47  ;;  %v10960_v21 = vmax.f32 %v7231_v27, %v1528_v2  ;;  %v16123_v53 = vld [vmem:[#allocation132_spill] sm:$0xff] }
 0x239   :  { %6063 = vrot.lane.b32.xlu0 %v16114_v41, %s7250_s21  ;;  %v16118_v15 = vpack.i.bf16 %v16116_v52, %v16117_v12  ;;  %v10944_v41 = vmax.f32 %v7230_v46, %v1526_v25  ;;  %v1531_v52 = vsel %vm187_vm11, %v1275_v9, %v7235_v35  ;;  %v7236_v61 = vld [vmem:[%s14639_s0 + $0x3b8] sm:$0xff]  ;;  %v1277_v25 = vsel %vm1159_vm9, %v5751_v44, %v5755_v59  ;;  %v5799_v12 = vpop.permute.xlu1 %5798  ;;  %v16131_v44 = vld [vmem:[#allocation134_spill] sm:$0xff] }
 0x23a   :  { %16120 = vst [vmem:[#allocation114_spill] sm:$0xff] %v10960_v21  ;;  %v1535_v46 = vsel %vm187_vm11, %v1279_v48, %v7236_v61  ;;  %v1278_v28 = vsel %vm1159_vm9, %v5756_v33, %v5760_v13  ;;  %v5801_v9 = vunpack.i.h.bf16 %v5799_v12  ;;  %v16122_v47 = vld [vmem:[#allocation73_spill] sm:$0xff]  ;;  %v10975_v2 = vmax.f32 %v7232_v37, %v1529_v62  ;;  %v16130_v48 = vld [vmem:[#allocation76_spill] sm:$0xff] }
 0x23b   :  { %6078 = vrot.lane.b32.xlu1 %v16118_v15, %s7250_s21  ;;  %16119 = vst [vmem:[#allocation46_spill] sm:$0xff] %v10944_v41  ;;  %v10969_v15 = vmax.f32 %v7233_v43, %v1532_v23  ;;  %v5800_v41 = vunpack.i.l.bf16 %v5799_v12  ;;  %v16124_v27 = vpack.i.bf16 %v16122_v47, %v16123_v53  ;;  %v10977_v21 = vmax.f32 %v7234_v17, %v1530_v45  ;;  %v16125_v33 = vld [vmem:[#allocation77_spill] sm:$0xff]  ;;  %v7237_v23 = vld [vmem:[%s14639_s0 + $0x3a8] sm:$0xff]  ;;  %v7238_v45 = vld [vmem:[%s14639_s0 + $0x3b0] sm:$0xff] }
 0x23c   :  { %v16126_v13 = vld [vmem:[#allocation133_spill] sm:$0xff]  ;;  %v10985_v43 = vmax.f32 %v7235_v35, %v1531_v52  ;;  %v1533_v37 = vsel %vm187_vm11, %v1277_v25, %v7237_v23  ;;  %v1534_v62 = vsel %vm186_vm10, %v1278_v28, %v7238_v45  ;;  %v2192_v17 = vsel %vm189_vm12, %v5801_v9, %v9561_v7  ;;  %v5794_v35 = vpop.permute.xlu0 %5793  ;;  %v16134_v12 = vld [vmem:[#allocation42_spill] sm:$0xff] }
 0x23d   :  { %16121 = vst [vmem:[#allocation50_spill] sm:$0xff] %v10969_v15  ;;  %6073 = vrot.lane.b32.xlu0 %v16124_v27, %s7250_s21  ;;  %v16127_v59 = vpack.i.bf16 %v16125_v33, %v16126_v13  ;;  %v11000_v52 = vmax.f32 %v7236_v61, %v1535_v46  ;;  %v5765_v47 = vunpack.i.l.bf16 %v10852_v5  ;;  %v11005_v25 = vmax.f32 %v9561_v7, %v2192_v17  ;;  %v5809_v27 = vpop.permute.xlu1 %5808  ;;  %v16135_v17 = vld [vmem:[#allocation80_spill] sm:$0xff] }
 0x23e   :  { %v5796_v53 = vunpack.i.h.bf16 %v5794_v35  ;;  %v1998_v33 = vsel %vm1996_vm13, %v5800_v41, %v5801_v9  ;;  %v5795_v13 = vunpack.i.l.bf16 %v5794_v35  ;;  %v5811_v28 = vunpack.i.h.bf16 %v5809_v27 }
 0x23f   :  { %6088 = vrot.lane.b32.xlu1 %v16127_v59, %s7250_s21  ;;  %16128 = vst [vmem:[#allocation115_spill] sm:$0xff] %v11000_v52  ;;  %16129 = vst [vmem:[#allocation49_spill] sm:$0xff] %v11005_v25  ;;  %v5810_v59 = vunpack.i.l.bf16 %v5809_v27  ;;  %v16132_v15 = vpack.i.bf16 %v16130_v48, %v16131_v44  ;;  %v11012_v61 = vmax.f32 %v7238_v45, %v1534_v62  ;;  %v16136_v25 = vld [vmem:[#allocation69_spill] sm:$0xff]  ;;  %v16141_v27 = vld [vmem:[#allocation87_spill] sm:$0xff] }
 0x240   :  { %v2190_v7 = vsel %vm189_vm12, %v5796_v53, %v16134_v12  ;;  %v16137_v41 = vpack.i.bf16 %v16135_v17, %v16136_v25  ;;  %v11022_v9 = vmax.f32 %v7237_v23, %v1533_v37  ;;  %v1997_v35 = vsel %vm1996_vm13, %v5795_v13, %v5796_v53  ;;  %v16140_v44 = vld [vmem:[#allocation45_spill] sm:$0xff]  ;;  %v5804_v62 = vpop.permute.xlu0 %5803 }
 0x241   :  { %6083 = vrot.lane.b32.xlu0 %v16132_v15, %s7250_s21  ;;  %16133 = vst [vmem:[#allocation116_spill] sm:$0xff] %v11012_v61  ;;  %v11026_v48 = vmax.f32 %v16134_v12, %v2190_v7  ;;  %v2000_v15 = vsel %vm1996_vm13, %v5810_v59, %v5811_v28  ;;  %v2196_v45 = vsel %vm189_vm12, %v5811_v28, %v16140_v44  ;;  %v16142_v25 = vld [vmem:[#allocation33_spill] sm:$0xff]  ;;  %v5806_v12 = vunpack.i.h.bf16 %v5804_v62  ;;  %v5819_v53 = vpop.permute.xlu1 %5818  ;;  %v16152_v28 = vld [vmem:[#allocation75_spill] sm:$0xff]  ;;  %v16157_v61 = vld [vmem:[#allocation28_spill] sm:$0xff] }
 0x242   :  { %16138 = vst [vmem:[#allocation53_spill] sm:$0xff] %v11022_v9  ;;  %v2191_v46 = vsel %vm188_vm14, %v1998_v33, %v16141_v27  ;;  %v2189_v23 = vsel %vm188_vm14, %v1997_v35, %v16142_v25  ;;  %v11039_v37 = vmax.f32 %v16140_v44, %v2196_v45  ;;  %v16144_v13 = vunpack.i.h.bf16 %v10852_v5  ;;  %v16145_v33 = vld [vmem:[#allocation79_spill] sm:$0xff] }
 0x243   :  { %6098 = vrot.lane.b32.xlu1 %v16137_v41, %s7250_s21  ;;  %16139 = vst [vmem:[#allocation117_spill] sm:$0xff] %v11026_v48  ;;  %v5805_v7 = vunpack.i.l.bf16 %v5804_v62  ;;  %v5821_v17 = vunpack.i.h.bf16 %v5819_v53  ;;  %v16146_v41 = vld [vmem:[#allocation72_spill] sm:$0xff]  ;;  %v11052_v35 = vmax.f32 %v16142_v25, %v2189_v23  ;;  %v16149_v44 = vld [vmem:[#allocation39_spill] sm:$0xff]  ;;  %v16151_v62 = vld [vmem:[#allocation82_spill] sm:$0xff] }
 0x244   :  { %16143 = vst [vmem:[#allocation52_spill] sm:$0xff] %v11039_v37  ;;  %v11044_v59 = vsel %vm1159_vm9, %v5765_v47, %v16144_v13  ;;  %v16147_v48 = vpack.i.bf16 %v16145_v33, %v16146_v41  ;;  %v2195_v45 = vsel %vm188_vm14, %v2000_v15, %v16149_v44  ;;  %v16150_v37 = vld [vmem:[#allocation36_spill] sm:$0xff]  ;;  %v5820_v13 = vunpack.i.l.bf16 %v5819_v53  ;;  %v16156_v23 = vld [vmem:[#allocation7_spill] sm:$0xff]  ;;  %v5814_v41 = vpop.permute.xlu0 %5813 }
 0x245   :  { %16148 = vst [vmem:[#allocation118_spill] sm:$0xff] %v11052_v35  ;;  %v2194_v47 = vsel %vm189_vm12, %v5806_v12, %v16150_v37  ;;  %v16153_v9 = vpack.i.bf16 %v16151_v62, %v16152_v28  ;;  %v11065_v33 = vmax.f32 %v16141_v27, %v2191_v46  ;;  %v2200_v15 = vsel %vm189_vm12, %v5821_v17, %v16156_v23  ;;  %v5829_v27 = vpop.permute.xlu1 %5828  ;;  %v16161_v62 = vld [vmem:[#allocation81_spill] sm:$0xff] }
 0x246   :  { %6093 = vrot.lane.b32.xlu0 %v16147_v48, %s7250_s21  ;;  %v1999_v48 = vsel %vm1996_vm13, %v5805_v7, %v5806_v12  ;;  %v11069_v25 = vmax.f32 %v16150_v37, %v2194_v47  ;;  %v11078_v28 = vmax.f32 %v16156_v23, %v2200_v15  ;;  %v2002_v46 = vsel %vm1996_vm13, %v5820_v13, %v5821_v17  ;;  %v16165_v17 = vld [vmem:[#allocation3_spill] sm:$0xff] }
 0x247   :  { %6108 = vrot.lane.b32.xlu1 %v16153_v9, %s7250_s21  ;;  %16154 = vst [vmem:[#allocation56_spill] sm:$0xff] %v11065_v33  ;;  %v2193_v53 = vsel %vm188_vm14, %v1999_v48, %v16157_v61  ;;  %v5816_v9 = vunpack.i.h.bf16 %v5814_v41  ;;  %v11082_v12 = vmax.f32 %v16149_v44, %v2195_v45  ;;  %v5815_v7 = vunpack.i.l.bf16 %v5814_v41  ;;  %v16164_v48 = vld [vmem:[#allocation85_spill] sm:$0xff] }
 0x248   :  { %16155 = vst [vmem:[#allocation119_spill] sm:$0xff] %v11069_v25  ;;  %16158 = vst [vmem:[#allocation55_spill] sm:$0xff] %v11078_v28  ;;  %v11085_v37 = vmax.f32 %v16157_v61, %v2193_v53  ;;  %v5831_v47 = vunpack.i.h.bf16 %v5829_v27  ;;  %v16162_v25 = vld [vmem:[#allocation78_spill] sm:$0xff]  ;;  %v2199_v23 = vsel %vm188_vm14, %v2002_v46, %v16164_v48  ;;  %v5830_v44 = vunpack.i.l.bf16 %v5829_v27  ;;  %v5824_v41 = vpop.permute.xlu0 %5823  ;;  %v16170_v46 = vld [vmem:[#allocation51_spill] sm:$0xff] }
 0x249   :  { %16159 = vst [vmem:[#allocation120_spill] sm:$0xff] %v11082_v12  ;;  %v16163_v52 = vpack.i.bf16 %v16161_v62, %v16162_v25  ;;  %v2198_v13 = vsel %vm189_vm12, %v5816_v9, %v16165_v17  ;;  %v11099_v61 = vpack.i.bf16 %v11065_v33, %v11052_v35  ;;  %v2001_v45 = vsel %vm1996_vm13, %v5815_v7, %v5816_v9  ;;  %v16168_v25 = vld [vmem:[#allocation2_spill] sm:$0xff] }
 0x24a   :  { %16160 = vst [vmem:[#allocation59_spill] sm:$0xff] %v11085_v37  ;;  %v11103_v15 = vmax.f32 %v16165_v17, %v2198_v13  ;;  %v11110_v53 = vpack.i.bf16 %v11082_v12, %v11085_v37  ;;  %v2197_v27 = vsel %vm188_vm14, %v2001_v45, %v16170_v46  ;;  %v2004_v62 = vsel %vm1996_vm13, %v5830_v44, %v5831_v47  ;;  %v5839_v17 = vpop.permute.xlu1 %5838 }
 0x24b   :  { %6103 = vrot.lane.b32.xlu0 %v16163_v52, %s7250_s21  ;;  %16166 = vst [vmem:[#allocation121_spill] sm:$0xff] %v11099_v61  ;;  %v2204_v52 = vsel %vm189_vm12, %v5831_v47, %v16168_v25  ;;  %v5826_v7 = vunpack.i.h.bf16 %v5824_v41  ;;  %v11120_v13 = vmax.f32 %v16164_v48, %v2199_v23  ;;  %v11123_v33 = vmax.f32 %v16170_v46, %v2197_v27  ;;  %v16177_v23 = vld [vmem:[#allocation86_spill] sm:$0xff] }
 0x24c   :  { %16167 = vst [vmem:[#allocation58_spill] sm:$0xff] %v11103_v15  ;;  %16169 = vst [vmem:[#allocation122_spill] sm:$0xff] %v11110_v53  ;;  %v11117_v9 = vmax.f32 %v16168_v25, %v2204_v52  ;;  %v5825_v35 = vunpack.i.l.bf16 %v5824_v41  ;;  %v5841_v12 = vunpack.i.h.bf16 %v5839_v17  ;;  %6118 = vrot.lane.b32.xlu1 %v11110_v53, %s7247_s5  ;;  %v16174_v47 = vunpack.i.l.bf16 %v10818_v31  ;;  %v16176_v25 = vld [vmem:[#allocation89_spill] sm:$0xff]  ;;  %v5834_v37 = vpop.permute.xlu0 %5833 }
 0x24d   :  { %16172 = vst [vmem:[#allocation123_spill] sm:$0xff] %v11120_v13  ;;  %16173 = vst [vmem:[#allocation61_spill] sm:$0xff] %v11123_v33  ;;  %v16175_v44 = vunpack.i.h.bf16 %v10852_v5  ;;  %v2203_v48 = vsel %vm188_vm14, %v2004_v62, %v16176_v25  ;;  %v2202_v52 = vsel %vm189_vm12, %v5826_v7, %v16177_v23  ;;  %v5840_v41 = vunpack.i.l.bf16 %v5839_v17  ;;  %v16180_v62 = vld [vmem:[#allocation83_spill] sm:$0xff] }
 0x24e   :  { %16171 = vst [vmem:[#allocation62_spill] sm:$0xff] %v11117_v9  ;;  %v2003_v46 = vsel %vm1996_vm13, %v5825_v35, %v5826_v7  ;;  %v11142_v27 = vmax.f32 %v16177_v23, %v2202_v52  ;;  %v2208_v5 = vsel %vm189_vm12, %v5841_v12, %v9756_v20  ;;  %v5836_v7 = vunpack.i.h.bf16 %v5834_v37  ;;  %v5849_v23 = vpop.permute.xlu1 %5848 }
 0x24f   :  { %6113 = vrot.lane.b32.xlu0 %v11099_v61, %s7247_s5  ;;  %v1281_v45 = vsel %vm1159_vm9, %v16175_v44, %v16174_v47  ;;  %v11149_v47 = vpack.i.bf16 %v11120_v13, %v11123_v33  ;;  %v2201_v44 = vsel %vm188_vm14, %v2003_v46, %v16180_v62  ;;  %v11155_v17 = vmax.f32 %v9756_v20, %v2208_v5  ;;  %v7239_v20 = vld [vmem:[%s14639_s0 + $0x3c0] sm:$0xff] }
 0x250   :  { %16178 = vst [vmem:[#allocation124_spill] sm:$0xff] %v11142_v27  ;;  %v2006_v35 = vsel %vm1996_vm13, %v5840_v41, %v5841_v12  ;;  %v11159_v52 = vmax.f32 %v16176_v25, %v2203_v48  ;;  %v11162_v61 = vmax.f32 %v16180_v62, %v2201_v44  ;;  %v5835_v53 = vunpack.i.l.bf16 %v5834_v37  ;;  %v16184_v41 = vld [vmem:[#allocation60_spill] sm:$0xff]  ;;  %v16186_v62 = vld [vmem:[#allocation57_spill] sm:$0xff]  ;;  %v5844_v33 = vpop.permute.xlu0 %5843 }
 0x251   :  { %16179 = vst [vmem:[#allocation65_spill] sm:$0xff] %v11149_v47  ;;  %16181 = vst [vmem:[#allocation125_spill] sm:$0xff] %v11155_v17  ;;  %v5851_v13 = vunpack.i.h.bf16 %v5849_v23  ;;  %v1536_v12 = vsel %vm186_vm10, %v11044_v59, %v7239_v20  ;;  %v2207_v25 = vsel %vm188_vm14, %v2006_v35, %v16184_v41  ;;  %v2206_v37 = vsel %vm189_vm12, %v5836_v7, %v9795_v8  ;;  %v16188_v35 = vld [vmem:[#allocation84_spill] sm:$0xff] }
 0x252   :  { %16182 = vst [vmem:[#allocation64_spill] sm:$0xff] %v11159_v52  ;;  %16183 = vst [vmem:[#allocation126_spill] sm:$0xff] %v11162_v61  ;;  %v5850_v48 = vunpack.i.l.bf16 %v5849_v23  ;;  %v2005_v46 = vsel %vm1996_vm13, %v5835_v53, %v5836_v7  ;;  %v11180_v5 = vmax.f32 %v9795_v8, %v2206_v37  ;;  %v11187_v59 = vpack.i.bf16 %v11159_v52, %v11162_v61  ;;  %v5859_v7 = vpop.permute.xlu1 %5858 }
 0x253   :  { %6123 = vrot.lane.b32.xlu0 %v11149_v47, %s7247_s5  ;;  %v2212_v44 = vsel %vm189_vm12, %v5851_v13, %v16186_v62  ;;  %v2205_v47 = vsel %vm188_vm14, %v2005_v46, %v16188_v35  ;;  %v5846_v8 = vunpack.i.h.bf16 %v5844_v33  ;;  %v11197_v37 = vmax.f32 %v16184_v41, %v2207_v25  ;;  %v16192_v41 = vld [vmem:[#allocation5_spill] sm:$0xff]  ;;  %v16193_v25 = vld [vmem:[#allocation6_spill] sm:$0xff] }
 0x254   :  { %16185 = vst [vmem:[#allocation68_spill] sm:$0xff] %v11180_v5  ;;  %16187 = vst [vmem:[#allocation127_spill] sm:$0xff] %v11187_v59  ;;  %v2008_v23 = vsel %vm1996_vm13, %v5850_v48, %v5851_v13  ;;  %v11194_v53 = vmax.f32 %v16186_v62, %v2212_v44  ;;  %v11200_v5 = vmax.f32 %v16188_v35, %v2205_v47  ;;  %v5845_v17 = vunpack.i.l.bf16 %v5844_v33  ;;  %v11207_v13 = vld [vmem:[%s14639_s0 + $0x3c8] sm:$0xff] }
 0x255   :  { %16190 = vst [vmem:[#allocation128_spill] sm:$0xff] %v11197_v37  ;;  %v5861_v52 = vunpack.i.h.bf16 %v5859_v7  ;;  %6128 = vrot.lane.b32.xlu1 %v11187_v59, %s7247_s5  ;;  %v11212_v48 = vsel %vm187_vm11, %v1281_v45, %v11207_v13  ;;  %v2211_v47 = vsel %vm188_vm14, %v2008_v23, %v16192_v41  ;;  %v2210_v33 = vsel %vm189_vm12, %v5846_v8, %v16193_v25  ;;  %v5854_v45 = vpop.permute.xlu0 %5853  ;;  %v16196_v23 = vld [vmem:[#allocation88_spill] sm:$0xff] }
 0x256   :  { %16189 = vst [vmem:[#allocation67_spill] sm:$0xff] %v11194_v53  ;;  %16191 = vst [vmem:[#allocation71_spill] sm:$0xff] %v11200_v5  ;;  %v5860_v46 = vunpack.i.l.bf16 %v5859_v7  ;;  %v2007_v62 = vsel %vm1996_vm13, %v5845_v17, %v5846_v8  ;;  %v11222_v44 = vmax.f32 %v16193_v25, %v2210_v33  ;;  %v11229_v61 = vpack.i.bf16 %v11197_v37, %v11200_v5  ;;  %v5869_v25 = vpop.permute.xlu1 %5868 }
 0x257   :  { %v2216_v35 = vsel %vm189_vm12, %v5861_v52, %v9875_v60  ;;  %v2209_v59 = vsel %vm188_vm14, %v2007_v62, %v16196_v23  ;;  %v5856_v8 = vunpack.i.h.bf16 %v5854_v45  ;;  %v11239_v33 = vmax.f32 %v16192_v41, %v2211_v47 }
 0x258   :  { %16194 = vst [vmem:[#allocation129_spill] sm:$0xff] %v11222_v44  ;;  %16195 = vst [vmem:[#allocation70_spill] sm:$0xff] %v11229_v61  ;;  %v11235_v7 = vmax.f32 %v9875_v60, %v2216_v35  ;;  %v2010_v17 = vsel %vm1996_vm13, %v5860_v46, %v5861_v52  ;;  %v11242_v44 = vmax.f32 %v16196_v23, %v2209_v59  ;;  %v5855_v53 = vunpack.i.l.bf16 %v5854_v45  ;;  %v16202_v52 = vld [vmem:[#allocation90_spill] sm:$0xff] }
 0x259   :  { %16198 = vst [vmem:[#allocation74_spill] sm:$0xff] %v11239_v33  ;;  %v5871_v37 = vunpack.i.h.bf16 %v5869_v25  ;;  %6133 = vrot.lane.b32.xlu0 %v11229_v61, %s7247_s5  ;;  %v16200_v62 = vunpack.i.h.bf16 %v10860_v39  ;;  %v16201_v60 = vunpack.i.l.bf16 %v10860_v39  ;;  %v2215_v46 = vsel %vm188_vm14, %v2010_v17, %v16202_v52  ;;  %v5864_v5 = vpop.permute.xlu0 %5863  ;;  %v16205_v17 = vld [vmem:[#allocation4_spill] sm:$0xff] }
 0x25a   :  { %16197 = vst [vmem:[#allocation130_spill] sm:$0xff] %v11235_v7  ;;  %16199 = vst [vmem:[#allocation131_spill] sm:$0xff] %v11242_v44  ;;  %v2214_v59 = vsel %vm189_vm12, %v5856_v8, %v9888_v6  ;;  %v5870_v41 = vunpack.i.l.bf16 %v5869_v25  ;;  %v2009_v47 = vsel %vm1996_vm13, %v5855_v53, %v5856_v8  ;;  %v5879_v8 = vpop.permute.xlu1 %5878 }
 0x25b   :  { %v1284_v35 = vsel %vm1159_vm9, %v16201_v60, %v16200_v62  ;;  %v11259_v45 = vmax.f32 %v9888_v6, %v2214_v59  ;;  %v2220_v23 = vsel %vm189_vm12, %v5871_v37, %v9974_v54  ;;  %v11266_v62 = vpack.i.bf16 %v11239_v33, %v11242_v44 }
 0x25c   :  { %v2213_v60 = vsel %vm188_vm14, %v2009_v47, %v16205_v17  ;;  %v2012_v25 = vsel %vm1996_vm13, %v5870_v41, %v5871_v37  ;;  %v11273_v53 = vmax.f32 %v9974_v54, %v2220_v23  ;;  %v5866_v6 = vunpack.i.h.bf16 %v5864_v5  ;;  %v16209_v47 = vld [vmem:[#allocation9_spill] sm:$0xff] }
 0x25d   :  { %16203 = vst [vmem:[#allocation73_spill] sm:$0xff] %v11259_v45  ;;  %16204 = vst [vmem:[#allocation132_spill] sm:$0xff] %v11266_v62  ;;  %v11276_v59 = vmax.f32 %v16202_v52, %v2215_v46  ;;  %v11279_v61 = vmax.f32 %v16205_v17, %v2213_v60  ;;  %v5865_v45 = vunpack.i.l.bf16 %v5864_v5  ;;  %v5881_v33 = vunpack.i.h.bf16 %v5879_v8  ;;  %6138 = vrot.lane.b32.xlu1 %v11266_v62, %s7247_s5  ;;  %v16211_v5 = vld [vmem:[#allocation93_spill] sm:$0xff]  ;;  %v16213_v17 = vld [vmem:[#allocation91_spill] sm:$0xff] }
 0x25e   :  { %16206 = vst [vmem:[#allocation77_spill] sm:$0xff] %v11273_v53  ;;  %v11283_v44 = vmax.f32 %v7239_v20, %v1536_v12  ;;  %v2219_v54 = vsel %vm188_vm14, %v2012_v25, %v16209_v47  ;;  %v2218_v37 = vsel %vm189_vm12, %v5866_v6, %v10010_v49  ;;  %v5880_v52 = vunpack.i.l.bf16 %v5879_v8  ;;  %v5874_v20 = vpop.permute.xlu0 %5873 }
 0x25f   :  { %16207 = vst [vmem:[#allocation133_spill] sm:$0xff] %v11276_v59  ;;  %16208 = vst [vmem:[#allocation76_spill] sm:$0xff] %v11279_v61  ;;  %v2011_v46 = vsel %vm1996_vm13, %v5865_v45, %v5866_v6  ;;  %v11293_v41 = vmax.f32 %v10010_v49, %v2218_v37  ;;  %v2224_v23 = vsel %vm189_vm12, %v5881_v33, %v16211_v5  ;;  %v5876_v49 = vunpack.i.h.bf16 %v5874_v20  ;;  %v5889_v6 = vpop.permute.xlu1 %5888 }
 0x260   :  { %v11300_v12 = vpack.i.bf16 %v11276_v59, %v11279_v61  ;;  %v2217_v60 = vsel %vm188_vm14, %v2011_v46, %v16213_v17  ;;  %v11306_v25 = vmax.f32 %v16211_v5, %v2224_v23  ;;  %v2014_v45 = vsel %vm1996_vm13, %v5880_v52, %v5881_v33  ;;  %v11320_v46 = vld [vmem:[%s14639_s0 + $0x3e0] sm:$0xff]  ;;  %v16218_v52 = vld [vmem:[#allocation12_spill] sm:$0xff] }
 0x261   :  { %16210 = vst [vmem:[#allocation134_spill] sm:$0xff] %v11293_v41  ;;  %v11310_v8 = vmax.f32 %v16209_v47, %v2219_v54  ;;  %v11313_v37 = vmax.f32 %v16213_v17, %v2217_v60  ;;  %v5875_v62 = vunpack.i.l.bf16 %v5874_v20  ;;  %v5891_v59 = vunpack.i.h.bf16 %v5889_v6  ;;  %v16217_v47 = vld [vmem:[#allocation94_spill] sm:$0xff]  ;;  %v16220_v60 = vld [vmem:[#allocation15_spill] sm:$0xff] }
 0x262   :  { %16212 = vst [vmem:[#allocation42_spill] sm:$0xff] %v11300_v12  ;;  %16214 = vst [vmem:[#allocation80_spill] sm:$0xff] %v11306_v25  ;;  %6143 = vrot.lane.b32.xlu0 %v11300_v12, %s7247_s5  ;;  %v11325_v33 = vsel %vm186_vm10, %v1284_v35, %v11320_v46  ;;  %v2223_v54 = vsel %vm188_vm14, %v2014_v45, %v16217_v47  ;;  %v2222_v5 = vsel %vm189_vm12, %v5876_v49, %v16218_v52  ;;  %v5884_v35 = vpop.permute.xlu0 %5883  ;;  %v16222_v45 = vld [vmem:[#allocation11_spill] sm:$0xff] }
 0x263   :  { %16215 = vst [vmem:[#allocation69_spill] sm:$0xff] %v11310_v8  ;;  %16216 = vst [vmem:[#allocation45_spill] sm:$0xff] %v11313_v37  ;;  %v5890_v23 = vunpack.i.l.bf16 %v5889_v6  ;;  %v2013_v20 = vsel %vm1996_vm13, %v5875_v62, %v5876_v49  ;;  %v11335_v17 = vmax.f32 %v16218_v52, %v2222_v5  ;;  %v2228_v61 = vsel %vm189_vm12, %v5891_v59, %v16220_v60  ;;  %v5899_v52 = vpop.permute.xlu1 %5898 }
 0x264   :  { %v11342_v12 = vpack.i.bf16 %v11310_v8, %v11313_v37  ;;  %v2221_v25 = vsel %vm188_vm14, %v2013_v20, %v16222_v45  ;;  %v11349_v62 = vmax.f32 %v16220_v60, %v2228_v61  ;;  %v5886_v49 = vunpack.i.h.bf16 %v5884_v35  ;;  %v16226_v37 = vld [vmem:[#allocation96_spill] sm:$0xff]  ;;  %v16229_v60 = vld [vmem:[#allocation19_spill] sm:$0xff] }
 0x265   :  { %16219 = vst [vmem:[#allocation87_spill] sm:$0xff] %v11335_v17  ;;  %v2016_v6 = vsel %vm1996_vm13, %v5890_v23, %v5891_v59  ;;  %v11352_v5 = vmax.f32 %v16217_v47, %v2223_v54  ;;  %v11355_v17 = vmax.f32 %v16222_v45, %v2221_v25  ;;  %v5885_v41 = vunpack.i.l.bf16 %v5884_v35  ;;  %v16227_v59 = vld [vmem:[#allocation14_spill] sm:$0xff] }
 0x266   :  { %16221 = vst [vmem:[#allocation33_spill] sm:$0xff] %v11342_v12  ;;  %16223 = vst [vmem:[#allocation79_spill] sm:$0xff] %v11349_v62  ;;  %v5901_v8 = vunpack.i.h.bf16 %v5899_v52  ;;  %6148 = vrot.lane.b32.xlu1 %v11342_v12, %s7247_s5  ;;  %v2227_v61 = vsel %vm188_vm14, %v2016_v6, %v16226_v37  ;;  %v2226_v23 = vsel %vm189_vm12, %v5886_v49, %v16227_v59  ;;  %v5900_v47 = vunpack.i.l.bf16 %v5899_v52  ;;  %v5894_v45 = vpop.permute.xlu0 %5893  ;;  %v16231_v6 = vld [vmem:[#allocation8_spill] sm:$0xff] }
 0x267   :  { %16224 = vst [vmem:[#allocation72_spill] sm:$0xff] %v11352_v5  ;;  %16225 = vst [vmem:[#allocation39_spill] sm:$0xff] %v11355_v17  ;;  %v2015_v54 = vsel %vm1996_vm13, %v5885_v41, %v5886_v49  ;;  %v11368_v25 = vmax.f32 %v16227_v59, %v2226_v23  ;;  %v11375_v20 = vpack.i.bf16 %v11352_v5, %v11355_v17  ;;  %v5896_v49 = vunpack.i.h.bf16 %v5894_v45  ;;  %v5909_v59 = vpop.permute.xlu1 %5908  ;;  %v16235_v5 = vld [vmem:[#allocation17_spill] sm:$0xff] }
 0x268   :  { %v2232_v35 = vsel %vm189_vm12, %v5901_v8, %v16229_v60  ;;  %v2225_v12 = vsel %vm188_vm14, %v2015_v54, %v16231_v6  ;;  %v2018_v41 = vsel %vm1996_vm13, %v5900_v47, %v5901_v8  ;;  %v11385_v23 = vmax.f32 %v16226_v37, %v2227_v61  ;;  %v16236_v8 = vld [vmem:[#allocation100_spill] sm:$0xff] }
 0x269   :  { %16228 = vst [vmem:[#allocation36_spill] sm:$0xff] %v11368_v25  ;;  %16230 = vst [vmem:[#allocation82_spill] sm:$0xff] %v11375_v20  ;;  %v11381_v52 = vmax.f32 %v16229_v60, %v2232_v35  ;;  %v11388_v25 = vmax.f32 %v16231_v6, %v2225_v12  ;;  %v5895_v62 = vunpack.i.l.bf16 %v5894_v45  ;;  %v5911_v17 = vunpack.i.h.bf16 %v5909_v59  ;;  %6153 = vrot.lane.b32.xlu0 %v11375_v20, %s7247_s5 }
 0x26a   :  { %16233 = vst [vmem:[#allocation7_spill] sm:$0xff] %v11385_v23  ;;  %v2231_v60 = vsel %vm188_vm14, %v2018_v41, %v16235_v5  ;;  %v2230_v47 = vsel %vm189_vm12, %v5896_v49, %v16236_v8  ;;  %v5910_v37 = vunpack.i.l.bf16 %v5909_v59  ;;  %v5904_v45 = vpop.permute.xlu0 %5903  ;;  %v16239_v41 = vld [vmem:[#allocation10_spill] sm:$0xff] }
 0x26b   :  { %16232 = vst [vmem:[#allocation75_spill] sm:$0xff] %v11381_v52  ;;  %16234 = vst [vmem:[#allocation28_spill] sm:$0xff] %v11388_v25  ;;  %v2017_v61 = vsel %vm1996_vm13, %v5895_v62, %v5896_v49  ;;  %v11401_v12 = vmax.f32 %v16236_v8, %v2230_v47  ;;  %v2236_v35 = vsel %vm189_vm12, %v5911_v17, %v10212_v40  ;;  %v5906_v49 = vunpack.i.h.bf16 %v5904_v45  ;;  %v5919_v8 = vpop.permute.xlu1 %5918 }
 0x26c   :  { %v11408_v6 = vpack.i.bf16 %v11385_v23, %v11388_v25  ;;  %v2229_v54 = vsel %vm188_vm14, %v2017_v61, %v16239_v41  ;;  %v2020_v59 = vsel %vm1996_vm13, %v5910_v37, %v5911_v17  ;;  %v11415_v62 = vmax.f32 %v10212_v40, %v2236_v35  ;;  %v16243_v23 = vld [vmem:[#allocation13_spill] sm:$0xff] }
 0x26d   :  { %16237 = vst [vmem:[#allocation81_spill] sm:$0xff] %v11401_v12  ;;  %v11418_v47 = vmax.f32 %v16235_v5, %v2231_v60  ;;  %v11421_v20 = vmax.f32 %v16239_v41, %v2229_v54  ;;  %v5905_v12 = vunpack.i.l.bf16 %v5904_v45  ;;  %v5921_v25 = vunpack.i.h.bf16 %v5919_v8  ;;  %v16246_v41 = vld [vmem:[#allocation95_spill] sm:$0xff] }
 0x26e   :  { %16238 = vst [vmem:[#allocation78_spill] sm:$0xff] %v11408_v6  ;;  %16240 = vst [vmem:[#allocation85_spill] sm:$0xff] %v11415_v62  ;;  %6158 = vrot.lane.b32.xlu1 %v11408_v6, %s7247_s5  ;;  %v2235_v40 = vsel %vm188_vm14, %v2020_v59, %v16243_v23  ;;  %v2234_v17 = vsel %vm189_vm12, %v5906_v49, %v10234_v42  ;;  %v5920_v5 = vunpack.i.l.bf16 %v5919_v8  ;;  %v5914_v35 = vpop.permute.xlu0 %5913 }
 0x26f   :  { %16241 = vst [vmem:[#allocation3_spill] sm:$0xff] %v11418_v47  ;;  %16242 = vst [vmem:[#allocation2_spill] sm:$0xff] %v11421_v20  ;;  %v2019_v60 = vsel %vm1996_vm13, %v5905_v12, %v5906_v49  ;;  %v11434_v54 = vmax.f32 %v10234_v42, %v2234_v17  ;;  %v2240_v37 = vsel %vm189_vm12, %v5921_v25, %v10260_v32  ;;  %v5916_v42 = vunpack.i.h.bf16 %v5914_v35  ;;  %v5929_v49 = vpop.permute.xlu1 %5928 }
 0x270   :  { %v11441_v45 = vpack.i.bf16 %v11418_v47, %v11421_v20  ;;  %v2233_v59 = vsel %vm188_vm14, %v2019_v60, %v16246_v41  ;;  %v11447_v8 = vmax.f32 %v10260_v32, %v2240_v37  ;;  %v2022_v12 = vsel %vm1996_vm13, %v5920_v5, %v5921_v25  ;;  %v16250_v47 = vld [vmem:[#allocation99_spill] sm:$0xff] }
 0x271   :  { %16244 = vst [vmem:[#allocation51_spill] sm:$0xff] %v11434_v54  ;;  %v11451_v17 = vmax.f32 %v16243_v23, %v2235_v40  ;;  %v11454_v61 = vmax.f32 %v16246_v41, %v2233_v59  ;;  %v5915_v6 = vunpack.i.l.bf16 %v5914_v35  ;;  %v5931_v20 = vunpack.i.h.bf16 %v5929_v49  ;;  %v16253_v59 = vld [vmem:[#allocation18_spill] sm:$0xff] }
 0x272   :  { %16245 = vst [vmem:[#allocation89_spill] sm:$0xff] %v11441_v45  ;;  %16247 = vst [vmem:[#allocation86_spill] sm:$0xff] %v11447_v8  ;;  %6163 = vrot.lane.b32.xlu0 %v11441_v45, %s7247_s5  ;;  %v2239_v32 = vsel %vm188_vm14, %v2022_v12, %v16250_v47  ;;  %v2238_v25 = vsel %vm189_vm12, %v5916_v42, %v10264_v36  ;;  %v5930_v23 = vunpack.i.l.bf16 %v5929_v49  ;;  %v5924_v35 = vpop.permute.xlu0 %5923 }
 0x273   :  { %16248 = vst [vmem:[#allocation83_spill] sm:$0xff] %v11451_v17  ;;  %16249 = vst [vmem:[#allocation60_spill] sm:$0xff] %v11454_v61  ;;  %v2021_v40 = vsel %vm1996_vm13, %v5915_v6, %v5916_v42  ;;  %v11467_v5 = vmax.f32 %v10264_v36, %v2238_v25  ;;  %v2244_v37 = vsel %vm189_vm12, %v5931_v20, %v10266_v50  ;;  %v5926_v36 = vunpack.i.h.bf16 %v5924_v35  ;;  %v5939_v42 = vpop.permute.xlu1 %5938 }
 0x274   :  { %v11474_v41 = vpack.i.bf16 %v11451_v17, %v11454_v61  ;;  %v2237_v12 = vsel %vm188_vm14, %v2021_v40, %v16253_v59  ;;  %v2024_v49 = vsel %vm1996_vm13, %v5930_v23, %v5931_v20  ;;  %v11481_v6 = vmax.f32 %v10266_v50, %v2244_v37  ;;  %v16257_v17 = vld [vmem:[#allocation21_spill] sm:$0xff]  ;;  %v16258_v23 = vld [vmem:[#allocation102_spill] sm:$0xff] }
 0x275   :  { %16251 = vst [vmem:[#allocation57_spill] sm:$0xff] %v11467_v5  ;;  %v11484_v25 = vmax.f32 %v16250_v47, %v2239_v32  ;;  %v11487_v60 = vmax.f32 %v16253_v59, %v2237_v12  ;;  %v5925_v45 = vunpack.i.l.bf16 %v5924_v35  ;;  %v5941_v61 = vunpack.i.h.bf16 %v5939_v42  ;;  %v16260_v35 = vld [vmem:[#allocation103_spill] sm:$0xff] }
 0x276   :  { %16252 = vst [vmem:[#allocation84_spill] sm:$0xff] %v11474_v41  ;;  %16254 = vst [vmem:[#allocation5_spill] sm:$0xff] %v11481_v6  ;;  %6168 = vrot.lane.b32.xlu1 %v11474_v41, %s7247_s5  ;;  %v2243_v20 = vsel %vm188_vm14, %v2024_v49, %v16257_v17  ;;  %v2242_v50 = vsel %vm189_vm12, %v5926_v36, %v16258_v23  ;;  %v5940_v40 = vunpack.i.l.bf16 %v5939_v42  ;;  %v5934_v12 = vpop.permute.xlu0 %5933  ;;  %v16262_v41 = vld [vmem:[#allocation16_spill] sm:$0xff] }
 0x277   :  { %16255 = vst [vmem:[#allocation6_spill] sm:$0xff] %v11484_v25  ;;  %16256 = vst [vmem:[#allocation88_spill] sm:$0xff] %v11487_v60  ;;  %v11499_v47 = vmax.f32 %v11207_v13, %v11212_v48  ;;  %v2023_v32 = vsel %vm1996_vm13, %v5925_v45, %v5926_v36  ;;  %v11503_v37 = vmax.f32 %v16258_v23, %v2242_v50  ;;  %v5936_v45 = vunpack.i.h.bf16 %v5934_v12  ;;  %v5949_v36 = vpop.permute.xlu1 %5948 }
 0x278   :  { %v2248_v59 = vsel %vm189_vm12, %v5941_v61, %v16260_v35  ;;  %v11510_v49 = vpack.i.bf16 %v11484_v25, %v11487_v60  ;;  %v2241_v42 = vsel %vm188_vm14, %v2023_v32, %v16262_v41  ;;  %v2026_v48 = vsel %vm1996_vm13, %v5940_v40, %v5941_v61  ;;  %v16268_v61 = vld [vmem:[#allocation22_spill] sm:$0xff] }
 0x279   :  { %16259 = vst [vmem:[#allocation90_spill] sm:$0xff] %v11503_v37  ;;  %v11516_v13 = vmax.f32 %v16260_v35, %v2248_v59  ;;  %v11520_v23 = vmax.f32 %v16257_v17, %v2243_v20  ;;  %v11523_v50 = vmax.f32 %v16262_v41, %v2241_v42  ;;  %v5935_v37 = vunpack.i.l.bf16 %v5934_v12  ;;  %v16269_v17 = vld [vmem:[#allocation101_spill] sm:$0xff] }
 0x27a   :  { %16261 = vst [vmem:[#allocation4_spill] sm:$0xff] %v11510_v49  ;;  %v5951_v60 = vunpack.i.h.bf16 %v5949_v36  ;;  %6173 = vrot.lane.b32.xlu0 %v11510_v49, %s7247_s5  ;;  %v16266_v32 = vunpack.i.l.bf16 %v10903_v1  ;;  %v16267_v35 = vunpack.i.h.bf16 %v10818_v31  ;;  %v2247_v40 = vsel %vm188_vm14, %v2026_v48, %v16268_v61  ;;  %v5944_v25 = vpop.permute.xlu0 %5943  ;;  %v16272_v48 = vld [vmem:[#allocation104_spill] sm:$0xff] }
 0x27b   :  { %16263 = vst [vmem:[#allocation9_spill] sm:$0xff] %v11516_v13  ;;  %16264 = vst [vmem:[#allocation93_spill] sm:$0xff] %v11520_v23  ;;  %v2246_v41 = vsel %vm189_vm12, %v5936_v45, %v16269_v17  ;;  %v5950_v20 = vunpack.i.l.bf16 %v5949_v36  ;;  %v2025_v12 = vsel %vm1996_vm13, %v5935_v37, %v5936_v45  ;;  %v5946_v45 = vunpack.i.h.bf16 %v5944_v25 }
 0x27c   :  { %16265 = vst [vmem:[#allocation91_spill] sm:$0xff] %v11523_v50  ;;  %v1282_v59 = vsel %vm1159_vm9, %v16267_v35, %v16266_v32  ;;  %v11540_v42 = vmax.f32 %v16269_v17, %v2246_v41  ;;  %v2252_v31 = vsel %vm189_vm12, %v5951_v60, %v10384_v18  ;;  %v11547_v32 = vpack.i.bf16 %v11520_v23, %v11523_v50  ;;  %v5959_v17 = vpop.permute.xlu1 %5958 }
 0x27d   :  { %v2245_v35 = vsel %vm188_vm14, %v2025_v12, %v16272_v48  ;;  %v2028_v36 = vsel %vm1996_vm13, %v5950_v20, %v5951_v60  ;;  %v11554_v37 = vmax.f32 %v10384_v18, %v2252_v31  ;;  %v11557_v41 = vmax.f32 %v16268_v61, %v2247_v40  ;;  %v16278_v20 = vld [vmem:[#allocation23_spill] sm:$0xff] }
 0x27e   :  { %16270 = vst [vmem:[#allocation94_spill] sm:$0xff] %v11540_v42  ;;  %16271 = vst [vmem:[#allocation12_spill] sm:$0xff] %v11547_v32  ;;  %v11560_v49 = vmax.f32 %v16272_v48, %v2245_v35  ;;  %v5945_v42 = vunpack.i.l.bf16 %v5944_v25  ;;  %v5961_v50 = vunpack.i.h.bf16 %v5959_v17  ;;  %6178 = vrot.lane.b32.xlu1 %v11547_v32, %s7247_s5  ;;  %v16276_v12 = vunpack.i.h.bf16 %v10903_v1  ;;  %v5954_v35 = vpop.permute.xlu0 %5953 }
 0x27f   :  { %16273 = vst [vmem:[#allocation15_spill] sm:$0xff] %v11554_v37  ;;  %16274 = vst [vmem:[#allocation11_spill] sm:$0xff] %v11557_v41  ;;  %v16277_v60 = vunpack.i.l.bf16 %v10903_v1  ;;  %v2251_v31 = vsel %vm188_vm14, %v2028_v36, %v16278_v20  ;;  %v2250_v61 = vsel %vm189_vm12, %v5946_v45, %v10388_v51  ;;  %v5960_v40 = vunpack.i.l.bf16 %v5959_v17  ;;  %v16281_v36 = vld [vmem:[#allocation20_spill] sm:$0xff] }
 0x280   :  { %16275 = vst [vmem:[#allocation96_spill] sm:$0xff] %v11560_v49  ;;  %v2027_v25 = vsel %vm1996_vm13, %v5945_v42, %v5946_v45  ;;  %v11577_v48 = vmax.f32 %v10388_v51, %v2250_v61  ;;  %v2256_v1 = vsel %vm189_vm12, %v5961_v50, %v10400_v34  ;;  %v5956_v51 = vunpack.i.h.bf16 %v5954_v35  ;;  %v5969_v45 = vpop.permute.xlu1 %5968 }
 0x281   :  { %v1283_v18 = vsel %vm1159_vm9, %v16277_v60, %v16276_v12  ;;  %v11584_v12 = vpack.i.bf16 %v11557_v41, %v11560_v49  ;;  %v2249_v60 = vsel %vm188_vm14, %v2027_v25, %v16281_v36  ;;  %v11590_v17 = vmax.f32 %v10400_v34, %v2256_v1  ;;  %v7242_v34 = vld [vmem:[%s14639_s0 + $0x3d0] sm:$0xff] }
 0x282   :  { %16279 = vst [vmem:[#allocation14_spill] sm:$0xff] %v11577_v48  ;;  %v2030_v42 = vsel %vm1996_vm13, %v5960_v40, %v5961_v50  ;;  %v11594_v61 = vmax.f32 %v16278_v20, %v2251_v31  ;;  %v11597_v23 = vmax.f32 %v16281_v36, %v2249_v60  ;;  %v5955_v32 = vunpack.i.l.bf16 %v5954_v35  ;;  %v5964_v36 = vpop.permute.xlu0 %5963  ;;  %v16287_v60 = vld [vmem:[#allocation97_spill] sm:$0xff] }
 0x283   :  { %16280 = vst [vmem:[#allocation19_spill] sm:$0xff] %v11584_v12  ;;  %16282 = vst [vmem:[#allocation8_spill] sm:$0xff] %v11590_v17  ;;  %v5971_v49 = vunpack.i.h.bf16 %v5969_v45  ;;  %6183 = vrot.lane.b32.xlu0 %v11584_v12, %s7247_s5  ;;  %v1538_v50 = vsel %vm186_vm10, %v1282_v59, %v7242_v34  ;;  %v2255_v20 = vsel %vm188_vm14, %v2030_v42, %v10375_v4  ;;  %v5970_v40 = vunpack.i.l.bf16 %v5969_v45 }
 0x284   :  { %16283 = vst [vmem:[#allocation17_spill] sm:$0xff] %v11594_v61  ;;  %16284 = vst [vmem:[#allocation100_spill] sm:$0xff] %v11597_v23  ;;  %v2254_v31 = vsel %vm189_vm12, %v5956_v51, %v10402_v57  ;;  %v2029_v25 = vsel %vm1996_vm13, %v5955_v32, %v5956_v51  ;;  %v11621_v59 = vpack.i.bf16 %v11594_v61, %v11597_v23  ;;  %v5979_v51 = vpop.permute.xlu1 %5978  ;;  %v5965_v12 = vunpack.i.l.bf16 %v5964_v36 }
 0x285   :  { %v11614_v1 = vmax.f32 %v10402_v57, %v2254_v31  ;;  %v2260_v35 = vsel %vm189_vm12, %v5971_v49, %v10415_v29  ;;  %v2253_v42 = vsel %vm188_vm14, %v2029_v25, %v16287_v60  ;;  %v2032_v45 = vsel %vm1996_vm13, %v5970_v40, %v5971_v49  ;;  %v11641_v49 = vld [vmem:[%s14639_s0 + $0x3d8] sm:$0xff] }
 0x286   :  { %16286 = vst [vmem:[#allocation13_spill] sm:$0xff] %v11621_v59  ;;  %v11628_v32 = vmax.f32 %v10415_v29, %v2260_v35  ;;  %v5966_v57 = vunpack.i.h.bf16 %v5964_v36  ;;  %v11631_v31 = vmax.f32 %v10375_v4, %v2255_v20  ;;  %v11634_v41 = vmax.f32 %v16287_v60, %v2253_v42  ;;  %6188 = vrot.lane.b32.xlu1 %v11621_v59, %s7247_s5  ;;  %v16291_v4 = vld [vmem:[#allocation24_spill] sm:$0xff] }
 0x287   :  { %16285 = vst [vmem:[#allocation10_spill] sm:$0xff] %v11614_v1  ;;  %v5981_v61 = vunpack.i.h.bf16 %v5979_v51  ;;  %v11646_v29 = vsel %vm187_vm11, %v1283_v18, %v11641_v49  ;;  %v2259_v20 = vsel %vm188_vm14, %v2032_v45, %v16291_v4  ;;  %v5980_v25 = vunpack.i.l.bf16 %v5979_v51  ;;  %v5974_v18 = vpop.permute.xlu0 %5973  ;;  %v16294_v45 = vld [vmem:[#allocation25_spill] sm:$0xff] }
 0x288   :  { %16288 = vst [vmem:[#allocation95_spill] sm:$0xff] %v11628_v32  ;;  %16289 = vst [vmem:[#allocation99_spill] sm:$0xff] %v11631_v31  ;;  %v2258_v40 = vsel %vm189_vm12, %v5966_v57, %v10443_v10  ;;  %v2031_v35 = vsel %vm1996_vm13, %v5965_v12, %v5966_v57  ;;  %v11663_v42 = vpack.i.bf16 %v11631_v31, %v11634_v41  ;;  %v5989_v57 = vpop.permute.xlu1 %5988 }
 0x289   :  { %16290 = vst [vmem:[#allocation18_spill] sm:$0xff] %v11634_v41  ;;  %v11656_v36 = vmax.f32 %v10443_v10, %v2258_v40  ;;  %v2264_v60 = vsel %vm189_vm12, %v5981_v61, %v10493_v14  ;;  %v2257_v23 = vsel %vm188_vm14, %v2031_v35, %v16294_v45  ;;  %v2034_v12 = vsel %vm1996_vm13, %v5980_v25, %v5981_v61 }
 0x28a   :  { %16293 = vst [vmem:[#allocation102_spill] sm:$0xff] %v11663_v42  ;;  %v11669_v51 = vmax.f32 %v10493_v14, %v2264_v60  ;;  %v5976_v10 = vunpack.i.h.bf16 %v5974_v18  ;;  %v11673_v40 = vmax.f32 %v16291_v4, %v2259_v20  ;;  %v11676_v59 = vmax.f32 %v16294_v45, %v2257_v23  ;;  %6193 = vrot.lane.b32.xlu0 %v11663_v42, %s7247_s5  ;;  %v16300_v4 = vld [vmem:[#allocation92_spill] sm:$0xff]  ;;  %v16302_v45 = vld [vmem:[#allocation107_spill] sm:$0xff] }
 0x28b   :  { %16292 = vst [vmem:[#allocation21_spill] sm:$0xff] %v11656_v36  ;;  %v5975_v36 = vunpack.i.l.bf16 %v5974_v18  ;;  %v5991_v31 = vunpack.i.h.bf16 %v5989_v57  ;;  %v16298_v35 = vunpack.i.h.bf16 %v10909_v56  ;;  %v16299_v14 = vunpack.i.l.bf16 %v10909_v56  ;;  %v5984_v42 = vpop.permute.xlu0 %5983 }
 0x28c   :  { %16295 = vst [vmem:[#allocation103_spill] sm:$0xff] %v11669_v51  ;;  %16296 = vst [vmem:[#allocation16_spill] sm:$0xff] %v11673_v40  ;;  %v2263_v61 = vsel %vm188_vm14, %v2034_v12, %v10489_v55  ;;  %v2262_v23 = vsel %vm189_vm12, %v5976_v10, %v16300_v4  ;;  %v5990_v20 = vunpack.i.l.bf16 %v5989_v57  ;;  %v16304_v12 = vld [vmem:[#allocation27_spill] sm:$0xff]  ;;  %v5985_v51 = vunpack.i.l.bf16 %v5984_v42 }
 0x28d   :  { %16297 = vst [vmem:[#allocation22_spill] sm:$0xff] %v11676_v59  ;;  %v1287_v60 = vsel %vm1159_vm9, %v16299_v14, %v16298_v35  ;;  %v2033_v25 = vsel %vm1996_vm13, %v5975_v36, %v5976_v10  ;;  %v11693_v18 = vmax.f32 %v16300_v4, %v2262_v23  ;;  %v2268_v41 = vsel %vm189_vm12, %v5991_v31, %v16302_v45  ;;  %v5999_v4 = vpop.permute.xlu1 %5998 }
 0x28e   :  { %v11700_v35 = vpack.i.bf16 %v11673_v40, %v11676_v59  ;;  %v2261_v14 = vsel %vm188_vm14, %v2033_v25, %v16304_v12  ;;  %v2036_v57 = vsel %vm1996_vm13, %v5990_v20, %v5991_v31  ;;  %v11707_v36 = vmax.f32 %v16302_v45, %v2268_v41  ;;  %v16308_v25 = vld [vmem:[#allocation106_spill] sm:$0xff] }
 0x28f   :  { %16301 = vst [vmem:[#allocation101_spill] sm:$0xff] %v11693_v18  ;;  %v5986_v10 = vunpack.i.h.bf16 %v5984_v42  ;;  %v11710_v23 = vmax.f32 %v10489_v55, %v2263_v61  ;;  %v11713_v18 = vmax.f32 %v16304_v12, %v2261_v14  ;;  %v6001_v40 = vunpack.i.h.bf16 %v5999_v4  ;;  %v16309_v31 = vld [vmem:[#allocation26_spill] sm:$0xff]  ;;  %v16311_v42 = vld [vmem:[#allocation32_spill] sm:$0xff] }
 0x290   :  { %16303 = vst [vmem:[#allocation104_spill] sm:$0xff] %v11700_v35  ;;  %16305 = vst [vmem:[#allocation23_spill] sm:$0xff] %v11707_v36  ;;  %6198 = vrot.lane.b32.xlu1 %v11700_v35, %s7247_s5  ;;  %v11717_v59 = vmax.f32 %v7242_v34, %v1538_v50  ;;  %v2267_v41 = vsel %vm188_vm14, %v2036_v57, %v16308_v25  ;;  %v6000_v55 = vunpack.i.l.bf16 %v5999_v4  ;;  %v5994_v34 = vpop.permute.xlu0 %5993  ;;  %v16313_v14 = vld [vmem:[#allocation108_spill] sm:$0xff] }
 0x291   :  { %16306 = vst [vmem:[#allocation20_spill] sm:$0xff] %v11710_v23  ;;  %16307 = vst [vmem:[#allocation97_spill] sm:$0xff] %v11713_v18  ;;  %v2266_v20 = vsel %vm189_vm12, %v5986_v10, %v16309_v31  ;;  %v2035_v61 = vsel %vm1996_vm13, %v5985_v51, %v5986_v10  ;;  %v2272_v12 = vsel %vm189_vm12, %v6001_v40, %v16311_v42  ;;  %v5996_v10 = vunpack.i.h.bf16 %v5994_v34 }
 0x292   :  { %v11727_v45 = vmax.f32 %v16309_v31, %v2266_v20  ;;  %v11734_v50 = vpack.i.bf16 %v11710_v23, %v11713_v18  ;;  %v2265_v57 = vsel %vm188_vm14, %v2035_v61, %v16313_v14  ;;  %v11740_v4 = vmax.f32 %v16311_v42, %v2272_v12  ;;  %v6009_v31 = vpop.permute.xlu1 %6008  ;;  %v11754_v61 = vld [vmem:[%s14639_s0 + $0x3f8] sm:$0xff] }
 0x293   :  { %v2038_v51 = vsel %vm1996_vm13, %v6000_v55, %v6001_v40  ;;  %v11744_v20 = vmax.f32 %v16308_v25, %v2267_v41  ;;  %v11747_v35 = vmax.f32 %v16313_v14, %v2265_v57  ;;  %v6011_v23 = vunpack.i.h.bf16 %v6009_v31  ;;  %v16317_v25 = vld [vmem:[#allocation63_spill] sm:$0xff]  ;;  %v16318_v55 = vld [vmem:[#allocation29_spill] sm:$0xff]  ;;  %v16320_v57 = vld [vmem:[#allocation98_spill] sm:$0xff] }
 0x294   :  { %16310 = vst [vmem:[#allocation24_spill] sm:$0xff] %v11727_v45  ;;  %16312 = vst [vmem:[#allocation25_spill] sm:$0xff] %v11734_v50  ;;  %v5995_v45 = vunpack.i.l.bf16 %v5994_v34  ;;  %6203 = vrot.lane.b32.xlu0 %v11734_v50, %s7247_s5  ;;  %v11759_v40 = vsel %vm187_vm11, %v1287_v60, %v11754_v61  ;;  %v2271_v41 = vsel %vm188_vm14, %v2038_v51, %v16317_v25  ;;  %v6010_v12 = vunpack.i.l.bf16 %v6009_v31  ;;  %v6004_v60 = vpop.permute.xlu0 %6003  ;;  %v16322_v51 = vld [vmem:[#allocation30_spill] sm:$0xff] }
 0x295   :  { %16314 = vst [vmem:[#allocation92_spill] sm:$0xff] %v11740_v4  ;;  %16315 = vst [vmem:[#allocation107_spill] sm:$0xff] %v11744_v20  ;;  %v2270_v42 = vsel %vm189_vm12, %v5996_v10, %v16318_v55  ;;  %v2276_v18 = vsel %vm189_vm12, %v6011_v23, %v16320_v57  ;;  %v11776_v50 = vpack.i.bf16 %v11744_v20, %v11747_v35  ;;  %v6005_v36 = vunpack.i.l.bf16 %v6004_v60 }
 0x296   :  { %16316 = vst [vmem:[#allocation27_spill] sm:$0xff] %v11747_v35  ;;  %v2037_v34 = vsel %vm1996_vm13, %v5995_v45, %v5996_v10  ;;  %v11769_v14 = vmax.f32 %v16318_v55, %v2270_v42  ;;  %v2040_v31 = vsel %vm1996_vm13, %v6010_v12, %v6011_v23  ;;  %v11783_v45 = vmax.f32 %v16320_v57, %v2276_v18  ;;  %v6019_v55 = vpop.permute.xlu1 %6018  ;;  %v16326_v35 = vld [vmem:[#allocation110_spill] sm:$0xff] }
 0x297   :  { %16321 = vst [vmem:[#allocation26_spill] sm:$0xff] %v11776_v50  ;;  %v2269_v4 = vsel %vm188_vm14, %v2037_v34, %v16322_v51  ;;  %v6006_v10 = vunpack.i.h.bf16 %v6004_v60  ;;  %v11786_v42 = vmax.f32 %v16317_v25, %v2271_v41  ;;  %v6021_v20 = vunpack.i.h.bf16 %v6019_v55  ;;  %6208 = vrot.lane.b32.xlu1 %v11776_v50, %s7247_s5 }
 0x298   :  { %16319 = vst [vmem:[#allocation106_spill] sm:$0xff] %v11769_v14  ;;  %16323 = vst [vmem:[#allocation32_spill] sm:$0xff] %v11783_v45  ;;  %v11789_v14 = vmax.f32 %v16322_v51, %v2269_v4  ;;  %v2275_v18 = vsel %vm188_vm14, %v2040_v31, %v16326_v35  ;;  %v6020_v25 = vunpack.i.l.bf16 %v6019_v55  ;;  %v6014_v57 = vpop.permute.xlu0 %6013  ;;  %v16329_v51 = vld [vmem:[#allocation105_spill] sm:$0xff] }
 0x299   :  { %16324 = vst [vmem:[#allocation108_spill] sm:$0xff] %v11786_v42  ;;  %v2274_v23 = vsel %vm189_vm12, %v6006_v10, %v10660_v30  ;;  %v2039_v41 = vsel %vm1996_vm13, %v6005_v36, %v6006_v10  ;;  %v2280_v12 = vsel %vm189_vm12, %v6021_v20, %v10683_v11  ;;  %v6015_v50 = vunpack.i.l.bf16 %v6014_v57 }
 0x29a   :  { %16325 = vst [vmem:[#allocation63_spill] sm:$0xff] %v11789_v14  ;;  %v11802_v4 = vmax.f32 %v10660_v30, %v2274_v23  ;;  %v11809_v60 = vpack.i.bf16 %v11786_v42, %v11789_v14  ;;  %v2273_v31 = vsel %vm188_vm14, %v2039_v41, %v16329_v51  ;;  %v11815_v55 = vmax.f32 %v10683_v11, %v2280_v12  ;;  %v6029_v10 = vpop.permute.xlu1 %6028  ;;  %v16333_v14 = vld [vmem:[#allocation35_spill] sm:$0xff] }
 0x29b   :  { %v2042_v36 = vsel %vm1996_vm13, %v6020_v25, %v6021_v20  ;;  %v6016_v30 = vunpack.i.h.bf16 %v6014_v57  ;;  %v11819_v23 = vmax.f32 %v16326_v35, %v2275_v18  ;;  %v11822_v34 = vmax.f32 %v16329_v51, %v2273_v31  ;;  %v16334_v20 = vld [vmem:[#allocation34_spill] sm:$0xff] }
 0x29c   :  { %16327 = vst [vmem:[#allocation29_spill] sm:$0xff] %v11802_v4  ;;  %16328 = vst [vmem:[#allocation98_spill] sm:$0xff] %v11809_v60  ;;  %v6031_v42 = vunpack.i.h.bf16 %v6029_v10  ;;  %6213 = vrot.lane.b32.xlu0 %v11809_v60, %s7247_s5  ;;  %v5785_v41 = vunpack.i.l.bf16 %v10956_v38  ;;  %v2279_v11 = vsel %vm188_vm14, %v2042_v36, %v16333_v14  ;;  %v6030_v35 = vunpack.i.l.bf16 %v6029_v10  ;;  %v6024_v51 = vpop.permute.xlu0 %6023  ;;  %v16337_v36 = vld [vmem:[#allocation111_spill] sm:$0xff] }
 0x29d   :  { %16330 = vst [vmem:[#allocation30_spill] sm:$0xff] %v11815_v55  ;;  %16331 = vst [vmem:[#allocation110_spill] sm:$0xff] %v11819_v23  ;;  %v2278_v25 = vsel %vm189_vm12, %v6016_v30, %v16334_v20  ;;  %v2041_v18 = vsel %vm1996_vm13, %v6015_v50, %v6016_v30  ;;  %v11842_v31 = vpack.i.bf16 %v11819_v23, %v11822_v34  ;;  %v6026_v30 = vunpack.i.h.bf16 %v6024_v51 }
 0x29e   :  { %16332 = vst [vmem:[#allocation105_spill] sm:$0xff] %v11822_v34  ;;  %v11835_v12 = vmax.f32 %v16334_v20, %v2278_v25  ;;  %v2284_v57 = vsel %vm189_vm12, %v6031_v42, %v10737_v19  ;;  %v2277_v60 = vsel %vm188_vm14, %v2041_v18, %v16337_v36  ;;  %v2044_v10 = vsel %vm1996_vm13, %v6030_v35, %v6031_v42  ;;  %v6039_v20 = vpop.permute.xlu1 %6038  ;;  %v16341_v34 = vld [vmem:[#allocation38_spill] sm:$0xff] }
 0x29f   :  { %16336 = vst [vmem:[#allocation34_spill] sm:$0xff] %v11842_v31  ;;  %v11849_v50 = vmax.f32 %v10737_v19, %v2284_v57  ;;  %v11852_v25 = vmax.f32 %v16333_v14, %v2279_v11  ;;  %v6025_v55 = vunpack.i.l.bf16 %v6024_v51  ;;  %v6041_v23 = vunpack.i.h.bf16 %v6039_v20  ;;  %6218 = vrot.lane.b32.xlu1 %v11842_v31, %s7247_s5  ;;  %v16353_v31 = vld [vmem:[#allocation109_spill] sm:$0xff] }
 0x2a0   :  { %16335 = vst [vmem:[#allocation35_spill] sm:$0xff] %v11835_v12  ;;  %v11855_v12 = vmax.f32 %v16337_v36, %v2277_v60  ;;  %v2283_v42 = vsel %vm188_vm14, %v2044_v10, %v16341_v34  ;;  %v2282_v19 = vsel %vm189_vm12, %v6026_v30, %v10750_v24  ;;  %v6040_v35 = vunpack.i.l.bf16 %v6039_v20  ;;  %v6034_v57 = vpop.permute.xlu0 %6033  ;;  %v16344_v36 = vld [vmem:[#allocation31_spill] sm:$0xff] }
 0x2a1   :  { %16338 = vst [vmem:[#allocation111_spill] sm:$0xff] %v11849_v50  ;;  %16339 = vst [vmem:[#allocation135_spill] sm:$0xff] %v11852_v25  ;;  %v11867_v14 = vmax.f32 %v11641_v49, %v11646_v29  ;;  %v2043_v60 = vsel %vm1996_vm13, %v6025_v55, %v6026_v30  ;;  %v11871_v11 = vmax.f32 %v10750_v24, %v2282_v19  ;;  %v6036_v24 = vunpack.i.h.bf16 %v6034_v57 }
 0x2a2   :  { %16340 = vst [vmem:[#allocation136_spill] sm:$0xff] %v11855_v12  ;;  %v2288_v18 = vsel %vm189_vm12, %v6041_v23, %v10820_v63  ;;  %v11878_v51 = vpack.i.bf16 %v11852_v25, %v11855_v12  ;;  %v2281_v10 = vsel %vm188_vm14, %v2043_v60, %v16344_v36  ;;  %v2046_v29 = vsel %vm1996_vm13, %v6040_v35, %v6041_v23  ;;  %v6049_v55 = vpop.permute.xlu1 %6048  ;;  %v16348_v12 = vld [vmem:[#allocation40_spill] sm:$0xff]  ;;  %v16349_v60 = vld [vmem:[#allocation41_spill] sm:$0xff] }
 0x2a3   :  { %16342 = vst [vmem:[#allocation38_spill] sm:$0xff] %v11871_v11  ;;  %v11884_v49 = vmax.f32 %v10820_v63, %v2288_v18  ;;  %v11888_v30 = vmax.f32 %v16341_v34, %v2283_v42  ;;  %v11891_v20 = vmax.f32 %v16344_v36, %v2281_v10  ;;  %v6035_v19 = vunpack.i.l.bf16 %v6034_v57  ;;  %v16351_v57 = vld [vmem:[#allocation44_spill] sm:$0xff] }
 0x2a4   :  { %16343 = vst [vmem:[#allocation137_spill] sm:$0xff] %v11878_v51  ;;  %v6051_v25 = vunpack.i.h.bf16 %v6049_v55  ;;  %6223 = vrot.lane.b32.xlu0 %v11878_v51, %s7247_s5  ;;  %v2287_v63 = vsel %vm188_vm14, %v2046_v29, %v16348_v12  ;;  %v2286_v23 = vsel %vm189_vm12, %v6036_v24, %v16349_v60  ;;  %v6050_v35 = vunpack.i.l.bf16 %v6049_v55  ;;  %v6044_v10 = vpop.permute.xlu0 %6043 }
 0x2a5   :  { %16345 = vst [vmem:[#allocation31_spill] sm:$0xff] %v11884_v49  ;;  %16346 = vst [vmem:[#allocation138_spill] sm:$0xff] %v11888_v30  ;;  %v11903_v34 = vmax.f32 %v11754_v61, %v11759_v40  ;;  %v2045_v42 = vsel %vm1996_vm13, %v6035_v19, %v6036_v24  ;;  %v11907_v18 = vmax.f32 %v16349_v60, %v2286_v23  ;;  %v6046_v24 = vunpack.i.h.bf16 %v6044_v10 }
 0x2a6   :  { %16347 = vst [vmem:[#allocation139_spill] sm:$0xff] %v11891_v20  ;;  %v2292_v36 = vsel %vm189_vm12, %v6051_v25, %v16351_v57  ;;  %v11914_v29 = vpack.i.bf16 %v11888_v30, %v11891_v20  ;;  %v2285_v55 = vsel %vm188_vm14, %v2045_v42, %v16353_v31  ;;  %v2048_v61 = vsel %vm1996_vm13, %v6050_v35, %v6051_v25  ;;  %v6059_v19 = vpop.permute.xlu1 %6058  ;;  %v16358_v35 = vld [vmem:[#allocation66_spill] sm:$0xff] }
 0x2a7   :  { %16350 = vst [vmem:[#allocation40_spill] sm:$0xff] %v11907_v18  ;;  %v11921_v40 = vmax.f32 %v16351_v57, %v2292_v36  ;;  %v11924_v60 = vmax.f32 %v16348_v12, %v2287_v63  ;;  %v11927_v23 = vmax.f32 %v16353_v31, %v2285_v55  ;;  %v6045_v51 = vunpack.i.l.bf16 %v6044_v10  ;;  %v16359_v36 = vld [vmem:[#allocation112_spill] sm:$0xff] }
 0x2a8   :  { %16352 = vst [vmem:[#allocation41_spill] sm:$0xff] %v11914_v29  ;;  %v6061_v30 = vunpack.i.h.bf16 %v6059_v19  ;;  %6228 = vrot.lane.b32.xlu1 %v11914_v29, %s7247_s5  ;;  %v16357_v42 = vunpack.i.h.bf16 %v10860_v39  ;;  %v2291_v57 = vsel %vm188_vm14, %v2048_v61, %v16358_v35  ;;  %v2290_v12 = vsel %vm189_vm12, %v6046_v24, %v16359_v36  ;;  %v6054_v55 = vpop.permute.xlu0 %6053  ;;  %v16362_v61 = vld [vmem:[#allocation37_spill] sm:$0xff] }
 0x2a9   :  { %16354 = vst [vmem:[#allocation44_spill] sm:$0xff] %v11921_v40  ;;  %16355 = vst [vmem:[#allocation109_spill] sm:$0xff] %v11924_v60  ;;  %v6060_v63 = vunpack.i.l.bf16 %v6059_v19  ;;  %v2047_v31 = vsel %vm1996_vm13, %v6045_v51, %v6046_v24  ;;  %v11942_v10 = vmax.f32 %v16359_v36, %v2290_v12  ;;  %v6056_v24 = vunpack.i.h.bf16 %v6054_v55 }
 0x2aa   :  { %16356 = vst [vmem:[#allocation140_spill] sm:$0xff] %v11927_v23  ;;  %v1285_v25 = vsel %vm1159_vm9, %v16357_v42, %v5785_v41  ;;  %v2296_v39 = vsel %vm189_vm12, %v6061_v30, %v10940_v22  ;;  %v11949_v41 = vpack.i.bf16 %v11924_v60, %v11927_v23  ;;  %v2289_v42 = vsel %vm188_vm14, %v2047_v31, %v16362_v61  ;;  %v6069_v36 = vpop.permute.xlu1 %6068 }
 0x2ab   :  { %16360 = vst [vmem:[#allocation66_spill] sm:$0xff] %v11942_v10  ;;  %v11955_v19 = vmax.f32 %v10940_v22, %v2296_v39  ;;  %v2050_v51 = vsel %vm1996_vm13, %v6060_v63, %v6061_v30  ;;  %v11959_v12 = vmax.f32 %v16358_v35, %v2291_v57  ;;  %v11962_v20 = vmax.f32 %v16362_v61, %v2289_v42  ;;  %v16368_v35 = vld [vmem:[#allocation113_spill] sm:$0xff] }
 0x2ac   :  { %16361 = vst [vmem:[#allocation112_spill] sm:$0xff] %v11949_v41  ;;  %v6055_v29 = vunpack.i.l.bf16 %v6054_v55  ;;  %v6071_v23 = vunpack.i.h.bf16 %v6069_v36  ;;  %6233 = vrot.lane.b32.xlu0 %v11949_v41, %s7247_s5  ;;  %v16366_v31 = vunpack.i.l.bf16 %v10909_v56  ;;  %v16367_v22 = vunpack.i.h.bf16 %v10956_v38  ;;  %v6064_v38 = vpop.permute.xlu0 %6063 }
 0x2ad   :  { %16363 = vst [vmem:[#allocation37_spill] sm:$0xff] %v11955_v19  ;;  %16364 = vst [vmem:[#allocation141_spill] sm:$0xff] %v11959_v12  ;;  %v2295_v30 = vsel %vm188_vm14, %v2050_v51, %v10911_v26  ;;  %v2294_v57 = vsel %vm189_vm12, %v6056_v24, %v16368_v35  ;;  %v6070_v63 = vunpack.i.l.bf16 %v6069_v36  ;;  %v11986_v42 = vpack.i.bf16 %v11959_v12, %v11962_v20  ;;  %v16371_v51 = vld [vmem:[#allocation43_spill] sm:$0xff] }
 0x2ae   :  { %16365 = vst [vmem:[#allocation142_spill] sm:$0xff] %v11962_v20  ;;  %v1286_v39 = vsel %vm1159_vm9, %v16367_v22, %v16366_v31  ;;  %v2049_v55 = vsel %vm1996_vm13, %v6055_v29, %v6056_v24  ;;  %v11979_v61 = vmax.f32 %v16368_v35, %v2294_v57  ;;  %v2300_v56 = vsel %vm189_vm12, %v6071_v23, %v10942_v3  ;;  %v6079_v22 = vpop.permute.xlu1 %6078 }
 0x2af   :  { %16370 = vst [vmem:[#allocation143_spill] sm:$0xff] %v11986_v42  ;;  %v2293_v31 = vsel %vm188_vm14, %v2049_v55, %v16371_v51  ;;  %v2052_v36 = vsel %vm1996_vm13, %v6070_v63, %v6071_v23  ;;  %v11993_v29 = vmax.f32 %v10942_v3, %v2300_v56  ;;  %v6066_v24 = vunpack.i.h.bf16 %v6064_v38  ;;  %6238 = vrot.lane.b32.xlu1 %v11986_v42, %s7247_s5  ;;  %v7245_v23 = vld [vmem:[%s14639_s0 + $0x3e8] sm:$0xff]  ;;  %v16375_v63 = vld [vmem:[#allocation46_spill] sm:$0xff] }
 0x2b0   :  { %16369 = vst [vmem:[#allocation113_spill] sm:$0xff] %v11979_v61  ;;  %v11996_v35 = vmax.f32 %v10911_v26, %v2295_v30  ;;  %v11999_v57 = vmax.f32 %v16371_v51, %v2293_v31  ;;  %v6065_v60 = vunpack.i.l.bf16 %v6064_v38  ;;  %v6081_v20 = vunpack.i.h.bf16 %v6079_v22  ;;  %v6074_v31 = vpop.permute.xlu0 %6073 }
 0x2b1   :  { %16372 = vst [vmem:[#allocation43_spill] sm:$0xff] %v11993_v29  ;;  %v1541_v3 = vsel %vm187_vm11, %v1285_v25, %v7245_v23  ;;  %v2299_v26 = vsel %vm188_vm14, %v2052_v36, %v16375_v63  ;;  %v2298_v30 = vsel %vm189_vm12, %v6066_v24, %v10958_v0  ;;  %v6080_v55 = vunpack.i.l.bf16 %v6079_v22  ;;  %v16378_v36 = vld [vmem:[#allocation47_spill] sm:$0xff] }
 0x2b2   :  { %16373 = vst [vmem:[#allocation144_spill] sm:$0xff] %v11996_v35  ;;  %16374 = vst [vmem:[#allocation145_spill] sm:$0xff] %v11999_v57  ;;  %v2051_v56 = vsel %vm1996_vm13, %v6065_v60, %v6066_v24  ;;  %v12016_v38 = vmax.f32 %v10958_v0, %v2298_v30  ;;  %v2304_v51 = vsel %vm189_vm12, %v6081_v20, %v10985_v43  ;;  %v6076_v0 = vunpack.i.h.bf16 %v6074_v31  ;;  %v6089_v24 = vpop.permute.xlu1 %6088 }
 0x2b3   :  { %v12023_v25 = vpack.i.bf16 %v11996_v35, %v11999_v57  ;;  %v2297_v12 = vsel %vm188_vm14, %v2051_v56, %v16378_v36  ;;  %v12029_v22 = vmax.f32 %v10985_v43, %v2304_v51  ;;  %v2054_v60 = vsel %vm1996_vm13, %v6080_v55, %v6081_v20  ;;  %v7246_v43 = vld [vmem:[%s14639_s0 + $0x3f0] sm:$0xff]  ;;  %v16383_v51 = vld [vmem:[#allocation115_spill] sm:$0xff]  ;;  %s7251_s0 = smov 74  }
 0x2b4   :  { %16376 = vst [vmem:[#allocation46_spill] sm:$0xff] %v12016_v38  ;;  %v12033_v30 = vmax.f32 %v16375_v63, %v2299_v26  ;;  %v12036_v41 = vmax.f32 %v16378_v36, %v2297_v12  ;;  %v6075_v42 = vunpack.i.l.bf16 %v6074_v31  ;;  %v6091_v57 = vunpack.i.h.bf16 %v6089_v24  ;;  %v6084_v36 = vpop.permute.xlu0 %6083 }
 0x2b5   :  { %16377 = vst [vmem:[#allocation146_spill] sm:$0xff] %v12023_v25  ;;  %16379 = vst [vmem:[#allocation47_spill] sm:$0xff] %v12029_v22  ;;  %6243 = vrot.lane.b32.xlu0 %v12023_v25, %s7247_s5  ;;  %v1542_v20 = vsel %vm186_vm10, %v1286_v39, %v7246_v43  ;;  %v2303_v63 = vsel %vm188_vm14, %v2054_v60, %v10977_v21  ;;  %v2302_v12 = vsel %vm189_vm12, %v6076_v0, %v10975_v2  ;;  %v16385_v60 = vld [vmem:[#allocation114_spill] sm:$0xff] }
 0x2b6   :  { %16380 = vst [vmem:[#allocation147_spill] sm:$0xff] %v12033_v30  ;;  %16381 = vst [vmem:[#allocation148_spill] sm:$0xff] %v12036_v41  ;;  %v6090_v26 = vunpack.i.l.bf16 %v6089_v24  ;;  %v2053_v55 = vsel %vm1996_vm13, %v6075_v42, %v6076_v0  ;;  %v12053_v56 = vmax.f32 %v10975_v2, %v2302_v12  ;;  %v2308_v31 = vsel %vm189_vm12, %v6091_v57, %v16383_v51  ;;  %v6099_v0 = vpop.permute.xlu1 %6098 }
 0x2b7   :  { %v12060_v39 = vpack.i.bf16 %v12033_v30, %v12036_v41  ;;  %v2301_v35 = vsel %vm188_vm14, %v2053_v55, %v16385_v60  ;;  %v12067_v42 = vmax.f32 %v16383_v51, %v2308_v31  ;;  %v6086_v2 = vunpack.i.h.bf16 %v6084_v36  ;;  %v16389_v55 = vld [vmem:[#allocation116_spill] sm:$0xff] }
 0x2b8   :  { %16382 = vst [vmem:[#allocation149_spill] sm:$0xff] %v12053_v56  ;;  %v2056_v24 = vsel %vm1996_vm13, %v6090_v26, %v6091_v57  ;;  %v12070_v12 = vmax.f32 %v10977_v21, %v2303_v63  ;;  %v12073_v25 = vmax.f32 %v16385_v60, %v2301_v35  ;;  %v6085_v56 = vunpack.i.l.bf16 %v6084_v36  ;;  %v16390_v26 = vld [vmem:[#allocation53_spill] sm:$0xff]  ;;  %v6094_v36 = vpop.permute.xlu0 %6093 }
 0x2b9   :  { %16384 = vst [vmem:[#allocation115_spill] sm:$0xff] %v12060_v39  ;;  %16386 = vst [vmem:[#allocation114_spill] sm:$0xff] %v12067_v42  ;;  %v6101_v41 = vunpack.i.h.bf16 %v6099_v0  ;;  %6248 = vrot.lane.b32.xlu1 %v12060_v39, %s7247_s5  ;;  %v1670_v30 = vmax.f32 %v7246_v43, %v1542_v20  ;;  %v2307_v57 = vsel %vm188_vm14, %v2056_v24, %v16389_v55  ;;  %v6100_v31 = vunpack.i.l.bf16 %v6099_v0  ;;  %v16393_v20 = vld [vmem:[#allocation50_spill] sm:$0xff] }
 0x2ba   :  { %16387 = vst [vmem:[#allocation150_spill] sm:$0xff] %v12070_v12  ;;  %16388 = vst [vmem:[#allocation151_spill] sm:$0xff] %v12073_v25  ;;  %v2306_v51 = vsel %vm189_vm12, %v6086_v2, %v16390_v26  ;;  %v2055_v21 = vsel %vm1996_vm13, %v6085_v56, %v6086_v2  ;;  %v12092_v43 = vpack.i.bf16 %v12070_v12, %v12073_v25  ;;  %v6096_v2 = vunpack.i.h.bf16 %v6094_v36  ;;  %v6109_v0 = vpop.permute.xlu1 %6108 }
 0x2bb   :  { %v12085_v35 = vmax.f32 %v16390_v26, %v2306_v51  ;;  %v2312_v63 = vsel %vm189_vm12, %v6101_v41, %v11867_v14  ;;  %v2305_v60 = vsel %vm188_vm14, %v2055_v21, %v16393_v20  ;;  %v2058_v56 = vsel %vm1996_vm13, %v6100_v31, %v6101_v41 }
 0x2bc   :  { %16392 = vst [vmem:[#allocation53_spill] sm:$0xff] %v12092_v43  ;;  %v12098_v24 = vmax.f32 %v11867_v14, %v2312_v63  ;;  %v12102_v26 = vmax.f32 %v16389_v55, %v2307_v57  ;;  %v12105_v51 = vmax.f32 %v16393_v20, %v2305_v60  ;;  %v6095_v39 = vunpack.i.l.bf16 %v6094_v36  ;;  %6253 = vrot.lane.b32.xlu0 %v12092_v43, %s7247_s5 }
 0x2bd   :  { %16391 = vst [vmem:[#allocation116_spill] sm:$0xff] %v12085_v35  ;;  %v6111_v25 = vunpack.i.h.bf16 %v6109_v0  ;;  %v2311_v14 = vsel %vm188_vm14, %v2058_v56, %v11717_v59  ;;  %v2310_v41 = vsel %vm189_vm12, %v6096_v2, %v11499_v47  ;;  %v6110_v31 = vunpack.i.l.bf16 %v6109_v0  ;;  %v6104_v36 = vpop.permute.xlu0 %6103 }
 0x2be   :  { %16394 = vst [vmem:[#allocation50_spill] sm:$0xff] %v12098_v24  ;;  %16395 = vst [vmem:[#allocation152_spill] sm:$0xff] %v12102_v26  ;;  %v1669_v21 = vmax.f32 %v7245_v23, %v1541_v3  ;;  %v2057_v55 = vsel %vm1996_vm13, %v6095_v39, %v6096_v2  ;;  %v12117_v57 = vmax.f32 %v11499_v47, %v2310_v41  ;;  %v6106_v47 = vunpack.i.h.bf16 %v6104_v36 }
 0x2bf   :  { %16396 = vst [vmem:[#allocation153_spill] sm:$0xff] %v12105_v51  ;;  %v2316_v63 = vsel %vm189_vm12, %v6111_v25, %v11903_v34  ;;  %v12124_v20 = vpack.i.bf16 %v12102_v26, %v12105_v51  ;;  %v2309_v60 = vsel %vm188_vm14, %v2057_v55, %v11283_v44  ;;  %v2060_v23 = vsel %vm1996_vm13, %v6110_v31, %v6111_v25 }
 0x2c0   :  { %16397 = vst [vmem:[#allocation154_spill] sm:$0xff] %v12117_v57  ;;  %v12131_v3 = vmax.f32 %v11903_v34, %v2316_v63  ;;  %v12134_v39 = vmax.f32 %v11717_v59, %v2311_v14  ;;  %v12137_v56 = vmax.f32 %v11283_v44, %v2309_v60  ;;  %v6105_v2 = vunpack.i.l.bf16 %v6104_v36  ;;  %v12150_v14 = vpop.permute.xlu1 %6118  ;;  %v16406_v60 = vld [vmem:[#allocation49_spill] sm:$0xff] }
 0x2c1   :  { %16398 = vst [vmem:[#allocation155_spill] sm:$0xff] %v12124_v20  ;;  %6258 = vrot.lane.b32.xlu1 %v12124_v20, %s7247_s5  ;;  %v1668_v0 = vmax.f32 %v11320_v46, %v11325_v33  ;;  %v2315_v25 = vsel %vm188_vm14, %v2060_v23, %v1670_v30  ;;  %v2314_v34 = vsel %vm189_vm12, %v6106_v47, %v1669_v21  ;;  %v12152_v44 = vpop.permute.xlu0 %6113  ;;  %v15251_v33 = vunpack.i.h.bf16 %v12150_v14  ;;  %v16407_v23 = vld [vmem:[#allocation52_spill] sm:$0xff] }
 0x2c2   :  { %16399 = vst [vmem:[#allocation156_spill] sm:$0xff] %v12131_v3  ;;  %16400 = vst [vmem:[#allocation157_spill] sm:$0xff] %v12134_v39  ;;  %v2059_v41 = vsel %vm1996_vm13, %v6105_v2, %v6106_v47  ;;  %v12148_v59 = vmax.f32 %v1669_v21, %v2314_v34  ;;  %v12156_v31 = vpack.i.bf16 %v12134_v39, %v12137_v56  ;;  %v15254_v58 = vunpack.i.l.bf16 %v12150_v14  ;;  %v16410_v34 = vld [vmem:[#allocation119_spill] sm:$0xff] }
 0x2c3   :  { %16401 = vst [vmem:[#allocation158_spill] sm:$0xff] %v12137_v56  ;;  %v2313_v46 = vsel %vm188_vm14, %v2059_v41, %v1668_v0  ;;  %v15252_v55 = vunpack.i.h.bf16 %v12152_v44  ;;  %v12163_v63 = vmax.f32 %v1670_v30, %v2315_v25  ;;  %v15253_v36 = vunpack.i.l.bf16 %v12152_v44  ;;  %v16408_v30 = vld [vmem:[#allocation117_spill] sm:$0xff] }
 0x2c4   :  { %16402 = vst [vmem:[#allocation159_spill] sm:$0xff] %v12148_v59  ;;  %16403 = vst [vmem:[#allocation160_spill] sm:$0xff] %v12156_v31  ;;  %v12165_v21 = vmax.f32 %v1668_v0, %v2313_v46  ;;  %6263 = vrot.lane.b32.xlu0 %v12156_v31, %s7247_s5  ;;  %v12180_v47 = vsel %vm194_vm0, %v15251_v33, %v16407_v23  ;;  %v12198_v41 = vsel %vm194_vm0, %v15254_v58, %v16410_v34  ;;  %v16416_v23 = vld [vmem:[#allocation68_spill] sm:$0xff] }
 0x2c5   :  { %16404 = vst [vmem:[#allocation161_spill] sm:$0xff] %v12163_v63  ;;  %v12174_v16 = vsel %vm194_vm0, %v15252_v55, %v16406_v60  ;;  %v12186_v2 = vsel %vm194_vm0, %v15253_v36, %v16408_v30  ;;  %v12188_v0 = vpop.permute.xlu0 %6123  ;;  %v12226_v51 = vpack.i.bf16 %v12180_v47, %v12198_v41  ;;  %v16415_v30 = vld [vmem:[#allocation125_spill] sm:$0xff] }
 0x2c6   :  { %16405 = vst [vmem:[#allocation162_spill] sm:$0xff] %v12165_v21  ;;  %v12192_v25 = vpack.i.bf16 %v12163_v63, %v12165_v21  ;;  %v15261_v46 = vunpack.i.h.bf16 %v12188_v0  ;;  %v15264_v33 = vunpack.i.l.bf16 %v12188_v0  ;;  %v12204_v55 = vpack.i.bf16 %v12174_v16, %v12186_v2 }
 0x2c7   :  { %v12222_v12 = vpop.permute.xlu1 %6128  ;;  %16412 = vst [vmem:[#allocation165_spill] sm:$0xff] %v12226_v51 }
 0x2c8   :  { %16409 = vst [vmem:[#allocation163_spill] sm:$0xff] %v12192_v25  ;;  %16411 = vst [vmem:[#allocation164_spill] sm:$0xff] %v12204_v55  ;;  %6268 = vrot.lane.b32.xlu1 %v12192_v25, %s7247_s5  ;;  %v12212_v36 = vsel %vm194_vm0, %v15261_v46, %v11078_v28  ;;  %v12218_v58 = vsel %vm194_vm0, %v15264_v33, %v11103_v15  ;;  %6273 = vrot.lane.b32.xlu0 %v12204_v55, %s7247_s5  ;;  %v15271_v46 = vunpack.i.h.bf16 %v12222_v12 }
 0x2c9   :  { %v12230_v26 = vpack.i.bf16 %v12212_v36, %v12218_v58  ;;  %v15272_v56 = vunpack.i.l.bf16 %v12222_v12 }
 0x2ca   :  { %v12240_v33 = vsel %vm194_vm0, %v15271_v46, %v11117_v9 }
 0x2cb   :  { %16413 = vst [vmem:[#allocation166_spill] sm:$0xff] %v12230_v26  ;;  %v12246_v39 = vsel %vm194_vm0, %v15272_v56, %v11142_v27  ;;  %v12250_v63 = vpop.permute.xlu0 %6133 }
 0x2cc   :  { %6278 = vrot.lane.b32.xlu1 %v12226_v51, %s7247_s5  ;;  %6283 = vrot.lane.b32.xlu0 %v12230_v26, %s7247_s5  ;;  %v12254_v21 = vpack.i.bf16 %v12240_v33, %v12246_v39  ;;  %v15277_v60 = vunpack.i.h.bf16 %v12250_v63  ;;  %v15279_v46 = vunpack.i.l.bf16 %v12250_v63 }
 0x2ce   :  { %16414 = vst [vmem:[#allocation167_spill] sm:$0xff] %v12254_v21  ;;  %v12264_v56 = vsel %vm194_vm0, %v15277_v60, %v16415_v30  ;;  %v12270_v34 = vsel %vm194_vm0, %v15279_v46, %v16416_v23  ;;  %v16418_v60 = vld [vmem:[#allocation67_spill] sm:$0xff]  ;;  %v16419_v46 = vld [vmem:[#allocation129_spill] sm:$0xff] }
 0x2cf   :  { %v12272_v28 = vpop.permute.xlu1 %6138  ;;  %v12276_v15 = vpack.i.bf16 %v12264_v56, %v12270_v34 }
 0x2d0   :  { %6288 = vrot.lane.b32.xlu1 %v12254_v21, %s7247_s5  ;;  %v15283_v9 = vunpack.i.h.bf16 %v12272_v28  ;;  %v15284_v27 = vunpack.i.l.bf16 %v12272_v28 }
 0x2d1   :  { %16417 = vst [vmem:[#allocation168_spill] sm:$0xff] %v12276_v15  ;;  %6293 = vrot.lane.b32.xlu0 %v12276_v15, %s7247_s5 }
 0x2d2   :  { %v12286_v43 = vsel %vm194_vm0, %v15283_v9, %v16418_v60  ;;  %v12292_v30 = vsel %vm194_vm0, %v15284_v27, %v16419_v46  ;;  %v16423_v27 = vld [vmem:[#allocation73_spill] sm:$0xff] }
 0x2d3   :  { %v12298_v20 = vpack.i.bf16 %v12286_v43, %v12292_v30 }
 0x2d4   :  { %v12294_v23 = vpop.permute.xlu0 %6143 }
 0x2d5   :  { %16420 = vst [vmem:[#allocation169_spill] sm:$0xff] %v12294_v23  ;;  %16421 = vst [vmem:[#allocation170_spill] sm:$0xff] %v12298_v20  ;;  %v15288_v31 = vunpack.i.h.bf16 %v12294_v23  ;;  %v15289_v25 = vunpack.i.l.bf16 %v12294_v23  ;;  %6298 = vrot.lane.b32.xlu1 %v12298_v20, %s7247_s5 }
 0x2d7   :  { %v12308_v9 = vsel %vm194_vm0, %v15288_v31, %v11235_v7  ;;  %v12314_v60 = vsel %vm194_vm0, %v15289_v25, %v16423_v27  ;;  %v16426_v25 = vld [vmem:[#allocation134_spill] sm:$0xff] }
 0x2d8   :  { %16422 = vst [vmem:[#allocation171_spill] sm:$0xff] %v12308_v9  ;;  %16424 = vst [vmem:[#allocation172_spill] sm:$0xff] %v12314_v60  ;;  %v12316_v46 = vpop.permute.xlu1 %6148  ;;  %v12320_v55 = vpack.i.bf16 %v12308_v9, %v12314_v60 }
 0x2d9   :  { %v15294_v51 = vunpack.i.h.bf16 %v12316_v46  ;;  %v15296_v26 = vunpack.i.l.bf16 %v12316_v46 }
 0x2da   :  { %16425 = vst [vmem:[#allocation173_spill] sm:$0xff] %v12320_v55  ;;  %6303 = vrot.lane.b32.xlu0 %v12320_v55, %s7247_s5 }
 0x2db   :  { %v12330_v31 = vsel %vm194_vm0, %v15294_v51, %v11273_v53  ;;  %v12336_v27 = vsel %vm194_vm0, %v15296_v26, %v16426_v25  ;;  %v12338_v7 = vpop.permute.xlu0 %6153  ;;  %v16428_v51 = vld [vmem:[#allocation80_spill] sm:$0xff]  ;;  %v16430_v26 = vld [vmem:[#allocation87_spill] sm:$0xff] }
 0x2dc   :  { %16427 = vst [vmem:[#allocation174_spill] sm:$0xff] %v12338_v7  ;;  %v12342_v21 = vpack.i.bf16 %v12330_v31, %v12336_v27  ;;  %v15302_v15 = vunpack.i.h.bf16 %v12338_v7  ;;  %v15303_v20 = vunpack.i.l.bf16 %v12338_v7 }
 0x2de   :  { %6308 = vrot.lane.b32.xlu1 %v12342_v21, %s7247_s5  ;;  %v12352_v53 = vsel %vm194_vm0, %v15302_v15, %v16428_v51  ;;  %v12358_v25 = vsel %vm194_vm0, %v15303_v20, %v16430_v26  ;;  %v16434_v15 = vld [vmem:[#allocation79_spill] sm:$0xff]  ;;  %v16436_v20 = vld [vmem:[#allocation36_spill] sm:$0xff] }
 0x2df   :  { %16429 = vst [vmem:[#allocation175_spill] sm:$0xff] %v12352_v53  ;;  %16431 = vst [vmem:[#allocation176_spill] sm:$0xff] %v12358_v25  ;;  %v12364_v60 = vpack.i.bf16 %v12352_v53, %v12358_v25 }
 0x2e0   :  { %v12360_v55 = vpop.permute.xlu1 %6158 }
 0x2e1   :  { %16432 = vst [vmem:[#allocation177_spill] sm:$0xff] %v12360_v55  ;;  %16433 = vst [vmem:[#allocation178_spill] sm:$0xff] %v12364_v60  ;;  %v15311_v9 = vunpack.i.h.bf16 %v12360_v55  ;;  %v15312_v23 = vunpack.i.l.bf16 %v12360_v55  ;;  %6313 = vrot.lane.b32.xlu0 %v12364_v60, %s7247_s5 }
 0x2e3   :  { %v12374_v51 = vsel %vm194_vm0, %v15311_v9, %v16434_v15  ;;  %v12380_v26 = vsel %vm194_vm0, %v15312_v23, %v16436_v20  ;;  %v16441_v23 = vld [vmem:[#allocation81_spill] sm:$0xff] }
 0x2e4   :  { %16435 = vst [vmem:[#allocation179_spill] sm:$0xff] %v12374_v51  ;;  %16437 = vst [vmem:[#allocation180_spill] sm:$0xff] %v12380_v26  ;;  %v12382_v25 = vpop.permute.xlu0 %6163  ;;  %v12386_v53 = vpack.i.bf16 %v12374_v51, %v12380_v26 }
 0x2e5   :  { %16438 = vst [vmem:[#allocation181_spill] sm:$0xff] %v12382_v25  ;;  %v15318_v60 = vunpack.i.h.bf16 %v12382_v25  ;;  %v15319_v7 = vunpack.i.l.bf16 %v12382_v25 }
 0x2e6   :  { %16439 = vst [vmem:[#allocation182_spill] sm:$0xff] %v12386_v53  ;;  %6318 = vrot.lane.b32.xlu1 %v12386_v53, %s7247_s5 }
 0x2e7   :  { %v12396_v9 = vsel %vm194_vm0, %v15318_v60, %v11381_v52  ;;  %v12402_v20 = vsel %vm194_vm0, %v15319_v7, %v16441_v23 }
 0x2e8   :  { %16440 = vst [vmem:[#allocation183_spill] sm:$0xff] %v12396_v9  ;;  %16442 = vst [vmem:[#allocation184_spill] sm:$0xff] %v12402_v20  ;;  %v12404_v15 = vpop.permute.xlu1 %6168  ;;  %v12408_v26 = vpack.i.bf16 %v12396_v9, %v12402_v20 }
 0x2e9   :  { %16443 = vst [vmem:[#allocation185_spill] sm:$0xff] %v12404_v15  ;;  %v15324_v53 = vunpack.i.h.bf16 %v12404_v15  ;;  %v15325_v51 = vunpack.i.l.bf16 %v12404_v15 }
 0x2ea   :  { %16444 = vst [vmem:[#allocation186_spill] sm:$0xff] %v12408_v26  ;;  %6323 = vrot.lane.b32.xlu0 %v12408_v26, %s7247_s5 }
 0x2eb   :  { %v12418_v60 = vsel %vm194_vm0, %v15324_v53, %v11415_v62  ;;  %v12424_v7 = vsel %vm194_vm0, %v15325_v51, %v11434_v54 }
 0x2ec   :  { %16445 = vst [vmem:[#allocation187_spill] sm:$0xff] %v12418_v60  ;;  %16446 = vst [vmem:[#allocation188_spill] sm:$0xff] %v12424_v7  ;;  %v12426_v23 = vpop.permute.xlu0 %6173  ;;  %v12430_v52 = vpack.i.bf16 %v12418_v60, %v12424_v7 }
 0x2ed   :  { %16447 = vst [vmem:[#allocation189_spill] sm:$0xff] %v12426_v23  ;;  %v15331_v26 = vunpack.i.h.bf16 %v12426_v23  ;;  %v15332_v20 = vunpack.i.l.bf16 %v12426_v23 }
 0x2ee   :  { %16448 = vst [vmem:[#allocation190_spill] sm:$0xff] %v12430_v52  ;;  %6328 = vrot.lane.b32.xlu1 %v12430_v52, %s7247_s5 }
 0x2ef   :  { %v12440_v53 = vsel %vm194_vm0, %v15331_v26, %v11447_v8  ;;  %v12446_v51 = vsel %vm194_vm0, %v15332_v20, %v11467_v5  ;;  %v16454_v20 = vld [vmem:[#allocation90_spill] sm:$0xff] }
 0x2f0   :  { %16449 = vst [vmem:[#allocation191_spill] sm:$0xff] %v12440_v53  ;;  %16450 = vst [vmem:[#allocation192_spill] sm:$0xff] %v12446_v51  ;;  %v12448_v54 = vpop.permute.xlu1 %6178  ;;  %v12452_v62 = vpack.i.bf16 %v12440_v53, %v12446_v51 }
 0x2f1   :  { %16451 = vst [vmem:[#allocation193_spill] sm:$0xff] %v12448_v54  ;;  %v15340_v52 = vunpack.i.h.bf16 %v12448_v54  ;;  %v15341_v7 = vunpack.i.l.bf16 %v12448_v54 }
 0x2f2   :  { %16452 = vst [vmem:[#allocation194_spill] sm:$0xff] %v12452_v62  ;;  %6333 = vrot.lane.b32.xlu0 %v12452_v62, %s7247_s5 }
 0x2f3   :  { %v12462_v26 = vsel %vm194_vm0, %v15340_v52, %v11481_v6  ;;  %v12468_v5 = vsel %vm194_vm0, %v15341_v7, %v16454_v20  ;;  %v16459_v7 = vld [vmem:[#allocation94_spill] sm:$0xff] }
 0x2f4   :  { %16453 = vst [vmem:[#allocation195_spill] sm:$0xff] %v12462_v26  ;;  %16455 = vst [vmem:[#allocation196_spill] sm:$0xff] %v12468_v5  ;;  %v12474_v51 = vpack.i.bf16 %v12462_v26, %v12468_v5 }
 0x2f5   :  { %v12470_v8 = vpop.permute.xlu0 %6183 }
 0x2f6   :  { %16456 = vst [vmem:[#allocation197_spill] sm:$0xff] %v12470_v8  ;;  %16457 = vst [vmem:[#allocation198_spill] sm:$0xff] %v12474_v51  ;;  %v15348_v62 = vunpack.i.h.bf16 %v12470_v8  ;;  %v15349_v53 = vunpack.i.l.bf16 %v12470_v8  ;;  %6338 = vrot.lane.b32.xlu1 %v12474_v51, %s7247_s5 }
 0x2f8   :  { %v12484_v52 = vsel %vm194_vm0, %v15348_v62, %v11516_v13  ;;  %v12490_v20 = vsel %vm194_vm0, %v15349_v53, %v16459_v7  ;;  %v12492_v6 = vpop.permute.xlu1 %6188 }
 0x2f9   :  { %16458 = vst [vmem:[#allocation199_spill] sm:$0xff] %v12484_v52  ;;  %16460 = vst [vmem:[#allocation200_spill] sm:$0xff] %v12490_v20  ;;  %v12496_v5 = vpack.i.bf16 %v12484_v52, %v12490_v20  ;;  %v15354_v51 = vunpack.i.h.bf16 %v12492_v6  ;;  %v15355_v26 = vunpack.i.l.bf16 %v12492_v6 }
 0x2fa   :  { %16461 = vst [vmem:[#allocation201_spill] sm:$0xff] %v12492_v6 }
 0x2fb   :  { %16462 = vst [vmem:[#allocation202_spill] sm:$0xff] %v12496_v5  ;;  %6343 = vrot.lane.b32.xlu0 %v12496_v5, %s7247_s5  ;;  %v12506_v62 = vsel %vm194_vm0, %v15354_v51, %v11554_v37  ;;  %v12512_v53 = vsel %vm194_vm0, %v15355_v26, %v11577_v48 }
 0x2fc   :  { %16463 = vst [vmem:[#allocation203_spill] sm:$0xff] %v12506_v62  ;;  %16464 = vst [vmem:[#allocation204_spill] sm:$0xff] %v12512_v53  ;;  %v12514_v7 = vpop.permute.xlu0 %6193  ;;  %v12518_v13 = vpack.i.bf16 %v12506_v62, %v12512_v53 }
 0x2fd   :  { %16465 = vst [vmem:[#allocation205_spill] sm:$0xff] %v12514_v7  ;;  %v15361_v5 = vunpack.i.h.bf16 %v12514_v7  ;;  %v15362_v20 = vunpack.i.l.bf16 %v12514_v7 }
 0x2fe   :  { %16466 = vst [vmem:[#allocation206_spill] sm:$0xff] %v12518_v13  ;;  %6348 = vrot.lane.b32.xlu1 %v12518_v13, %s7247_s5 }
 0x2ff   :  { %v12528_v51 = vsel %vm194_vm0, %v15361_v5, %v11590_v17  ;;  %v12534_v26 = vsel %vm194_vm0, %v15362_v20, %v11614_v1  ;;  %v16472_v20 = vld [vmem:[#allocation21_spill] sm:$0xff] }
 0x300   :  { %16467 = vst [vmem:[#allocation207_spill] sm:$0xff] %v12528_v51  ;;  %16468 = vst [vmem:[#allocation208_spill] sm:$0xff] %v12534_v26  ;;  %v12540_v37 = vpack.i.bf16 %v12528_v51, %v12534_v26 }
 0x302   :  { %v12536_v48 = vpop.permute.xlu1 %6198  ;;  %16470 = vst [vmem:[#allocation210_spill] sm:$0xff] %v12540_v37  ;;  %6353 = vrot.lane.b32.xlu0 %v12540_v37, %s7247_s5 }
 0x303   :  { %16469 = vst [vmem:[#allocation209_spill] sm:$0xff] %v12536_v48  ;;  %v15369_v13 = vunpack.i.h.bf16 %v12536_v48  ;;  %v15371_v52 = vunpack.i.l.bf16 %v12536_v48 }
 0x305   :  { %v12550_v5 = vsel %vm194_vm0, %v15369_v13, %v11628_v32  ;;  %v12556_v1 = vsel %vm194_vm0, %v15371_v52, %v16472_v20  ;;  %v16476_v13 = vld [vmem:[#allocation103_spill] sm:$0xff]  ;;  %v16478_v52 = vld [vmem:[#allocation101_spill] sm:$0xff] }
 0x306   :  { %16471 = vst [vmem:[#allocation211_spill] sm:$0xff] %v12550_v5  ;;  %16473 = vst [vmem:[#allocation212_spill] sm:$0xff] %v12556_v1  ;;  %v12558_v17 = vpop.permute.xlu0 %6203  ;;  %v12562_v53 = vpack.i.bf16 %v12550_v5, %v12556_v1 }
 0x307   :  { %16474 = vst [vmem:[#allocation213_spill] sm:$0xff] %v12558_v17  ;;  %v15379_v62 = vunpack.i.h.bf16 %v12558_v17  ;;  %v15380_v8 = vunpack.i.l.bf16 %v12558_v17 }
 0x308   :  { %16475 = vst [vmem:[#allocation214_spill] sm:$0xff] %v12562_v53  ;;  %6358 = vrot.lane.b32.xlu1 %v12562_v53, %s7247_s5 }
 0x309   :  { %v12572_v32 = vsel %vm194_vm0, %v15379_v62, %v16476_v13  ;;  %v12578_v20 = vsel %vm194_vm0, %v15380_v8, %v16478_v52  ;;  %v12580_v54 = vpop.permute.xlu1 %6208  ;;  %v16481_v62 = vld [vmem:[#allocation23_spill] sm:$0xff]  ;;  %v16482_v8 = vld [vmem:[#allocation24_spill] sm:$0xff] }
 0x30a   :  { %16477 = vst [vmem:[#allocation215_spill] sm:$0xff] %v12572_v32  ;;  %16479 = vst [vmem:[#allocation216_spill] sm:$0xff] %v12578_v20  ;;  %v12584_v6 = vpack.i.bf16 %v12572_v32, %v12578_v20  ;;  %v15389_v60 = vunpack.i.h.bf16 %v12580_v54  ;;  %v15390_v37 = vunpack.i.l.bf16 %v12580_v54 }
 0x30c   :  { %16480 = vst [vmem:[#allocation217_spill] sm:$0xff] %v12584_v6  ;;  %6363 = vrot.lane.b32.xlu0 %v12584_v6, %s7247_s5  ;;  %v12594_v13 = vsel %vm194_vm0, %v15389_v60, %v16481_v62  ;;  %v12600_v52 = vsel %vm194_vm0, %v15390_v37, %v16482_v8  ;;  %v16485_v60 = vld [vmem:[#allocation92_spill] sm:$0xff]  ;;  %v16486_v37 = vld [vmem:[#allocation106_spill] sm:$0xff] }
 0x30d   :  { %16483 = vst [vmem:[#allocation218_spill] sm:$0xff] %v12600_v52  ;;  %v12606_v9 = vpack.i.bf16 %v12594_v13, %v12600_v52 }
 0x30e   :  { %v12602_v23 = vpop.permute.xlu0 %6213 }
 0x30f   :  { %16484 = vst [vmem:[#allocation219_spill] sm:$0xff] %v12606_v9  ;;  %v15397_v15 = vunpack.i.h.bf16 %v12602_v23  ;;  %v15398_v25 = vunpack.i.l.bf16 %v12602_v23  ;;  %6368 = vrot.lane.b32.xlu1 %v12606_v9, %s7247_s5 }
 0x311   :  { %v12616_v62 = vsel %vm194_vm0, %v15397_v15, %v16485_v60  ;;  %v12622_v8 = vsel %vm194_vm0, %v15398_v25, %v16486_v37  ;;  %v12624_v55 = vpop.permute.xlu1 %6218 }
 0x312   :  { %v12628_v26 = vpack.i.bf16 %v12616_v62, %v12622_v8  ;;  %v15401_v51 = vunpack.i.h.bf16 %v12624_v55  ;;  %v15403_v7 = vunpack.i.l.bf16 %v12624_v55 }
 0x314   :  { %6373 = vrot.lane.b32.xlu0 %v12628_v26, %s7247_s5  ;;  %v12638_v15 = vsel %vm194_vm0, %v15401_v51, %v11783_v45  ;;  %v12644_v25 = vsel %vm194_vm0, %v15403_v7, %v11802_v4  ;;  %v16487_v51 = vld [vmem:[#allocation30_spill] sm:$0xff]  ;;  %v16488_v7 = vld [vmem:[#allocation35_spill] sm:$0xff] }
 0x315   :  { %v12650_v60 = vpack.i.bf16 %v12638_v15, %v12644_v25 }
 0x316   :  { %v12646_v37 = vpop.permute.xlu0 %6223 }
 0x317   :  { %v15410_v53 = vunpack.i.h.bf16 %v12646_v37  ;;  %v15411_v1 = vunpack.i.l.bf16 %v12646_v37  ;;  %6378 = vrot.lane.b32.xlu1 %v12650_v60, %s7247_s5 }
 0x319   :  { %v12660_v45 = vsel %vm194_vm0, %v15410_v53, %v16487_v51  ;;  %v12666_v4 = vsel %vm194_vm0, %v15411_v1, %v16488_v7 }
 0x31a   :  { %v12668_v5 = vpop.permute.xlu1 %6228  ;;  %v12672_v48 = vpack.i.bf16 %v12660_v45, %v12666_v4 }
 0x31b   :  { %v15415_v6 = vunpack.i.h.bf16 %v12668_v5  ;;  %v15416_v20 = vunpack.i.l.bf16 %v12668_v5 }
 0x31c   :  { %6383 = vrot.lane.b32.xlu0 %v12672_v48, %s7247_s5 }
 0x31d   :  { %v12682_v53 = vsel %vm194_vm0, %v15415_v6, %v11849_v50  ;;  %v12688_v1 = vsel %vm194_vm0, %v15416_v20, %v11871_v11 }
 0x31e   :  { %v12690_v7 = vpop.permute.xlu0 %6233  ;;  %v12694_v51 = vpack.i.bf16 %v12682_v53, %v12688_v1 }
 0x31f   :  { %v15421_v32 = vunpack.i.h.bf16 %v12690_v7  ;;  %v15422_v17 = vunpack.i.l.bf16 %v12690_v7 }
 0x320   :  { %6388 = vrot.lane.b32.xlu1 %v12694_v51, %s7247_s5 }
 0x321   :  { %v12704_v6 = vsel %vm194_vm0, %v15421_v32, %v11884_v49  ;;  %v12710_v20 = vsel %vm194_vm0, %v15422_v17, %v11907_v18  ;;  %v12712_v50 = vpop.permute.xlu1 %6238 }
 0x322   :  { %16489 = vst [vmem:[#allocation220_spill] sm:$0xff] %v12704_v6  ;;  %16490 = vst [vmem:[#allocation221_spill] sm:$0xff] %v12710_v20  ;;  %v12716_v11 = vpack.i.bf16 %v12704_v6, %v12710_v20  ;;  %v15428_v9 = vunpack.i.h.bf16 %v12712_v50  ;;  %v15429_v52 = vunpack.i.l.bf16 %v12712_v50 }
 0x324   :  { %16491 = vst [vmem:[#allocation222_spill] sm:$0xff] %v12716_v11  ;;  %6393 = vrot.lane.b32.xlu0 %v12716_v11, %s7247_s5  ;;  %v12726_v32 = vsel %vm194_vm0, %v15428_v9, %v11921_v40  ;;  %v12732_v17 = vsel %vm194_vm0, %v15429_v52, %v11942_v10 }
 0x325   :  { %16492 = vst [vmem:[#allocation223_spill] sm:$0xff] %v12726_v32  ;;  %16493 = vst [vmem:[#allocation224_spill] sm:$0xff] %v12732_v17  ;;  %v12738_v49 = vpack.i.bf16 %v12726_v32, %v12732_v17 }
 0x327   :  { %v12734_v18 = vpop.permute.xlu0 %6243  ;;  %16494 = vst [vmem:[#allocation225_spill] sm:$0xff] %v12738_v49  ;;  %6398 = vrot.lane.b32.xlu1 %v12738_v49, %s7247_s5 }
 0x328   :  { %v15435_v11 = vunpack.i.h.bf16 %v12734_v18  ;;  %v15436_v20 = vunpack.i.l.bf16 %v12734_v18 }
 0x32a   :  { %v12748_v9 = vsel %vm194_vm0, %v15435_v11, %v11955_v19  ;;  %v12754_v52 = vsel %vm194_vm0, %v15436_v20, %v11979_v61 }
 0x32b   :  { %16495 = vst [vmem:[#allocation226_spill] sm:$0xff] %v12748_v9  ;;  %16496 = vst [vmem:[#allocation227_spill] sm:$0xff] %v12754_v52  ;;  %v12756_v10 = vpop.permute.xlu1 %6248  ;;  %v12760_v40 = vpack.i.bf16 %v12748_v9, %v12754_v52 }
 0x32c   :  { %v15442_v49 = vunpack.i.h.bf16 %v12756_v10  ;;  %v15443_v17 = vunpack.i.l.bf16 %v12756_v10 }
 0x32d   :  { %16497 = vst [vmem:[#allocation228_spill] sm:$0xff] %v12760_v40  ;;  %6403 = vrot.lane.b32.xlu0 %v12760_v40, %s7247_s5 }
 0x32e   :  { %v12770_v11 = vsel %vm194_vm0, %v15442_v49, %v11993_v29  ;;  %v12776_v20 = vsel %vm194_vm0, %v15443_v17, %v12016_v38  ;;  %v12778_v61 = vpop.permute.xlu0 %6253  ;;  %v16503_v17 = vld [vmem:[#allocation149_spill] sm:$0xff] }
 0x32f   :  { %16498 = vst [vmem:[#allocation229_spill] sm:$0xff] %v12770_v11  ;;  %16499 = vst [vmem:[#allocation230_spill] sm:$0xff] %v12776_v20  ;;  %v12782_v19 = vpack.i.bf16 %v12770_v11, %v12776_v20  ;;  %v15451_v40 = vunpack.i.h.bf16 %v12778_v61  ;;  %v15452_v52 = vunpack.i.l.bf16 %v12778_v61 }
 0x330   :  { %16500 = vst [vmem:[#allocation231_spill] sm:$0xff] %v12778_v61 }
 0x331   :  { %16501 = vst [vmem:[#allocation232_spill] sm:$0xff] %v12782_v19  ;;  %6408 = vrot.lane.b32.xlu1 %v12782_v19, %s7247_s5  ;;  %v12792_v49 = vsel %vm194_vm0, %v15451_v40, %v12029_v22  ;;  %v12798_v38 = vsel %vm194_vm0, %v15452_v52, %v16503_v17 }
 0x332   :  { %16502 = vst [vmem:[#allocation233_spill] sm:$0xff] %v12792_v49  ;;  %16504 = vst [vmem:[#allocation234_spill] sm:$0xff] %v12798_v38  ;;  %v12804_v20 = vpack.i.bf16 %v12792_v49, %v12798_v38 }
 0x333   :  { %v12800_v29 = vpop.permute.xlu1 %6258 }
 0x334   :  { %16505 = vst [vmem:[#allocation235_spill] sm:$0xff] %v12800_v29  ;;  %16506 = vst [vmem:[#allocation236_spill] sm:$0xff] %v12804_v20  ;;  %v15457_v19 = vunpack.i.h.bf16 %v12800_v29  ;;  %v15458_v9 = vunpack.i.l.bf16 %v12800_v29  ;;  %6413 = vrot.lane.b32.xlu0 %v12804_v20, %s7247_s5 }
 0x336   :  { %v12814_v40 = vsel %vm194_vm0, %v15457_v19, %v12067_v42  ;;  %v12820_v52 = vsel %vm194_vm0, %v15458_v9, %v12085_v35  ;;  %v12822_v17 = vpop.permute.xlu0 %6263 }
 0x337   :  { %16507 = vst [vmem:[#allocation237_spill] sm:$0xff] %v12814_v40  ;;  %16508 = vst [vmem:[#allocation238_spill] sm:$0xff] %v12820_v52  ;;  %v12826_v22 = vpack.i.bf16 %v12814_v40, %v12820_v52  ;;  %v15468_v20 = vunpack.i.h.bf16 %v12822_v17  ;;  %v15469_v38 = vunpack.i.l.bf16 %v12822_v17 }
 0x338   :  { %16509 = vst [vmem:[#allocation239_spill] sm:$0xff] %v12822_v17 }
 0x339   :  { %16510 = vst [vmem:[#allocation240_spill] sm:$0xff] %v12826_v22  ;;  %6418 = vrot.lane.b32.xlu1 %v12826_v22, %s7247_s5  ;;  %v12836_v19 = vsel %vm194_vm0, %v15468_v20, %v12098_v24  ;;  %v12842_v9 = vsel %vm194_vm0, %v15469_v38, %v12117_v57  ;;  %v16514_v24 = vunpack.i.l.bf16 %v12152_v44 }
 0x33a   :  { %16511 = vst [vmem:[#allocation241_spill] sm:$0xff] %v12836_v19  ;;  %16512 = vst [vmem:[#allocation242_spill] sm:$0xff] %v12842_v9  ;;  %v12844_v35 = vpop.permute.xlu1 %6268  ;;  %v12848_v42 = vpack.i.bf16 %v12836_v19, %v12842_v9  ;;  %v6274_v40 = vpop.permute.xlu0 %6273  ;;  %v16516_v19 = vunpack.i.h.bf16 %v12152_v44 }
 0x33b   :  { %v15475_v22 = vunpack.i.h.bf16 %v12844_v35  ;;  %v15483_v52 = vunpack.i.l.bf16 %v12844_v35  ;;  %v6276_v49 = vunpack.i.h.bf16 %v6274_v40  ;;  %v6275_v20 = vunpack.i.l.bf16 %v6274_v40 }
 0x33c   :  { %16513 = vst [vmem:[#allocation243_spill] sm:$0xff] %v12848_v42  ;;  %6423 = vrot.lane.b32.xlu0 %v12848_v42, %s7247_s5 }
 0x33d   :  { %v12858_v38 = vsel %vm194_vm0, %v15475_v22, %v12131_v3  ;;  %v12864_v57 = vsel %vm194_vm0, %v15483_v52, %v12148_v59  ;;  %v2765_v9 = vsel %vm194_vm0, %v6275_v20, %v16514_v24  ;;  %v2766_v22 = vsel %vm194_vm0, %v6276_v49, %v16516_v19 }
 0x33e   :  { %v6279_v40 = vpop.permute.xlu1 %6278  ;;  %v12871_v42 = vpack.i.bf16 %v12858_v38, %v12864_v57  ;;  %v6284_v29 = vpop.permute.xlu0 %6283  ;;  %v6432_v61 = vpack.i.bf16 %v2765_v9, %v12186_v2  ;;  %v16517_v24 = vunpack.i.l.bf16 %v12150_v14  ;;  %v6437_v44 = vpack.i.bf16 %v2766_v22, %v12174_v16  ;;  %v16683_v6 = vld [vmem:[#allocation238_spill] sm:$0xff] }
 0x33f   :  { %v6281_v3 = vunpack.i.h.bf16 %v6279_v40  ;;  %v6280_v17 = vunpack.i.l.bf16 %v6279_v40  ;;  %v6285_v52 = vunpack.i.l.bf16 %v6284_v29  ;;  %v16518_v19 = vunpack.i.h.bf16 %v12150_v14 }
 0x340   :  { %16515 = vst [vmem:[#allocation244_spill] sm:$0xff] %v12871_v42  ;;  %6428 = vrot.lane.b32.xlu1 %v12871_v42, %s7247_s5  ;;  %6433 = vrot.lane.b32.xlu0 %v6432_v61, %s7251_s0  ;;  %v6286_v2 = vunpack.i.h.bf16 %v6284_v29  ;;  %v16519_v40 = vunpack.i.l.bf16 %v12188_v0  ;;  %v16520_v22 = vunpack.i.h.bf16 %v12188_v0  ;;  %v16521_v29 = vunpack.i.l.bf16 %v12222_v12  ;;  %s7252_s5 = smov 114  }
 0x341   :  { %v2767_v20 = vsel %vm194_vm0, %v6280_v17, %v16517_v24  ;;  %v2768_v9 = vsel %vm194_vm0, %v6281_v3, %v16518_v19 }
 0x342   :  { %v6289_v59 = vpop.permute.xlu1 %6288  ;;  %v6442_v49 = vpack.i.bf16 %v2767_v20, %v12198_v41  ;;  %v2769_v42 = vsel %vm194_vm0, %v6285_v52, %v16519_v40  ;;  %v6447_v61 = vpack.i.bf16 %v2768_v9, %v12180_v47  ;;  %v2770_v16 = vsel %vm194_vm0, %v6286_v2, %v16520_v22 }
 0x343   :  { %v6290_v11 = vunpack.i.l.bf16 %v6289_v59  ;;  %v6294_v17 = vpop.permute.xlu0 %6293  ;;  %v6291_v14 = vunpack.i.h.bf16 %v6289_v59  ;;  %v6452_v3 = vpack.i.bf16 %v2769_v42, %v12218_v58  ;;  %v6457_v20 = vpack.i.bf16 %v2770_v16, %v12212_v36 }
 0x344   :  { %6438 = vrot.lane.b32.xlu1 %v6437_v44, %s7251_s0  ;;  %6443 = vrot.lane.b32.xlu0 %v6442_v49, %s7251_s0  ;;  %v6295_v52 = vunpack.i.l.bf16 %v6294_v17  ;;  %v16522_v47 = vunpack.i.h.bf16 %v12222_v12  ;;  %v6296_v44 = vunpack.i.h.bf16 %v6294_v17  ;;  %v16523_v42 = vunpack.i.l.bf16 %v12250_v63 }
 0x345   :  { %v2771_v41 = vsel %vm194_vm0, %v6290_v11, %v16521_v29  ;;  %v16524_v36 = vunpack.i.h.bf16 %v12250_v63 }
 0x346   :  { %v2772_v0 = vsel %vm194_vm0, %v6291_v14, %v16522_v47  ;;  %v6462_v59 = vpack.i.bf16 %v2771_v41, %v12246_v39  ;;  %v2773_v58 = vsel %vm194_vm0, %v6295_v52, %v16523_v42  ;;  %v16525_v39 = vunpack.i.l.bf16 %v12272_v28 }
 0x347   :  { %v6299_v24 = vpop.permute.xlu1 %6298  ;;  %v6467_v49 = vpack.i.bf16 %v2772_v0, %v12240_v33  ;;  %v2774_v12 = vsel %vm194_vm0, %v6296_v44, %v16524_v36  ;;  %v6472_v9 = vpack.i.bf16 %v2773_v58, %v12270_v34  ;;  %v16526_v33 = vunpack.i.h.bf16 %v12272_v28 }
 0x348   :  { %6448 = vrot.lane.b32.xlu1 %v6447_v61, %s7251_s0  ;;  %6453 = vrot.lane.b32.xlu0 %v6452_v3, %s7251_s0  ;;  %v6300_v11 = vunpack.i.l.bf16 %v6299_v24  ;;  %v6301_v19 = vunpack.i.h.bf16 %v6299_v24  ;;  %v6477_v17 = vpack.i.bf16 %v2774_v12, %v12264_v56  ;;  %v16527_v34 = vunpack.i.l.bf16 %v12316_v46 }
 0x349   :  { %v16528_v28 = vunpack.i.h.bf16 %v12316_v46  ;;  %v16529_v12 = vunpack.i.h.bf16 %v12668_v5 }
 0x34a   :  { %v2775_v2 = vsel %vm194_vm0, %v6300_v11, %v16525_v39  ;;  %v2776_v63 = vsel %vm194_vm0, %v6301_v19, %v16526_v33 }
 0x34b   :  { %v6482_v16 = vpack.i.bf16 %v2775_v2, %v12292_v30  ;;  %v6487_v3 = vpack.i.bf16 %v2776_v63, %v12286_v43 }
 0x34c   :  { %6458 = vrot.lane.b32.xlu1 %v6457_v20, %s7251_s0  ;;  %6463 = vrot.lane.b32.xlu0 %v6462_v59, %s7251_s0  ;;  %v6304_v24 = vpop.permute.xlu0 %6303 }
 0x34d   :  { %v6306_v33 = vunpack.i.h.bf16 %v6304_v24  ;;  %v6305_v63 = vunpack.i.l.bf16 %v6304_v24 }
 0x350   :  { %6468 = vrot.lane.b32.xlu1 %v6467_v49, %s7251_s0  ;;  %6473 = vrot.lane.b32.xlu0 %v6472_v9, %s7251_s0  ;;  %v6309_v40 = vpop.permute.xlu1 %6308  ;;  %v16530_v9 = vunpack.i.l.bf16 %v12668_v5  ;;  %v16531_v5 = vld [vmem:[#allocation169_spill] sm:$0xff] }
 0x351   :  { %v6311_v61 = vunpack.i.h.bf16 %v6309_v40  ;;  %v6310_v22 = vunpack.i.l.bf16 %v6309_v40 }
 0x353   :  { %v2779_v14 = vsel %vm194_vm0, %v6310_v22, %v16527_v34  ;;  %v2780_v29 = vsel %vm194_vm0, %v6311_v61, %v16528_v28  ;;  %v16532_v22 = vunpack.i.h.bf16 %v16531_v5 }
 0x354   :  { %6478 = vrot.lane.b32.xlu1 %v6477_v17, %s7251_s0  ;;  %6483 = vrot.lane.b32.xlu0 %v6482_v16, %s7251_s0  ;;  %v6492_v56 = vpack.i.bf16 %v2779_v14, %v12336_v27  ;;  %v6497_v30 = vpack.i.bf16 %v2780_v29, %v12330_v31  ;;  %v12948_v27 = vpop.permute.xlu0 %6313  ;;  %v16537_v29 = vld [vmem:[#allocation172_spill] sm:$0xff] }
 0x358   :  { %6488 = vrot.lane.b32.xlu1 %v6487_v3, %s7251_s0  ;;  %6493 = vrot.lane.b32.xlu0 %v6492_v56, %s7251_s0  ;;  %v12942_v41 = vpop.permute.xlu1 %6318  ;;  %v16534_v3 = vld [vmem:[#allocation41_spill] sm:$0xff] }
 0x359   :  { %v16535_v56 = vld [vmem:[#allocation33_spill] sm:$0xff] }
 0x35c   :  { %6498 = vrot.lane.b32.xlu1 %v6497_v30, %s7251_s0  ;;  %v12952_v20 = vpop.permute.xlu0 %6323  ;;  %v16538_v30 = vunpack.i.h.bf16 %v12646_v37 }
 0x360   :  { %v12944_v52 = vpop.permute.xlu1 %6328 }
 0x364   :  { %v12956_v0 = vpop.permute.xlu0 %6333 }
 0x368   :  { %v12946_v43 = vpop.permute.xlu1 %6338 }
 0x36d   :  { %v12960_v44 = vpop.permute.xlu0 %6343 }
 0x370   :  { %v12950_v46 = vpop.permute.xlu1 %6348 }
 0x374   :  { %v12962_v42 = vpop.permute.xlu0 %6353 }
 0x37a   :  { %v12954_v47 = vpop.permute.xlu1 %6358 }
 0x37e   :  { %v12964_v36 = vpop.permute.xlu0 %6363 }
 0x381   :  { %v12958_v31 = vpop.permute.xlu1 %6368 }
 0x386   :  { %v6374_v17 = vpop.permute.xlu0 %6373 }
 0x389   :  { %v6379_v59 = vpop.permute.xlu1 %6378 }
 0x38e   :  { %v6384_v61 = vpop.permute.xlu0 %6383 }
 0x38f   :  { %v6386_v34 = vunpack.i.h.bf16 %v6384_v61  ;;  %v6385_v14 = vunpack.i.l.bf16 %v6384_v61  ;;  %v6375_v61 = vunpack.i.l.bf16 %v6374_v17 }
 0x391   :  { %v2810_v24 = vsel %vm194_vm0, %v6386_v34, %v16538_v30  ;;  %v16550_v34 = vld [vmem:[#allocation168_spill] sm:$0xff]  ;;  %v6366_v30 = vunpack.i.h.bf16 %v12964_v36 }
 0x392   :  { %v6389_v58 = vpop.permute.xlu1 %6388 }
 0x393   :  { %v6391_v11 = vunpack.i.h.bf16 %v6389_v58  ;;  %v6390_v49 = vunpack.i.l.bf16 %v6389_v58  ;;  %v16539_v58 = vunpack.i.l.bf16 %v12646_v37  ;;  %v16540_v37 = vld [vmem:[#allocation173_spill] sm:$0xff] }
 0x395   :  { %v2812_v19 = vsel %vm194_vm0, %v6391_v11, %v16529_v12  ;;  %v2811_v39 = vsel %vm194_vm0, %v6390_v49, %v16530_v9  ;;  %v2809_v11 = vsel %vm194_vm0, %v6385_v14, %v16539_v58  ;;  %v6547_v49 = vpack.i.bf16 %v2810_v24, %v12660_v45  ;;  %v16556_v58 = vld [vmem:[#allocation219_spill] sm:$0xff] }
 0x396   :  { %v6507_v2 = vpack.i.bf16 %v2812_v19, %v12682_v53  ;;  %v6502_v40 = vpack.i.bf16 %v2811_v39, %v12688_v1  ;;  %v2778_v53 = vsel %vm194_vm0, %v6306_v33, %v16532_v22  ;;  %v16533_v1 = vunpack.i.l.bf16 %v16531_v5  ;;  %v16544_v33 = vld [vmem:[#allocation42_spill] sm:$0xff] }
 0x397   :  { %v6542_v12 = vpack.i.bf16 %v2809_v11, %v12666_v4  ;;  %v6381_v19 = vunpack.i.h.bf16 %v6379_v59  ;;  %v6380_v9 = vunpack.i.l.bf16 %v6379_v59  ;;  %v16541_v39 = vunpack.i.h.bf16 %v12624_v55  ;;  %v16557_v11 = vld [vmem:[#allocation167_spill] sm:$0xff] }
 0x398   :  { %6508 = vrot.lane.b32.xlu1 %v6507_v2, %s7251_s0  ;;  %6503 = vrot.lane.b32.xlu0 %v6502_v40, %s7251_s0  ;;  %v2777_v16 = vsel %vm194_vm0, %v6305_v63, %v16533_v1  ;;  %v16542_v45 = vunpack.i.l.bf16 %v12624_v55  ;;  %v16543_v40 = vld [vmem:[#allocation137_spill] sm:$0xff]  ;;  %v6376_v63 = vunpack.i.h.bf16 %v6374_v17  ;;  %v16545_v55 = vld [vmem:[#allocation170_spill] sm:$0xff]  ;;  %v16546_v5 = vunpack.i.h.bf16 %v12602_v23  ;;  %v16549_v1 = vld [vmem:[#allocation132_spill] sm:$0xff] }
 0x399   :  { %v2808_v2 = vsel %vm194_vm0, %v6381_v19, %v16541_v39  ;;  %v16551_v14 = vunpack.i.h.bf16 %v12580_v54  ;;  %v6365_v24 = vunpack.i.l.bf16 %v12964_v36  ;;  %v16561_v36 = vld [vmem:[#allocation26_spill] sm:$0xff] }
 0x39a   :  { %v2807_v4 = vsel %vm194_vm0, %v6380_v9, %v16542_v45  ;;  %v6577_v59 = vpack.i.bf16 %v2808_v2, %v12638_v15  ;;  %v2806_v22 = vsel %vm194_vm0, %v6376_v63, %v16546_v5  ;;  %v16547_v15 = vunpack.i.l.bf16 %v12602_v23  ;;  %v16562_v2 = vld [vmem:[#allocation127_spill] sm:$0xff] }
 0x39b   :  { %v6607_v17 = vpack.i.bf16 %v2806_v22, %v12616_v62  ;;  %v6370_v23 = vunpack.i.l.bf16 %v12958_v31  ;;  %v16566_v22 = vld [vmem:[#allocation217_spill] sm:$0xff] }
 0x39c   :  { %6518 = vrot.lane.b32.xlu1 %v12694_v51, %s7252_s5  ;;  %6513 = vrot.lane.b32.xlu0 %v12342_v21, %s7252_s5  ;;  %v16536_v51 = vld [vmem:[#allocation171_spill] sm:$0xff]  ;;  %v6532_v21 = vpack.i.bf16 %v2777_v16, %v16537_v29  ;;  %v6371_v16 = vunpack.i.h.bf16 %v12958_v31  ;;  %v13056_v31 = vpop.permute.xlu0 %6393 }
 0x39d   :  { %v6537_v28 = vpack.i.bf16 %v2778_v53, %v16536_v51  ;;  %v16548_v53 = vld [vmem:[#allocation34_spill] sm:$0xff] }
 0x39e   :  { %v2804_v62 = vsel %vm194_vm0, %v6371_v16, %v16551_v14  ;;  %v16554_v51 = vld [vmem:[#allocation70_spill] sm:$0xff]  ;;  %v16575_v14 = vld [vmem:[#allocation211_spill] sm:$0xff] }
 0x3a0   :  { %6528 = vrot.lane.b32.xlu1 %v16534_v3, %s7252_s5  ;;  %6523 = vrot.lane.b32.xlu0 %v16535_v56, %s7252_s5  ;;  %v16553_v56 = vld [vmem:[#allocation98_spill] sm:$0xff] }
 0x3a4   :  { %6538 = vrot.lane.b32.xlu1 %v6537_v28, %s7251_s0  ;;  %6533 = vrot.lane.b32.xlu0 %v6532_v21, %s7251_s0  ;;  %v16555_v28 = vld [vmem:[#allocation218_spill] sm:$0xff]  ;;  %v13062_v21 = vpop.permute.xlu1 %6398 }
 0x3a8   :  { %6548 = vrot.lane.b32.xlu1 %v6547_v49, %s7251_s0  ;;  %6543 = vrot.lane.b32.xlu0 %v6542_v12, %s7251_s0  ;;  %v16558_v12 = vld [vmem:[#allocation213_spill] sm:$0xff] }
 0x3a9   :  { %v16559_v19 = vunpack.i.h.bf16 %v16558_v12 }
 0x3ab   :  { %v2802_v9 = vsel %vm194_vm0, %v6366_v30, %v16559_v19  ;;  %v16579_v30 = vld [vmem:[#allocation165_spill] sm:$0xff] }
 0x3ac   :  { %6558 = vrot.lane.b32.xlu1 %v12672_v48, %s7252_s5  ;;  %6553 = vrot.lane.b32.xlu0 %v16540_v37, %s7252_s5  ;;  %v6572_v48 = vpack.i.bf16 %v2807_v4, %v12644_v25  ;;  %v2805_v25 = vsel %vm194_vm0, %v6375_v61, %v16547_v15  ;;  %v16560_v37 = vunpack.i.l.bf16 %v16558_v12  ;;  %v6361_v61 = vunpack.i.h.bf16 %v12954_v47  ;;  %v16567_v15 = vld [vmem:[#allocation166_spill] sm:$0xff]  ;;  %v16580_v12 = vld [vmem:[#allocation205_spill] sm:$0xff] }
 0x3ad   :  { %v16581_v19 = vunpack.i.h.bf16 %v16580_v12 }
 0x3ae   :  { %v2801_v39 = vsel %vm194_vm0, %v6365_v24, %v16560_v37  ;;  %v6316_v24 = vunpack.i.h.bf16 %v12948_v27 }
 0x3b0   :  { %6568 = vrot.lane.b32.xlu1 %v16543_v40, %s7252_s5  ;;  %6563 = vrot.lane.b32.xlu0 %v16544_v33, %s7252_s5  ;;  %v16563_v40 = vld [vmem:[#allocation215_spill] sm:$0xff] }
 0x3b1   :  { %v6667_v33 = vpack.i.bf16 %v2802_v9, %v16563_v40  ;;  %v16583_v40 = vld [vmem:[#allocation104_spill] sm:$0xff] }
 0x3b4   :  { %6578 = vrot.lane.b32.xlu1 %v6577_v59, %s7251_s0  ;;  %6573 = vrot.lane.b32.xlu0 %v6572_v48, %s7251_s0  ;;  %v16564_v59 = vld [vmem:[#allocation216_spill] sm:$0xff] }
 0x3b5   :  { %v6662_v48 = vpack.i.bf16 %v2801_v39, %v16564_v59  ;;  %v16585_v59 = vld [vmem:[#allocation174_spill] sm:$0xff] }
 0x3b8   :  { %6588 = vrot.lane.b32.xlu1 %v12650_v60, %s7252_s5  ;;  %6583 = vrot.lane.b32.xlu0 %v16545_v55, %s7252_s5  ;;  %v6602_v60 = vpack.i.bf16 %v2805_v25, %v12622_v8  ;;  %v16552_v8 = vunpack.i.l.bf16 %v12580_v54  ;;  %v13064_v54 = vpop.permute.xlu0 %6403  ;;  %v6360_v55 = vunpack.i.l.bf16 %v12954_v47  ;;  %v16568_v25 = vld [vmem:[#allocation209_spill] sm:$0xff] }
 0x3b9   :  { %v16572_v47 = vld [vmem:[#allocation25_spill] sm:$0xff] }
 0x3ba   :  { %v2803_v3 = vsel %vm194_vm0, %v6370_v23, %v16552_v8  ;;  %v16573_v23 = vld [vmem:[#allocation65_spill] sm:$0xff]  ;;  %v16576_v8 = vld [vmem:[#allocation212_spill] sm:$0xff] }
 0x3bb   :  { %v6632_v29 = vpack.i.bf16 %v2803_v3, %v16555_v28 }
 0x3bc   :  { %6598 = vrot.lane.b32.xlu1 %v16548_v53, %s7252_s5  ;;  %6593 = vrot.lane.b32.xlu0 %v16549_v1, %s7252_s5  ;;  %v13074_v49 = vpop.permute.xlu0 %6413  ;;  %v16569_v53 = vunpack.i.h.bf16 %v16568_v25 }
 0x3be   :  { %v2800_v1 = vsel %vm194_vm0, %v6361_v61, %v16569_v53 }
 0x3c0   :  { %6608 = vrot.lane.b32.xlu1 %v6607_v17, %s7251_s0  ;;  %6603 = vrot.lane.b32.xlu0 %v6602_v60, %s7251_s0  ;;  %v13088_v4 = vpop.permute.xlu0 %6423  ;;  %v16570_v17 = vunpack.i.l.bf16 %v16568_v25  ;;  %v16590_v25 = vld [vmem:[#allocation208_spill] sm:$0xff] }
 0x3c2   :  { %v2799_v60 = vsel %vm194_vm0, %v6360_v55, %v16570_v17  ;;  %v6331_v55 = vunpack.i.h.bf16 %v12944_v52 }
 0x3c3   :  { %v6692_v3 = vpack.i.bf16 %v2799_v60, %v16576_v8  ;;  %v16593_v60 = vld [vmem:[#allocation177_spill] sm:$0xff] }
 0x3c4   :  { %6618 = vrot.lane.b32.xlu1 %v12628_v26, %s7252_s5  ;;  %6613 = vrot.lane.b32.xlu0 %v16550_v34, %s7252_s5  ;;  %v6637_v26 = vpack.i.bf16 %v2804_v62, %v12594_v13  ;;  %v13072_v13 = vpop.permute.xlu1 %6408  ;;  %v13098_v5 = vpop.permute.xlu0 %6433  ;;  %v6697_v62 = vpack.i.bf16 %v2800_v1, %v16575_v14  ;;  %v16591_v1 = vunpack.i.l.bf16 %v16585_v59  ;;  %v16596_v14 = vunpack.i.l.bf16 %v16593_v60  ;;  %v16598_v8 = vld [vmem:[#allocation181_spill] sm:$0xff] }
 0x3c5   :  { %16565 = vst [vmem:[#allocation169_spill] sm:$0xff] %v13098_v5 }
 0x3c8   :  { %6628 = vrot.lane.b32.xlu1 %v16553_v56, %s7252_s5  ;;  %6623 = vrot.lane.b32.xlu0 %v16554_v51, %s7252_s5  ;;  %v13086_v45 = vpop.permute.xlu1 %6418  ;;  %v13116_v34 = vpop.permute.xlu0 %6443  ;;  %v6356_v51 = vunpack.i.h.bf16 %v12962_v42 }
 0x3c9   :  { %16574 = vst [vmem:[#allocation33_spill] sm:$0xff] %v13116_v34 }
 0x3ca   :  { %v2798_v9 = vsel %vm194_vm0, %v6356_v51, %v16581_v19 }
 0x3cc   :  { %6638 = vrot.lane.b32.xlu1 %v6637_v26, %s7251_s0  ;;  %6633 = vrot.lane.b32.xlu0 %v6632_v29, %s7251_s0  ;;  %v13094_v63 = vpop.permute.xlu1 %6428  ;;  %v6355_v26 = vunpack.i.l.bf16 %v12962_v42  ;;  %v13126_v28 = vpop.permute.xlu0 %6453  ;;  %v16578_v29 = vld [vmem:[#allocation214_spill] sm:$0xff]  ;;  %v16582_v42 = vunpack.i.l.bf16 %v16580_v12  ;;  %v16604_v12 = vld [vmem:[#allocation185_spill] sm:$0xff] }
 0x3cd   :  { %16577 = vst [vmem:[#allocation171_spill] sm:$0xff] %v13126_v28  ;;  %v16605_v19 = vunpack.i.h.bf16 %v16604_v12 }
 0x3ce   :  { %v2797_v37 = vsel %vm194_vm0, %v6355_v26, %v16582_v42  ;;  %v6336_v26 = vunpack.i.h.bf16 %v12956_v0  ;;  %v6351_v42 = vunpack.i.h.bf16 %v12950_v46 }
 0x3cf   :  { %v6722_v53 = vpack.i.bf16 %v2797_v37, %v16590_v25  ;;  %v6455_v37 = vunpack.i.l.bf16 %v13126_v28 }
 0x3d0   :  { %6648 = vrot.lane.b32.xlu1 %v16556_v58, %s7252_s5  ;;  %6643 = vrot.lane.b32.xlu0 %v16557_v11, %s7252_s5  ;;  %v13110_v16 = vpop.permute.xlu1 %6438  ;;  %v6315_v58 = vunpack.i.l.bf16 %v12948_v27  ;;  %v6321_v11 = vunpack.i.h.bf16 %v12942_v41  ;;  %v16584_v27 = vld [vmem:[#allocation122_spill] sm:$0xff] }
 0x3d1   :  { %16571 = vst [vmem:[#allocation41_spill] sm:$0xff] %v13110_v16 }
 0x3d2   :  { %v13163_v17 = vsel %vm194_vm0, %v6315_v58, %v16591_v1  ;;  %v6341_v1 = vunpack.i.h.bf16 %v12946_v43 }
 0x3d3   :  { %16592 = vst [vmem:[#allocation137_spill] sm:$0xff] %v13163_v17  ;;  %v16629_v17 = vld [vmem:[#allocation197_spill] sm:$0xff] }
 0x3d4   :  { %6658 = vrot.lane.b32.xlu1 %v16561_v36, %s7252_s5  ;;  %6653 = vrot.lane.b32.xlu0 %v16562_v2, %s7252_s5  ;;  %v13122_v56 = vpop.permute.xlu1 %6448  ;;  %v6320_v36 = vunpack.i.l.bf16 %v12942_v41  ;;  %v6326_v2 = vunpack.i.h.bf16 %v12952_v20  ;;  %v16589_v41 = vld [vmem:[#allocation207_spill] sm:$0xff]  ;;  %v16630_v58 = vunpack.i.h.bf16 %v16629_v17 }
 0x3d8   :  { %6668 = vrot.lane.b32.xlu1 %v6667_v33, %s7251_s0  ;;  %6663 = vrot.lane.b32.xlu0 %v6662_v48, %s7251_s0  ;;  %v13141_v39 = vpop.permute.xlu1 %6458  ;;  %v6325_v33 = vunpack.i.l.bf16 %v12952_v20  ;;  %v16586_v48 = vunpack.i.h.bf16 %v16585_v59  ;;  %v16594_v20 = vunpack.i.h.bf16 %v16593_v60  ;;  %v6340_v60 = vunpack.i.l.bf16 %v12946_v43 }
 0x3d9   :  { %v6345_v43 = vunpack.i.l.bf16 %v12960_v44 }
 0x3da   :  { %v13153_v61 = vsel %vm194_vm0, %v6316_v24, %v16586_v48 }
 0x3db   :  { %16587 = vst [vmem:[#allocation172_spill] sm:$0xff] %v13153_v61 }
 0x3dc   :  { %6678 = vrot.lane.b32.xlu1 %v16566_v22, %s7252_s5  ;;  %6673 = vrot.lane.b32.xlu0 %v16567_v15, %s7252_s5  ;;  %v13156_v22 = vpop.permute.xlu0 %6463  ;;  %v6727_v15 = vpack.i.bf16 %v2798_v9, %v16589_v41  ;;  %v13190_v24 = vpop.permute.xlu1 %6468  ;;  %v13197_v9 = vsel %vm194_vm0, %v6331_v55, %v16605_v19  ;;  %v6430_v41 = vunpack.i.l.bf16 %v13094_v63  ;;  %v16667_v55 = vld [vmem:[#allocation48_spill] sm:$0xff] }
 0x3dd   :  { %16588 = vst [vmem:[#allocation173_spill] sm:$0xff] %v13156_v22  ;;  %vm190_vm1 = vcmp.ge.s32.totalorder %v16667_v55, 14 }
 0x3e0   :  { %6688 = vrot.lane.b32.xlu1 %v16572_v47, %s7252_s5  ;;  %6683 = vrot.lane.b32.xlu0 %v16573_v23, %s7252_s5  ;;  %v13168_v47 = vsel %vm194_vm0, %v6321_v11, %v16594_v20  ;;  %v6330_v23 = vunpack.i.l.bf16 %v12944_v52  ;;  %v13221_v20 = vpop.permute.xlu0 %6473  ;;  %v16620_v11 = vld [vmem:[#allocation188_spill] sm:$0xff] }
 0x3e1   :  { %16595 = vst [vmem:[#allocation42_spill] sm:$0xff] %v13168_v47 }
 0x3e4   :  { %6698 = vrot.lane.b32.xlu1 %v6697_v62, %s7251_s0  ;;  %6693 = vrot.lane.b32.xlu0 %v6692_v3, %s7251_s0  ;;  %v13174_v62 = vsel %vm194_vm0, %v6320_v36, %v16596_v14  ;;  %v16599_v3 = vunpack.i.h.bf16 %v16598_v8  ;;  %v13250_v36 = vpop.permute.xlu1 %6478 }
 0x3e5   :  { %16597 = vst [vmem:[#allocation170_spill] sm:$0xff] %v13174_v62 }
 0x3e6   :  { %v13179_v51 = vsel %vm194_vm0, %v6326_v2, %v16599_v3  ;;  %v16628_v2 = vld [vmem:[#allocation192_spill] sm:$0xff] }
 0x3e7   :  { %16600 = vst [vmem:[#allocation34_spill] sm:$0xff] %v13179_v51  ;;  %v16696_v51 = vld [vmem:[#allocation38_spill] sm:$0xff] }
 0x3e8   :  { %6708 = vrot.lane.b32.xlu1 %v16578_v29, %s7252_s5  ;;  %6703 = vrot.lane.b32.xlu0 %v16579_v30, %s7252_s5  ;;  %v16601_v29 = vunpack.i.l.bf16 %v16598_v8  ;;  %v6335_v30 = vunpack.i.l.bf16 %v12956_v0  ;;  %v16608_v0 = vunpack.i.l.bf16 %v16604_v12  ;;  %v16617_v12 = vld [vmem:[#allocation187_spill] sm:$0xff] }
 0x3e9   :  { %v16622_v8 = vld [vmem:[#allocation191_spill] sm:$0xff] }
 0x3ea   :  { %v13187_v52 = vsel %vm194_vm0, %v6325_v33, %v16601_v29  ;;  %v6350_v33 = vunpack.i.l.bf16 %v12950_v46  ;;  %v16614_v46 = vld [vmem:[#allocation164_spill] sm:$0xff]  ;;  %v6346_v29 = vunpack.i.h.bf16 %v12960_v44  ;;  %v6431_v44 = vunpack.i.h.bf16 %v13094_v63  ;;  %v16627_v63 = vld [vmem:[#allocation121_spill] sm:$0xff] }
 0x3eb   :  { %16602 = vst [vmem:[#allocation132_spill] sm:$0xff] %v13187_v52 }
 0x3ec   :  { %6718 = vrot.lane.b32.xlu1 %v16583_v40, %s7252_s5  ;;  %6713 = vrot.lane.b32.xlu0 %v16584_v27, %s7252_s5  ;;  %v13207_v27 = vsel %vm194_vm0, %v6330_v23, %v16608_v0  ;;  %v16613_v23 = vld [vmem:[#allocation210_spill] sm:$0xff]  ;;  %v16618_v0 = vld [vmem:[#allocation201_spill] sm:$0xff]  ;;  %v6401_v40 = vunpack.i.h.bf16 %v13062_v21 }
 0x3f0   :  { %6728 = vrot.lane.b32.xlu1 %v6727_v15, %s7251_s0  ;;  %6723 = vrot.lane.b32.xlu0 %v6722_v53, %s7251_s0  ;;  %v16611_v15 = vld [vmem:[#allocation189_spill] sm:$0xff] }
 0x3f1   :  { %v16612_v25 = vunpack.i.h.bf16 %v16611_v15  ;;  %v16616_v3 = vunpack.i.l.bf16 %v16611_v15 }
 0x3f3   :  { %v13217_v53 = vsel %vm194_vm0, %v6336_v26, %v16612_v25  ;;  %v13232_v26 = vsel %vm194_vm0, %v6335_v30, %v16616_v3  ;;  %v16619_v25 = vunpack.i.h.bf16 %v16618_v0  ;;  %v16621_v30 = vunpack.i.l.bf16 %v16618_v0 }
 0x3f4   :  { %6738 = vrot.lane.b32.xlu1 %v16613_v23, %s7252_s5  ;;  %6733 = vrot.lane.b32.xlu0 %v16614_v46, %s7252_s5  ;;  %v6396_v46 = vunpack.i.h.bf16 %v13056_v31 }
 0x3f5   :  { %v2796_v23 = vsel %vm194_vm0, %v6351_v42, %v16619_v25  ;;  %v2795_v3 = vsel %vm194_vm0, %v6350_v33, %v16621_v30  ;;  %v16623_v25 = vld [vmem:[#allocation193_spill] sm:$0xff]  ;;  %v6400_v33 = vunpack.i.l.bf16 %v13062_v21  ;;  %v16626_v30 = vld [vmem:[#allocation102_spill] sm:$0xff]  ;;  %v6395_v21 = vunpack.i.l.bf16 %v13056_v31 }
 0x3f6   :  { %v16624_v48 = vunpack.i.h.bf16 %v16623_v25  ;;  %v16625_v15 = vunpack.i.l.bf16 %v16623_v25  ;;  %v16635_v42 = vunpack.i.h.bf16 %v12712_v50  ;;  %v6405_v31 = vunpack.i.l.bf16 %v13064_v54 }
 0x3f8   :  { %v13257_v19 = vsel %vm194_vm0, %v6341_v1, %v16624_v48  ;;  %v13262_v0 = vsel %vm194_vm0, %v6340_v60, %v16625_v15  ;;  %6748 = vrot.lane.b32.xlu1 %v16626_v30, %s7252_s5  ;;  %6743 = vrot.lane.b32.xlu0 %v16627_v63, %s7252_s5  ;;  %v13274_v48 = vsel %vm194_vm0, %v6346_v29, %v16630_v58  ;;  %v16631_v1 = vunpack.i.l.bf16 %v16629_v17  ;;  %v16632_v15 = vld [vmem:[#allocation203_spill] sm:$0xff]  ;;  %v13294_v17 = vpop.permute.xlu0 %6483  ;;  %v16637_v29 = vld [vmem:[#allocation204_spill] sm:$0xff] }
 0x3f9   :  { %v6757_v25 = vpack.i.bf16 %v2796_v23, %v16632_v15  ;;  %v16633_v30 = vunpack.i.h.bf16 %v12690_v7  ;;  %v13291_v61 = vsel %vm194_vm0, %v6401_v40, %v16635_v42  ;;  %v6406_v58 = vunpack.i.h.bf16 %v13064_v54  ;;  %v16642_v54 = vld [vmem:[#allocation195_spill] sm:$0xff] }
 0x3fa   :  { %v13279_v60 = vsel %vm194_vm0, %v6345_v43, %v16631_v1  ;;  %16636 = vst [vmem:[#allocation98_spill] sm:$0xff] %v13291_v61  ;;  %v6752_v43 = vpack.i.bf16 %v2795_v3, %v16637_v29  ;;  %v6411_v23 = vunpack.i.h.bf16 %v13072_v13  ;;  %v16638_v1 = vunpack.i.h.bf16 %v12844_v35  ;;  %v16643_v29 = vld [vmem:[#allocation196_spill] sm:$0xff] }
 0x3fb   :  { %v13286_v63 = vsel %vm194_vm0, %v6396_v46, %v16633_v30  ;;  %v16639_v15 = vunpack.i.l.bf16 %v12844_v35  ;;  %v16640_v40 = vunpack.i.l.bf16 %v12712_v50  ;;  %v16644_v35 = vunpack.i.l.bf16 %v12690_v7  ;;  %v13321_v50 = vpop.permute.xlu1 %6488 }
 0x3fc   :  { %16634 = vst [vmem:[#allocation168_spill] sm:$0xff] %v13286_v63  ;;  %v2828_v46 = vsel %vm194_vm0, %v6431_v44, %v16638_v1  ;;  %6758 = vrot.lane.b32.xlu1 %v6757_v25, %s7251_s0  ;;  %6753 = vrot.lane.b32.xlu0 %v6752_v43, %s7251_s0  ;;  %v16650_v1 = vunpack.i.l.bf16 %v12734_v18  ;;  %v16652_v43 = vunpack.i.h.bf16 %v12756_v10 }
 0x3fd   :  { %v2827_v30 = vsel %vm194_vm0, %v6430_v41, %v16639_v15  ;;  %v13308_v42 = vsel %vm194_vm0, %v6400_v33, %v16640_v40  ;;  %v13319_v41 = vsel %vm194_vm0, %v6395_v21, %v16644_v35  ;;  %v16646_v33 = vld [vmem:[#allocation199_spill] sm:$0xff]  ;;  %v16647_v15 = vld [vmem:[#allocation200_spill] sm:$0xff]  ;;  %v6410_v40 = vunpack.i.l.bf16 %v13072_v13 }
 0x3fe   :  { %16641 = vst [vmem:[#allocation70_spill] sm:$0xff] %v13308_v42  ;;  %16645 = vst [vmem:[#allocation218_spill] sm:$0xff] %v13319_v41  ;;  %v6767_v44 = vpack.i.bf16 %v2828_v46, %v12858_v38  ;;  %v6762_v7 = vpack.i.bf16 %v2827_v30, %v12864_v57  ;;  %v16648_v35 = vunpack.i.h.bf16 %v12734_v18  ;;  %v13342_v25 = vsel %vm194_vm0, %v6405_v31, %v16650_v1  ;;  %v6494_v18 = vpop.permute.xlu0 %6493 }
 0x3ff   :  { %16651 = vst [vmem:[#allocation167_spill] sm:$0xff] %v13342_v25  ;;  %v13347_v13 = vsel %vm194_vm0, %v6411_v23, %v16652_v43  ;;  %v6416_v46 = vunpack.i.h.bf16 %v13074_v49  ;;  %v6415_v30 = vunpack.i.l.bf16 %v13074_v49  ;;  %v6426_v31 = vunpack.i.h.bf16 %v13088_v4  ;;  %v6499_v42 = vpop.permute.xlu1 %6498  ;;  %v16682_v25 = vld [vmem:[#allocation242_spill] sm:$0xff] }
 0x400   :  { %v13337_v3 = vsel %vm194_vm0, %v6406_v58, %v16648_v35  ;;  %16653 = vst [vmem:[#allocation213_spill] sm:$0xff] %v13347_v13  ;;  %v6421_v58 = vunpack.i.h.bf16 %v13086_v45  ;;  %v6420_v35 = vunpack.i.l.bf16 %v13086_v45  ;;  %6768 = vrot.lane.b32.xlu1 %v6767_v44, %s7251_s0  ;;  %6763 = vrot.lane.b32.xlu0 %v6762_v7, %s7251_s0  ;;  %v6425_v23 = vunpack.i.l.bf16 %v13088_v4  ;;  %v16663_v44 = vld [vmem:[#allocation235_spill] sm:$0xff]  ;;  %v16665_v4 = vld [vmem:[#allocation244_spill] sm:$0xff] }
 0x401   :  { %16649 = vst [vmem:[#allocation219_spill] sm:$0xff] %v13337_v3  ;;  %v6435_v43 = vunpack.i.l.bf16 %v13098_v5  ;;  %v16655_v57 = vunpack.i.l.bf16 %v12756_v10  ;;  %v6445_v1 = vunpack.i.l.bf16 %v13116_v34  ;;  %v6496_v41 = vunpack.i.h.bf16 %v6494_v18  ;;  %v16660_v10 = vld [vmem:[#allocation231_spill] sm:$0xff]  ;;  %v16684_v3 = vld [vmem:[#allocation118_spill] sm:$0xff] }
 0x402   :  { %v6495_v38 = vunpack.i.l.bf16 %v6494_v18  ;;  %v16661_v32 = vunpack.i.h.bf16 %v16660_v10  ;;  %v16664_v61 = vunpack.i.h.bf16 %v16663_v44  ;;  %v16666_v18 = vld [vmem:[#allocation206_spill] sm:$0xff]  ;;  %v6500_v47 = vunpack.i.l.bf16 %v6499_v42 }
 0x403   :  { %v13364_v49 = vsel %vm194_vm0, %v6410_v40, %v16655_v57  ;;  %v16662_v57 = vunpack.i.l.bf16 %v16660_v10 }
 0x404   :  { %16656 = vst [vmem:[#allocation26_spill] sm:$0xff] %v13364_v49  ;;  %v13377_v40 = vsel %vm194_vm0, %v6416_v46, %v16661_v32  ;;  %v13387_v63 = vsel %vm194_vm0, %v6421_v58, %v16664_v61  ;;  %6778 = vrot.lane.b32.xlu1 %v16665_v4, %s7252_s5  ;;  %6773 = vrot.lane.b32.xlu0 %v16666_v18, %s7252_s5  ;;  %v16668_v32 = vunpack.i.l.bf16 %v16663_v44  ;;  %v16672_v4 = vunpack.i.h.bf16 %v13098_v5  ;;  %v16678_v5 = vld [vmem:[#allocation13_spill] sm:$0xff]  ;;  %v16701_v49 = vld [vmem:[#allocation202_spill] sm:$0xff] }
 0x405   :  { %v13382_v45 = vsel %vm194_vm0, %v6415_v30, %v16662_v57  ;;  %v16669_v30 = vld [vmem:[#allocation239_spill] sm:$0xff]  ;;  %v6501_v44 = vunpack.i.h.bf16 %v6499_v42  ;;  %v6465_v18 = vunpack.i.l.bf16 %v13156_v22 }
 0x406   :  { %v13397_v46 = vsel %vm194_vm0, %v6420_v35, %v16668_v32  ;;  %v16670_v10 = vunpack.i.h.bf16 %v16669_v30  ;;  %v16671_v61 = vunpack.i.l.bf16 %v16669_v30  ;;  %v3218_v62 = vsel %vm3217_vm15, %v6435_v43, %v16672_v4  ;;  %v16673_v35 = vld [vmem:[#allocation54_spill] sm:$0xff]  ;;  %v16677_v42 = vld [vmem:[#allocation163_spill] sm:$0xff] }
 0x407   :  { %vm193_vm2 = vcmp.lt.s32.totalorder %v16673_v35, 182  ;;  %v16674_v32 = vunpack.i.h.bf16 %v13116_v34  ;;  %v3232_v30 = vsel %vm3217_vm15, %v6495_v38, %v6496_v41  ;;  %v16679_v34 = vld [vmem:[#allocation237_spill] sm:$0xff]  ;;  %v16680_v38 = vld [vmem:[#allocation234_spill] sm:$0xff] }
 0x408   :  { %v2826_v57 = vsel %vm194_vm0, %v6426_v31, %v16670_v10  ;;  %v2825_v58 = vsel %vm194_vm0, %v6425_v23, %v16671_v61  ;;  %v16675_v10 = vld [vmem:[#allocation233_spill] sm:$0xff]  ;;  %6788 = vrot.lane.b32.xlu1 %v16677_v42, %s7252_s5  ;;  %6783 = vrot.lane.b32.xlu0 %v16678_v5, %s7252_s5  ;;  %v13436_v42 = vsel %vm190_vm1, %v3218_v62, %v16684_v3  ;;  %v16686_v5 = vunpack.i.h.bf16 %v13126_v28  ;;  %v16700_v61 = vld [vmem:[#allocation243_spill] sm:$0xff] }
 0x409   :  { %v3220_v31 = vsel %vm3217_vm15, %v6445_v1, %v16674_v32  ;;  %v16681_v23 = vld [vmem:[#allocation241_spill] sm:$0xff]  ;;  %v6802_v43 = vpack.i.bf16 %v2825_v58, %v16682_v25  ;;  %16685 = vst [vmem:[#allocation127_spill] sm:$0xff] %v13436_v42  ;;  %v3233_v1 = vsel %vm3217_vm15, %v6500_v47, %v6501_v44  ;;  %vm3990_vm0 = vcmask 932864   ;;  %v16688_v58 = vld [vmem:[#allocation59_spill] sm:$0xff] }
 0x40a   :  { %v6807_v7 = vpack.i.bf16 %v2826_v57, %v16681_v23  ;;  %v13441_v14 = vsel %vm3217_vm15, %v6455_v37, %v16686_v5  ;;  %v6509_v32 = vpop.permute.xlu1 %6508  ;;  %v6504_v52 = vpop.permute.xlu0 %6503  ;;  %v16687_v57 = vld [vmem:[#allocation45_spill] sm:$0xff]  ;;  %v13450_v23 = vsel %vm190_vm1, %v3220_v31, %v16688_v58  ;;  %v16690_v37 = vunpack.i.h.bf16 %v13156_v22 }
 0x40b   :  { %v3438_v25 = vsel %vm190_vm1, %v3232_v30, %v16687_v57  ;;  %16689 = vst [vmem:[#allocation215_spill] sm:$0xff] %v13450_v23  ;;  %v6511_v62 = vunpack.i.h.bf16 %v6509_v32  ;;  %v6510_v4 = vunpack.i.l.bf16 %v6509_v32  ;;  %v6506_v3 = vunpack.i.h.bf16 %v6504_v52 }
 0x40c   :  { %v6505_v42 = vunpack.i.l.bf16 %v6504_v52  ;;  %v13455_v47 = vsel %vm3217_vm15, %v6465_v18, %v16690_v37  ;;  %v16691_v30 = vpack.i.bf16 %v13274_v48, %v16646_v33  ;;  %v16692_v31 = vpack.i.bf16 %v13279_v60, %v16647_v15  ;;  %v16693_v52 = vld [vmem:[#allocation134_spill] sm:$0xff]  ;;  %v16694_v37 = vld [vmem:[#allocation69_spill] sm:$0xff]  ;;  %v16697_v60 = vld [vmem:[#allocation111_spill] sm:$0xff] }
 0x40d   :  { %v3567_v32 = vmax.f32 %v16693_v52, %v6496_v41  ;;  %v3265_v58 = vsel %vm3217_vm15, %v6510_v4, %v6511_v62  ;;  %v3440_v59 = vsel %vm190_vm1, %v3233_v1, %v16694_v37  ;;  %v3566_v5 = vmax.f32 %v16687_v57, %v3438_v25  ;;  %v16695_v33 = vld [vmem:[#allocation77_spill] sm:$0xff]  ;;  %v16699_v57 = vld [vmem:[#allocation138_spill] sm:$0xff] }
 0x40e   :  { %6798 = vrot.lane.b32.xlu1 %v16691_v30, %s7251_s0  ;;  %6793 = vrot.lane.b32.xlu0 %v16692_v31, %s7251_s0  ;;  %v3264_v18 = vsel %vm3217_vm15, %v6505_v42, %v6506_v3  ;;  %v6519_v23 = vpop.permute.xlu1 %6518  ;;  %v6514_v48 = vpop.permute.xlu0 %6513  ;;  %v3569_v30 = vmax.f32 %v16695_v33, %v6501_v44  ;;  %v3631_v28 = vmax.f32 %v16696_v51, %v6506_v3  ;;  %v16698_v31 = vld [vmem:[#allocation139_spill] sm:$0xff]  ;;  %v6485_v1 = vunpack.i.l.bf16 %v13294_v17 }
 0x40f   :  { %v3633_v15 = vmax.f32 %v16697_v60, %v6511_v62  ;;  %v3502_v41 = vsel %vm190_vm1, %v3264_v18, %v16698_v31  ;;  %v6521_v4 = vunpack.i.h.bf16 %v6519_v23  ;;  %v6520_v42 = vunpack.i.l.bf16 %v6519_v23 }
 0x410   :  { %v6516_v52 = vunpack.i.h.bf16 %v6514_v48  ;;  %v6515_v16 = vunpack.i.l.bf16 %v6514_v48  ;;  %v3568_v44 = vmax.f32 %v16694_v37, %v3440_v59  ;;  %v3504_v51 = vsel %vm190_vm1, %v3265_v58, %v16699_v57 }
 0x411   :  { %v3630_v3 = vmax.f32 %v16698_v31, %v3502_v41  ;;  %v4276_v62 = vsel %vm193_vm2, %v6520_v42, %v3631_v28  ;;  %v3632_v22 = vmax.f32 %v16699_v57, %v3504_v51  ;;  %v15509_v57 = vunpack.i.h.bf16 %v13321_v50 }
 0x412   :  { %6808 = vrot.lane.b32.xlu1 %v6807_v7, %s7251_s0  ;;  %6803 = vrot.lane.b32.xlu0 %v6802_v43, %s7251_s0  ;;  %v4212_v25 = vsel %vm193_vm2, %v6515_v16, %v3567_v32  ;;  %v4214_v23 = vsel %vm193_vm2, %v6516_v52, %v3569_v30  ;;  %v4278_v7 = vsel %vm193_vm2, %v6521_v4, %v3633_v15  ;;  %v6529_v43 = vpop.permute.xlu1 %6528  ;;  %v6524_v59 = vpop.permute.xlu0 %6523  ;;  %v16706_v51 = vunpack.i.h.bf16 %v13294_v17 }
 0x413   :  { %v4340_v18 = vmax.f32 %v3567_v32, %v4212_v25  ;;  %v4342_v37 = vmax.f32 %v3569_v30, %v4214_v23  ;;  %v4404_v48 = vmax.f32 %v3631_v28, %v4276_v62  ;;  %v4406_v58 = vmax.f32 %v3633_v15, %v4278_v7 }
 0x414   :  { %v6531_v33 = vunpack.i.h.bf16 %v6529_v43  ;;  %v6530_v60 = vunpack.i.l.bf16 %v6529_v43  ;;  %v6526_v31 = vunpack.i.h.bf16 %v6524_v59  ;;  %v6525_v41 = vunpack.i.l.bf16 %v6524_v59 }
 0x415   :  { %v4502_v21 = vpack.c.bf16 %v4342_v37, %v4340_v18  ;;  %v4534_v13 = vpack.c.bf16 %v4406_v58, %v4404_v48  ;;  %v16707_v37 = vld [vmem:[#allocation126_spill] sm:$0xff]  ;;  %v16708_v58 = vld [vmem:[#allocation61_spill] sm:$0xff] }
 0x416   :  { %6818 = vrot.lane.b32.xlu1 %v16700_v61, %s7252_s5  ;;  %6813 = vrot.lane.b32.xlu0 %v16701_v49, %s7252_s5  ;;  %v4005_v32 = vsel %vm3990_vm0, %v6525_v41, %v6515_v16  ;;  %v4006_v28 = vsel %vm3990_vm0, %v6526_v31, %v6516_v52  ;;  %v4037_v30 = vsel %vm3990_vm0, %v6530_v60, %v6520_v42  ;;  %v6539_v25 = vpop.permute.xlu1 %6538  ;;  %v6534_v23 = vpop.permute.xlu0 %6533  ;;  %v6490_v16 = vunpack.i.l.bf16 %v13321_v50  ;;  %v16702_v52 = vld [vmem:[#allocation160_spill] sm:$0xff] }
 0x417   :  { %v4038_v15 = vsel %vm3990_vm0, %v6531_v33, %v6521_v4  ;;  %4551 = vmatprep.subr.bf16.mxu0 %v4502_v21  ;;  %4624 = vmatprep.subr.bf16.mxu1 %v4534_v13  ;;  %v4339_v61 = vmax.f32 %v3566_v5, %v4005_v32  ;;  %v4341_v62 = vmax.f32 %v3568_v44, %v4006_v28  ;;  %v6541_v49 = vunpack.i.h.bf16 %v6539_v25  ;;  %v16703_v4 = vld [vmem:[#allocation19_spill] sm:$0xff]  ;;  %v16724_v33 = vld [vmem:[#allocation198_spill] sm:$0xff] }
 0x418   :  { %v4403_v7 = vmax.f32 %v3630_v3, %v4037_v30  ;;  %v6540_v43 = vunpack.i.l.bf16 %v6539_v25  ;;  %v6536_v59 = vunpack.i.h.bf16 %v6534_v23  ;;  %v6535_v18 = vunpack.i.l.bf16 %v6534_v23 }
 0x419   :  { %v4501_v42 = vpack.c.bf16 %v4341_v62, %v4339_v61  ;;  %v4405_v21 = vmax.f32 %v3632_v22, %v4038_v15  ;;  %v16704_v13 = vunpack.i.h.bf16 %v13221_v20  ;;  %v16705_v5 = vunpack.i.l.bf16 %v13221_v20  ;;  %v16710_v61 = vld [vmem:[#allocation131_spill] sm:$0xff] }
 0x41a   :  { %6828 = vrot.lane.b32.xlu1 %v16702_v52, %s7252_s5  ;;  %6823 = vrot.lane.b32.xlu0 %v16703_v4, %s7252_s5  ;;  %v3228_v3 = vsel %vm3217_vm15, %v6485_v1, %v16706_v51  ;;  %v13524_v48 = vsel %vm190_vm1, %v13455_v47, %v16707_v37  ;;  %v13530_v22 = vsel %vm190_vm1, %v13441_v14, %v16708_v58  ;;  %v6549_v41 = vpop.permute.xlu1 %6548  ;;  %v6544_v1 = vpop.permute.xlu0 %6543  ;;  %v16714_v4 = vld [vmem:[#allocation133_spill] sm:$0xff]  ;;  %v16717_v51 = vld [vmem:[#allocation30_spill] sm:$0xff] }
 0x41b   :  { %v3226_v44 = vsel %vm3217_vm15, %v16705_v5, %v16704_v13  ;;  %v3231_v60 = vsel %vm3217_vm15, %v6540_v43, %v6541_v49  ;;  %v3230_v31 = vsel %vm3217_vm15, %v6535_v18, %v6536_v59  ;;  %4552 = vmatpush1.bf16.msra.mxu0 %v4501_v42  ;;  %v4533_v32 = vpack.c.bf16 %v4405_v21, %v4403_v7  ;;  %v16711_v7 = vld [vmem:[#allocation71_spill] sm:$0xff]  ;;  %v16715_v21 = vld [vmem:[#allocation130_spill] sm:$0xff]  ;;  %v16716_v5 = vld [vmem:[#allocation73_spill] sm:$0xff] }
 0x41c   :  { %v6551_v28 = vunpack.i.h.bf16 %v6549_v41  ;;  %v6550_v30 = vunpack.i.l.bf16 %v6549_v41  ;;  %v6546_v47 = vunpack.i.h.bf16 %v6544_v1  ;;  %v6545_v15 = vunpack.i.l.bf16 %v6544_v1  ;;  %v16718_v41 = vld [vmem:[#allocation35_spill] sm:$0xff] }
 0x41d   :  { %v13539_v14 = vsel %vm3217_vm15, %v6490_v16, %v15509_v57  ;;  %4625 = vmatpush1.bf16.msra.mxu1 %v4533_v32  ;;  %v16709_v23 = vpack.i.bf16 %v13257_v19, %v16642_v54  ;;  %v13548_v62 = vsel %vm190_vm1, %v3228_v3, %v16710_v61  ;;  %v13553_v43 = vsel %vm190_vm1, %v3226_v44, %v16711_v7  ;;  %v16713_v19 = vld [vmem:[#allocation76_spill] sm:$0xff] }
 0x41e   :  { %v3263_v18 = vsel %vm3217_vm15, %v6550_v30, %v6551_v28  ;;  %v3262_v16 = vsel %vm3217_vm15, %v6545_v15, %v6546_v47  ;;  %v16712_v52 = vpack.i.bf16 %v13262_v0, %v16643_v29  ;;  %v3434_v54 = vsel %vm190_vm1, %v3230_v31, %v16713_v19  ;;  %v6559_v32 = vpop.permute.xlu1 %6558  ;;  %v6554_v30 = vpop.permute.xlu0 %6553 }
 0x41f   :  { %6838 = vrot.lane.b32.xlu1 %v16709_v23, %s7251_s0  ;;  %v3436_v42 = vsel %vm190_vm1, %v3231_v60, %v16714_v4  ;;  %v3565_v13 = vmax.f32 %v16715_v21, %v6541_v49  ;;  %v3563_v44 = vmax.f32 %v16716_v5, %v6536_v59  ;;  %v3629_v3 = vmax.f32 %v16717_v51, %v6551_v28  ;;  %v16720_v59 = vld [vmem:[#allocation136_spill] sm:$0xff] }
 0x420   :  { %6833 = vrot.lane.b32.xlu0 %v16712_v52, %s7251_s0  ;;  %v3627_v1 = vmax.f32 %v16718_v41, %v6546_v47  ;;  %v6561_v0 = vunpack.i.h.bf16 %v6559_v32  ;;  %v6560_v29 = vunpack.i.l.bf16 %v6559_v32  ;;  %v6556_v15 = vunpack.i.h.bf16 %v6554_v30  ;;  %v16721_v47 = vld [vmem:[#allocation135_spill] sm:$0xff] }
 0x421   :  { %v6555_v23 = vunpack.i.l.bf16 %v6554_v30  ;;  %v16719_v31 = vpack.i.bf16 %v13387_v63, %v16679_v34  ;;  %v3562_v60 = vmax.f32 %v16713_v19, %v3434_v54  ;;  %v3564_v49 = vmax.f32 %v16714_v4, %v3436_v42  ;;  %v16723_v30 = vld [vmem:[#allocation240_spill] sm:$0xff] }
 0x422   :  { %v3498_v28 = vsel %vm190_vm1, %v3262_v16, %v16720_v59  ;;  %v3500_v52 = vsel %vm190_vm1, %v3263_v18, %v16721_v47  ;;  %v16722_v21 = vpack.i.bf16 %v13397_v46, %v16683_v6  ;;  %v4210_v63 = vsel %vm193_vm2, %v6556_v15, %v3565_v13  ;;  %v6569_v54 = vpop.permute.xlu1 %6568  ;;  %v6564_v4 = vpop.permute.xlu0 %6563 }
 0x423   :  { %6848 = vrot.lane.b32.xlu1 %v16719_v31, %s7251_s0  ;;  %v4208_v34 = vsel %vm193_vm2, %v6555_v23, %v3563_v44  ;;  %v4272_v19 = vsel %vm193_vm2, %v6560_v29, %v3627_v1  ;;  %v4274_v16 = vsel %vm193_vm2, %v6561_v0, %v3629_v3  ;;  %v4338_v42 = vmax.f32 %v3565_v13, %v4210_v63 }
 0x424   :  { %6843 = vrot.lane.b32.xlu0 %v16722_v21, %s7251_s0  ;;  %v4336_v18 = vmax.f32 %v3563_v44, %v4208_v34  ;;  %v4400_v5 = vmax.f32 %v3627_v1, %v4272_v19  ;;  %v4402_v51 = vmax.f32 %v3629_v3, %v4274_v16  ;;  %v6571_v6 = vunpack.i.h.bf16 %v6569_v54 }
 0x425   :  { %v6570_v46 = vunpack.i.l.bf16 %v6569_v54  ;;  %v6566_v41 = vunpack.i.h.bf16 %v6564_v4  ;;  %v6565_v32 = vunpack.i.l.bf16 %v6564_v4  ;;  %v3626_v57 = vmax.f32 %v16720_v59, %v3498_v28  ;;  %v16728_v4 = vld [vmem:[#allocation129_spill] sm:$0xff] }
 0x426   :  { %v4500_v31 = vpack.c.bf16 %v4338_v42, %v4336_v18  ;;  %v4532_v21 = vpack.c.bf16 %v4402_v51, %v4400_v5  ;;  %v3628_v25 = vmax.f32 %v16721_v47, %v3500_v52  ;;  %v4036_v1 = vsel %vm3990_vm0, %v6571_v6, %v6561_v0  ;;  %v6579_v63 = vpop.permute.xlu1 %6578  ;;  %v6574_v19 = vpop.permute.xlu0 %6573  ;;  %v16729_v42 = vld [vmem:[#allocation155_spill] sm:$0xff]  ;;  %v16730_v51 = vld [vmem:[#allocation12_spill] sm:$0xff]  ;;  %v16731_v6 = vld [vmem:[#allocation74_spill] sm:$0xff] }
 0x427   :  { %6858 = vrot.lane.b32.xlu1 %v16723_v30, %s7252_s5  ;;  %v4003_v13 = vsel %vm3990_vm0, %v6565_v32, %v6555_v23  ;;  %v4004_v44 = vsel %vm3990_vm0, %v6566_v41, %v6556_v15  ;;  %v4035_v3 = vsel %vm3990_vm0, %v6570_v46, %v6560_v29  ;;  %v6471_v34 = vunpack.i.h.bf16 %v13190_v24  ;;  %v16733_v32 = vld [vmem:[#allocation67_spill] sm:$0xff] }
 0x428   :  { %6853 = vrot.lane.b32.xlu0 %v16724_v33, %s7252_s5  ;;  %4553 = vmatprep.subr.bf16.mxu0 %v4500_v31  ;;  %v4335_v59 = vmax.f32 %v3562_v60, %v4003_v13  ;;  %v4337_v28 = vmax.f32 %v3564_v49, %v4004_v44  ;;  %v4399_v47 = vmax.f32 %v3626_v57, %v4035_v3  ;;  %v6581_v52 = vunpack.i.h.bf16 %v6579_v63 }
 0x429   :  { %4626 = vmatprep.subr.bf16.mxu1 %v4532_v21  ;;  %v6580_v16 = vunpack.i.l.bf16 %v6579_v63  ;;  %v6576_v33 = vunpack.i.h.bf16 %v6574_v19  ;;  %v6575_v54 = vunpack.i.l.bf16 %v6574_v19  ;;  %v16725_v23 = vunpack.i.h.bf16 %v13250_v36  ;;  %v16735_v21 = vld [vmem:[#allocation29_spill] sm:$0xff] }
 0x42a   :  { %v16726_v15 = vunpack.i.l.bf16 %v13250_v36  ;;  %v16727_v0 = vunpack.i.h.bf16 %v13294_v17  ;;  %v4499_v60 = vpack.c.bf16 %v4337_v28, %v4335_v59  ;;  %v4401_v57 = vmax.f32 %v3628_v25, %v4036_v1  ;;  %v16734_v25 = vld [vmem:[#allocation32_spill] sm:$0xff]  ;;  %v6589_v44 = vpop.permute.xlu1 %6588  ;;  %v6584_v3 = vpop.permute.xlu0 %6583 }
 0x42b   :  { %6868 = vrot.lane.b32.xlu1 %v16729_v42, %s7252_s5  ;;  %v3261_v49 = vsel %vm3217_vm15, %v6580_v16, %v6581_v52  ;;  %v3260_v5 = vsel %vm3217_vm15, %v6575_v54, %v6576_v33  ;;  %v3432_v46 = vsel %vm190_vm1, %v13539_v14, %v16731_v6  ;;  %v3558_v17 = vmax.f32 %v16710_v61, %v13548_v62  ;;  %v16737_v62 = vld [vmem:[#allocation105_spill] sm:$0xff]  ;;  %v16738_v16 = vld [vmem:[#allocation110_spill] sm:$0xff] }
 0x42c   :  { %v13611_v29 = vsel %vm3217_vm15, %v16726_v15, %v16725_v23  ;;  %v3559_v18 = vmax.f32 %v16728_v4, %v16727_v0  ;;  %6863 = vrot.lane.b32.xlu0 %v16730_v51, %s7252_s5  ;;  %v16732_v41 = vunpack.i.h.bf16 %v13321_v50  ;;  %v3625_v31 = vmax.f32 %v16734_v25, %v6581_v52  ;;  %4554 = vmatpush1.bf16.msra.mxu0 %v4499_v60 }
 0x42d   :  { %v3623_v13 = vmax.f32 %v16735_v21, %v6576_v33  ;;  %v4531_v1 = vpack.c.bf16 %v4401_v57, %v4399_v47  ;;  %v6591_v63 = vunpack.i.h.bf16 %v6589_v44  ;;  %v6590_v19 = vunpack.i.l.bf16 %v6589_v44 }
 0x42e   :  { %v3561_v30 = vmax.f32 %v16733_v32, %v16732_v41  ;;  %v6586_v59 = vunpack.i.h.bf16 %v6584_v3  ;;  %v6585_v28 = vunpack.i.l.bf16 %v6584_v3  ;;  %v6470_v14 = vunpack.i.l.bf16 %v13190_v24  ;;  %v6599_v15 = vpop.permute.xlu1 %6598  ;;  %v6594_v0 = vpop.permute.xlu0 %6593 }
 0x42f   :  { %4627 = vmatpush1.bf16.msra.mxu1 %v4531_v1  ;;  %v16736_v50 = vpack.i.bf16 %v13217_v53, %v16622_v8  ;;  %v3560_v61 = vmax.f32 %v16731_v6, %v3432_v46  ;;  %v3494_v52 = vsel %vm190_vm1, %v3260_v5, %v16737_v62  ;;  %v3496_v47 = vsel %vm190_vm1, %v3261_v49, %v16738_v16 }
 0x430   :  { %v16739_v33 = vpack.i.bf16 %v13232_v26, %v16628_v2  ;;  %v4204_v54 = vsel %vm193_vm2, %v6585_v28, %v3559_v18  ;;  %v4206_v53 = vsel %vm193_vm2, %v6586_v59, %v3561_v30  ;;  %v4268_v8 = vsel %vm193_vm2, %v6590_v19, %v3623_v13 }
 0x431   :  { %6878 = vrot.lane.b32.xlu1 %v16736_v50, %s7251_s0  ;;  %v4270_v23 = vsel %vm193_vm2, %v6591_v63, %v3625_v31  ;;  %v4332_v4 = vmax.f32 %v3559_v18, %v4204_v54  ;;  %v4334_v42 = vmax.f32 %v3561_v30, %v4206_v53  ;;  %v4396_v60 = vmax.f32 %v3623_v13, %v4268_v8  ;;  %v16746_v54 = vld [vmem:[#allocation128_spill] sm:$0xff]  ;;  %v16748_v8 = vld [vmem:[#allocation125_spill] sm:$0xff] }
 0x432   :  { %6873 = vrot.lane.b32.xlu0 %v16739_v33, %s7251_s0  ;;  %v4398_v57 = vmax.f32 %v3625_v31, %v4270_v23  ;;  %v6601_v2 = vunpack.i.h.bf16 %v6599_v15  ;;  %v6600_v26 = vunpack.i.l.bf16 %v6599_v15  ;;  %v6596_v49 = vunpack.i.h.bf16 %v6594_v0  ;;  %v6609_v21 = vpop.permute.xlu1 %6608  ;;  %v6604_v13 = vpop.permute.xlu0 %6603  ;;  %v16745_v33 = vld [vmem:[#allocation194_spill] sm:$0xff]  ;;  %v16749_v15 = vld [vmem:[#allocation92_spill] sm:$0xff] }
 0x433   :  { %v6595_v5 = vunpack.i.l.bf16 %v6594_v0  ;;  %v16740_v51 = vpack.i.bf16 %v13377_v40, %v16675_v10  ;;  %v4498_v6 = vpack.c.bf16 %v4334_v42, %v4332_v4  ;;  %v3622_v41 = vmax.f32 %v16737_v62, %v3494_v52  ;;  %v16744_v52 = vld [vmem:[#allocation236_spill] sm:$0xff]  ;;  %v16750_v4 = vld [vmem:[#allocation106_spill] sm:$0xff] }
 0x434   :  { %v4530_v46 = vpack.c.bf16 %v4398_v57, %v4396_v60  ;;  %v3624_v32 = vmax.f32 %v16738_v16, %v3496_v47  ;;  %v16741_v18 = vpack.i.bf16 %v13382_v45, %v16680_v38  ;;  %v4002_v25 = vsel %vm3990_vm0, %v6596_v49, %v6586_v59 }
 0x435   :  { %6888 = vrot.lane.b32.xlu1 %v16740_v51, %s7251_s0  ;;  %v4001_v30 = vsel %vm3990_vm0, %v6595_v5, %v6585_v28  ;;  %v4033_v31 = vsel %vm3990_vm0, %v6600_v26, %v6590_v19  ;;  %v4034_v40 = vsel %vm3990_vm0, %v6601_v2, %v6591_v63  ;;  %v6461_v10 = vunpack.i.h.bf16 %v13141_v39  ;;  %4555 = vmatprep.subr.bf16.mxu0 %v4498_v6  ;;  %v16743_v19 = vld [vmem:[#allocation68_spill] sm:$0xff] }
 0x436   :  { %6883 = vrot.lane.b32.xlu0 %v16741_v18, %s7251_s0  ;;  %4628 = vmatprep.subr.bf16.mxu1 %v4530_v46  ;;  %v4331_v44 = vmax.f32 %v3558_v17, %v4001_v30  ;;  %v4333_v3 = vmax.f32 %v3560_v61, %v4002_v25  ;;  %v4395_v1 = vmax.f32 %v3622_v41, %v4033_v31  ;;  %v6611_v50 = vunpack.i.h.bf16 %v6609_v21  ;;  %v6619_v60 = vpop.permute.xlu1 %6618  ;;  %v6614_v57 = vpop.permute.xlu0 %6613  ;;  %v16753_v46 = vld [vmem:[#allocation108_spill] sm:$0xff] }
 0x437   :  { %v6610_v45 = vunpack.i.l.bf16 %v6609_v21  ;;  %v6606_v38 = vunpack.i.h.bf16 %v6604_v13  ;;  %v6605_v62 = vunpack.i.l.bf16 %v6604_v13  ;;  %v13675_v59 = vsel %vm3217_vm15, %v6470_v14, %v6471_v34 }
 0x438   :  { %v16742_v63 = vunpack.i.h.bf16 %v13221_v20  ;;  %v4497_v16 = vpack.c.bf16 %v4333_v3, %v4331_v44  ;;  %v4397_v17 = vmax.f32 %v3624_v32, %v4034_v40  ;;  %v3428_v14 = vsel %vm190_vm1, %v13611_v29, %v16746_v54  ;;  %v16754_v32 = vld [vmem:[#allocation4_spill] sm:$0xff] }
 0x439   :  { %6898 = vrot.lane.b32.xlu1 %v16744_v52, %s7252_s5  ;;  %v3259_v61 = vsel %vm3217_vm15, %v6610_v45, %v6611_v50  ;;  %v3258_v47 = vsel %vm3217_vm15, %v6605_v62, %v6606_v38  ;;  %v3554_v20 = vmax.f32 %v16711_v7, %v13553_v43  ;;  %v16747_v53 = vunpack.i.h.bf16 %v13250_v36  ;;  %v16751_v7 = vld [vmem:[#allocation53_spill] sm:$0xff]  ;;  %v16752_v43 = vld [vmem:[#allocation63_spill] sm:$0xff] }
 0x43a   :  { %v3555_v28 = vmax.f32 %v16743_v19, %v16742_v63  ;;  %6893 = vrot.lane.b32.xlu0 %v16745_v33, %s7252_s5  ;;  %v3621_v0 = vmax.f32 %v16749_v15, %v6611_v50  ;;  %v3619_v42 = vmax.f32 %v16750_v4, %v6606_v38  ;;  %4556 = vmatpush1.bf16.msra.mxu0 %v4497_v16  ;;  %v6621_v26 = vunpack.i.h.bf16 %v6619_v60  ;;  %v6629_v40 = vpop.permute.xlu1 %6628  ;;  %v6624_v21 = vpop.permute.xlu0 %6623 }
 0x43b   :  { %v3557_v23 = vmax.f32 %v16748_v8, %v16747_v53  ;;  %v4529_v2 = vpack.c.bf16 %v4397_v17, %v4395_v1  ;;  %v6620_v49 = vunpack.i.l.bf16 %v6619_v60  ;;  %v6616_v5 = vunpack.i.h.bf16 %v6614_v57 }
 0x43c   :  { %v6615_v51 = vunpack.i.l.bf16 %v6614_v57  ;;  %v6460_v29 = vunpack.i.l.bf16 %v13141_v39  ;;  %v3556_v36 = vmax.f32 %v16746_v54, %v3428_v14  ;;  %v3490_v6 = vsel %vm190_vm1, %v3258_v47, %v16752_v43  ;;  %v16759_v57 = vld [vmem:[#allocation124_spill] sm:$0xff]  ;;  %v16791_v39 = vld [vmem:[#allocation226_spill] sm:$0xff] }
 0x43d   :  { %4629 = vmatpush1.bf16.msra.mxu1 %v4529_v2  ;;  %6908 = vrot.lane.b32.xlu1 %v16751_v7, %s7252_s5  ;;  %v3492_v41 = vsel %vm190_vm1, %v3259_v61, %v16753_v46  ;;  %v4202_v30 = vsel %vm193_vm2, %v6616_v5, %v3557_v23  ;;  %v4264_v25 = vsel %vm193_vm2, %v6620_v49, %v3619_v42  ;;  %v6631_v50 = vunpack.i.h.bf16 %v6629_v40 }
 0x43e   :  { %6903 = vrot.lane.b32.xlu0 %v16754_v32, %s7252_s5  ;;  %v4200_v18 = vsel %vm193_vm2, %v6615_v51, %v3555_v28  ;;  %v4266_v31 = vsel %vm193_vm2, %v6621_v26, %v3621_v0  ;;  %v4330_v44 = vmax.f32 %v3557_v23, %v4202_v30  ;;  %v4392_v3 = vmax.f32 %v3619_v42, %v4264_v25  ;;  %v6639_v54 = vpop.permute.xlu1 %6638  ;;  %v6634_v14 = vpop.permute.xlu0 %6633  ;;  %v16757_v42 = vld [vmem:[#allocation173_spill] sm:$0xff]  ;;  %v16768_v25 = vld [vmem:[#allocation23_spill] sm:$0xff] }
 0x43f   :  { %v4328_v13 = vmax.f32 %v3555_v28, %v4200_v18  ;;  %v4394_v1 = vmax.f32 %v3621_v0, %v4266_v31  ;;  %v6630_v45 = vunpack.i.l.bf16 %v6629_v40  ;;  %v6626_v38 = vunpack.i.h.bf16 %v6624_v21  ;;  %v16767_v18 = vld [vmem:[#allocation62_spill] sm:$0xff]  ;;  %v16769_v40 = vld [vmem:[#allocation24_spill] sm:$0xff] }
 0x440   :  { %v6625_v62 = vunpack.i.l.bf16 %v6624_v21  ;;  %v16755_v63 = vpack.i.bf16 %v13197_v9, %v16617_v12  ;;  %v3618_v16 = vmax.f32 %v16752_v43, %v3490_v6  ;;  %v3620_v17 = vmax.f32 %v16753_v46, %v3492_v41  ;;  %v16763_v43 = vld [vmem:[#allocation26_spill] sm:$0xff]  ;;  %v16766_v46 = vld [vmem:[#allocation64_spill] sm:$0xff] }
 0x441   :  { %v4496_v19 = vpack.c.bf16 %v4330_v44, %v4328_v13  ;;  %v4528_v52 = vpack.c.bf16 %v4394_v1, %v4392_v3  ;;  %v16756_v28 = vpack.i.bf16 %v13207_v27, %v16620_v11  ;;  %v4000_v47 = vsel %vm3990_vm0, %v6626_v38, %v6616_v5  ;;  %v16764_v6 = vld [vmem:[#allocation230_spill] sm:$0xff] }
 0x442   :  { %6918 = vrot.lane.b32.xlu1 %v16755_v63, %s7251_s0  ;;  %v3999_v61 = vsel %vm3990_vm0, %v6625_v62, %v6615_v51  ;;  %v4031_v33 = vsel %vm3990_vm0, %v6630_v45, %v6620_v49  ;;  %v4032_v9 = vsel %vm3990_vm0, %v6631_v50, %v6621_v26  ;;  %v6451_v12 = vunpack.i.h.bf16 %v13122_v56  ;;  %v16760_v26 = vld [vmem:[#allocation213_spill] sm:$0xff]  ;;  %v6649_v13 = vpop.permute.xlu1 %6648  ;;  %v6644_v44 = vpop.permute.xlu0 %6643  ;;  %v16772_v62 = vld [vmem:[#allocation107_spill] sm:$0xff] }
 0x443   :  { %6913 = vrot.lane.b32.xlu0 %v16756_v28, %s7251_s0  ;;  %4557 = vmatprep.subr.bf16.mxu0 %v4496_v19  ;;  %v4327_v53 = vmax.f32 %v3554_v20, %v3999_v61  ;;  %v4329_v8 = vmax.f32 %v3556_v36, %v4000_v47  ;;  %v4391_v23 = vmax.f32 %v3618_v16, %v4031_v33  ;;  %v6641_v15 = vunpack.i.h.bf16 %v6639_v54  ;;  %v16761_v49 = vld [vmem:[#allocation229_spill] sm:$0xff]  ;;  %v16773_v19 = vld [vmem:[#allocation190_spill] sm:$0xff] }
 0x444   :  { %4630 = vmatprep.subr.bf16.mxu1 %v4528_v52  ;;  %v6640_v11 = vunpack.i.l.bf16 %v6639_v54  ;;  %v6636_v27 = vunpack.i.h.bf16 %v6634_v14  ;;  %v6635_v0 = vunpack.i.l.bf16 %v6634_v14  ;;  %v13735_v4 = vsel %vm3217_vm15, %v6460_v29, %v6461_v10 }
 0x445   :  { %v16758_v60 = vunpack.i.h.bf16 %v16757_v42  ;;  %v16762_v5 = vpack.i.bf16 %v16760_v26, %v16761_v49  ;;  %v4495_v20 = vpack.c.bf16 %v4329_v8, %v4327_v53  ;;  %v4393_v51 = vmax.f32 %v3620_v17, %v4032_v9 }
 0x446   :  { %v3257_v7 = vsel %vm3217_vm15, %v6640_v11, %v6641_v15  ;;  %v3256_v36 = vsel %vm3217_vm15, %v6635_v0, %v6636_v27  ;;  %v16765_v29 = vpack.i.bf16 %v16763_v43, %v16764_v6  ;;  %v3424_v41 = vsel %vm190_vm1, %v13675_v59, %v16766_v46  ;;  %v6659_v61 = vpop.permute.xlu1 %6658  ;;  %v6654_v47 = vpop.permute.xlu0 %6653  ;;  %v16774_v11 = vld [vmem:[#allocation115_spill] sm:$0xff] }
 0x447   :  { %v3551_v2 = vmax.f32 %v16759_v57, %v16758_v60  ;;  %6928 = vrot.lane.b32.xlu1 %v16762_v5, %s7251_s0  ;;  %v3550_v32 = vmax.f32 %v16707_v37, %v13524_v48  ;;  %v3553_v30 = vmax.f32 %v16767_v18, %v6471_v34  ;;  %v3617_v31 = vmax.f32 %v16768_v25, %v6641_v15  ;;  %v16770_v37 = vld [vmem:[#allocation232_spill] sm:$0xff]  ;;  %v16771_v48 = vld [vmem:[#allocation27_spill] sm:$0xff] }
 0x448   :  { %6923 = vrot.lane.b32.xlu0 %v16765_v29, %s7251_s0  ;;  %v3615_v21 = vmax.f32 %v16769_v40, %v6636_v27  ;;  %4558 = vmatpush1.bf16.msra.mxu0 %v4495_v20  ;;  %v4527_v3 = vpack.c.bf16 %v4393_v51, %v4391_v23  ;;  %v6651_v1 = vunpack.i.h.bf16 %v6649_v13  ;;  %v6650_v50 = vunpack.i.l.bf16 %v6649_v13  ;;  %v16775_v57 = vld [vmem:[#allocation84_spill] sm:$0xff]  ;;  %v16776_v20 = vld [vmem:[#allocation41_spill] sm:$0xff] }
 0x449   :  { %v6646_v45 = vunpack.i.h.bf16 %v6644_v44  ;;  %v6645_v38 = vunpack.i.l.bf16 %v6644_v44  ;;  %v6450_v59 = vunpack.i.l.bf16 %v13122_v56  ;;  %v3552_v24 = vmax.f32 %v16766_v46, %v3424_v41  ;;  %v16780_v44 = vld [vmem:[#allocation34_spill] sm:$0xff] }
 0x44a   :  { %4631 = vmatpush1.bf16.msra.mxu1 %v4527_v3  ;;  %v3486_v34 = vsel %vm190_vm1, %v3256_v36, %v16771_v48  ;;  %v3488_v63 = vsel %vm190_vm1, %v3257_v7, %v16772_v62  ;;  %v4260_v17 = vsel %vm193_vm2, %v6650_v50, %v3615_v21  ;;  %v4262_v28 = vsel %vm193_vm2, %v6651_v1, %v3617_v31  ;;  %v6669_v7 = vpop.permute.xlu1 %6668  ;;  %v6664_v36 = vpop.permute.xlu0 %6663  ;;  %v16781_v3 = vld [vmem:[#allocation183_spill] sm:$0xff] }
 0x44b   :  { %6938 = vrot.lane.b32.xlu1 %v16770_v37, %s7252_s5  ;;  %v4196_v52 = vsel %vm193_vm2, %v6645_v38, %v3551_v2  ;;  %v4198_v16 = vsel %vm193_vm2, %v6646_v45, %v3553_v30  ;;  %v4388_v54 = vmax.f32 %v3615_v21, %v4260_v17  ;;  %v4390_v14 = vmax.f32 %v3617_v31, %v4262_v28  ;;  %v16777_v31 = vld [vmem:[#allocation171_spill] sm:$0xff]  ;;  %v16779_v21 = vld [vmem:[#allocation58_spill] sm:$0xff]  ;;  %v16783_v37 = vld [vmem:[#allocation132_spill] sm:$0xff] }
 0x44c   :  { %6933 = vrot.lane.b32.xlu0 %v16773_v19, %s7252_s5  ;;  %v4324_v33 = vmax.f32 %v3551_v2, %v4196_v52  ;;  %v4326_v9 = vmax.f32 %v3553_v30, %v4198_v16  ;;  %v6661_v53 = vunpack.i.h.bf16 %v6659_v61  ;;  %v6660_v8 = vunpack.i.l.bf16 %v6659_v61  ;;  %v16788_v52 = vld [vmem:[#allocation103_spill] sm:$0xff]  ;;  %v16789_v17 = vld [vmem:[#allocation101_spill] sm:$0xff] }
 0x44d   :  { %v6656_v23 = vunpack.i.h.bf16 %v6654_v47  ;;  %v6655_v15 = vunpack.i.l.bf16 %v6654_v47  ;;  %v4526_v0 = vpack.c.bf16 %v4390_v14, %v4388_v54  ;;  %v3614_v42 = vmax.f32 %v16771_v48, %v3486_v34  ;;  %v16786_v48 = vld [vmem:[#allocation123_spill] sm:$0xff] }
 0x44e   :  { %v4494_v27 = vpack.c.bf16 %v4326_v9, %v4324_v33  ;;  %v3616_v60 = vmax.f32 %v16772_v62, %v3488_v63  ;;  %v4029_v49 = vsel %vm3990_vm0, %v6660_v8, %v6650_v50  ;;  %v4030_v5 = vsel %vm3990_vm0, %v6661_v53, %v6651_v1  ;;  %v16787_v63 = vld [vmem:[#allocation55_spill] sm:$0xff]  ;;  %v6679_v61 = vpop.permute.xlu1 %6678  ;;  %v6674_v47 = vpop.permute.xlu0 %6673  ;;  %v16793_v8 = vld [vmem:[#allocation97_spill] sm:$0xff] }
 0x44f   :  { %6948 = vrot.lane.b32.xlu1 %v16774_v11, %s7252_s5  ;;  %v3997_v2 = vsel %vm3990_vm0, %v6655_v15, %v6645_v38  ;;  %v3998_v26 = vsel %vm3990_vm0, %v6656_v23, %v6646_v45  ;;  %v6441_v51 = vunpack.i.h.bf16 %v16776_v20  ;;  %4632 = vmatprep.subr.bf16.mxu1 %v4526_v0  ;;  %v4387_v29 = vmax.f32 %v3614_v42, %v4029_v49  ;;  %v16794_v15 = vld [vmem:[#allocation20_spill] sm:$0xff]  ;;  %v16796_v0 = vld [vmem:[#allocation227_spill] sm:$0xff] }
 0x450   :  { %6943 = vrot.lane.b32.xlu0 %v16775_v57, %s7252_s5  ;;  %4559 = vmatprep.subr.bf16.mxu0 %v4494_v27  ;;  %v4323_v43 = vmax.f32 %v3550_v32, %v3997_v2  ;;  %v4325_v6 = vmax.f32 %v3552_v24, %v3998_v26  ;;  %v6671_v46 = vunpack.i.h.bf16 %v6669_v7  ;;  %v6670_v41 = vunpack.i.l.bf16 %v6669_v7  ;;  %v16784_v24 = vld [vmem:[#allocation184_spill] sm:$0xff]  ;;  %v16795_v27 = vld [vmem:[#allocation167_spill] sm:$0xff] }
 0x451   :  { %v6666_v18 = vunpack.i.h.bf16 %v6664_v36  ;;  %v6665_v30 = vunpack.i.l.bf16 %v6664_v36  ;;  %v13795_v25 = vsel %vm3217_vm15, %v6450_v59, %v6451_v12  ;;  %v16778_v40 = vunpack.i.h.bf16 %v16777_v31 }
 0x452   :  { %v16782_v1 = vpack.i.bf16 %v16780_v44, %v16781_v3  ;;  %v4493_v32 = vpack.c.bf16 %v4325_v6, %v4323_v43  ;;  %v4389_v50 = vmax.f32 %v3616_v60, %v4030_v5  ;;  %v3255_v45 = vsel %vm3217_vm15, %v6670_v41, %v6671_v46  ;;  %v6689_v49 = vpop.permute.xlu1 %6688  ;;  %v6684_v5 = vpop.permute.xlu0 %6683  ;;  %v16799_v3 = vld [vmem:[#allocation186_spill] sm:$0xff] }
 0x453   :  { %v3547_v13 = vmax.f32 %v16779_v21, %v16778_v40  ;;  %v3254_v38 = vsel %vm3217_vm15, %v6665_v30, %v6666_v18  ;;  %v16785_v59 = vpack.i.bf16 %v16783_v37, %v16784_v24  ;;  %v3420_v34 = vsel %vm190_vm1, %v13735_v4, %v16786_v48  ;;  %v16798_v30 = vld [vmem:[#allocation228_spill] sm:$0xff] }
 0x454   :  { %6958 = vrot.lane.b32.xlu1 %v16782_v1, %s7251_s0  ;;  %v3546_v62 = vmax.f32 %v16708_v58, %v13530_v22  ;;  %v3549_v19 = vmax.f32 %v16787_v63, %v6461_v10  ;;  %v3613_v16 = vmax.f32 %v16788_v52, %v6671_v46  ;;  %v3611_v28 = vmax.f32 %v16789_v17, %v6666_v18  ;;  %v16790_v58 = vld [vmem:[#allocation219_spill] sm:$0xff] }
 0x455   :  { %6953 = vrot.lane.b32.xlu0 %v16785_v59, %s7251_s0  ;;  %4560 = vmatpush1.bf16.msra.mxu0 %v4493_v32  ;;  %v4525_v33 = vpack.c.bf16 %v4389_v50, %v4387_v29  ;;  %v6681_v9 = vunpack.i.h.bf16 %v6679_v61  ;;  %v6680_v54 = vunpack.i.l.bf16 %v6679_v61  ;;  %v6676_v14 = vunpack.i.h.bf16 %v6674_v47 }
 0x456   :  { %v6675_v53 = vunpack.i.l.bf16 %v6674_v47  ;;  %v6440_v4 = vunpack.i.l.bf16 %v16776_v20  ;;  %v16792_v22 = vpack.i.bf16 %v16790_v58, %v16791_v39  ;;  %v3548_v10 = vmax.f32 %v16786_v48, %v3420_v34  ;;  %v16803_v47 = vld [vmem:[#allocation146_spill] sm:$0xff]  ;;  %v16806_v58 = vld [vmem:[#allocation215_spill] sm:$0xff] }
 0x457   :  { %4633 = vmatpush1.bf16.msra.mxu1 %v4525_v33  ;;  %v3482_v23 = vsel %vm190_vm1, %v3254_v38, %v16793_v8  ;;  %v3484_v11 = vsel %vm190_vm1, %v3255_v45, %v16794_v15  ;;  %v16797_v42 = vpack.i.bf16 %v16795_v27, %v16796_v0  ;;  %v4194_v57 = vsel %vm193_vm2, %v6676_v14, %v3549_v19  ;;  %v6699_v45 = vpop.permute.xlu1 %6698  ;;  %v6694_v38 = vpop.permute.xlu0 %6693  ;;  %v16807_v39 = vld [vmem:[#allocation59_spill] sm:$0xff] }
 0x458   :  { %6968 = vrot.lane.b32.xlu1 %v16792_v22, %s7251_s0  ;;  %v4192_v60 = vsel %vm193_vm2, %v6675_v53, %v3547_v13  ;;  %v4256_v2 = vsel %vm193_vm2, %v6680_v54, %v3611_v28  ;;  %v4258_v26 = vsel %vm193_vm2, %v6681_v9, %v3613_v16  ;;  %v4322_v36 = vmax.f32 %v3549_v19, %v4194_v57  ;;  %v16839_v20 = vld [vmem:[#allocation143_spill] sm:$0xff] }
 0x459   :  { %6963 = vrot.lane.b32.xlu0 %v16797_v42, %s7251_s0  ;;  %v4320_v7 = vmax.f32 %v3547_v13, %v4192_v60  ;;  %v4384_v43 = vmax.f32 %v3611_v28, %v4256_v2  ;;  %v4386_v6 = vmax.f32 %v3613_v16, %v4258_v26  ;;  %v6691_v29 = vunpack.i.h.bf16 %v6689_v49  ;;  %v16800_v16 = vld [vmem:[#allocation33_spill] sm:$0xff]  ;;  %v16802_v28 = vld [vmem:[#allocation119_spill] sm:$0xff] }
 0x45a   :  { %v6690_v46 = vunpack.i.l.bf16 %v6689_v49  ;;  %v6686_v41 = vunpack.i.h.bf16 %v6684_v5  ;;  %v6685_v18 = vunpack.i.l.bf16 %v6684_v5  ;;  %v3610_v21 = vmax.f32 %v16793_v8, %v3482_v23  ;;  %v16809_v23 = vld [vmem:[#allocation95_spill] sm:$0xff] }
 0x45b   :  { %v4492_v31 = vpack.c.bf16 %v4322_v36, %v4320_v7  ;;  %v4524_v40 = vpack.c.bf16 %v4386_v6, %v4384_v43  ;;  %v3612_v44 = vmax.f32 %v16794_v15, %v3484_v11  ;;  %v4028_v50 = vsel %vm3990_vm0, %v6691_v29, %v6681_v9  ;;  %v16810_v11 = vld [vmem:[#allocation21_spill] sm:$0xff]  ;;  %v6709_v0 = vpop.permute.xlu1 %6708  ;;  %v6704_v42 = vpop.permute.xlu0 %6703  ;;  %v16812_v5 = vld [vmem:[#allocation179_spill] sm:$0xff]  ;;  %v16815_v43 = vld [vmem:[#allocation16_spill] sm:$0xff] }
 0x45c   :  { %6978 = vrot.lane.b32.xlu1 %v16798_v30, %s7252_s5  ;;  %v3995_v13 = vsel %vm3990_vm0, %v6685_v18, %v6675_v53  ;;  %v3996_v1 = vsel %vm3990_vm0, %v6686_v41, %v6676_v14  ;;  %v4027_v32 = vsel %vm3990_vm0, %v6690_v46, %v6680_v54  ;;  %v6701_v48 = vunpack.i.h.bf16 %v6699_v45  ;;  %v16804_v14 = vld [vmem:[#allocation89_spill] sm:$0xff]  ;;  %v16805_v53 = vld [vmem:[#allocation120_spill] sm:$0xff]  ;;  %v16816_v29 = vld [vmem:[#allocation170_spill] sm:$0xff] }
 0x45d   :  { %6973 = vrot.lane.b32.xlu0 %v16799_v3, %s7252_s5  ;;  %4561 = vmatprep.subr.bf16.mxu0 %v4492_v31  ;;  %v4319_v37 = vmax.f32 %v3546_v62, %v3995_v13  ;;  %v4321_v24 = vmax.f32 %v3548_v10, %v3996_v1  ;;  %v4383_v59 = vmax.f32 %v3610_v21, %v4027_v32  ;;  %v6700_v34 = vunpack.i.l.bf16 %v6699_v45  ;;  %v16808_v10 = vld [vmem:[#allocation52_spill] sm:$0xff] }
 0x45e   :  { %4634 = vmatprep.subr.bf16.mxu1 %v4524_v40  ;;  %v6696_v63 = vunpack.i.h.bf16 %v6694_v38  ;;  %v6695_v19 = vunpack.i.l.bf16 %v6694_v38  ;;  %v13858_v52 = vsel %vm3217_vm15, %v6440_v4, %v6441_v51  ;;  %v16801_v17 = vunpack.i.h.bf16 %v16800_v16  ;;  %v16817_v46 = vld [vmem:[#allocation180_spill] sm:$0xff] }
 0x45f   :  { %v4491_v33 = vpack.c.bf16 %v4321_v24, %v4319_v37  ;;  %v4385_v62 = vmax.f32 %v3612_v44, %v4028_v50  ;;  %v3253_v9 = vsel %vm3217_vm15, %v6700_v34, %v6701_v48  ;;  %v3416_v4 = vsel %vm190_vm1, %v13795_v25, %v16805_v53  ;;  %v16811_v25 = vld [vmem:[#allocation42_spill] sm:$0xff]  ;;  %v6719_v21 = vpop.permute.xlu1 %6718  ;;  %v6714_v44 = vpop.permute.xlu0 %6713 }
 0x460   :  { %v3543_v61 = vmax.f32 %v16802_v28, %v16801_v17  ;;  %6988 = vrot.lane.b32.xlu1 %v16803_v47, %s7252_s5  ;;  %v3252_v54 = vsel %vm3217_vm15, %v6695_v19, %v6696_v63  ;;  %v3542_v22 = vmax.f32 %v16807_v39, %v16806_v58  ;;  %v3545_v8 = vmax.f32 %v16808_v10, %v6451_v12  ;;  %v16814_v12 = vld [vmem:[#allocation22_spill] sm:$0xff]  ;;  %v16823_v47 = vld [vmem:[#allocation224_spill] sm:$0xff] }
 0x461   :  { %6983 = vrot.lane.b32.xlu0 %v16804_v14, %s7252_s5  ;;  %v3609_v15 = vmax.f32 %v16809_v23, %v6701_v48  ;;  %v3607_v27 = vmax.f32 %v16810_v11, %v6696_v63  ;;  %4562 = vmatpush1.bf16.msra.mxu0 %v4491_v33  ;;  %v4523_v60 = vpack.c.bf16 %v4385_v62, %v4383_v59  ;;  %v6711_v57 = vunpack.i.h.bf16 %v6709_v0  ;;  %v16819_v24 = vld [vmem:[#allocation98_spill] sm:$0xff]  ;;  %v16820_v59 = vld [vmem:[#allocation223_spill] sm:$0xff] }
 0x462   :  { %v6710_v2 = vunpack.i.l.bf16 %v6709_v0  ;;  %v6706_v26 = vunpack.i.h.bf16 %v6704_v42  ;;  %v6705_v49 = vunpack.i.l.bf16 %v6704_v42  ;;  %v16813_v7 = vpack.i.bf16 %v16811_v25, %v16812_v5  ;;  %v16828_v42 = vld [vmem:[#allocation225_spill] sm:$0xff]  ;;  %v16831_v5 = vld [vmem:[#allocation182_spill] sm:$0xff] }
 0x463   :  { %4635 = vmatpush1.bf16.msra.mxu1 %v4523_v60  ;;  %v3544_v56 = vmax.f32 %v16805_v53, %v3416_v4  ;;  %v3478_v36 = vsel %vm190_vm1, %v3252_v54, %v16814_v12  ;;  %v3480_v6 = vsel %vm190_vm1, %v3253_v9, %v16815_v43  ;;  %v16818_v41 = vpack.i.bf16 %v16816_v29, %v16817_v46  ;;  %v6729_v54 = vpop.permute.xlu1 %6728  ;;  %v6724_v14 = vpop.permute.xlu0 %6723  ;;  %v16836_v46 = vld [vmem:[#allocation8_spill] sm:$0xff] }
 0x464   :  { %6998 = vrot.lane.b32.xlu1 %v16813_v7, %s7251_s0  ;;  %v4188_v18 = vsel %vm193_vm2, %v6705_v49, %v3543_v61  ;;  %v4190_v30 = vsel %vm193_vm2, %v6706_v26, %v3545_v8  ;;  %v4252_v31 = vsel %vm193_vm2, %v6710_v2, %v3607_v27  ;;  %v4254_v40 = vsel %vm193_vm2, %v6711_v57, %v3609_v15  ;;  %v16832_v7 = vld [vmem:[#allocation56_spill] sm:$0xff] }
 0x465   :  { %6993 = vrot.lane.b32.xlu0 %v16818_v41, %s7251_s0  ;;  %v4316_v3 = vmax.f32 %v3543_v61, %v4188_v18  ;;  %v4318_v13 = vmax.f32 %v3545_v8, %v4190_v30  ;;  %v4380_v1 = vmax.f32 %v3607_v27, %v4252_v31  ;;  %v4382_v32 = vmax.f32 %v3609_v15, %v4254_v40  ;;  %v16822_v61 = vld [vmem:[#allocation70_spill] sm:$0xff]  ;;  %v16825_v15 = vld [vmem:[#allocation169_spill] sm:$0xff] }
 0x466   :  { %v6721_v50 = vunpack.i.h.bf16 %v6719_v21  ;;  %v6720_v45 = vunpack.i.l.bf16 %v6719_v21  ;;  %v6716_v38 = vunpack.i.h.bf16 %v6714_v44  ;;  %v6715_v37 = vunpack.i.l.bf16 %v6714_v44  ;;  %v16827_v27 = vld [vmem:[#allocation117_spill] sm:$0xff]  ;;  %v16837_v18 = vld [vmem:[#allocation10_spill] sm:$0xff] }
 0x467   :  { %v16821_v48 = vpack.i.bf16 %v16819_v24, %v16820_v59  ;;  %v4490_v34 = vpack.c.bf16 %v4318_v13, %v4316_v3  ;;  %v4522_v63 = vpack.c.bf16 %v4382_v32, %v4380_v1  ;;  %v3606_v19 = vmax.f32 %v16814_v12, %v3478_v36  ;;  %v16833_v12 = vld [vmem:[#allocation127_spill] sm:$0xff]  ;;  %v16834_v36 = vld [vmem:[#allocation118_spill] sm:$0xff]  ;;  %v6739_v31 = vpop.permute.xlu1 %6738  ;;  %v6734_v40 = vpop.permute.xlu0 %6733 }
 0x468   :  { %v3608_v16 = vmax.f32 %v16815_v43, %v3480_v6  ;;  %v3993_v17 = vsel %vm3990_vm0, %v6715_v37, %v6705_v49  ;;  %v3994_v28 = vsel %vm3990_vm0, %v6716_v38, %v6706_v26  ;;  %v16824_v33 = vpack.i.bf16 %v16822_v61, %v16823_v47  ;;  %v16830_v26 = vld [vmem:[#allocation218_spill] sm:$0xff]  ;;  %v16835_v6 = vld [vmem:[#allocation49_spill] sm:$0xff] }
 0x469   :  { %7008 = vrot.lane.b32.xlu1 %v16821_v48, %s7251_s0  ;;  %v4025_v62 = vsel %vm3990_vm0, %v6720_v45, %v6710_v2  ;;  %v4026_v9 = vsel %vm3990_vm0, %v6721_v50, %v6711_v57  ;;  %4563 = vmatprep.subr.bf16.mxu0 %v4490_v34  ;;  %v4315_v53 = vmax.f32 %v3542_v22, %v3993_v17  ;;  %v6731_v39 = vunpack.i.h.bf16 %v6729_v54  ;;  %v16829_v2 = vld [vmem:[#allocation221_spill] sm:$0xff]  ;;  %v16840_v50 = vld [vmem:[#allocation99_spill] sm:$0xff]  ;;  %v16841_v24 = vld [vmem:[#allocation78_spill] sm:$0xff] }
 0x46a   :  { %7003 = vrot.lane.b32.xlu0 %v16824_v33, %s7251_s0  ;;  %4636 = vmatprep.subr.bf16.mxu1 %v4522_v63  ;;  %v4317_v4 = vmax.f32 %v3544_v56, %v3994_v28  ;;  %v4379_v58 = vmax.f32 %v3606_v19, %v4025_v62  ;;  %v6730_v10 = vunpack.i.l.bf16 %v6729_v54  ;;  %v6726_v8 = vunpack.i.h.bf16 %v6724_v14  ;;  %v16843_v54 = vld [vmem:[#allocation175_spill] sm:$0xff] }
 0x46b   :  { %v6725_v23 = vunpack.i.l.bf16 %v6724_v14  ;;  %v16826_v11 = vunpack.i.h.bf16 %v16825_v15  ;;  %v4381_v57 = vmax.f32 %v3608_v16, %v4026_v9  ;;  %v7042_v49 = vpack.i.bf16 %v16830_v26, %v16829_v2  ;;  %v6749_v34 = vpop.permute.xlu1 %6748  ;;  %v6744_v63 = vpop.permute.xlu0 %6743  ;;  %v16842_v9 = vld [vmem:[#allocation172_spill] sm:$0xff]  ;;  %v16854_v26 = vld [vmem:[#allocation222_spill] sm:$0xff] }
 0x46c   :  { %v4489_v60 = vpack.c.bf16 %v4317_v4, %v4315_v53  ;;  %v3251_v22 = vsel %vm3217_vm15, %v6730_v10, %v6731_v39  ;;  %v3412_v56 = vsel %vm190_vm1, %v13858_v52, %v16832_v7  ;;  %v3538_v43 = vmax.f32 %v16834_v36, %v16833_v12  ;;  %v16838_v52 = vld [vmem:[#allocation18_spill] sm:$0xff]  ;;  %v16846_v15 = vld [vmem:[#allocation176_spill] sm:$0xff] }
 0x46d   :  { %v3539_v0 = vmax.f32 %v16827_v27, %v16826_v11  ;;  %7018 = vrot.lane.b32.xlu1 %v16828_v42, %s7252_s5  ;;  %v3250_v25 = vsel %vm3217_vm15, %v6725_v23, %v6726_v8  ;;  %v3541_v29 = vmax.f32 %v16835_v6, %v6441_v51  ;;  %v3605_v41 = vmax.f32 %v16836_v46, %v6731_v39  ;;  %v16845_v23 = vld [vmem:[#allocation137_spill] sm:$0xff]  ;;  %v16848_v36 = vld [vmem:[#allocation168_spill] sm:$0xff] }
 0x46e   :  { %7013 = vrot.lane.b32.xlu0 %v16831_v5, %s7252_s5  ;;  %v3603_v30 = vmax.f32 %v16837_v18, %v6726_v8  ;;  %4564 = vmatpush1.bf16.msra.mxu0 %v4489_v60  ;;  %v4521_v21 = vpack.c.bf16 %v4381_v57, %v4379_v58  ;;  %v6741_v44 = vunpack.i.h.bf16 %v6739_v31  ;;  %v6740_v3 = vunpack.i.l.bf16 %v6739_v31  ;;  %v16849_v6 = vld [vmem:[#allocation220_spill] sm:$0xff] }
 0x46f   :  { %v6736_v13 = vunpack.i.h.bf16 %v6734_v40  ;;  %v6735_v1 = vunpack.i.l.bf16 %v6734_v40  ;;  %v3474_v32 = vsel %vm190_vm1, %v3250_v25, %v16838_v52  ;;  %v3540_v51 = vmax.f32 %v16832_v7, %v3412_v56  ;;  %v6759_v42 = vpop.permute.xlu1 %6758  ;;  %v6754_v60 = vpop.permute.xlu0 %6753 }
 0x470   :  { %4637 = vmatpush1.bf16.msra.mxu1 %v4521_v21  ;;  %v3476_v45 = vsel %vm190_vm1, %v3251_v22, %v16840_v50  ;;  %v4248_v59 = vsel %vm193_vm2, %v6740_v3, %v3603_v30  ;;  %v4250_v48 = vsel %vm193_vm2, %v6741_v44, %v3605_v41  ;;  %v6751_v61 = vunpack.i.h.bf16 %v6749_v34 }
 0x471   :  { %7028 = vrot.lane.b32.xlu1 %v16839_v20, %s7252_s5  ;;  %v4186_v38 = vsel %vm193_vm2, %v6736_v13, %v3541_v29  ;;  %v4184_v37 = vsel %vm193_vm2, %v6735_v1, %v3539_v0  ;;  %v4376_v17 = vmax.f32 %v3603_v30, %v4248_v59  ;;  %v4378_v28 = vmax.f32 %v3605_v41, %v4250_v48  ;;  %v16851_v30 = vld [vmem:[#allocation100_spill] sm:$0xff]  ;;  %v16856_v59 = vld [vmem:[#allocation17_spill] sm:$0xff] }
 0x472   :  { %7023 = vrot.lane.b32.xlu0 %v16841_v24, %s7252_s5  ;;  %v4312_v19 = vmax.f32 %v3539_v0, %v4184_v37  ;;  %v4314_v16 = vmax.f32 %v3541_v29, %v4186_v38  ;;  %v6750_v47 = vunpack.i.l.bf16 %v6749_v34  ;;  %v6746_v33 = vunpack.i.h.bf16 %v6744_v63  ;;  %v16855_v24 = vld [vmem:[#allocation178_spill] sm:$0xff] }
 0x473   :  { %v6745_v62 = vunpack.i.l.bf16 %v6744_v63  ;;  %v16844_v14 = vpack.i.bf16 %v16842_v9, %v16843_v54  ;;  %v4520_v4 = vpack.c.bf16 %v4378_v28, %v4376_v17  ;;  %v3602_v58 = vmax.f32 %v16838_v52, %v3474_v32  ;;  %v6769_v40 = vpop.permute.xlu1 %6768  ;;  %v6764_v21 = vpop.permute.xlu0 %6763  ;;  %v16852_v32 = vld [vmem:[#allocation15_spill] sm:$0xff]  ;;  %v4446_v63 = vld [vmem:[%s14640_s1 + $0x38] sm:$0xff] }
 0x474   :  { %v4488_v53 = vpack.c.bf16 %v4314_v16, %v4312_v19  ;;  %v3604_v39 = vmax.f32 %v16840_v50, %v3476_v45  ;;  %v3992_v8 = vsel %vm3990_vm0, %v6746_v33, %v6736_v13  ;;  %v16847_v11 = vpack.i.bf16 %v16845_v23, %v16846_v15  ;;  %v4444_v50 = vld [vmem:[%s14640_s1 + $0x28] sm:$0xff]  ;;  %v4442_v45 = vld [vmem:[%s14640_s1 + $0x18] sm:$0xff]  ;;  %v16857_v19 = vld [vmem:[#allocation156_spill] sm:$0xff] }
 0x475   :  { %7038 = vrot.lane.b32.xlu1 %v16844_v14, %s7251_s0  ;;  %v3991_v10 = vsel %vm3990_vm0, %v6745_v62, %v6735_v1  ;;  %v4023_v27 = vsel %vm3990_vm0, %v6750_v47, %v6740_v3  ;;  %v4024_v0 = vsel %vm3990_vm0, %v6751_v61, %v6741_v44  ;;  %4638 = vmatprep.subr.bf16.mxu1 %v4520_v4  ;;  %v6761_v5 = vunpack.i.h.bf16 %v6759_v42  ;;  %v16858_v17 = vld [vmem:[#allocation159_spill] sm:$0xff]  ;;  %v16859_v4 = vld [vmem:[#allocation162_spill] sm:$0xff] }
 0x476   :  { %7033 = vrot.lane.b32.xlu0 %v16847_v11, %s7251_s0  ;;  %4565 = vmatprep.subr.bf16.mxu0 %v4488_v53  ;;  %v4311_v57 = vmax.f32 %v3538_v43, %v3991_v10  ;;  %v4313_v22 = vmax.f32 %v3540_v51, %v3992_v8  ;;  %v4375_v25 = vmax.f32 %v3602_v58, %v4023_v27  ;;  %v6760_v7 = vunpack.i.l.bf16 %v6759_v42  ;;  %v16853_v51 = vld [vmem:[#allocation14_spill] sm:$0xff]  ;;  %v16861_v8 = vld [vmem:[#allocation161_spill] sm:$0xff] }
 0x477   :  { %v6756_v56 = vunpack.i.h.bf16 %v6754_v60  ;;  %v6755_v12 = vunpack.i.l.bf16 %v6754_v60  ;;  %v16850_v29 = vpack.i.bf16 %v16848_v36, %v16849_v6  ;;  %v4377_v41 = vmax.f32 %v3604_v39, %v4024_v0  ;;  %v6779_v61 = vpop.permute.xlu1 %6778  ;;  %v6774_v47 = vpop.permute.xlu0 %6773  ;;  %v16860_v39 = vld [vmem:[#allocation112_spill] sm:$0xff]  ;;  %v16862_v42 = vld [vmem:[#allocation82_spill] sm:$0xff] }
 0x478   :  { %v4487_v46 = vpack.c.bf16 %v4313_v22, %v4311_v57  ;;  %v3249_v43 = vsel %vm3217_vm15, %v6760_v7, %v6761_v5  ;;  %v6771_v3 = vunpack.i.h.bf16 %v6769_v40  ;;  %v6770_v13 = vunpack.i.l.bf16 %v6769_v40 }
 0x479   :  { %7048 = vrot.lane.b32.xlu1 %v16850_v29, %s7251_s0  ;;  %v3248_v18 = vsel %vm3217_vm15, %v6755_v12, %v6756_v56  ;;  %v4519_v44 = vpack.c.bf16 %v4377_v41, %v4375_v25  ;;  %v6766_v1 = vunpack.i.h.bf16 %v6764_v21  ;;  %v6765_v52 = vunpack.i.l.bf16 %v6764_v21 }
 0x47a   :  { %7043 = vrot.lane.b32.xlu0 %v7042_v49, %s7251_s0  ;;  %v13985_v31 = vsel %vm190_vm1, %v3248_v18, %v16851_v30  ;;  %4566 = vmatpush1.bf16.msra.mxu0 %v4487_v46  ;;  %v3601_v20 = vmax.f32 %v16852_v32, %v6761_v5  ;;  %v3599_v2 = vmax.f32 %v16853_v51, %v6756_v56  ;;  %v4440_v49 = vld [vmem:[%s14640_s1 + $0x8] sm:$0xff]  ;;  %v6781_v9 = vunpack.i.h.bf16 %v6779_v61 }
 0x47b   :  { %4639 = vmatpush1.bf16.msra.mxu1 %v4519_v44  ;;  %v3281_v38 = vsel %vm3217_vm15, %v6770_v13, %v6771_v3  ;;  %v3280_v37 = vsel %vm3217_vm15, %v6765_v52, %v6766_v1  ;;  %v3472_v48 = vsel %vm190_vm1, %v3249_v43, %v16856_v59  ;;  %v3598_v34 = vmax.f32 %v16851_v30, %v13985_v31  ;;  %v6789_v60 = vpop.permute.xlu1 %6788  ;;  %v6784_v57 = vpop.permute.xlu0 %6783 }
 0x47c   :  { %v3665_v16 = vmax.f32 %v16857_v19, %v6771_v3  ;;  %v3663_v28 = vmax.f32 %v16858_v17, %v6766_v1  ;;  %v4472_v33 = vpack.c.bf16 %v4444_v50, %v4440_v49  ;;  %v4474_v62 = vpack.c.bf16 %v4446_v63, %v4442_v45  ;;  %v16863_v63 = vld [vmem:[#allocation11_spill] sm:$0xff] }
 0x47d   :  { %7058 = vrot.lane.b32.xlu1 %v16854_v26, %s7252_s5  ;;  %v6780_v54 = vunpack.i.l.bf16 %v6779_v61  ;;  %v6776_v14 = vunpack.i.h.bf16 %v6774_v47  ;;  %v6775_v53 = vunpack.i.l.bf16 %v6774_v47  ;;  %v3534_v58 = vsel %vm190_vm1, %v3280_v37, %v16859_v4  ;;  %v16865_v47 = vld [vmem:[#allocation9_spill] sm:$0xff] }
 0x47e   :  { %7053 = vrot.lane.b32.xlu0 %v16855_v24, %s7252_s5  ;;  %v3600_v10 = vmax.f32 %v16856_v59, %v3472_v48  ;;  %v3536_v23 = vsel %vm190_vm1, %v3281_v38, %v16861_v8  ;;  %4583 = vmatprep.mubr.bf16.mxu0 %v4472_v33  ;;  %v4310_v11 = vsel %vm193_vm2, %v6781_v9, %v3665_v16  ;;  %v6791_v56 = vunpack.i.h.bf16 %v6789_v60 }
 0x47f   :  { %v4308_v15 = vsel %vm193_vm2, %v6780_v54, %v3663_v28  ;;  %v4246_v27 = vsel %vm193_vm2, %v6776_v14, %v3601_v20  ;;  %v4244_v0 = vsel %vm193_vm2, %v6775_v53, %v3599_v2  ;;  %v4438_v7 = vmax.f32 %v3665_v16, %v4310_v11  ;;  %4656 = vmatprep.mubr.bf16.mxu1 %v4474_v62  ;;  %v16864_v16 = vld [vmem:[#allocation96_spill] sm:$0xff]  ;;  %v16866_v62 = vld [vmem:[#allocation94_spill] sm:$0xff]  ;;  %v16869_v11 = vld [vmem:[#allocation157_spill] sm:$0xff] }
 0x480   :  { %v4372_v22 = vmax.f32 %v3599_v2, %v4244_v0  ;;  %v4374_v25 = vmax.f32 %v3601_v20, %v4246_v27  ;;  %v4436_v5 = vmax.f32 %v3663_v28, %v4308_v15  ;;  %v6790_v12 = vunpack.i.l.bf16 %v6789_v60  ;;  %v6799_v21 = vpop.permute.xlu1 %6798  ;;  %v6794_v44 = vpop.permute.xlu0 %6793  ;;  %v16870_v0 = vld [vmem:[#allocation158_spill] sm:$0xff] }
 0x481   :  { %7068 = vrot.lane.b32.xlu1 %v16860_v39, %s7252_s5  ;;  %v6786_v36 = vunpack.i.h.bf16 %v6784_v57  ;;  %v6785_v6 = vunpack.i.l.bf16 %v6784_v57  ;;  %v3662_v41 = vmax.f32 %v16859_v4, %v3534_v58  ;;  %v3664_v18 = vmax.f32 %v16861_v8, %v3536_v23 }
 0x482   :  { %7063 = vrot.lane.b32.xlu0 %v16862_v42, %s7252_s5  ;;  %v4518_v29 = vpack.c.bf16 %v4374_v25, %v4372_v22  ;;  %v4550_v46 = vpack.c.bf16 %v4438_v7, %v4436_v5  ;;  %v4053_v43 = vsel %vm3990_vm0, %v6790_v12, %v6780_v54  ;;  %v4054_v30 = vsel %vm3990_vm0, %v6791_v56, %v6781_v9  ;;  %v16867_v54 = vld [vmem:[#allocation50_spill] sm:$0xff] }
 0x483   :  { %v4021_v31 = vsel %vm3990_vm0, %v6785_v6, %v6775_v53  ;;  %v4022_v40 = vsel %vm3990_vm0, %v6786_v36, %v6776_v14  ;;  %v4435_v1 = vmax.f32 %v3662_v41, %v4053_v43  ;;  %v6801_v52 = vunpack.i.h.bf16 %v6799_v21  ;;  %v16868_v53 = vld [vmem:[#allocation154_spill] sm:$0xff] }
 0x484   :  { %4567 = vmatprep.subr.bf16.mxu0 %v4518_v29  ;;  %4640 = vmatprep.subr.bf16.mxu1 %v4550_v46  ;;  %v4371_v3 = vmax.f32 %v3598_v34, %v4021_v31  ;;  %v4373_v13 = vmax.f32 %v3600_v10, %v4022_v40  ;;  %v6800_v32 = vunpack.i.l.bf16 %v6799_v21  ;;  %v6796_v20 = vunpack.i.h.bf16 %v6794_v44  ;;  %v6809_v45 = vpop.permute.xlu1 %6808  ;;  %v6804_v38 = vpop.permute.xlu0 %6803 }
 0x485   :  { %v6795_v51 = vunpack.i.l.bf16 %v6794_v44  ;;  %v4437_v26 = vmax.f32 %v3664_v18, %v4054_v30  ;;  %v6811_v24 = vunpack.i.h.bf16 %v6809_v45  ;;  %v6810_v59 = vunpack.i.l.bf16 %v6809_v45 }
 0x486   :  { %v4517_v2 = vpack.c.bf16 %v4373_v13, %v4371_v3  ;;  %v3247_v49 = vsel %vm3217_vm15, %v6800_v32, %v6801_v52  ;;  %v6806_v48 = vunpack.i.h.bf16 %v6804_v38  ;;  %v6805_v34 = vunpack.i.l.bf16 %v6804_v38 }
 0x487   :  { %v3246_v50 = vsel %vm3217_vm15, %v6795_v51, %v6796_v20  ;;  %v4549_v37 = vpack.c.bf16 %v4437_v26, %v4435_v1  ;;  %v3468_v19 = vsel %vm190_vm1, %v3247_v49, %v16863_v63  ;;  %v3279_v28 = vsel %vm3217_vm15, %v6810_v59, %v6811_v24 }
 0x488   :  { %4568 = vmatpush2.bf16.msra.mxu0 %v4517_v2  ;;  %v3466_v17 = vsel %vm190_vm1, %v3246_v50, %v16864_v16  ;;  %v3278_v61 = vsel %vm3217_vm15, %v6805_v34, %v6806_v48  ;;  %v3597_v33 = vmax.f32 %v16865_v47, %v6801_v52  ;;  %v3595_v9 = vmax.f32 %v16866_v62, %v6796_v20  ;;  %v6819_v58 = vpop.permute.xlu1 %6818  ;;  %v6814_v39 = vpop.permute.xlu0 %6813 }
 0x489   :  { %4641 = vmatpush2.bf16.msra.mxu1 %v4549_v37  ;;  %v3661_v14 = vmax.f32 %v16867_v54, %v6811_v24  ;;  %v3659_v4 = vmax.f32 %v16868_v53, %v6806_v48  ;;  %v6821_v10 = vunpack.i.h.bf16 %v6819_v58  ;;  %v6820_v8 = vunpack.i.l.bf16 %v6819_v58 }
 0x48a   :  { %v6816_v23 = vunpack.i.h.bf16 %v6814_v39  ;;  %v6815_v15 = vunpack.i.l.bf16 %v6814_v39  ;;  %v3532_v27 = vsel %vm190_vm1, %v3279_v28, %v16869_v11  ;;  %v3530_v42 = vsel %vm190_vm1, %v3278_v61, %v16870_v0  ;;  %v16871_v61 = vld [vmem:[#allocation93_spill] sm:$0xff] }
 0x48b   :  { %v3594_v60 = vmax.f32 %v16864_v16, %v3466_v17  ;;  %v3596_v57 = vmax.f32 %v16863_v63, %v3468_v19  ;;  %v4304_v22 = vsel %vm193_vm2, %v6820_v8, %v3659_v4  ;;  %v4306_v25 = vsel %vm193_vm2, %v6821_v10, %v3661_v14 }
 0x48c   :  { %v4242_v5 = vsel %vm193_vm2, %v6816_v23, %v3597_v33  ;;  %v4240_v7 = vsel %vm193_vm2, %v6815_v15, %v3595_v9  ;;  %v6829_v56 = vpop.permute.xlu1 %6828  ;;  %v6824_v12 = vpop.permute.xlu0 %6823  ;;  %v4432_v29 = vmax.f32 %v3659_v4, %v4304_v22  ;;  %v4434_v46 = vmax.f32 %v3661_v14, %v4306_v25  ;;  %v16873_v14 = vld [vmem:[#allocation90_spill] sm:$0xff]  ;;  %v16874_v4 = vld [vmem:[#allocation152_spill] sm:$0xff] }
 0x48d   :  { %v4368_v36 = vmax.f32 %v3595_v9, %v4240_v7  ;;  %v4370_v6 = vmax.f32 %v3597_v33, %v4242_v5  ;;  %v6831_v41 = vunpack.i.h.bf16 %v6829_v56  ;;  %v6830_v18 = vunpack.i.l.bf16 %v6829_v56  ;;  %v16872_v9 = vld [vmem:[#allocation5_spill] sm:$0xff] }
 0x48e   :  { %v6826_v43 = vunpack.i.h.bf16 %v6824_v12  ;;  %v6825_v30 = vunpack.i.l.bf16 %v6824_v12  ;;  %v4548_v40 = vpack.c.bf16 %v4434_v46, %v4432_v29  ;;  %v3658_v21 = vmax.f32 %v16870_v0, %v3530_v42  ;;  %v16878_v7 = vld [vmem:[#allocation153_spill] sm:$0xff] }
 0x48f   :  { %v4516_v31 = vpack.c.bf16 %v4370_v6, %v4368_v36  ;;  %v3660_v44 = vmax.f32 %v16869_v11, %v3532_v27  ;;  %v4051_v3 = vsel %vm3990_vm0, %v6830_v18, %v6820_v8  ;;  %v4052_v13 = vsel %vm3990_vm0, %v6831_v41, %v6821_v10  ;;  %v16875_v8 = vld [vmem:[#allocation114_spill] sm:$0xff] }
 0x490   :  { %v4019_v1 = vsel %vm3990_vm0, %v6825_v30, %v6815_v15  ;;  %v4020_v52 = vsel %vm3990_vm0, %v6826_v43, %v6816_v23  ;;  %4642 = vmatprep.subr.bf16.mxu1 %v4548_v40  ;;  %v4431_v2 = vmax.f32 %v3658_v21, %v4051_v3  ;;  %v16876_v15 = vld [vmem:[#allocation116_spill] sm:$0xff] }
 0x491   :  { %v6839_v32 = vpop.permute.xlu1 %6838  ;;  %4569 = vmatprep.subr.bf16.mxu0 %v4516_v31  ;;  %v4367_v20 = vmax.f32 %v3594_v60, %v4019_v1  ;;  %v4369_v51 = vmax.f32 %v3596_v57, %v4020_v52  ;;  %v4433_v45 = vmax.f32 %v3660_v44, %v4052_v13  ;;  %v16877_v60 = vld [vmem:[#allocation91_spill] sm:$0xff] }
 0x492   :  { %v6841_v26 = vunpack.i.h.bf16 %v6839_v32  ;;  %v6840_v49 = vunpack.i.l.bf16 %v6839_v32  ;;  %v6834_v50 = vpop.permute.xlu0 %6833 }
 0x493   :  { %v4515_v38 = vpack.c.bf16 %v4369_v51, %v4367_v20  ;;  %v6836_v37 = vunpack.i.h.bf16 %v6834_v50  ;;  %v6835_v24 = vunpack.i.l.bf16 %v6834_v50  ;;  %v4547_v59 = vpack.c.bf16 %v4433_v45, %v4431_v2 }
 0x494   :  { %v3245_v48 = vsel %vm3217_vm15, %v6840_v49, %v6841_v26  ;;  %v3593_v54 = vmax.f32 %v16872_v9, %v6841_v26 }
 0x495   :  { %v6849_v34 = vpop.permute.xlu1 %6848  ;;  %4570 = vmatpush2.bf16.msra.mxu0 %v4515_v38  ;;  %4643 = vmatpush2.bf16.msra.mxu1 %v4547_v59  ;;  %v3464_v47 = vsel %vm190_vm1, %v3245_v48, %v16871_v61  ;;  %v3244_v33 = vsel %vm3217_vm15, %v6835_v24, %v6836_v37  ;;  %v3591_v53 = vmax.f32 %v16873_v14, %v6836_v37  ;;  %v16879_v14 = vld [vmem:[#allocation6_spill] sm:$0xff] }
 0x496   :  { %v6851_v63 = vunpack.i.h.bf16 %v6849_v34  ;;  %v6850_v19 = vunpack.i.l.bf16 %v6849_v34  ;;  %v6844_v16 = vpop.permute.xlu0 %6843  ;;  %v3462_v57 = vsel %vm190_vm1, %v3244_v33, %v16877_v60  ;;  %v3592_v5 = vmax.f32 %v16871_v61, %v3464_v47 }
 0x497   :  { %v6846_v17 = vunpack.i.h.bf16 %v6844_v16  ;;  %v6845_v28 = vunpack.i.l.bf16 %v6844_v16  ;;  %v3590_v2 = vmax.f32 %v16877_v60, %v3462_v57  ;;  %v16884_v57 = vld [vmem:[#allocation149_spill] sm:$0xff] }
 0x498   :  { %v3277_v62 = vsel %vm3217_vm15, %v6850_v19, %v6851_v63  ;;  %v3657_v23 = vmax.f32 %v16875_v8, %v6851_v63  ;;  %v16881_v8 = vld [vmem:[#allocation57_spill] sm:$0xff] }
 0x499   :  { %v3528_v58 = vsel %vm190_vm1, %v3277_v62, %v16874_v4  ;;  %v3276_v39 = vsel %vm3217_vm15, %v6845_v28, %v6846_v17  ;;  %v6859_v10 = vpop.permute.xlu1 %6858  ;;  %v3655_v11 = vmax.f32 %v16876_v15, %v6846_v17  ;;  %v16882_v15 = vld [vmem:[#allocation150_spill] sm:$0xff] }
 0x49a   :  { %v6861_v27 = vunpack.i.h.bf16 %v6859_v10  ;;  %v6860_v0 = vunpack.i.l.bf16 %v6859_v10  ;;  %v6854_v42 = vpop.permute.xlu0 %6853  ;;  %v3526_v56 = vsel %vm190_vm1, %v3276_v39, %v16878_v7  ;;  %v3656_v6 = vmax.f32 %v16874_v4, %v3528_v58  ;;  %v16880_v39 = vld [vmem:[#allocation86_spill] sm:$0xff] }
 0x49b   :  { %v6856_v22 = vunpack.i.h.bf16 %v6854_v42  ;;  %v6855_v25 = vunpack.i.l.bf16 %v6854_v42  ;;  %v3654_v52 = vmax.f32 %v16878_v7, %v3526_v56  ;;  %v16883_v42 = vld [vmem:[#allocation47_spill] sm:$0xff]  ;;  %v16885_v56 = vld [vmem:[#allocation88_spill] sm:$0xff] }
 0x49c   :  { %v4300_v12 = vsel %vm193_vm2, %v6860_v0, %v3655_v11  ;;  %v4302_v36 = vsel %vm193_vm2, %v6861_v27, %v3657_v23 }
 0x49d   :  { %v4238_v29 = vsel %vm193_vm2, %v6856_v22, %v3593_v54  ;;  %v4236_v46 = vsel %vm193_vm2, %v6855_v25, %v3591_v53  ;;  %v6869_v41 = vpop.permute.xlu1 %6868  ;;  %v4428_v18 = vmax.f32 %v3655_v11, %v4300_v12  ;;  %v4430_v43 = vmax.f32 %v3657_v23, %v4302_v36 }
 0x49e   :  { %v6871_v30 = vunpack.i.h.bf16 %v6869_v41  ;;  %v6870_v31 = vunpack.i.l.bf16 %v6869_v41  ;;  %v6864_v40 = vpop.permute.xlu0 %6863  ;;  %v4364_v21 = vmax.f32 %v3591_v53, %v4236_v46  ;;  %v4366_v44 = vmax.f32 %v3593_v54, %v4238_v29  ;;  %v16886_v46 = vld [vmem:[#allocation151_spill] sm:$0xff] }
 0x49f   :  { %v6866_v3 = vunpack.i.h.bf16 %v6864_v40  ;;  %v6865_v13 = vunpack.i.l.bf16 %v6864_v40  ;;  %v4546_v1 = vpack.c.bf16 %v4430_v43, %v4428_v18 }
 0x4a0   :  { %v4049_v32 = vsel %vm3990_vm0, %v6870_v31, %v6860_v0  ;;  %v4050_v20 = vsel %vm3990_vm0, %v6871_v30, %v6861_v27  ;;  %v4514_v51 = vpack.c.bf16 %v4366_v44, %v4364_v21 }
 0x4a1   :  { %v4017_v26 = vsel %vm3990_vm0, %v6865_v13, %v6855_v25  ;;  %v4018_v49 = vsel %vm3990_vm0, %v6866_v3, %v6856_v22  ;;  %4644 = vmatprep.subr.bf16.mxu1 %v4546_v1  ;;  %v4427_v45 = vmax.f32 %v3654_v52, %v4049_v32  ;;  %v4429_v38 = vmax.f32 %v3656_v6, %v4050_v20 }
 0x4a2   :  { %4571 = vmatprep.subr.bf16.mxu0 %v4514_v51  ;;  %v4363_v48 = vmax.f32 %v3590_v2, %v4017_v26  ;;  %v4365_v34 = vmax.f32 %v3592_v5, %v4018_v49 }
 0x4a3   :  { %v6879_v50 = vpop.permute.xlu1 %6878  ;;  %v4545_v63 = vpack.c.bf16 %v4429_v38, %v4427_v45 }
 0x4a4   :  { %v6881_v37 = vunpack.i.h.bf16 %v6879_v50  ;;  %v6880_v24 = vunpack.i.l.bf16 %v6879_v50  ;;  %v6874_v59 = vpop.permute.xlu0 %6873  ;;  %v4513_v17 = vpack.c.bf16 %v4365_v34, %v4363_v48 }
 0x4a5   :  { %v6876_v19 = vunpack.i.h.bf16 %v6874_v59  ;;  %v6875_v16 = vunpack.i.l.bf16 %v6874_v59  ;;  %4645 = vmatpush2.bf16.msra.mxu1 %v4545_v63 }
 0x4a6   :  { %v3243_v28 = vsel %vm3217_vm15, %v6880_v24, %v6881_v37  ;;  %4572 = vmatpush2.bf16.msra.mxu0 %v4513_v17  ;;  %v3589_v10 = vmax.f32 %v16880_v39, %v6881_v37 }
 0x4a7   :  { %v6889_v61 = vpop.permute.xlu1 %6888  ;;  %v3460_v53 = vsel %vm190_vm1, %v3243_v28, %v16879_v14  ;;  %v3242_v4 = vsel %vm3217_vm15, %v6875_v16, %v6876_v19  ;;  %v3587_v23 = vmax.f32 %v16881_v8, %v6876_v19  ;;  %v16887_v8 = vld [vmem:[#allocation83_spill] sm:$0xff] }
 0x4a8   :  { %v6891_v47 = vunpack.i.h.bf16 %v6889_v61  ;;  %v6890_v33 = vunpack.i.l.bf16 %v6889_v61  ;;  %v6884_v62 = vpop.permute.xlu0 %6883  ;;  %v3458_v12 = vsel %vm190_vm1, %v3242_v4, %v16885_v56  ;;  %v3588_v29 = vmax.f32 %v16879_v14, %v3460_v53 }
 0x4a9   :  { %v6886_v9 = vunpack.i.h.bf16 %v6884_v62  ;;  %v6885_v54 = vunpack.i.l.bf16 %v6884_v62  ;;  %v3586_v37 = vmax.f32 %v16885_v56, %v3458_v12  ;;  %v16892_v12 = vld [vmem:[#allocation46_spill] sm:$0xff] }
 0x4aa   :  { %v3275_v58 = vsel %vm3217_vm15, %v6890_v33, %v6891_v47  ;;  %v3653_v60 = vmax.f32 %v16883_v42, %v6891_v47  ;;  %v16889_v42 = vld [vmem:[#allocation51_spill] sm:$0xff] }
 0x4ab   :  { %v3524_v11 = vsel %vm190_vm1, %v3275_v58, %v16882_v15  ;;  %v3274_v27 = vsel %vm3217_vm15, %v6885_v54, %v6886_v9  ;;  %v6899_v0 = vpop.permute.xlu1 %6898  ;;  %v3651_v22 = vmax.f32 %v16884_v57, %v6886_v9  ;;  %v16890_v57 = vld [vmem:[#allocation147_spill] sm:$0xff] }
 0x4ac   :  { %v6901_v25 = vunpack.i.h.bf16 %v6899_v0  ;;  %v6900_v5 = vunpack.i.l.bf16 %v6899_v0  ;;  %v6894_v7 = vpop.permute.xlu0 %6893  ;;  %v3522_v41 = vsel %vm190_vm1, %v3274_v27, %v16886_v46  ;;  %v3652_v30 = vmax.f32 %v16882_v15, %v3524_v11  ;;  %v16888_v27 = vld [vmem:[#allocation85_spill] sm:$0xff] }
 0x4ad   :  { %v6896_v36 = vunpack.i.h.bf16 %v6894_v7  ;;  %v6895_v6 = vunpack.i.l.bf16 %v6894_v7  ;;  %v3650_v49 = vmax.f32 %v16886_v46, %v3522_v41  ;;  %v16891_v7 = vld [vmem:[#allocation43_spill] sm:$0xff]  ;;  %v16893_v41 = vld [vmem:[#allocation60_spill] sm:$0xff] }
 0x4ae   :  { %v4296_v18 = vsel %vm193_vm2, %v6900_v5, %v3651_v22  ;;  %v4298_v43 = vsel %vm193_vm2, %v6901_v25, %v3653_v60 }
 0x4af   :  { %v4234_v31 = vsel %vm193_vm2, %v6896_v36, %v3589_v10  ;;  %v4232_v40 = vsel %vm193_vm2, %v6895_v6, %v3587_v23  ;;  %v6909_v21 = vpop.permute.xlu1 %6908  ;;  %v4424_v44 = vmax.f32 %v3651_v22, %v4296_v18  ;;  %v4426_v3 = vmax.f32 %v3653_v60, %v4298_v43 }
 0x4b0   :  { %v6911_v13 = vunpack.i.h.bf16 %v6909_v21  ;;  %v6910_v1 = vunpack.i.l.bf16 %v6909_v21  ;;  %v6904_v52 = vpop.permute.xlu0 %6903  ;;  %v4360_v32 = vmax.f32 %v3587_v23, %v4232_v40  ;;  %v4362_v20 = vmax.f32 %v3589_v10, %v4234_v31  ;;  %v16894_v40 = vld [vmem:[#allocation148_spill] sm:$0xff] }
 0x4b1   :  { %v6906_v51 = vunpack.i.h.bf16 %v6904_v52  ;;  %v6905_v2 = vunpack.i.l.bf16 %v6904_v52  ;;  %v4544_v26 = vpack.c.bf16 %v4426_v3, %v4424_v44 }
 0x4b2   :  { %v4047_v50 = vsel %vm3990_vm0, %v6910_v1, %v6900_v5  ;;  %v4048_v45 = vsel %vm3990_vm0, %v6911_v13, %v6901_v25  ;;  %v4512_v38 = vpack.c.bf16 %v4362_v20, %v4360_v32 }
 0x4b3   :  { %v4015_v24 = vsel %vm3990_vm0, %v6905_v2, %v6895_v6  ;;  %v4016_v59 = vsel %vm3990_vm0, %v6906_v51, %v6896_v36  ;;  %4646 = vmatprep.subr.bf16.mxu1 %v4544_v26  ;;  %v4423_v34 = vmax.f32 %v3650_v49, %v4047_v50  ;;  %v4425_v63 = vmax.f32 %v3652_v30, %v4048_v45 }
 0x4b4   :  { %v6919_v48 = vpop.permute.xlu1 %6918  ;;  %4573 = vmatprep.subr.bf16.mxu0 %v4512_v38  ;;  %v4359_v28 = vmax.f32 %v3586_v37, %v4015_v24  ;;  %v4361_v61 = vmax.f32 %v3588_v29, %v4016_v59 }
 0x4b5   :  { %v6921_v19 = vunpack.i.h.bf16 %v6919_v48  ;;  %v6920_v16 = vunpack.i.l.bf16 %v6919_v48  ;;  %v6914_v17 = vpop.permute.xlu0 %6913  ;;  %v4543_v47 = vpack.c.bf16 %v4425_v63, %v4423_v34 }
 0x4b6   :  { %v6916_v33 = vunpack.i.h.bf16 %v6914_v17  ;;  %v6915_v62 = vunpack.i.l.bf16 %v6914_v17  ;;  %v4511_v9 = vpack.c.bf16 %v4361_v61, %v4359_v28 }
 0x4b7   :  { %v3241_v54 = vsel %vm3217_vm15, %v6920_v16, %v6921_v19  ;;  %4647 = vmatpush2.bf16.msra.mxu1 %v4543_v47  ;;  %v3585_v0 = vmax.f32 %v16888_v27, %v6921_v19 }
 0x4b8   :  { %4574 = vmatpush2.bf16.msra.mxu0 %v4511_v9  ;;  %v3456_v23 = vsel %vm190_vm1, %v3241_v54, %v16887_v8  ;;  %v3240_v15 = vsel %vm3217_vm15, %v6915_v62, %v6916_v33  ;;  %v3583_v60 = vmax.f32 %v16889_v42, %v6916_v33  ;;  %v16895_v42 = vld [vmem:[#allocation3_spill] sm:$0xff] }
 0x4b9   :  { %v6929_v14 = vpop.permute.xlu1 %6928  ;;  %v3454_v18 = vsel %vm190_vm1, %v3240_v15, %v16893_v41  ;;  %v3584_v31 = vmax.f32 %v16887_v8, %v3456_v23 }
 0x4ba   :  { %v6931_v53 = vunpack.i.h.bf16 %v6929_v14  ;;  %v6930_v4 = vunpack.i.l.bf16 %v6929_v14  ;;  %v6924_v58 = vpop.permute.xlu0 %6923  ;;  %v3582_v19 = vmax.f32 %v16893_v41, %v3454_v18  ;;  %v16900_v18 = vld [vmem:[#allocation113_spill] sm:$0xff] }
 0x4bb   :  { %v6926_v39 = vunpack.i.h.bf16 %v6924_v58  ;;  %v6925_v10 = vunpack.i.l.bf16 %v6924_v58 }
 0x4bc   :  { %v3273_v11 = vsel %vm3217_vm15, %v6930_v4, %v6931_v53  ;;  %v3649_v56 = vmax.f32 %v16891_v7, %v6931_v53  ;;  %v16897_v7 = vld [vmem:[#allocation81_spill] sm:$0xff] }
 0x4bd   :  { %v3520_v22 = vsel %vm190_vm1, %v3273_v11, %v16890_v57  ;;  %v3272_v25 = vsel %vm3217_vm15, %v6925_v10, %v6926_v39  ;;  %v6939_v5 = vpop.permute.xlu1 %6938  ;;  %v3647_v36 = vmax.f32 %v16892_v12, %v6926_v39  ;;  %v16898_v12 = vld [vmem:[#allocation144_spill] sm:$0xff] }
 0x4be   :  { %v6941_v6 = vunpack.i.h.bf16 %v6939_v5  ;;  %v6940_v29 = vunpack.i.l.bf16 %v6939_v5  ;;  %v6934_v46 = vpop.permute.xlu0 %6933  ;;  %v3518_v21 = vsel %vm190_vm1, %v3272_v25, %v16894_v40  ;;  %v3648_v13 = vmax.f32 %v16890_v57, %v3520_v22  ;;  %v16896_v25 = vld [vmem:[#allocation75_spill] sm:$0xff] }
 0x4bf   :  { %v6936_v43 = vunpack.i.h.bf16 %v6934_v46  ;;  %v6935_v30 = vunpack.i.l.bf16 %v6934_v46  ;;  %v3646_v59 = vmax.f32 %v16894_v40, %v3518_v21  ;;  %v16899_v46 = vld [vmem:[#allocation37_spill] sm:$0xff]  ;;  %v16901_v21 = vld [vmem:[#allocation2_spill] sm:$0xff] }
 0x4c0   :  { %v4292_v44 = vsel %vm193_vm2, %v6940_v29, %v3647_v36  ;;  %v4294_v3 = vsel %vm193_vm2, %v6941_v6, %v3649_v56 }
 0x4c1   :  { %v4230_v1 = vsel %vm193_vm2, %v6936_v43, %v3585_v0  ;;  %v4228_v52 = vsel %vm193_vm2, %v6935_v30, %v3583_v60  ;;  %v6949_v32 = vpop.permute.xlu1 %6948  ;;  %v4420_v20 = vmax.f32 %v3647_v36, %v4292_v44  ;;  %v4422_v51 = vmax.f32 %v3649_v56, %v4294_v3 }
 0x4c2   :  { %v6951_v2 = vunpack.i.h.bf16 %v6949_v32  ;;  %v6950_v26 = vunpack.i.l.bf16 %v6949_v32  ;;  %v6944_v49 = vpop.permute.xlu0 %6943  ;;  %v4356_v50 = vmax.f32 %v3583_v60, %v4228_v52  ;;  %v4358_v45 = vmax.f32 %v3585_v0, %v4230_v1  ;;  %v16902_v52 = vld [vmem:[#allocation145_spill] sm:$0xff] }
 0x4c3   :  { %v6946_v38 = vunpack.i.h.bf16 %v6944_v49  ;;  %v6945_v37 = vunpack.i.l.bf16 %v6944_v49  ;;  %v4542_v24 = vpack.c.bf16 %v4422_v51, %v4420_v20 }
 0x4c4   :  { %v4045_v48 = vsel %vm3990_vm0, %v6950_v26, %v6940_v29  ;;  %v4046_v34 = vsel %vm3990_vm0, %v6951_v2, %v6941_v6  ;;  %v4510_v63 = vpack.c.bf16 %v4358_v45, %v4356_v50 }
 0x4c5   :  { %v4013_v16 = vsel %vm3990_vm0, %v6945_v37, %v6935_v30  ;;  %v4014_v17 = vsel %vm3990_vm0, %v6946_v38, %v6936_v43  ;;  %4648 = vmatprep.subr.bf16.mxu1 %v4542_v24  ;;  %v4419_v61 = vmax.f32 %v3646_v59, %v4045_v48  ;;  %v4421_v47 = vmax.f32 %v3648_v13, %v4046_v34 }
 0x4c6   :  { %v6959_v28 = vpop.permute.xlu1 %6958  ;;  %4575 = vmatprep.subr.bf16.mxu0 %v4510_v63  ;;  %v4355_v54 = vmax.f32 %v3582_v19, %v4013_v16  ;;  %v4357_v14 = vmax.f32 %v3584_v31, %v4014_v17 }
 0x4c7   :  { %v6961_v33 = vunpack.i.h.bf16 %v6959_v28  ;;  %v6960_v62 = vunpack.i.l.bf16 %v6959_v28  ;;  %v6954_v9 = vpop.permute.xlu0 %6953  ;;  %v4541_v53 = vpack.c.bf16 %v4421_v47, %v4419_v61 }
 0x4c8   :  { %v6956_v4 = vunpack.i.h.bf16 %v6954_v9  ;;  %v6955_v58 = vunpack.i.l.bf16 %v6954_v9  ;;  %v4509_v39 = vpack.c.bf16 %v4357_v14, %v4355_v54 }
 0x4c9   :  { %v3239_v10 = vsel %vm3217_vm15, %v6960_v62, %v6961_v33  ;;  %4649 = vmatpush2.bf16.msra.mxu1 %v4541_v53  ;;  %v3581_v5 = vmax.f32 %v16896_v25, %v6961_v33 }
 0x4ca   :  { %v6969_v8 = vpop.permute.xlu1 %6968  ;;  %4576 = vmatpush2.bf16.msra.mxu0 %v4509_v39  ;;  %v3452_v60 = vsel %vm190_vm1, %v3239_v10, %v16895_v42  ;;  %v3238_v57 = vsel %vm3217_vm15, %v6955_v58, %v6956_v4  ;;  %v3579_v56 = vmax.f32 %v16897_v7, %v6956_v4  ;;  %v16903_v7 = vld [vmem:[#allocation7_spill] sm:$0xff] }
 0x4cb   :  { %v6971_v23 = vunpack.i.h.bf16 %v6969_v8  ;;  %v6970_v15 = vunpack.i.l.bf16 %v6969_v8  ;;  %v6964_v11 = vpop.permute.xlu0 %6963  ;;  %v3450_v44 = vsel %vm190_vm1, %v3238_v57, %v16901_v21  ;;  %v3580_v1 = vmax.f32 %v16895_v42, %v3452_v60 }
 0x4cc   :  { %v6966_v27 = vunpack.i.h.bf16 %v6964_v11  ;;  %v6965_v0 = vunpack.i.l.bf16 %v6964_v11  ;;  %v3578_v33 = vmax.f32 %v16901_v21, %v3450_v44  ;;  %v16908_v44 = vld [vmem:[#allocation66_spill] sm:$0xff] }
 0x4cd   :  { %v3271_v22 = vsel %vm3217_vm15, %v6970_v15, %v6971_v23  ;;  %v3645_v41 = vmax.f32 %v16899_v46, %v6971_v23  ;;  %v16905_v46 = vld [vmem:[#allocation36_spill] sm:$0xff] }
 0x4ce   :  { %v3516_v36 = vsel %vm190_vm1, %v3271_v22, %v16898_v12  ;;  %v3270_v6 = vsel %vm3217_vm15, %v6965_v0, %v6966_v27  ;;  %v6979_v29 = vpop.permute.xlu1 %6978  ;;  %v3643_v43 = vmax.f32 %v16900_v18, %v6966_v27  ;;  %v16906_v18 = vld [vmem:[#allocation141_spill] sm:$0xff] }
 0x4cf   :  { %v6981_v30 = vunpack.i.h.bf16 %v6979_v29  ;;  %v6980_v31 = vunpack.i.l.bf16 %v6979_v29  ;;  %v6974_v40 = vpop.permute.xlu0 %6973  ;;  %v3514_v32 = vsel %vm190_vm1, %v3270_v6, %v16902_v52  ;;  %v3644_v2 = vmax.f32 %v16898_v12, %v3516_v36  ;;  %v16904_v6 = vld [vmem:[#allocation79_spill] sm:$0xff] }
 0x4d0   :  { %v6976_v3 = vunpack.i.h.bf16 %v6974_v40  ;;  %v6975_v13 = vunpack.i.l.bf16 %v6974_v40  ;;  %v3642_v17 = vmax.f32 %v16902_v52, %v3514_v32  ;;  %v16907_v40 = vld [vmem:[#allocation44_spill] sm:$0xff] }
 0x4d1   :  { %v4288_v20 = vsel %vm193_vm2, %v6980_v31, %v3643_v43  ;;  %v4290_v51 = vsel %vm193_vm2, %v6981_v30, %v3645_v41  ;;  %v16909_v32 = vld [vmem:[#allocation28_spill] sm:$0xff] }
 0x4d2   :  { %v4226_v26 = vsel %vm193_vm2, %v6976_v3, %v3581_v5  ;;  %v4224_v49 = vsel %vm193_vm2, %v6975_v13, %v3579_v56  ;;  %v6989_v50 = vpop.permute.xlu1 %6988  ;;  %v4416_v45 = vmax.f32 %v3643_v43, %v4288_v20  ;;  %v4418_v38 = vmax.f32 %v3645_v41, %v4290_v51 }
 0x4d3   :  { %v6991_v37 = vunpack.i.h.bf16 %v6989_v50  ;;  %v6990_v24 = vunpack.i.l.bf16 %v6989_v50  ;;  %v6984_v59 = vpop.permute.xlu0 %6983  ;;  %v4352_v48 = vmax.f32 %v3579_v56, %v4224_v49  ;;  %v4354_v34 = vmax.f32 %v3581_v5, %v4226_v26  ;;  %v16910_v49 = vld [vmem:[#allocation142_spill] sm:$0xff] }
 0x4d4   :  { %v6986_v63 = vunpack.i.h.bf16 %v6984_v59  ;;  %v6985_v19 = vunpack.i.l.bf16 %v6984_v59  ;;  %v4540_v16 = vpack.c.bf16 %v4418_v38, %v4416_v45 }
 0x4d5   :  { %v4043_v28 = vsel %vm3990_vm0, %v6990_v24, %v6980_v31  ;;  %v4044_v61 = vsel %vm3990_vm0, %v6991_v37, %v6981_v30  ;;  %v4508_v47 = vpack.c.bf16 %v4354_v34, %v4352_v48 }
 0x4d6   :  { %v4011_v62 = vsel %vm3990_vm0, %v6985_v19, %v6975_v13  ;;  %v4012_v9 = vsel %vm3990_vm0, %v6986_v63, %v6976_v3  ;;  %v6999_v54 = vpop.permute.xlu1 %6998  ;;  %4650 = vmatprep.subr.bf16.mxu1 %v4540_v16  ;;  %v4415_v14 = vmax.f32 %v3642_v17, %v4043_v28  ;;  %v4417_v53 = vmax.f32 %v3644_v2, %v4044_v61 }
 0x4d7   :  { %v7001_v4 = vunpack.i.h.bf16 %v6999_v54  ;;  %v7000_v58 = vunpack.i.l.bf16 %v6999_v54  ;;  %v6994_v39 = vpop.permute.xlu0 %6993  ;;  %4577 = vmatprep.subr.bf16.mxu0 %v4508_v47  ;;  %v4351_v10 = vmax.f32 %v3578_v33, %v4011_v62  ;;  %v4353_v8 = vmax.f32 %v3580_v1, %v4012_v9 }
 0x4d8   :  { %v4539_v23 = vpack.c.bf16 %v4417_v53, %v4415_v14  ;;  %v6996_v15 = vunpack.i.h.bf16 %v6994_v39  ;;  %v6995_v11 = vunpack.i.l.bf16 %v6994_v39 }
 0x4d9   :  { %v4507_v27 = vpack.c.bf16 %v4353_v8, %v4351_v10  ;;  %v3237_v0 = vsel %vm3217_vm15, %v7000_v58, %v7001_v4  ;;  %v3577_v29 = vmax.f32 %v16904_v6, %v7001_v4 }
 0x4da   :  { %4651 = vmatpush2.bf16.msra.mxu1 %v4539_v23  ;;  %v3448_v56 = vsel %vm190_vm1, %v3237_v0, %v16903_v7  ;;  %v3236_v12 = vsel %vm3217_vm15, %v6995_v11, %v6996_v15  ;;  %v3575_v41 = vmax.f32 %v16905_v46, %v6996_v15  ;;  %v16911_v46 = vld [vmem:[#allocation72_spill] sm:$0xff] }
 0x4db   :  { %v7009_v42 = vpop.permute.xlu1 %7008  ;;  %4578 = vmatpush2.bf16.msra.mxu0 %v4507_v27  ;;  %v3446_v20 = vsel %vm190_vm1, %v3236_v12, %v16909_v32  ;;  %v3576_v26 = vmax.f32 %v16903_v7, %v3448_v56 }
 0x4dc   :  { %v7011_v60 = vunpack.i.h.bf16 %v7009_v42  ;;  %v7010_v57 = vunpack.i.l.bf16 %v7009_v42  ;;  %v7004_v22 = vpop.permute.xlu0 %7003  ;;  %v3574_v4 = vmax.f32 %v16909_v32, %v3446_v20  ;;  %v16916_v20 = vld [vmem:[#allocation40_spill] sm:$0xff] }
 0x4dd   :  { %v7006_v25 = vunpack.i.h.bf16 %v7004_v22  ;;  %v7005_v5 = vunpack.i.l.bf16 %v7004_v22 }
 0x4de   :  { %v3269_v36 = vsel %vm3217_vm15, %v7010_v57, %v7011_v60  ;;  %v3641_v21 = vmax.f32 %v16907_v40, %v7011_v60  ;;  %v16913_v40 = vld [vmem:[#allocation87_spill] sm:$0xff] }
 0x4df   :  { %v3512_v43 = vsel %vm190_vm1, %v3269_v36, %v16906_v18  ;;  %v3268_v30 = vsel %vm3217_vm15, %v7005_v5, %v7006_v25  ;;  %v7019_v31 = vpop.permute.xlu1 %7018  ;;  %v3639_v3 = vmax.f32 %v16908_v44, %v7006_v25  ;;  %v16914_v44 = vld [vmem:[#allocation109_spill] sm:$0xff] }
 0x4e0   :  { %v7021_v13 = vunpack.i.h.bf16 %v7019_v31  ;;  %v7020_v1 = vunpack.i.l.bf16 %v7019_v31  ;;  %v7014_v52 = vpop.permute.xlu0 %7013  ;;  %v3510_v50 = vsel %vm190_vm1, %v3268_v30, %v16910_v49  ;;  %v3640_v37 = vmax.f32 %v16906_v18, %v3512_v43  ;;  %v16912_v30 = vld [vmem:[#allocation80_spill] sm:$0xff] }
 0x4e1   :  { %v7016_v51 = vunpack.i.h.bf16 %v7014_v52  ;;  %v7015_v2 = vunpack.i.l.bf16 %v7014_v52  ;;  %v3638_v9 = vmax.f32 %v16910_v49, %v3510_v50  ;;  %v16915_v52 = vld [vmem:[#allocation31_spill] sm:$0xff] }
 0x4e2   :  { %v4284_v45 = vsel %vm193_vm2, %v7020_v1, %v3639_v3  ;;  %v4286_v38 = vsel %vm193_vm2, %v7021_v13, %v3641_v21  ;;  %v16917_v50 = vld [vmem:[#allocation39_spill] sm:$0xff] }
 0x4e3   :  { %v4222_v24 = vsel %vm193_vm2, %v7016_v51, %v3577_v29  ;;  %v4220_v59 = vsel %vm193_vm2, %v7015_v2, %v3575_v41  ;;  %v7029_v48 = vpop.permute.xlu1 %7028  ;;  %v4412_v34 = vmax.f32 %v3639_v3, %v4284_v45  ;;  %v4414_v63 = vmax.f32 %v3641_v21, %v4286_v38 }
 0x4e4   :  { %v7031_v19 = vunpack.i.h.bf16 %v7029_v48  ;;  %v7030_v16 = vunpack.i.l.bf16 %v7029_v48  ;;  %v7024_v17 = vpop.permute.xlu0 %7023  ;;  %v4348_v28 = vmax.f32 %v3575_v41, %v4220_v59  ;;  %v4350_v61 = vmax.f32 %v3577_v29, %v4222_v24  ;;  %v16918_v59 = vld [vmem:[#allocation140_spill] sm:$0xff] }
 0x4e5   :  { %v7026_v47 = vunpack.i.h.bf16 %v7024_v17  ;;  %v7025_v33 = vunpack.i.l.bf16 %v7024_v17  ;;  %v4538_v62 = vpack.c.bf16 %v4414_v63, %v4412_v34 }
 0x4e6   :  { %v4041_v54 = vsel %vm3990_vm0, %v7030_v16, %v7020_v1  ;;  %v4042_v14 = vsel %vm3990_vm0, %v7031_v19, %v7021_v13  ;;  %v4506_v53 = vpack.c.bf16 %v4350_v61, %v4348_v28 }
 0x4e7   :  { %v4009_v58 = vsel %vm3990_vm0, %v7025_v33, %v7015_v2  ;;  %v4010_v39 = vsel %vm3990_vm0, %v7026_v47, %v7016_v51  ;;  %v7039_v10 = vpop.permute.xlu1 %7038  ;;  %4652 = vmatprep.subr.bf16.mxu1 %v4538_v62  ;;  %v4411_v8 = vmax.f32 %v3638_v9, %v4041_v54  ;;  %v4413_v23 = vmax.f32 %v3640_v37, %v4042_v14 }
 0x4e8   :  { %v7041_v15 = vunpack.i.h.bf16 %v7039_v10  ;;  %v7040_v11 = vunpack.i.l.bf16 %v7039_v10  ;;  %v7034_v27 = vpop.permute.xlu0 %7033  ;;  %4579 = vmatprep.subr.bf16.mxu0 %v4506_v53  ;;  %v4347_v0 = vmax.f32 %v3574_v4, %v4009_v58  ;;  %v4349_v42 = vmax.f32 %v3576_v26, %v4010_v39 }
 0x4e9   :  { %v4537_v60 = vpack.c.bf16 %v4413_v23, %v4411_v8  ;;  %v7036_v57 = vunpack.i.h.bf16 %v7034_v27  ;;  %v7035_v22 = vunpack.i.l.bf16 %v7034_v27 }
 0x4ea   :  { %v4505_v25 = vpack.c.bf16 %v4349_v42, %v4347_v0  ;;  %v3235_v5 = vsel %vm3217_vm15, %v7040_v11, %v7041_v15  ;;  %v3573_v31 = vmax.f32 %v16912_v30, %v7041_v15  ;;  %v4439_v0 = vld [vmem:[%s14640_s1] sm:$0xff]  ;;  %v4441_v42 = vld [vmem:[%s14640_s1 + $0x10] sm:$0xff] }
 0x4eb   :  { %v7049_v7 = vpop.permute.xlu1 %7048  ;;  %4653 = vmatpush2.bf16.msra.mxu1 %v4537_v60  ;;  %v3444_v41 = vsel %vm190_vm1, %v3235_v5, %v16911_v46  ;;  %v3234_v18 = vsel %vm3217_vm15, %v7035_v22, %v7036_v57  ;;  %v3571_v21 = vmax.f32 %v16913_v40, %v7036_v57  ;;  %v4445_v60 = vld [vmem:[%s14640_s1 + $0x30] sm:$0xff]  ;;  %v4450_v5 = vld [vmem:[%s14640_s1 + $0x58] sm:$0xff]  ;;  %v4451_v40 = vld [vmem:[%s14640_s1 + $0x60] sm:$0xff] }
 0x4ec   :  { %v7051_v56 = vunpack.i.h.bf16 %v7049_v7  ;;  %v7050_v12 = vunpack.i.l.bf16 %v7049_v7  ;;  %v7044_v36 = vpop.permute.xlu0 %7043  ;;  %4580 = vmatpush2.bf16.msra.mxu0 %v4505_v25  ;;  %v3442_v45 = vsel %vm190_vm1, %v3234_v18, %v16917_v50  ;;  %v3572_v24 = vmax.f32 %v16911_v46, %v3444_v41  ;;  %v4443_v25 = vld [vmem:[%s14640_s1 + $0x20] sm:$0xff]  ;;  %v4454_v7 = vld [vmem:[%s14640_s1 + $0x78] sm:$0xff]  ;;  %v4449_v30 = vld [vmem:[%s14640_s1 + $0x50] sm:$0xff] }
 0x4ed   :  { %v7046_v6 = vunpack.i.h.bf16 %v7044_v36  ;;  %v7045_v29 = vunpack.i.l.bf16 %v7044_v36  ;;  %v3570_v35 = vmax.f32 %v16917_v50, %v3442_v45  ;;  %v4452_v36 = vld [vmem:[%s14640_s1 + $0x68] sm:$0xff]  ;;  %v4471_v46 = vpack.c.bf16 %v4443_v25, %v4439_v0  ;;  %v4466_v50 = vld [vmem:[%s14640_s1 + $0xd8] sm:$0xff] }
 0x4ee   :  { %v3267_v43 = vsel %vm3217_vm15, %v7050_v12, %v7051_v56  ;;  %v3637_v32 = vmax.f32 %v16915_v52, %v7051_v56  ;;  %v4448_v12 = vld [vmem:[%s14640_s1 + $0x48] sm:$0xff]  ;;  %v4478_v41 = vpack.c.bf16 %v4454_v7, %v4450_v5  ;;  %v4470_v45 = vld [vmem:[%s14640_s1 + $0xf8] sm:$0xff] }
 0x4ef   :  { %v3508_v3 = vsel %vm190_vm1, %v3267_v43, %v16914_v44  ;;  %v3266_v13 = vsel %vm3217_vm15, %v7045_v29, %v7046_v6  ;;  %v7059_v1 = vpop.permute.xlu1 %7058  ;;  %v3635_v51 = vmax.f32 %v16916_v20, %v7046_v6  ;;  %v4473_v29 = vpack.c.bf16 %v4445_v60, %v4441_v42  ;;  %v4447_v43 = vld [vmem:[%s14640_s1 + $0x40] sm:$0xff] }
 0x4f0   :  { %v7061_v2 = vunpack.i.h.bf16 %v7059_v1  ;;  %v7060_v26 = vunpack.i.l.bf16 %v7059_v1  ;;  %v7054_v49 = vpop.permute.xlu0 %7053  ;;  %v3506_v48 = vsel %vm190_vm1, %v3266_v13, %v16918_v59  ;;  %v3636_v19 = vmax.f32 %v16914_v44, %v3508_v3  ;;  %v4462_v44 = vld [vmem:[%s14640_s1 + $0xb8] sm:$0xff]  ;;  %v4456_v3 = vld [vmem:[%s14640_s1 + $0x88] sm:$0xff] }
 0x4f1   :  { %v7056_v38 = vunpack.i.h.bf16 %v7054_v49  ;;  %v7055_v37 = vunpack.i.l.bf16 %v7054_v49  ;;  %v3634_v58 = vmax.f32 %v16918_v59, %v3506_v48  ;;  %v4476_v18 = vpack.c.bf16 %v4452_v36, %v4448_v12  ;;  %v4460_v13 = vld [vmem:[%s14640_s1 + $0xa8] sm:$0xff]  ;;  %v4459_v49 = vld [vmem:[%s14640_s1 + $0xa0] sm:$0xff] }
 0x4f2   :  { %v4280_v34 = vsel %vm193_vm2, %v7060_v26, %v3635_v51  ;;  %v4282_v63 = vsel %vm193_vm2, %v7061_v2, %v3637_v32  ;;  %v4475_v52 = vpack.c.bf16 %v4451_v40, %v4447_v43  ;;  %v4480_v20 = vpack.c.bf16 %v4460_v13, %v4456_v3 }
 0x4f3   :  { %v4218_v16 = vsel %vm193_vm2, %v7056_v38, %v3573_v31  ;;  %v4216_v17 = vsel %vm193_vm2, %v7055_v37, %v3571_v21  ;;  %v7069_v28 = vpop.permute.xlu1 %7068  ;;  %v4408_v61 = vmax.f32 %v3635_v51, %v4280_v34  ;;  %v4410_v47 = vmax.f32 %v3637_v32, %v4282_v63  ;;  %v4455_v51 = vld [vmem:[%s14640_s1 + $0x80] sm:$0xff]  ;;  %v4465_v63 = vld [vmem:[%s14640_s1 + $0xd0] sm:$0xff] }
 0x4f4   :  { %v7071_v33 = vunpack.i.h.bf16 %v7069_v28  ;;  %v7070_v55 = vunpack.i.l.bf16 %v7069_v28  ;;  %v7064_v62 = vpop.permute.xlu0 %7063  ;;  %v4344_v9 = vmax.f32 %v3571_v21, %v4216_v17  ;;  %v4346_v54 = vmax.f32 %v3573_v31, %v4218_v16  ;;  %v4453_v31 = vld [vmem:[%s14640_s1 + $0x70] sm:$0xff]  ;;  %v4458_v21 = vld [vmem:[%s14640_s1 + $0x98] sm:$0xff]  ;;  %v4463_v16 = vld [vmem:[%s14640_s1 + $0xc0] sm:$0xff] }
 0x4f5   :  { %v7066_v14 = vunpack.i.h.bf16 %v7064_v62  ;;  %v7065_v53 = vunpack.i.l.bf16 %v7064_v62  ;;  %v4536_v4 = vpack.c.bf16 %v4410_v47, %v4408_v61  ;;  %v4477_v1 = vpack.c.bf16 %v4453_v31, %v4449_v30  ;;  %v4467_v17 = vld [vmem:[%s14640_s1 + $0xe0] sm:$0xff] }
 0x4f6   :  { %v4039_v39 = vsel %vm3990_vm0, %v7070_v55, %v7060_v26  ;;  %v4040_v10 = vsel %vm3990_vm0, %v7071_v33, %v7061_v2  ;;  %v4504_v8 = vpack.c.bf16 %v4346_v54, %v4344_v9  ;;  %v4482_v32 = vpack.c.bf16 %v4462_v44, %v4458_v21  ;;  %v4457_v2 = vld [vmem:[%s14640_s1 + $0x90] sm:$0xff] }
 0x4f7   :  { %v4007_v23 = vsel %vm3990_vm0, %v7065_v53, %v7055_v37  ;;  %v4008_v15 = vsel %vm3990_vm0, %v7066_v14, %v7056_v38  ;;  %4654 = vmatprep.subr.bf16.mxu1 %v4536_v4  ;;  %v4407_v11 = vmax.f32 %v3634_v58, %v4039_v39  ;;  %v4409_v27 = vmax.f32 %v3636_v19, %v4040_v10  ;;  %v4461_v26 = vld [vmem:[%s14640_s1 + $0xb0] sm:$0xff]  ;;  %v4464_v38 = vld [vmem:[%s14640_s1 + $0xc8] sm:$0xff] }
 0x4f8   :  { %4581 = vmatprep.subr.bf16.mxu0 %v4504_v8  ;;  %v4343_v57 = vmax.f32 %v3570_v35, %v4007_v23  ;;  %v4345_v22 = vmax.f32 %v3572_v24, %v4008_v15  ;;  %v4468_v37 = vld [vmem:[%s14640_s1 + $0xe8] sm:$0xff]  ;;  %v4481_v24 = vpack.c.bf16 %v4461_v26, %v4457_v2  ;;  %v4479_v59 = vpack.c.bf16 %v4459_v49, %v4455_v51  ;;  %v4469_v19 = vld [vmem:[%s14640_s1 + $0xf0] sm:$0xff] }
 0x4f9   :  { %v4535_v56 = vpack.c.bf16 %v4409_v27, %v4407_v11  ;;  %v4486_v48 = vpack.c.bf16 %v4470_v45, %v4466_v50  ;;  %v4484_v34 = vpack.c.bf16 %v4468_v37, %v4464_v38  ;;  %v4485_v28 = vpack.c.bf16 %v4469_v19, %v4465_v63 }
 0x4fa   :  { %v4503_v6 = vpack.c.bf16 %v4345_v22, %v4343_v57  ;;  %v4483_v61 = vpack.c.bf16 %v4467_v17, %v4463_v16 }
 0x4fb   :  { %4655 = vmatpush2.bf16.msra.mxu1 %v4535_v56 }
 0x4fc   :  { %4582 = vmatpush2.bf16.msra.mxu0 %v4503_v6 }
 0x4fe   :  { %4657 = vmatmul.mubr.bf16.vlgmr.msra.gmra.mxu1 %v4473_v29 }
 0x4ff   :  { %4584 = vmatmul.mubr.bf16.vlgmr.msra.gmra.mxu0 %v4471_v46  ;;  %4666 = vmatprep.mubr.bf16.mxu1 %v4478_v41 }
 0x500   :  { %4593 = vmatprep.mubr.bf16.mxu0 %v4476_v18 }
 0x506   :  { %4667 = vmatmul.mubr.bf16.gmra.mxu1 %v4477_v1 }
 0x507   :  { %4594 = vmatmul.mubr.bf16.gmra.mxu0 %v4475_v52  ;;  %4676 = vmatprep.mubr.bf16.mxu1 %v4482_v32 }
 0x508   :  { %4603 = vmatprep.mubr.bf16.mxu0 %v4480_v20 }
 0x50e   :  { %4677 = vmatmul.mubr.bf16.gmra.mxu1 %v4481_v24 }
 0x50f   :  { %4604 = vmatmul.mubr.bf16.gmra.mxu0 %v4479_v59  ;;  %4686 = vmatprep.mubr.bf16.mxu1 %v4486_v48 }
 0x510   :  { %4613 = vmatprep.mubr.bf16.mxu0 %v4484_v34 }
 0x516   :  { %4687 = vmatmul.mubr.bf16.gmra.mxu1 %v4485_v28 }
 0x517   :  { %4614 = vmatmul.mubr.bf16.gmra.mxu0 %v4483_v61 }
 0x5be   :  { %v4658_v47 = vpop.f32.mrf.mxu1 }
 0x5bf   :  { %v4585_v33 = vpop.f32.mrf.mxu0 }
 0x5c0   :  { %v4660_v55 = vpop.f32.mrf.mxu1  ;;  %v14377_v14 = vadd.f32 %v4658_v47, %v4585_v33 }
 0x5c1   :  { %v4587_v62 = vpop.f32.mrf.mxu0 }
 0x5c2   :  { %v14375_v9 = vadd.f32 %v4660_v55, %v4587_v62  ;;  %v4662_v54 = vpop.f32.mrf.mxu1 }
 0x5c3   :  { %v4589_v53 = vpop.f32.mrf.mxu0 }
 0x5c4   :  { %v4698_v4 = vsel %vm4697_vm3, %v14375_v9, 0.0  ;;  %v4664_v58 = vpop.f32.mrf.mxu1  ;;  %v14384_v23 = vadd.f32 %v4662_v54, %v4589_v53 }
 0x5c5   :  { %v4699_v39 = vadd.f32 %v4698_v4, %v14377_v14  ;;  %v4591_v10 = vpop.f32.mrf.mxu0 }
 0x5c6   :  { %v14382_v8 = vadd.f32 %v4664_v58, %v4591_v10  ;;  %v4668_v35 = vpop.f32.mrf.mxu1 }
 0x5c7   :  { %4700 = vadd.xlane.f32.xlu0 %v4699_v39  ;;  %v4595_v15 = vpop.f32.mrf.mxu0 }
 0x5c8   :  { %v4702_v11 = vsel %vm4697_vm3, %v14382_v8, 0.0  ;;  %v4670_v27 = vpop.f32.mrf.mxu1  ;;  %v14391_v22 = vadd.f32 %v4668_v35, %v4595_v15 }
 0x5c9   :  { %v4703_v0 = vadd.f32 %v4702_v11, %v14384_v23  ;;  %v4597_v42 = vpop.f32.mrf.mxu0 }
 0x5ca   :  { %v14389_v60 = vadd.f32 %v4670_v27, %v4597_v42  ;;  %v4672_v57 = vpop.f32.mrf.mxu1 }
 0x5cb   :  { %4704 = vadd.xlane.f32.xlu1 %v4703_v0  ;;  %v4599_v25 = vpop.f32.mrf.mxu0 }
 0x5cc   :  { %v4706_v5 = vsel %vm4697_vm3, %v14389_v60, 0.0  ;;  %v4674_v7 = vpop.f32.mrf.mxu1  ;;  %v14398_v29 = vadd.f32 %v4672_v57, %v4599_v25 }
 0x5cd   :  { %v4707_v56 = vadd.f32 %v4706_v5, %v14391_v22  ;;  %v4601_v12 = vpop.f32.mrf.mxu0 }
 0x5ce   :  { %v14396_v36 = vadd.f32 %v4674_v7, %v4601_v12  ;;  %v4678_v6 = vpop.f32.mrf.mxu1 }
 0x5cf   :  { %4708 = vadd.xlane.f32.xlu0 %v4707_v56  ;;  %v4605_v46 = vpop.f32.mrf.mxu0 }
 0x5d0   :  { %v4710_v41 = vsel %vm4697_vm3, %v14396_v36, 0.0  ;;  %v4680_v18 = vpop.f32.mrf.mxu1  ;;  %v14405_v21 = vadd.f32 %v4678_v6, %v4605_v46 }
 0x5d1   :  { %v4711_v43 = vadd.f32 %v4710_v41, %v14398_v29  ;;  %v4607_v30 = vpop.f32.mrf.mxu0 }
 0x5d2   :  { %v14403_v31 = vadd.f32 %v4680_v18, %v4607_v30  ;;  %v4682_v40 = vpop.f32.mrf.mxu1 }
 0x5d3   :  { %4712 = vadd.xlane.f32.xlu0 %v4711_v43  ;;  %v4609_v44 = vpop.f32.mrf.mxu0 }
 0x5d4   :  { %v4714_v3 = vsel %vm4697_vm3, %v14403_v31, 0.0  ;;  %v4684_v13 = vpop.f32.mrf.mxu1  ;;  %v14412_v51 = vadd.f32 %v4682_v40, %v4609_v44 }
 0x5d5   :  { %v4715_v1 = vadd.f32 %v4714_v3, %v14405_v21  ;;  %v4611_v52 = vpop.f32.mrf.mxu0 }
 0x5d6   :  { %v14410_v32 = vadd.f32 %v4684_v13, %v4611_v52  ;;  %v4688_v20 = vpop.f32.mrf.mxu1 }
 0x5d7   :  { %4716 = vadd.xlane.f32.xlu1 %v4715_v1  ;;  %v4615_v2 = vpop.f32.mrf.mxu0 }
 0x5d8   :  { %v4718_v26 = vsel %vm4697_vm3, %v14410_v32, 0.0  ;;  %v4690_v49 = vpop.f32.mrf.mxu1  ;;  %v14419_v24 = vadd.f32 %v4688_v20, %v4615_v2 }
 0x5d9   :  { %v4719_v50 = vadd.f32 %v4718_v26, %v14412_v51  ;;  %v4617_v45 = vpop.f32.mrf.mxu0 }
 0x5da   :  { %v14417_v38 = vadd.f32 %v4690_v49, %v4617_v45  ;;  %v4692_v37 = vpop.f32.mrf.mxu1 }
 0x5db   :  { %4720 = vadd.xlane.f32.xlu0 %v4719_v50  ;;  %v4619_v59 = vpop.f32.mrf.mxu0 }
 0x5dc   :  { %v4722_v48 = vsel %vm4697_vm3, %v14417_v38, 0.0  ;;  %v4694_v34 = vpop.f32.mrf.mxu1  ;;  %v14426_v17 = vadd.f32 %v4692_v37, %v4619_v59 }
 0x5dd   :  { %v4723_v63 = vadd.f32 %v4722_v48, %v14419_v24  ;;  %v4621_v19 = vpop.f32.mrf.mxu0 }
 0x5de   :  { %v14424_v16 = vadd.f32 %v4694_v34, %v4621_v19 }
 0x5df   :  { %4724 = vadd.xlane.f32.xlu1 %v4723_v63 }
 0x5e0   :  { %v4726_v28 = vsel %vm4697_vm3, %v14424_v16, 0.0 }
 0x5e1   :  { %v4727_v61 = vadd.f32 %v4726_v28, %v14426_v17 }
 0x5e3   :  { %4728 = vadd.xlane.f32.xlu0 %v4727_v61 }
 0x650   :  { %v4701_v47 = vpop.xlane.xlu0 %4700 }
 0x651   :  { %v4730_v33 = vmul.f32 0.0051020407, %v4701_v47 }
 0x653   :  { %v14432_v55 = vsub.f32 %v14377_v14, %v4730_v33  ;;  %v14435_v62 = vsub.f32 %v14375_v9, %v4730_v33 }
 0x654   :  { %v4705_v54 = vpop.xlane.xlu1 %4704 }
 0x655   :  { %v4754_v53 = vmul.f32 %v14432_v55, %v14432_v55  ;;  %v4755_v4 = vmul.f32 %v14435_v62, %v14435_v62  ;;  %v4731_v58 = vmul.f32 0.0051020407, %v4705_v54  ;;  %v4901_v54 = vld [vmem:[%s14641_s3 + $0x18] sm:$0xff] }
 0x657   :  { %v14442_v39 = vsub.f32 %v14384_v23, %v4731_v58  ;;  %v14445_v10 = vsub.f32 %v14382_v8, %v4731_v58  ;;  %v4770_v14 = vsel %vm4697_vm3, %v4755_v4, 0.0  ;;  %v4903_v4 = vld [vmem:[%s14641_s3 + $0x28] sm:$0xff]  ;;  %v4902_v58 = vld [vmem:[%s14641_s3 + $0x20] sm:$0xff] }
 0x658   :  { %v4709_v35 = vpop.xlane.xlu0 %4708  ;;  %v4771_v15 = vadd.f32 %v4770_v14, %v4754_v53  ;;  %v4900_v53 = vld [vmem:[%s14641_s3 + $0x10] sm:$0xff] }
 0x659   :  { %v4756_v9 = vmul.f32 %v14442_v39, %v14442_v39  ;;  %v4757_v11 = vmul.f32 %v14445_v10, %v14445_v10  ;;  %v4732_v27 = vmul.f32 0.0051020407, %v4709_v35 }
 0x65a   :  { %4772 = vadd.xlane.f32.xlu1 %v4771_v15 }
 0x65b   :  { %v14453_v0 = vsub.f32 %v14391_v22, %v4732_v27  ;;  %v14456_v23 = vsub.f32 %v14389_v60, %v4732_v27  ;;  %v4774_v8 = vsel %vm4697_vm3, %v4757_v11, 0.0 }
 0x65c   :  { %v4713_v42 = vpop.xlane.xlu0 %4712  ;;  %v4775_v57 = vadd.f32 %v4774_v8, %v4756_v9 }
 0x65d   :  { %v4758_v25 = vmul.f32 %v14453_v0, %v14453_v0  ;;  %v4759_v5 = vmul.f32 %v14456_v23, %v14456_v23  ;;  %v4733_v7 = vmul.f32 0.0051020407, %v4713_v42 }
 0x65e   :  { %4776 = vadd.xlane.f32.xlu0 %v4775_v57 }
 0x65f   :  { %v14464_v56 = vsub.f32 %v14398_v29, %v4733_v7  ;;  %v14467_v22 = vsub.f32 %v14396_v36, %v4733_v7  ;;  %v4778_v60 = vsel %vm4697_vm3, %v4759_v5, 0.0 }
 0x660   :  { %v4717_v12 = vpop.xlane.xlu1 %4716  ;;  %v4779_v6 = vadd.f32 %v4778_v60, %v4758_v25 }
 0x661   :  { %v4760_v46 = vmul.f32 %v14464_v56, %v14464_v56  ;;  %v4761_v41 = vmul.f32 %v14467_v22, %v14467_v22  ;;  %v4734_v18 = vmul.f32 0.0051020407, %v4717_v12  ;;  %v4826_v12 = vld [vmem:[%s14642_s2] sm:$0xff] }
 0x662   :  { %4780 = vadd.xlane.f32.xlu1 %v4779_v6 }
 0x663   :  { %v14475_v43 = vsub.f32 %v14405_v21, %v4734_v18  ;;  %v14478_v29 = vsub.f32 %v14403_v31, %v4734_v18  ;;  %v4782_v36 = vsel %vm4697_vm3, %v4761_v41, 0.0 }
 0x664   :  { %v4721_v30 = vpop.xlane.xlu0 %4720  ;;  %v4783_v40 = vadd.f32 %v4782_v36, %v4760_v46 }
 0x665   :  { %v4762_v44 = vmul.f32 %v14475_v43, %v14475_v43  ;;  %v4763_v3 = vmul.f32 %v14478_v29, %v14478_v29  ;;  %v4735_v13 = vmul.f32 0.0051020407, %v4721_v30  ;;  %v4827_v30 = vld [vmem:[%s14642_s2 + $0x8] sm:$0xff] }
 0x666   :  { %4784 = vadd.xlane.f32.xlu0 %v4783_v40 }
 0x667   :  { %v14486_v1 = vsub.f32 %v14412_v51, %v4735_v13  ;;  %v14489_v21 = vsub.f32 %v14410_v32, %v4735_v13  ;;  %v4786_v31 = vsel %vm4697_vm3, %v4763_v3, 0.0 }
 0x668   :  { %v4725_v52 = vpop.xlane.xlu1 %4724  ;;  %v4787_v20 = vadd.f32 %v4786_v31, %v4762_v44 }
 0x669   :  { %v4764_v2 = vmul.f32 %v14486_v1, %v14486_v1  ;;  %v4765_v26 = vmul.f32 %v14489_v21, %v14489_v21  ;;  %v4736_v49 = vmul.f32 0.0051020407, %v4725_v52  ;;  %v4828_v52 = vld [vmem:[%s14642_s2 + $0x10] sm:$0xff] }
 0x66a   :  { %4788 = vadd.xlane.f32.xlu1 %v4787_v20 }
 0x66b   :  { %v14497_v50 = vsub.f32 %v14419_v24, %v4736_v49  ;;  %v14500_v51 = vsub.f32 %v14417_v38, %v4736_v49  ;;  %v4790_v32 = vsel %vm4697_vm3, %v4765_v26, 0.0  ;;  %v4904_v26 = vld [vmem:[%s14641_s3 + $0x30] sm:$0xff] }
 0x66c   :  { %v4729_v45 = vpop.xlane.xlu0 %4728  ;;  %v4791_v37 = vadd.f32 %v4790_v32, %v4764_v2 }
 0x66d   :  { %v4766_v59 = vmul.f32 %v14497_v50, %v14497_v50  ;;  %v4767_v48 = vmul.f32 %v14500_v51, %v14500_v51  ;;  %v4737_v34 = vmul.f32 0.0051020407, %v4729_v45 }
 0x66e   :  { %4792 = vadd.xlane.f32.xlu0 %v4791_v37  ;;  %v4829_v37 = vld [vmem:[%s14642_s2 + $0x18] sm:$0xff] }
 0x66f   :  { %v14508_v63 = vsub.f32 %v14426_v17, %v4737_v34  ;;  %v14511_v24 = vsub.f32 %v14424_v16, %v4737_v34  ;;  %v4794_v38 = vsel %vm4697_vm3, %v4767_v48, 0.0  ;;  %v4898_v17 = vld [vmem:[%s14641_s3] sm:$0xff]  ;;  %v4899_v16 = vld [vmem:[%s14641_s3 + $0x8] sm:$0xff] }
 0x670   :  { %v4795_v19 = vadd.f32 %v4794_v38, %v4766_v59 }
 0x671   :  { %v4768_v28 = vmul.f32 %v14508_v63, %v14508_v63  ;;  %v4769_v61 = vmul.f32 %v14511_v24, %v14511_v24 }
 0x672   :  { %4796 = vadd.xlane.f32.xlu1 %v4795_v19  ;;  %v4830_v19 = vld [vmem:[%s14642_s2 + $0x20] sm:$0xff] }
 0x673   :  { %v4798_v47 = vsel %vm4697_vm3, %v4769_v61, 0.0 }
 0x674   :  { %v4799_v33 = vadd.f32 %v4798_v47, %v4768_v28  ;;  %v4831_v47 = vld [vmem:[%s14642_s2 + $0x28] sm:$0xff] }
 0x676   :  { %4800 = vadd.xlane.f32.xlu0 %v4799_v33 }
 0x683   :  { %4908 = vperm.xlu1 %7072, %v4898_v17  }
 0x687   :  { %4913 = vperm.xlu1 %7072, %v4899_v16   ;;  %v4832_v16 = vld [vmem:[%s14642_s2 + $0x30] sm:$0xff] }
 0x68b   :  { %4923 = vperm.xlu1 %7072, %v4901_v54  }
 0x68c   :  { %4918 = vperm.xlu0 %7073, %v4900_v53  }
 0x68f   :  { %4933 = vperm.xlu1 %7072, %v4903_v4   ;;  %v4833_v4 = vld [vmem:[%s14642_s2 + $0x38] sm:$0xff] }
 0x690   :  { %4928 = vperm.xlu0 %7073, %v4902_v58  }
 0x6e3   :  { %v4773_v14 = vpop.xlane.xlu1 %4772 }
 0x6e4   :  { %v4802_v35 = vmul.f32 0.0051020407, %v4773_v14 }
 0x6e6   :  { %v4810_v15 = vadd.f32 0.001, %v4802_v35  ;;  %v4905_v35 = vld [vmem:[%s14641_s3 + $0x38] sm:$0xff] }
 0x6e7   :  { %v4777_v9 = vpop.xlane.xlu0 %4776 }
 0x6e8   :  { %7074 = vrsqrt.f32 %v4810_v15  ;;  %v4803_v11 = vmul.f32 0.0051020407, %v4777_v9 }
 0x6ea   :  { %v4811_v27 = vadd.f32 0.001, %v4803_v11 }
 0x6eb   :  { %v4781_v8 = vpop.xlane.xlu1 %4780 }
 0x6ec   :  { %7076 = vrsqrt.f32 %v4811_v27  ;;  %v4804_v42 = vmul.f32 0.0051020407, %v4781_v8 }
 0x6ee   :  { %v4812_v57 = vadd.f32 0.001, %v4804_v42 }
 0x6ef   :  { %v4785_v25 = vpop.xlane.xlu0 %4784 }
 0x6f0   :  { %7078 = vrsqrt.f32 %v4812_v57  ;;  %v4805_v5 = vmul.f32 0.0051020407, %v4785_v25 }
 0x6f2   :  { %v4813_v7 = vadd.f32 0.001, %v4805_v5 }
 0x6f3   :  { %v4789_v60 = vpop.xlane.xlu1 %4788 }
 0x6f4   :  { %7080 = vrsqrt.f32 %v4813_v7  ;;  %v4806_v6 = vmul.f32 0.0051020407, %v4789_v60 }
 0x6f5   :  { %v7075_v46 = vpop.eup %7074 }
 0x6f6   :  { %v4814_v41 = vadd.f32 0.001, %v4806_v6  ;;  %v4834_v18 = vmul.f32 %v7075_v46, %v4826_v12 }
 0x6f7   :  { %v4793_v36 = vpop.xlane.xlu0 %4792 }
 0x6f8   :  { %7082 = vrsqrt.f32 %v4814_v41  ;;  %v4807_v40 = vmul.f32 0.0051020407, %v4793_v36  ;;  %4844 = vperm.xlu1 %7072, %v4834_v18  }
 0x6f9   :  { %v7077_v44 = vpop.eup %7076 }
 0x6fa   :  { %v4815_v3 = vadd.f32 0.001, %v4807_v40  ;;  %v4835_v13 = vmul.f32 %v7077_v44, %v4827_v30 }
 0x6fb   :  { %v4797_v31 = vpop.xlane.xlu1 %4796 }
 0x6fc   :  { %7084 = vrsqrt.f32 %v4815_v3  ;;  %v4808_v20 = vmul.f32 0.0051020407, %v4797_v31  ;;  %4849 = vperm.xlu0 %7073, %v4835_v13  }
 0x6fd   :  { %v7079_v2 = vpop.eup %7078 }
 0x6fe   :  { %v4816_v49 = vadd.f32 0.001, %v4808_v20  ;;  %v4836_v32 = vmul.f32 %v7079_v2, %v4828_v52 }
 0x6ff   :  { %v4801_v45 = vpop.xlane.xlu0 %4800  ;;  %v4909_v15 = vpop.permute.xlu1 %4908 }
 0x700   :  { %7086 = vrsqrt.f32 %v4816_v49  ;;  %v4809_v59 = vmul.f32 0.0051020407, %v4801_v45  ;;  %4854 = vperm.xlu1 %7072, %v4836_v32   ;;  %4938 = vperm.xlu0 %7073, %v4904_v26  }
 0x701   :  { %v7081_v48 = vpop.eup %7080 }
 0x702   :  { %v4817_v34 = vadd.f32 0.001, %v4809_v59  ;;  %v4837_v38 = vmul.f32 %v7081_v48, %v4829_v37 }
 0x703   :  { %v4914_v9 = vpop.permute.xlu1 %4913 }
 0x704   :  { %7088 = vrsqrt.f32 %v4817_v34  ;;  %4859 = vperm.xlu1 %7072, %v4837_v38  }
 0x705   :  { %v7083_v28 = vpop.eup %7082 }
 0x706   :  { %v4838_v61 = vmul.f32 %v7083_v28, %v4830_v19 }
 0x707   :  { %v4924_v11 = vpop.permute.xlu1 %4923  ;;  %v4919_v27 = vpop.permute.xlu0 %4918 }
 0x708   :  { %4864 = vperm.xlu1 %7072, %v4838_v61  }
 0x709   :  { %v7085_v33 = vpop.eup %7084 }
 0x70a   :  { %v4839_v17 = vmul.f32 %v7085_v33, %v4831_v47 }
 0x70b   :  { %v4934_v8 = vpop.permute.xlu1 %4933  ;;  %v4929_v42 = vpop.permute.xlu0 %4928 }
 0x70c   :  { %4869 = vperm.xlu1 %7072, %v4839_v17  }
 0x70d   :  { %v7087_v54 = vpop.eup %7086 }
 0x70e   :  { %v4840_v53 = vmul.f32 %v7087_v54, %v4832_v16 }
 0x710   :  { %4874 = vperm.xlu1 %7072, %v4840_v53  }
 0x711   :  { %v7089_v58 = vpop.eup %7088 }
 0x712   :  { %v4841_v14 = vmul.f32 %v7089_v58, %v4833_v4 }
 0x714   :  { %4879 = vperm.xlu1 %7072, %v4841_v14  }
 0x718   :  { %4943 = vperm.xlu1 %7072, %v4905_v35  }
 0x773   :  { %v4845_v57 = vpop.permute.xlu1 %4844 }
 0x774   :  { %v4882_v25 = vmul.f32 %v4845_v57, %v14432_v55  ;;  %v4883_v5 = vmul.f32 %v4845_v57, %v14435_v62 }
 0x776   :  { %v4946_v7 = vadd.f32 %v4909_v15, %v4882_v25  ;;  %v4947_v60 = vadd.f32 %v4909_v15, %v4883_v5 }
 0x777   :  { %v4850_v12 = vpop.permute.xlu0 %4849 }
 0x778   :  { %4962 = vst [vmem:[%s14643_s4] sm:$0xff] %v4946_v7  ;;  %4963 = vst.msk [vmem:[%s14643_s4 + $0x8] sm:$0xff] %vm4697_vm3, %v4947_v60  ;;  %v4884_v6 = vmul.f32 %v4850_v12, %v14442_v39  ;;  %v4885_v46 = vmul.f32 %v4850_v12, %v14445_v10 }
 0x77a   :  { %v4948_v41 = vadd.f32 %v4914_v9, %v4884_v6  ;;  %v4949_v55 = vadd.f32 %v4914_v9, %v4885_v46 }
 0x77b   :  { %v4855_v18 = vpop.permute.xlu1 %4854  ;;  %v4939_v45 = vpop.permute.xlu0 %4938 }
 0x77c   :  { %4964 = vst [vmem:[%s14643_s4 + $0x10] sm:$0xff] %v4948_v41  ;;  %4965 = vst.msk [vmem:[%s14643_s4 + $0x18] sm:$0xff] %vm4697_vm3, %v4949_v55  ;;  %v4886_v62 = vmul.f32 %v4855_v18, %v14453_v0  ;;  %v4887_v36 = vmul.f32 %v4855_v18, %v14456_v23 }
 0x77e   :  { %v4950_v30 = vadd.f32 %v4919_v27, %v4886_v62  ;;  %v4951_v39 = vadd.f32 %v4919_v27, %v4887_v36 }
 0x77f   :  { %v4860_v40 = vpop.permute.xlu1 %4859 }
 0x780   :  { %4966 = vst [vmem:[%s14643_s4 + $0x20] sm:$0xff] %v4950_v30  ;;  %4967 = vst.msk [vmem:[%s14643_s4 + $0x28] sm:$0xff] %vm4697_vm3, %v4951_v39  ;;  %v4888_v10 = vmul.f32 %v4860_v40, %v14464_v56  ;;  %v4889_v44 = vmul.f32 %v4860_v40, %v14467_v22 }
 0x782   :  { %v4952_v3 = vadd.f32 %v4924_v11, %v4888_v10  ;;  %v4953_v0 = vadd.f32 %v4924_v11, %v4889_v44 }
 0x783   :  { %v4865_v13 = vpop.permute.xlu1 %4864 }
 0x784   :  { %4968 = vst [vmem:[%s14643_s4 + $0x30] sm:$0xff] %v4952_v3  ;;  %4969 = vst.msk [vmem:[%s14643_s4 + $0x38] sm:$0xff] %vm4697_vm3, %v4953_v0  ;;  %v4890_v23 = vmul.f32 %v4865_v13, %v14475_v43  ;;  %v4891_v31 = vmul.f32 %v4865_v13, %v14478_v29 }
 0x786   :  { %v4954_v52 = vadd.f32 %v4929_v42, %v4890_v23  ;;  %v4955_v56 = vadd.f32 %v4929_v42, %v4891_v31 }
 0x787   :  { %v4870_v20 = vpop.permute.xlu1 %4869 }
 0x788   :  { %4970 = vst [vmem:[%s14643_s4 + $0x40] sm:$0xff] %v4954_v52  ;;  %4971 = vst.msk [vmem:[%s14643_s4 + $0x48] sm:$0xff] %vm4697_vm3, %v4955_v56  ;;  %v4892_v22 = vmul.f32 %v4870_v20, %v14486_v1  ;;  %v4893_v2 = vmul.f32 %v4870_v20, %v14489_v21 }
 0x78a   :  { %v4956_v26 = vadd.f32 %v4934_v8, %v4892_v22  ;;  %v4957_v43 = vadd.f32 %v4934_v8, %v4893_v2 }
 0x78b   :  { %v4875_v49 = vpop.permute.xlu1 %4874 }
 0x78c   :  { %4972 = vst [vmem:[%s14643_s4 + $0x50] sm:$0xff] %v4956_v26  ;;  %4973 = vst.msk [vmem:[%s14643_s4 + $0x58] sm:$0xff] %vm4697_vm3, %v4957_v43  ;;  %v4894_v29 = vmul.f32 %v4875_v49, %v14497_v50  ;;  %v4895_v32 = vmul.f32 %v4875_v49, %v14500_v51 }
 0x78e   :  { %v4958_v1 = vadd.f32 %v4939_v45, %v4894_v29  ;;  %v4959_v37 = vadd.f32 %v4939_v45, %v4895_v32 }
 0x78f   :  { %v4880_v21 = vpop.permute.xlu1 %4879 }
 0x790   :  { %4974 = vst [vmem:[%s14643_s4 + $0x60] sm:$0xff] %v4958_v1  ;;  %4975 = vst.msk [vmem:[%s14643_s4 + $0x68] sm:$0xff] %vm4697_vm3, %v4959_v37  ;;  %v4896_v59 = vmul.f32 %v4880_v21, %v14508_v63  ;;  %v4897_v48 = vmul.f32 %v4880_v21, %v14511_v24 }
 0x793   :  { %v4944_v50 = vpop.permute.xlu1 %4943 }
 0x794   :  { %v4960_v34 = vadd.f32 %v4944_v50, %v4896_v59  ;;  %v4961_v51 = vadd.f32 %v4944_v50, %v4897_v48 }
 0x796   :  { %4976 = vst [vmem:[%s14643_s4 + $0x70] sm:$0xff] %v4960_v34  ;;  %4977 = vst.msk [vmem:[%s14643_s4 + $0x78] sm:$0xff] %vm4697_vm3, %v4961_v51 }

</bundles_post_ra>
